<compile_context>
chip_gen: v5e
topology: v5e:2x2
jax: 0.10.0
libtpu: 0.0.40
codegen_flags: <defaults>
</compile_context>

<pallas_src>
from functools import partial

import jax
import jax.numpy as jnp
from jax import lax
from jax.experimental import pallas as pl
from jax.experimental.pallas import tpu as pltpu

OC_PAD = 128                      # conv output channels padded to a full lane group
VMEM_LIMIT = 32 * 1024 * 1024     # safe on v5e/v6e/v7x; per-call usage is < 4 MiB


def _round_up(x, m):
    return (x + m - 1) // m * m


# ----------------------------------------------------------------------------
# Pallas kernel: fused valid-conv + bias + ReLU for one image (grid over batch)
# ----------------------------------------------------------------------------
def _conv_kernel(x_ref, w_ref, b_ref, o_ref, *, ksize, stride, oh, ow):
    """x_ref : (1, s*s, Hp, Wp, Cin)   bf16  phase-split input image (VMEM resident)
       w_ref : (ksize*ksize, Cin, 128) bf16  per-offset (Cin, OC_pad) weight slabs
       b_ref : (1, 128)                f32
       o_ref : (1, oh, ow, 128)        bf16  lane-dense output
    """
    s = stride
    ocp = o_ref.shape[-1]
    bias = b_ref[...]                                     # (1, 128) f32

    def row_body(r, carry):
        acc = jnp.zeros((ow, ocp), jnp.float32)
        for i in range(ksize):
            for j in range(ksize):
                # Output row r, kernel offset (i, j): original pixel
                # (s*r + i, s*q + j) lives in phase (i%s, j%s) at phase-row
                # r + i//s, phase-cols [j//s, j//s + ow)  -> contiguous slice.
                patch = x_ref[0, (i % s) * s + (j % s), r + i // s,
                              pl.ds(j // s, ow), :]       # (ow, Cin) bf16
                acc = acc + jnp.dot(patch, w_ref[i * ksize + j],
                                    preferred_element_type=jnp.float32)
        o_ref[0, r] = jnp.maximum(acc + bias, 0.0).astype(o_ref.dtype)
        return carry

    lax.fori_loop(0, oh, row_body, 0)


def _phase_split(x, s):
    """(B,H,W,C) -> (B, s*s, ceil(H/s), ceil(W/s), C). 1x data movement (vs the
    old 25x im2col blow-up); padded rows/cols are never read by valid patches."""
    B, H, W, C = x.shape
    if s == 1:
        return x[:, None]                                 # (B, 1, H, W, C)
    Hp, Wp = _round_up(H, s) // s, _round_up(W, s) // s
    x = jnp.pad(x, ((0, 0), (0, Hp * s - H), (0, Wp * s - W), (0, 0)))
    x = x.reshape(B, Hp, s, Wp, s, C).transpose(0, 2, 4, 1, 3, 5)
    return x.reshape(B, s * s, Hp, Wp, C)


def conv2d_relu_pallas(x_nhwc, w_pack, b_pack, ksize, stride):
    """Valid conv + bias + ReLU, fused in one Pallas kernel per layer.
    x_nhwc: (B, H, W, Cin) bf16. Returns (B, oh, ow, 128) bf16."""
    B, H, W, Cin = x_nhwc.shape
    oh = (H - ksize) // stride + 1
    ow = (W - ksize) // stride + 1
    x_ph = _phase_split(x_nhwc, stride)
    _, nph, Hp, Wp, _ = x_ph.shape
    # TODO(synk): for very large images / batches, add an output-row grid axis
    # (input block stays resident via a constant index_map) so v7x's 64 MiB
    # VMEM and both TensorCores are covered beyond the batch axis.
    kernel = partial(_conv_kernel, ksize=ksize, stride=stride, oh=oh, ow=ow)
    return pl.pallas_call(
        kernel,
        out_shape=jax.ShapeDtypeStruct((B, oh, ow, OC_PAD), jnp.bfloat16),
        grid=(B,),
        in_specs=[
            pl.BlockSpec((1, nph, Hp, Wp, Cin), lambda b: (b, 0, 0, 0, 0)),
            pl.BlockSpec(w_pack.shape, lambda b: (0, 0, 0)),
            pl.BlockSpec(b_pack.shape, lambda b: (0, 0)),
        ],
        out_specs=pl.BlockSpec((1, oh, ow, OC_PAD), lambda b: (b, 0, 0, 0)),
        compiler_params=pltpu.CompilerParams(
            dimension_semantics=("parallel",),   # megacore-shard over batch (v7x)
            vmem_limit_bytes=VMEM_LIMIT,
        ),
    )(x_ph, w_pack, b_pack)


# ----------------------------------------------------------------------------
# Pallas kernel: all 4 FC layers fused, weights VMEM-resident
# ----------------------------------------------------------------------------
def _fc_kernel(x_ref, w1, b1, w2, b2, w3, b3, w4, b4, o_ref):
    def dense(h, w_ref, b_ref, relu):
        acc = jnp.dot(h.astype(jnp.bfloat16), w_ref[...],
                      preferred_element_type=jnp.float32) + b_ref[...]
        return jnp.maximum(acc, 0.0) if relu else acc

    h = x_ref[...]
    h = dense(h, w1, b1, True)
    h = dense(h, w2, b2, True)
    h = dense(h, w3, b3, True)
    o_ref[...] = dense(h, w4, b4, False)


def fc_stack_pallas(x, fc_w, fc_b):
    """x: (M_pad, K1_pad) bf16; fc_w/fc_b: 4 bf16 weights + f32 (1,N) biases."""
    assert len(fc_w) == 4 and len(fc_b) == 4
    Mp, _ = x.shape
    n_out = fc_w[-1].shape[1]
    args = [x]
    in_specs = [pl.BlockSpec(x.shape, lambda i: (0, 0))]
    for w, b in zip(fc_w, fc_b):
        args += [w, b]
        in_specs += [pl.BlockSpec(w.shape, lambda i: (0, 0)),
                     pl.BlockSpec(b.shape, lambda i: (0, 0))]
    return pl.pallas_call(
        _fc_kernel,
        out_shape=jax.ShapeDtypeStruct((Mp, n_out), jnp.float32),
        grid=(1,),
        in_specs=in_specs,
        out_specs=pl.BlockSpec((Mp, n_out), lambda i: (0, 0)),
        compiler_params=pltpu.CompilerParams(
            dimension_semantics=("arbitrary",),
            vmem_limit_bytes=VMEM_LIMIT,
        ),
    )(*args)


# ----------------------------------------------------------------------------
# Parameter init (deterministic, synthetic — mirrors nn.Module shapes, PyTorch layout)
# ----------------------------------------------------------------------------
CONV_DEFS = [  # (out_c, in_c or None->lazy, k, stride)
    (24, None, 5, 2),
    (36, 24, 5, 2),
    (48, 36, 5, 2),
    (64, 48, 3, 1),
    (64, 64, 3, 1),
]
FC_DIMS = [1024, 512, 256, 128]


def init_params(key, in_channels, H, W, xyz_features):
    params = {"conv": [], "fc": []}
    h, w, ic = H, W, in_channels
    for oc, ic_def, k, st in CONV_DEFS:
        icc = ic if ic_def is None else ic_def
        key, kw_, kb_ = jax.random.split(key, 3)
        fan_in = icc * k * k
        wgt = jax.random.normal(kw_, (oc, icc, k, k), jnp.float32) / jnp.sqrt(fan_in)
        bias = jax.random.normal(kb_, (oc,), jnp.float32) * 0.01
        params["conv"].append((wgt, bias, st))
        h, w = (h - k) // st + 1, (w - k) // st + 1
        ic = oc
    d_in = ic * h * w + xyz_features
    for d_out in FC_DIMS:
        key, kw_, kb_ = jax.random.split(key, 3)
        wgt = jax.random.normal(kw_, (d_in, d_out), jnp.float32) / jnp.sqrt(d_in)
        bias = jax.random.normal(kb_, (d_out,), jnp.float32) * 0.01
        params["fc"].append((wgt, bias))
        d_in = d_out
    return params


def pack_params(params, in_channels, H, W):
    """One-time weight repacking: OIHW -> (kh*kw, Cin_stored, 128) bf16 slabs,
    biases padded to (1,128) f32, FC1 rows reordered to the channels-last
    padded flatten, all FC weights bf16, K1 padded to a multiple of 128."""
    conv_w, conv_b, conv_meta = [], [], []
    h, w = H, W
    cin_stored = in_channels
    for (wgt, bias, stride) in params["conv"]:
        oc, ic, kh, kw = wgt.shape
        wp = jnp.transpose(wgt, (2, 3, 1, 0)).reshape(kh * kw, ic, oc)   # (i*kw+j, c, o)
        wp = jnp.pad(wp, ((0, 0), (0, cin_stored - ic), (0, OC_PAD - oc)))
        bp = jnp.pad(bias, (0, OC_PAD - oc)).reshape(1, OC_PAD).astype(jnp.float32)
        conv_w.append(wp.astype(jnp.bfloat16))
        conv_b.append(bp)
        conv_meta.append((kh, stride))
        h, w = (h - kh) // stride + 1, (w - kw) // stride + 1
        cin_stored = OC_PAD
    oc_last = params["conv"][-1][0].shape[0]

    # FC1: PyTorch flattens NCHW (c-major); our activation flatten is (h, w, c_pad).
    w1, b1 = params["fc"][0]
    n1 = w1.shape[1]
    conv_rows = w1[: oc_last * h * w].reshape(oc_last, h, w, n1).transpose(1, 2, 0, 3)
    conv_rows = jnp.pad(conv_rows, ((0, 0), (0, 0), (0, OC_PAD - oc_last), (0, 0)))
    conv_rows = conv_rows.reshape(h * w * OC_PAD, n1)
    w1p = jnp.concatenate([conv_rows, w1[oc_last * h * w:]], axis=0)
    k1_pad = _round_up(w1p.shape[0], 128)
    w1p = jnp.pad(w1p, ((0, k1_pad - w1p.shape[0]), (0, 0)))

    fc_w = [w1p.astype(jnp.bfloat16)]
    fc_b = [b1.reshape(1, -1).astype(jnp.float32)]
    for (wl, bl) in params["fc"][1:]:
        fc_w.append(wl.astype(jnp.bfloat16))
        fc_b.append(bl.reshape(1, -1).astype(jnp.float32))

    arrays = {"conv_w": conv_w, "conv_b": conv_b, "fc_w": fc_w, "fc_b": fc_b}
    meta = (tuple(conv_meta), int(k1_pad))
    return arrays, meta


# ----------------------------------------------------------------------------
# PilotNet forward (Pallas) and a pure-JAX reference with the same bf16 convention
# ----------------------------------------------------------------------------
@partial(jax.jit, static_argnums=(1,))
def pilotnet_forward(arrays, meta, past_frames, past_xyz):
    conv_meta, k1_pad = meta
    B, T, C, H, W = past_frames.shape
    # NCHW frame stack -> channels-last once at the top; bf16 activations from here.
    x = past_frames.reshape(B, T * C, H, W).transpose(0, 2, 3, 1).astype(jnp.bfloat16)
    for idx, (ksize, stride) in enumerate(conv_meta):
        x = conv2d_relu_pallas(x, arrays["conv_w"][idx], arrays["conv_b"][idx],
                               ksize, stride)            # (B, oh, ow, 128) bf16
    feat = x.reshape(B, -1)                              # channels-last padded flatten
    feat = jnp.concatenate(
        [feat, past_xyz.reshape(B, -1).astype(jnp.bfloat16)], axis=1)
    m_pad = _round_up(B, 8)
    feat = jnp.pad(feat, ((0, m_pad - B), (0, k1_pad - feat.shape[1])))
    out = fc_stack_pallas(feat, arrays["fc_w"], arrays["fc_b"])
    return out[:B]


def pilotnet_reference(params, past_frames, past_xyz):
    """lax.conv reference using identical bf16-operand / f32-accumulate convention."""
    B, T, C, H, W = past_frames.shape
    x = past_frames.reshape(B, T * C, H, W).astype(jnp.bfloat16)
    for (wgt, bias, stride) in params["conv"]:
        y = lax.conv_general_dilated(
            x, wgt.astype(jnp.bfloat16), (stride, stride), "VALID",
            dimension_numbers=("NCHW", "OIHW", "NCHW"),
            preferred_element_type=jnp.float32)
        x = jnp.maximum(y + bias.reshape(1, -1, 1, 1), 0.0).astype(jnp.bfloat16)
    feat = x.reshape(B, -1).astype(jnp.float32)
    feat = jnp.concatenate([feat, past_xyz.reshape(B, -1).astype(jnp.float32)], axis=1)
    h = feat
    n_fc = len(params["fc"])
    for i, (wl, bl) in enumerate(params["fc"]):
        h = jnp.dot(h.astype(jnp.bfloat16), wl.astype(jnp.bfloat16),
                    preferred_element_type=jnp.float32) + bl
        if i < n_fc - 1:
            h = jnp.maximum(h, 0.0)
    return h


# ----------------------------------------------------------------------------
if __name__ == "__main__":
    B, T, C, H, W = 2, 2, 3, 64, 64   # 64x64 -> 30 -> 13 -> 5 -> 3 -> 1 spatial

    key = jax.random.PRNGKey(0)
    k_frames, k_xyz, k_params = jax.random.split(key, 3)
    past_frames = jax.random.normal(k_frames, (B, T, C, H, W), jnp.float32)
    past_xyz = jax.random.normal(k_xyz, (B, T, 3), jnp.float32)

    params = init_params(k_params, in_channels=T * C, H=H, W=W, xyz_features=T * 3)
    arrays, meta = pack_params(params, in_channels=T * C, H=H, W=W)

    out = jax.block_until_ready(pilotnet_forward(arrays, meta, past_frames, past_xyz))
    ref = jax.block_until_ready(
        jax.jit(lambda pf, px: pilotnet_reference(params, pf, px))(past_frames, past_xyz))

    assert out.shape == (B, 128), out.shape
    # Both paths use bf16 operands + f32 accumulation and round intermediates to
    # bf16 at the same points; tolerance covers accumulation-order differences.
    assert jnp.allclose(out, ref, rtol=3e-2, atol=3e-2), (
        "mismatch vs. reference: max abs diff = %f"
        % float(jnp.max(jnp.abs(out - ref))))
    print("KERNEL_OK")
</pallas_src>

<mosaic_0001>
module attributes {stable_mosaic.version = 11 : i64} {
  func.func @_conv_kernel(%arg0: i32, %arg1: memref<1x4x32x32x6xbf16, #tpu.memory_space<vmem>>, %arg2: memref<25x6x128xbf16, #tpu.memory_space<vmem>>, %arg3: memref<1x128xf32, #tpu.memory_space<vmem>>, %arg4: memref<1x30x30x128xbf16, #tpu.memory_space<vmem>>) attributes {dimension_semantics = [#tpu.dimension_semantics<parallel>], iteration_bounds = array<i64: 2>, scalar_prefetch = 0 : i64, scratch_operands = 0 : i64, tpu.core_type = #tpu.core_type<tc>, window_params = [{transform_indices = @transform_0, window_bounds = array<i64: 1, 4, 32, 32, 6>}, {pipeline_mode = #tpu.pipeline_mode<synchronous>, transform_indices = @transform_1, window_bounds = array<i64: 25, 6, 128>}, {pipeline_mode = #tpu.pipeline_mode<synchronous>, transform_indices = @transform_2, window_bounds = array<i64: 1, 128>}, {transform_indices = @transform_3, window_bounds = array<i64: 1, 30, 30, 128>}]} {
    %c0 = arith.constant 0 : index
    %c0_0 = arith.constant 0 : index
    %0 = vector.load %arg3[%c0, %c0_0] : memref<1x128xf32, #tpu.memory_space<vmem>>, vector<1x128xf32>
    %c0_i32 = arith.constant 0 : i32
    %c30_i32 = arith.constant 30 : i32
    %1 = arith.addi %c0_i32, %c30_i32 : i32
    %c1_i32 = arith.constant 1 : i32
    scf.for %arg5 = %c0_i32 to %1 step %c1_i32  : i32 {
      %cst = arith.constant 0.000000e+00 : f32
      %2 = vector.broadcast %cst : f32 to vector<30x128xf32>
      %c0_i32_2 = arith.constant 0 : i32
      %3 = arith.addi %arg5, %c0_i32_2 : i32
      %c0_3 = arith.constant 0 : index
      %c0_4 = arith.constant 0 : index
      %4 = arith.index_cast %3 : i32 to index
      %c0_5 = arith.constant 0 : index
      %c0_6 = arith.constant 0 : index
      %5 = vector.load %arg1[%c0_3, %c0_4, %4, %c0_5, %c0_6] : memref<1x4x32x32x6xbf16, #tpu.memory_space<vmem>>, vector<1x1x1x30x6xbf16>
      %6 = vector.shape_cast %5 : vector<1x1x1x30x6xbf16> to vector<30x6xbf16>
      %c0_7 = arith.constant 0 : index
      %c0_8 = arith.constant 0 : index
      %c0_9 = arith.constant 0 : index
      %7 = vector.load %arg2[%c0_7, %c0_8, %c0_9] : memref<25x6x128xbf16, #tpu.memory_space<vmem>>, vector<1x6x128xbf16>
      %8 = vector.shape_cast %7 : vector<1x6x128xbf16> to vector<6x128xbf16>
      %cst_10 = arith.constant dense<0.000000e+00> : vector<30x128xf32>
      %9 = tpu.matmul %6, %8, %cst_10 {dimension_numbers = #tpu.dot_dimension_numbers<[1], [0], [0], [1], [0, 0, 1, 1], [], []>} : vector<30x6xbf16>, vector<6x128xbf16>, vector<30x128xf32> -> vector<30x128xf32>
      %10 = arith.addf %2, %9 : vector<30x128xf32>
      %c0_i32_11 = arith.constant 0 : i32
      %11 = arith.addi %arg5, %c0_i32_11 : i32
      %c0_12 = arith.constant 0 : index
      %c1 = arith.constant 1 : index
      %12 = arith.index_cast %11 : i32 to index
      %c0_13 = arith.constant 0 : index
      %c0_14 = arith.constant 0 : index
      %13 = vector.load %arg1[%c0_12, %c1, %12, %c0_13, %c0_14] : memref<1x4x32x32x6xbf16, #tpu.memory_space<vmem>>, vector<1x1x1x30x6xbf16>
      %14 = vector.shape_cast %13 : vector<1x1x1x30x6xbf16> to vector<30x6xbf16>
      %c1_15 = arith.constant 1 : index
      %c0_16 = arith.constant 0 : index
      %c0_17 = arith.constant 0 : index
      %15 = vector.load %arg2[%c1_15, %c0_16, %c0_17] : memref<25x6x128xbf16, #tpu.memory_space<vmem>>, vector<1x6x128xbf16>
      %16 = vector.shape_cast %15 : vector<1x6x128xbf16> to vector<6x128xbf16>
      %cst_18 = arith.constant dense<0.000000e+00> : vector<30x128xf32>
      %17 = tpu.matmul %14, %16, %cst_18 {dimension_numbers = #tpu.dot_dimension_numbers<[1], [0], [0], [1], [0, 0, 1, 1], [], []>} : vector<30x6xbf16>, vector<6x128xbf16>, vector<30x128xf32> -> vector<30x128xf32>
      %18 = arith.addf %10, %17 : vector<30x128xf32>
      %c0_i32_19 = arith.constant 0 : i32
      %19 = arith.addi %arg5, %c0_i32_19 : i32
      %c0_20 = arith.constant 0 : index
      %c0_21 = arith.constant 0 : index
      %20 = arith.index_cast %19 : i32 to index
      %c1_22 = arith.constant 1 : index
      %c0_23 = arith.constant 0 : index
      %21 = vector.load %arg1[%c0_20, %c0_21, %20, %c1_22, %c0_23] : memref<1x4x32x32x6xbf16, #tpu.memory_space<vmem>>, vector<1x1x1x30x6xbf16>
      %22 = vector.shape_cast %21 : vector<1x1x1x30x6xbf16> to vector<30x6xbf16>
      %c2 = arith.constant 2 : index
      %c0_24 = arith.constant 0 : index
      %c0_25 = arith.constant 0 : index
      %23 = vector.load %arg2[%c2, %c0_24, %c0_25] : memref<25x6x128xbf16, #tpu.memory_space<vmem>>, vector<1x6x128xbf16>
      %24 = vector.shape_cast %23 : vector<1x6x128xbf16> to vector<6x128xbf16>
      %cst_26 = arith.constant dense<0.000000e+00> : vector<30x128xf32>
      %25 = tpu.matmul %22, %24, %cst_26 {dimension_numbers = #tpu.dot_dimension_numbers<[1], [0], [0], [1], [0, 0, 1, 1], [], []>} : vector<30x6xbf16>, vector<6x128xbf16>, vector<30x128xf32> -> vector<30x128xf32>
      %26 = arith.addf %18, %25 : vector<30x128xf32>
      %c0_i32_27 = arith.constant 0 : i32
      %27 = arith.addi %arg5, %c0_i32_27 : i32
      %c0_28 = arith.constant 0 : index
      %c1_29 = arith.constant 1 : index
      %28 = arith.index_cast %27 : i32 to index
      %c1_30 = arith.constant 1 : index
      %c0_31 = arith.constant 0 : index
      %29 = vector.load %arg1[%c0_28, %c1_29, %28, %c1_30, %c0_31] : memref<1x4x32x32x6xbf16, #tpu.memory_space<vmem>>, vector<1x1x1x30x6xbf16>
      %30 = vector.shape_cast %29 : vector<1x1x1x30x6xbf16> to vector<30x6xbf16>
      %c3 = arith.constant 3 : index
      %c0_32 = arith.constant 0 : index
      %c0_33 = arith.constant 0 : index
      %31 = vector.load %arg2[%c3, %c0_32, %c0_33] : memref<25x6x128xbf16, #tpu.memory_space<vmem>>, vector<1x6x128xbf16>
      %32 = vector.shape_cast %31 : vector<1x6x128xbf16> to vector<6x128xbf16>
      %cst_34 = arith.constant dense<0.000000e+00> : vector<30x128xf32>
      %33 = tpu.matmul %30, %32, %cst_34 {dimension_numbers = #tpu.dot_dimension_numbers<[1], [0], [0], [1], [0, 0, 1, 1], [], []>} : vector<30x6xbf16>, vector<6x128xbf16>, vector<30x128xf32> -> vector<30x128xf32>
      %34 = arith.addf %26, %33 : vector<30x128xf32>
      %c0_i32_35 = arith.constant 0 : i32
      %35 = arith.addi %arg5, %c0_i32_35 : i32
      %c0_36 = arith.constant 0 : index
      %c0_37 = arith.constant 0 : index
      %36 = arith.index_cast %35 : i32 to index
      %c2_38 = arith.constant 2 : index
      %c0_39 = arith.constant 0 : index
      %37 = vector.load %arg1[%c0_36, %c0_37, %36, %c2_38, %c0_39] : memref<1x4x32x32x6xbf16, #tpu.memory_space<vmem>>, vector<1x1x1x30x6xbf16>
      %38 = vector.shape_cast %37 : vector<1x1x1x30x6xbf16> to vector<30x6xbf16>
      %c4 = arith.constant 4 : index
      %c0_40 = arith.constant 0 : index
      %c0_41 = arith.constant 0 : index
      %39 = vector.load %arg2[%c4, %c0_40, %c0_41] : memref<25x6x128xbf16, #tpu.memory_space<vmem>>, vector<1x6x128xbf16>
      %40 = vector.shape_cast %39 : vector<1x6x128xbf16> to vector<6x128xbf16>
      %cst_42 = arith.constant dense<0.000000e+00> : vector<30x128xf32>
      %41 = tpu.matmul %38, %40, %cst_42 {dimension_numbers = #tpu.dot_dimension_numbers<[1], [0], [0], [1], [0, 0, 1, 1], [], []>} : vector<30x6xbf16>, vector<6x128xbf16>, vector<30x128xf32> -> vector<30x128xf32>
      %42 = arith.addf %34, %41 : vector<30x128xf32>
      %c0_i32_43 = arith.constant 0 : i32
      %43 = arith.addi %arg5, %c0_i32_43 : i32
      %c0_44 = arith.constant 0 : index
      %c2_45 = arith.constant 2 : index
      %44 = arith.index_cast %43 : i32 to index
      %c0_46 = arith.constant 0 : index
      %c0_47 = arith.constant 0 : index
      %45 = vector.load %arg1[%c0_44, %c2_45, %44, %c0_46, %c0_47] : memref<1x4x32x32x6xbf16, #tpu.memory_space<vmem>>, vector<1x1x1x30x6xbf16>
      %46 = vector.shape_cast %45 : vector<1x1x1x30x6xbf16> to vector<30x6xbf16>
      %c5 = arith.constant 5 : index
      %c0_48 = arith.constant 0 : index
      %c0_49 = arith.constant 0 : index
      %47 = vector.load %arg2[%c5, %c0_48, %c0_49] : memref<25x6x128xbf16, #tpu.memory_space<vmem>>, vector<1x6x128xbf16>
      %48 = vector.shape_cast %47 : vector<1x6x128xbf16> to vector<6x128xbf16>
      %cst_50 = arith.constant dense<0.000000e+00> : vector<30x128xf32>
      %49 = tpu.matmul %46, %48, %cst_50 {dimension_numbers = #tpu.dot_dimension_numbers<[1], [0], [0], [1], [0, 0, 1, 1], [], []>} : vector<30x6xbf16>, vector<6x128xbf16>, vector<30x128xf32> -> vector<30x128xf32>
      %50 = arith.addf %42, %49 : vector<30x128xf32>
      %c0_i32_51 = arith.constant 0 : i32
      %51 = arith.addi %arg5, %c0_i32_51 : i32
      %c0_52 = arith.constant 0 : index
      %c3_53 = arith.constant 3 : index
      %52 = arith.index_cast %51 : i32 to index
      %c0_54 = arith.constant 0 : index
      %c0_55 = arith.constant 0 : index
      %53 = vector.load %arg1[%c0_52, %c3_53, %52, %c0_54, %c0_55] : memref<1x4x32x32x6xbf16, #tpu.memory_space<vmem>>, vector<1x1x1x30x6xbf16>
      %54 = vector.shape_cast %53 : vector<1x1x1x30x6xbf16> to vector<30x6xbf16>
      %c6 = arith.constant 6 : index
      %c0_56 = arith.constant 0 : index
      %c0_57 = arith.constant 0 : index
      %55 = vector.load %arg2[%c6, %c0_56, %c0_57] : memref<25x6x128xbf16, #tpu.memory_space<vmem>>, vector<1x6x128xbf16>
      %56 = vector.shape_cast %55 : vector<1x6x128xbf16> to vector<6x128xbf16>
      %cst_58 = arith.constant dense<0.000000e+00> : vector<30x128xf32>
      %57 = tpu.matmul %54, %56, %cst_58 {dimension_numbers = #tpu.dot_dimension_numbers<[1], [0], [0], [1], [0, 0, 1, 1], [], []>} : vector<30x6xbf16>, vector<6x128xbf16>, vector<30x128xf32> -> vector<30x128xf32>
      %58 = arith.addf %50, %57 : vector<30x128xf32>
      %c0_i32_59 = arith.constant 0 : i32
      %59 = arith.addi %arg5, %c0_i32_59 : i32
      %c0_60 = arith.constant 0 : index
      %c2_61 = arith.constant 2 : index
      %60 = arith.index_cast %59 : i32 to index
      %c1_62 = arith.constant 1 : index
      %c0_63 = arith.constant 0 : index
      %61 = vector.load %arg1[%c0_60, %c2_61, %60, %c1_62, %c0_63] : memref<1x4x32x32x6xbf16, #tpu.memory_space<vmem>>, vector<1x1x1x30x6xbf16>
      %62 = vector.shape_cast %61 : vector<1x1x1x30x6xbf16> to vector<30x6xbf16>
      %c7 = arith.constant 7 : index
      %c0_64 = arith.constant 0 : index
      %c0_65 = arith.constant 0 : index
      %63 = vector.load %arg2[%c7, %c0_64, %c0_65] : memref<25x6x128xbf16, #tpu.memory_space<vmem>>, vector<1x6x128xbf16>
      %64 = vector.shape_cast %63 : vector<1x6x128xbf16> to vector<6x128xbf16>
      %cst_66 = arith.constant dense<0.000000e+00> : vector<30x128xf32>
      %65 = tpu.matmul %62, %64, %cst_66 {dimension_numbers = #tpu.dot_dimension_numbers<[1], [0], [0], [1], [0, 0, 1, 1], [], []>} : vector<30x6xbf16>, vector<6x128xbf16>, vector<30x128xf32> -> vector<30x128xf32>
      %66 = arith.addf %58, %65 : vector<30x128xf32>
      %c0_i32_67 = arith.constant 0 : i32
      %67 = arith.addi %arg5, %c0_i32_67 : i32
      %c0_68 = arith.constant 0 : index
      %c3_69 = arith.constant 3 : index
      %68 = arith.index_cast %67 : i32 to index
      %c1_70 = arith.constant 1 : index
      %c0_71 = arith.constant 0 : index
      %69 = vector.load %arg1[%c0_68, %c3_69, %68, %c1_70, %c0_71] : memref<1x4x32x32x6xbf16, #tpu.memory_space<vmem>>, vector<1x1x1x30x6xbf16>
      %70 = vector.shape_cast %69 : vector<1x1x1x30x6xbf16> to vector<30x6xbf16>
      %c8 = arith.constant 8 : index
      %c0_72 = arith.constant 0 : index
      %c0_73 = arith.constant 0 : index
      %71 = vector.load %arg2[%c8, %c0_72, %c0_73] : memref<25x6x128xbf16, #tpu.memory_space<vmem>>, vector<1x6x128xbf16>
      %72 = vector.shape_cast %71 : vector<1x6x128xbf16> to vector<6x128xbf16>
      %cst_74 = arith.constant dense<0.000000e+00> : vector<30x128xf32>
      %73 = tpu.matmul %70, %72, %cst_74 {dimension_numbers = #tpu.dot_dimension_numbers<[1], [0], [0], [1], [0, 0, 1, 1], [], []>} : vector<30x6xbf16>, vector<6x128xbf16>, vector<30x128xf32> -> vector<30x128xf32>
      %74 = arith.addf %66, %73 : vector<30x128xf32>
      %c0_i32_75 = arith.constant 0 : i32
      %75 = arith.addi %arg5, %c0_i32_75 : i32
      %c0_76 = arith.constant 0 : index
      %c2_77 = arith.constant 2 : index
      %76 = arith.index_cast %75 : i32 to index
      %c2_78 = arith.constant 2 : index
      %c0_79 = arith.constant 0 : index
      %77 = vector.load %arg1[%c0_76, %c2_77, %76, %c2_78, %c0_79] : memref<1x4x32x32x6xbf16, #tpu.memory_space<vmem>>, vector<1x1x1x30x6xbf16>
      %78 = vector.shape_cast %77 : vector<1x1x1x30x6xbf16> to vector<30x6xbf16>
      %c9 = arith.constant 9 : index
      %c0_80 = arith.constant 0 : index
      %c0_81 = arith.constant 0 : index
      %79 = vector.load %arg2[%c9, %c0_80, %c0_81] : memref<25x6x128xbf16, #tpu.memory_space<vmem>>, vector<1x6x128xbf16>
      %80 = vector.shape_cast %79 : vector<1x6x128xbf16> to vector<6x128xbf16>
      %cst_82 = arith.constant dense<0.000000e+00> : vector<30x128xf32>
      %81 = tpu.matmul %78, %80, %cst_82 {dimension_numbers = #tpu.dot_dimension_numbers<[1], [0], [0], [1], [0, 0, 1, 1], [], []>} : vector<30x6xbf16>, vector<6x128xbf16>, vector<30x128xf32> -> vector<30x128xf32>
      %82 = arith.addf %74, %81 : vector<30x128xf32>
      %c1_i32_83 = arith.constant 1 : i32
      %83 = arith.addi %arg5, %c1_i32_83 : i32
      %c0_84 = arith.constant 0 : index
      %c0_85 = arith.constant 0 : index
      %84 = arith.index_cast %83 : i32 to index
      %c0_86 = arith.constant 0 : index
      %c0_87 = arith.constant 0 : index
      %85 = vector.load %arg1[%c0_84, %c0_85, %84, %c0_86, %c0_87] : memref<1x4x32x32x6xbf16, #tpu.memory_space<vmem>>, vector<1x1x1x30x6xbf16>
      %86 = vector.shape_cast %85 : vector<1x1x1x30x6xbf16> to vector<30x6xbf16>
      %c10 = arith.constant 10 : index
      %c0_88 = arith.constant 0 : index
      %c0_89 = arith.constant 0 : index
      %87 = vector.load %arg2[%c10, %c0_88, %c0_89] : memref<25x6x128xbf16, #tpu.memory_space<vmem>>, vector<1x6x128xbf16>
      %88 = vector.shape_cast %87 : vector<1x6x128xbf16> to vector<6x128xbf16>
      %cst_90 = arith.constant dense<0.000000e+00> : vector<30x128xf32>
      %89 = tpu.matmul %86, %88, %cst_90 {dimension_numbers = #tpu.dot_dimension_numbers<[1], [0], [0], [1], [0, 0, 1, 1], [], []>} : vector<30x6xbf16>, vector<6x128xbf16>, vector<30x128xf32> -> vector<30x128xf32>
      %90 = arith.addf %82, %89 : vector<30x128xf32>
      %c1_i32_91 = arith.constant 1 : i32
      %91 = arith.addi %arg5, %c1_i32_91 : i32
      %c0_92 = arith.constant 0 : index
      %c1_93 = arith.constant 1 : index
      %92 = arith.index_cast %91 : i32 to index
      %c0_94 = arith.constant 0 : index
      %c0_95 = arith.constant 0 : index
      %93 = vector.load %arg1[%c0_92, %c1_93, %92, %c0_94, %c0_95] : memref<1x4x32x32x6xbf16, #tpu.memory_space<vmem>>, vector<1x1x1x30x6xbf16>
      %94 = vector.shape_cast %93 : vector<1x1x1x30x6xbf16> to vector<30x6xbf16>
      %c11 = arith.constant 11 : index
      %c0_96 = arith.constant 0 : index
      %c0_97 = arith.constant 0 : index
      %95 = vector.load %arg2[%c11, %c0_96, %c0_97] : memref<25x6x128xbf16, #tpu.memory_space<vmem>>, vector<1x6x128xbf16>
      %96 = vector.shape_cast %95 : vector<1x6x128xbf16> to vector<6x128xbf16>
      %cst_98 = arith.constant dense<0.000000e+00> : vector<30x128xf32>
      %97 = tpu.matmul %94, %96, %cst_98 {dimension_numbers = #tpu.dot_dimension_numbers<[1], [0], [0], [1], [0, 0, 1, 1], [], []>} : vector<30x6xbf16>, vector<6x128xbf16>, vector<30x128xf32> -> vector<30x128xf32>
      %98 = arith.addf %90, %97 : vector<30x128xf32>
      %c1_i32_99 = arith.constant 1 : i32
      %99 = arith.addi %arg5, %c1_i32_99 : i32
      %c0_100 = arith.constant 0 : index
      %c0_101 = arith.constant 0 : index
      %100 = arith.index_cast %99 : i32 to index
      %c1_102 = arith.constant 1 : index
      %c0_103 = arith.constant 0 : index
      %101 = vector.load %arg1[%c0_100, %c0_101, %100, %c1_102, %c0_103] : memref<1x4x32x32x6xbf16, #tpu.memory_space<vmem>>, vector<1x1x1x30x6xbf16>
      %102 = vector.shape_cast %101 : vector<1x1x1x30x6xbf16> to vector<30x6xbf16>
      %c12 = arith.constant 12 : index
      %c0_104 = arith.constant 0 : index
      %c0_105 = arith.constant 0 : index
      %103 = vector.load %arg2[%c12, %c0_104, %c0_105] : memref<25x6x128xbf16, #tpu.memory_space<vmem>>, vector<1x6x128xbf16>
      %104 = vector.shape_cast %103 : vector<1x6x128xbf16> to vector<6x128xbf16>
      %cst_106 = arith.constant dense<0.000000e+00> : vector<30x128xf32>
      %105 = tpu.matmul %102, %104, %cst_106 {dimension_numbers = #tpu.dot_dimension_numbers<[1], [0], [0], [1], [0, 0, 1, 1], [], []>} : vector<30x6xbf16>, vector<6x128xbf16>, vector<30x128xf32> -> vector<30x128xf32>
      %106 = arith.addf %98, %105 : vector<30x128xf32>
      %c1_i32_107 = arith.constant 1 : i32
      %107 = arith.addi %arg5, %c1_i32_107 : i32
      %c0_108 = arith.constant 0 : index
      %c1_109 = arith.constant 1 : index
      %108 = arith.index_cast %107 : i32 to index
      %c1_110 = arith.constant 1 : index
      %c0_111 = arith.constant 0 : index
      %109 = vector.load %arg1[%c0_108, %c1_109, %108, %c1_110, %c0_111] : memref<1x4x32x32x6xbf16, #tpu.memory_space<vmem>>, vector<1x1x1x30x6xbf16>
      %110 = vector.shape_cast %109 : vector<1x1x1x30x6xbf16> to vector<30x6xbf16>
      %c13 = arith.constant 13 : index
      %c0_112 = arith.constant 0 : index
      %c0_113 = arith.constant 0 : index
      %111 = vector.load %arg2[%c13, %c0_112, %c0_113] : memref<25x6x128xbf16, #tpu.memory_space<vmem>>, vector<1x6x128xbf16>
      %112 = vector.shape_cast %111 : vector<1x6x128xbf16> to vector<6x128xbf16>
      %cst_114 = arith.constant dense<0.000000e+00> : vector<30x128xf32>
      %113 = tpu.matmul %110, %112, %cst_114 {dimension_numbers = #tpu.dot_dimension_numbers<[1], [0], [0], [1], [0, 0, 1, 1], [], []>} : vector<30x6xbf16>, vector<6x128xbf16>, vector<30x128xf32> -> vector<30x128xf32>
      %114 = arith.addf %106, %113 : vector<30x128xf32>
      %c1_i32_115 = arith.constant 1 : i32
      %115 = arith.addi %arg5, %c1_i32_115 : i32
      %c0_116 = arith.constant 0 : index
      %c0_117 = arith.constant 0 : index
      %116 = arith.index_cast %115 : i32 to index
      %c2_118 = arith.constant 2 : index
      %c0_119 = arith.constant 0 : index
      %117 = vector.load %arg1[%c0_116, %c0_117, %116, %c2_118, %c0_119] : memref<1x4x32x32x6xbf16, #tpu.memory_space<vmem>>, vector<1x1x1x30x6xbf16>
      %118 = vector.shape_cast %117 : vector<1x1x1x30x6xbf16> to vector<30x6xbf16>
      %c14 = arith.constant 14 : index
      %c0_120 = arith.constant 0 : index
      %c0_121 = arith.constant 0 : index
      %119 = vector.load %arg2[%c14, %c0_120, %c0_121] : memref<25x6x128xbf16, #tpu.memory_space<vmem>>, vector<1x6x128xbf16>
      %120 = vector.shape_cast %119 : vector<1x6x128xbf16> to vector<6x128xbf16>
      %cst_122 = arith.constant dense<0.000000e+00> : vector<30x128xf32>
      %121 = tpu.matmul %118, %120, %cst_122 {dimension_numbers = #tpu.dot_dimension_numbers<[1], [0], [0], [1], [0, 0, 1, 1], [], []>} : vector<30x6xbf16>, vector<6x128xbf16>, vector<30x128xf32> -> vector<30x128xf32>
      %122 = arith.addf %114, %121 : vector<30x128xf32>
      %c1_i32_123 = arith.constant 1 : i32
      %123 = arith.addi %arg5, %c1_i32_123 : i32
      %c0_124 = arith.constant 0 : index
      %c2_125 = arith.constant 2 : index
      %124 = arith.index_cast %123 : i32 to index
      %c0_126 = arith.constant 0 : index
      %c0_127 = arith.constant 0 : index
      %125 = vector.load %arg1[%c0_124, %c2_125, %124, %c0_126, %c0_127] : memref<1x4x32x32x6xbf16, #tpu.memory_space<vmem>>, vector<1x1x1x30x6xbf16>
      %126 = vector.shape_cast %125 : vector<1x1x1x30x6xbf16> to vector<30x6xbf16>
      %c15 = arith.constant 15 : index
      %c0_128 = arith.constant 0 : index
      %c0_129 = arith.constant 0 : index
      %127 = vector.load %arg2[%c15, %c0_128, %c0_129] : memref<25x6x128xbf16, #tpu.memory_space<vmem>>, vector<1x6x128xbf16>
      %128 = vector.shape_cast %127 : vector<1x6x128xbf16> to vector<6x128xbf16>
      %cst_130 = arith.constant dense<0.000000e+00> : vector<30x128xf32>
      %129 = tpu.matmul %126, %128, %cst_130 {dimension_numbers = #tpu.dot_dimension_numbers<[1], [0], [0], [1], [0, 0, 1, 1], [], []>} : vector<30x6xbf16>, vector<6x128xbf16>, vector<30x128xf32> -> vector<30x128xf32>
      %130 = arith.addf %122, %129 : vector<30x128xf32>
      %c1_i32_131 = arith.constant 1 : i32
      %131 = arith.addi %arg5, %c1_i32_131 : i32
      %c0_132 = arith.constant 0 : index
      %c3_133 = arith.constant 3 : index
      %132 = arith.index_cast %131 : i32 to index
      %c0_134 = arith.constant 0 : index
      %c0_135 = arith.constant 0 : index
      %133 = vector.load %arg1[%c0_132, %c3_133, %132, %c0_134, %c0_135] : memref<1x4x32x32x6xbf16, #tpu.memory_space<vmem>>, vector<1x1x1x30x6xbf16>
      %134 = vector.shape_cast %133 : vector<1x1x1x30x6xbf16> to vector<30x6xbf16>
      %c16 = arith.constant 16 : index
      %c0_136 = arith.constant 0 : index
      %c0_137 = arith.constant 0 : index
      %135 = vector.load %arg2[%c16, %c0_136, %c0_137] : memref<25x6x128xbf16, #tpu.memory_space<vmem>>, vector<1x6x128xbf16>
      %136 = vector.shape_cast %135 : vector<1x6x128xbf16> to vector<6x128xbf16>
      %cst_138 = arith.constant dense<0.000000e+00> : vector<30x128xf32>
      %137 = tpu.matmul %134, %136, %cst_138 {dimension_numbers = #tpu.dot_dimension_numbers<[1], [0], [0], [1], [0, 0, 1, 1], [], []>} : vector<30x6xbf16>, vector<6x128xbf16>, vector<30x128xf32> -> vector<30x128xf32>
      %138 = arith.addf %130, %137 : vector<30x128xf32>
      %c1_i32_139 = arith.constant 1 : i32
      %139 = arith.addi %arg5, %c1_i32_139 : i32
      %c0_140 = arith.constant 0 : index
      %c2_141 = arith.constant 2 : index
      %140 = arith.index_cast %139 : i32 to index
      %c1_142 = arith.constant 1 : index
      %c0_143 = arith.constant 0 : index
      %141 = vector.load %arg1[%c0_140, %c2_141, %140, %c1_142, %c0_143] : memref<1x4x32x32x6xbf16, #tpu.memory_space<vmem>>, vector<1x1x1x30x6xbf16>
      %142 = vector.shape_cast %141 : vector<1x1x1x30x6xbf16> to vector<30x6xbf16>
      %c17 = arith.constant 17 : index
      %c0_144 = arith.constant 0 : index
      %c0_145 = arith.constant 0 : index
      %143 = vector.load %arg2[%c17, %c0_144, %c0_145] : memref<25x6x128xbf16, #tpu.memory_space<vmem>>, vector<1x6x128xbf16>
      %144 = vector.shape_cast %143 : vector<1x6x128xbf16> to vector<6x128xbf16>
      %cst_146 = arith.constant dense<0.000000e+00> : vector<30x128xf32>
      %145 = tpu.matmul %142, %144, %cst_146 {dimension_numbers = #tpu.dot_dimension_numbers<[1], [0], [0], [1], [0, 0, 1, 1], [], []>} : vector<30x6xbf16>, vector<6x128xbf16>, vector<30x128xf32> -> vector<30x128xf32>
      %146 = arith.addf %138, %145 : vector<30x128xf32>
      %c1_i32_147 = arith.constant 1 : i32
      %147 = arith.addi %arg5, %c1_i32_147 : i32
      %c0_148 = arith.constant 0 : index
      %c3_149 = arith.constant 3 : index
      %148 = arith.index_cast %147 : i32 to index
      %c1_150 = arith.constant 1 : index
      %c0_151 = arith.constant 0 : index
      %149 = vector.load %arg1[%c0_148, %c3_149, %148, %c1_150, %c0_151] : memref<1x4x32x32x6xbf16, #tpu.memory_space<vmem>>, vector<1x1x1x30x6xbf16>
      %150 = vector.shape_cast %149 : vector<1x1x1x30x6xbf16> to vector<30x6xbf16>
      %c18 = arith.constant 18 : index
      %c0_152 = arith.constant 0 : index
      %c0_153 = arith.constant 0 : index
      %151 = vector.load %arg2[%c18, %c0_152, %c0_153] : memref<25x6x128xbf16, #tpu.memory_space<vmem>>, vector<1x6x128xbf16>
      %152 = vector.shape_cast %151 : vector<1x6x128xbf16> to vector<6x128xbf16>
      %cst_154 = arith.constant dense<0.000000e+00> : vector<30x128xf32>
      %153 = tpu.matmul %150, %152, %cst_154 {dimension_numbers = #tpu.dot_dimension_numbers<[1], [0], [0], [1], [0, 0, 1, 1], [], []>} : vector<30x6xbf16>, vector<6x128xbf16>, vector<30x128xf32> -> vector<30x128xf32>
      %154 = arith.addf %146, %153 : vector<30x128xf32>
      %c1_i32_155 = arith.constant 1 : i32
      %155 = arith.addi %arg5, %c1_i32_155 : i32
      %c0_156 = arith.constant 0 : index
      %c2_157 = arith.constant 2 : index
      %156 = arith.index_cast %155 : i32 to index
      %c2_158 = arith.constant 2 : index
      %c0_159 = arith.constant 0 : index
      %157 = vector.load %arg1[%c0_156, %c2_157, %156, %c2_158, %c0_159] : memref<1x4x32x32x6xbf16, #tpu.memory_space<vmem>>, vector<1x1x1x30x6xbf16>
      %158 = vector.shape_cast %157 : vector<1x1x1x30x6xbf16> to vector<30x6xbf16>
      %c19 = arith.constant 19 : index
      %c0_160 = arith.constant 0 : index
      %c0_161 = arith.constant 0 : index
      %159 = vector.load %arg2[%c19, %c0_160, %c0_161] : memref<25x6x128xbf16, #tpu.memory_space<vmem>>, vector<1x6x128xbf16>
      %160 = vector.shape_cast %159 : vector<1x6x128xbf16> to vector<6x128xbf16>
      %cst_162 = arith.constant dense<0.000000e+00> : vector<30x128xf32>
      %161 = tpu.matmul %158, %160, %cst_162 {dimension_numbers = #tpu.dot_dimension_numbers<[1], [0], [0], [1], [0, 0, 1, 1], [], []>} : vector<30x6xbf16>, vector<6x128xbf16>, vector<30x128xf32> -> vector<30x128xf32>
      %162 = arith.addf %154, %161 : vector<30x128xf32>
      %c2_i32 = arith.constant 2 : i32
      %163 = arith.addi %arg5, %c2_i32 : i32
      %c0_163 = arith.constant 0 : index
      %c0_164 = arith.constant 0 : index
      %164 = arith.index_cast %163 : i32 to index
      %c0_165 = arith.constant 0 : index
      %c0_166 = arith.constant 0 : index
      %165 = vector.load %arg1[%c0_163, %c0_164, %164, %c0_165, %c0_166] : memref<1x4x32x32x6xbf16, #tpu.memory_space<vmem>>, vector<1x1x1x30x6xbf16>
      %166 = vector.shape_cast %165 : vector<1x1x1x30x6xbf16> to vector<30x6xbf16>
      %c20 = arith.constant 20 : index
      %c0_167 = arith.constant 0 : index
      %c0_168 = arith.constant 0 : index
      %167 = vector.load %arg2[%c20, %c0_167, %c0_168] : memref<25x6x128xbf16, #tpu.memory_space<vmem>>, vector<1x6x128xbf16>
      %168 = vector.shape_cast %167 : vector<1x6x128xbf16> to vector<6x128xbf16>
      %cst_169 = arith.constant dense<0.000000e+00> : vector<30x128xf32>
      %169 = tpu.matmul %166, %168, %cst_169 {dimension_numbers = #tpu.dot_dimension_numbers<[1], [0], [0], [1], [0, 0, 1, 1], [], []>} : vector<30x6xbf16>, vector<6x128xbf16>, vector<30x128xf32> -> vector<30x128xf32>
      %170 = arith.addf %162, %169 : vector<30x128xf32>
      %c2_i32_170 = arith.constant 2 : i32
      %171 = arith.addi %arg5, %c2_i32_170 : i32
      %c0_171 = arith.constant 0 : index
      %c1_172 = arith.constant 1 : index
      %172 = arith.index_cast %171 : i32 to index
      %c0_173 = arith.constant 0 : index
      %c0_174 = arith.constant 0 : index
      %173 = vector.load %arg1[%c0_171, %c1_172, %172, %c0_173, %c0_174] : memref<1x4x32x32x6xbf16, #tpu.memory_space<vmem>>, vector<1x1x1x30x6xbf16>
      %174 = vector.shape_cast %173 : vector<1x1x1x30x6xbf16> to vector<30x6xbf16>
      %c21 = arith.constant 21 : index
      %c0_175 = arith.constant 0 : index
      %c0_176 = arith.constant 0 : index
      %175 = vector.load %arg2[%c21, %c0_175, %c0_176] : memref<25x6x128xbf16, #tpu.memory_space<vmem>>, vector<1x6x128xbf16>
      %176 = vector.shape_cast %175 : vector<1x6x128xbf16> to vector<6x128xbf16>
      %cst_177 = arith.constant dense<0.000000e+00> : vector<30x128xf32>
      %177 = tpu.matmul %174, %176, %cst_177 {dimension_numbers = #tpu.dot_dimension_numbers<[1], [0], [0], [1], [0, 0, 1, 1], [], []>} : vector<30x6xbf16>, vector<6x128xbf16>, vector<30x128xf32> -> vector<30x128xf32>
      %178 = arith.addf %170, %177 : vector<30x128xf32>
      %c2_i32_178 = arith.constant 2 : i32
      %179 = arith.addi %arg5, %c2_i32_178 : i32
      %c0_179 = arith.constant 0 : index
      %c0_180 = arith.constant 0 : index
      %180 = arith.index_cast %179 : i32 to index
      %c1_181 = arith.constant 1 : index
      %c0_182 = arith.constant 0 : index
      %181 = vector.load %arg1[%c0_179, %c0_180, %180, %c1_181, %c0_182] : memref<1x4x32x32x6xbf16, #tpu.memory_space<vmem>>, vector<1x1x1x30x6xbf16>
      %182 = vector.shape_cast %181 : vector<1x1x1x30x6xbf16> to vector<30x6xbf16>
      %c22 = arith.constant 22 : index
      %c0_183 = arith.constant 0 : index
      %c0_184 = arith.constant 0 : index
      %183 = vector.load %arg2[%c22, %c0_183, %c0_184] : memref<25x6x128xbf16, #tpu.memory_space<vmem>>, vector<1x6x128xbf16>
      %184 = vector.shape_cast %183 : vector<1x6x128xbf16> to vector<6x128xbf16>
      %cst_185 = arith.constant dense<0.000000e+00> : vector<30x128xf32>
      %185 = tpu.matmul %182, %184, %cst_185 {dimension_numbers = #tpu.dot_dimension_numbers<[1], [0], [0], [1], [0, 0, 1, 1], [], []>} : vector<30x6xbf16>, vector<6x128xbf16>, vector<30x128xf32> -> vector<30x128xf32>
      %186 = arith.addf %178, %185 : vector<30x128xf32>
      %c2_i32_186 = arith.constant 2 : i32
      %187 = arith.addi %arg5, %c2_i32_186 : i32
      %c0_187 = arith.constant 0 : index
      %c1_188 = arith.constant 1 : index
      %188 = arith.index_cast %187 : i32 to index
      %c1_189 = arith.constant 1 : index
      %c0_190 = arith.constant 0 : index
      %189 = vector.load %arg1[%c0_187, %c1_188, %188, %c1_189, %c0_190] : memref<1x4x32x32x6xbf16, #tpu.memory_space<vmem>>, vector<1x1x1x30x6xbf16>
      %190 = vector.shape_cast %189 : vector<1x1x1x30x6xbf16> to vector<30x6xbf16>
      %c23 = arith.constant 23 : index
      %c0_191 = arith.constant 0 : index
      %c0_192 = arith.constant 0 : index
      %191 = vector.load %arg2[%c23, %c0_191, %c0_192] : memref<25x6x128xbf16, #tpu.memory_space<vmem>>, vector<1x6x128xbf16>
      %192 = vector.shape_cast %191 : vector<1x6x128xbf16> to vector<6x128xbf16>
      %cst_193 = arith.constant dense<0.000000e+00> : vector<30x128xf32>
      %193 = tpu.matmul %190, %192, %cst_193 {dimension_numbers = #tpu.dot_dimension_numbers<[1], [0], [0], [1], [0, 0, 1, 1], [], []>} : vector<30x6xbf16>, vector<6x128xbf16>, vector<30x128xf32> -> vector<30x128xf32>
      %194 = arith.addf %186, %193 : vector<30x128xf32>
      %c2_i32_194 = arith.constant 2 : i32
      %195 = arith.addi %arg5, %c2_i32_194 : i32
      %c0_195 = arith.constant 0 : index
      %c0_196 = arith.constant 0 : index
      %196 = arith.index_cast %195 : i32 to index
      %c2_197 = arith.constant 2 : index
      %c0_198 = arith.constant 0 : index
      %197 = vector.load %arg1[%c0_195, %c0_196, %196, %c2_197, %c0_198] : memref<1x4x32x32x6xbf16, #tpu.memory_space<vmem>>, vector<1x1x1x30x6xbf16>
      %198 = vector.shape_cast %197 : vector<1x1x1x30x6xbf16> to vector<30x6xbf16>
      %c24 = arith.constant 24 : index
      %c0_199 = arith.constant 0 : index
      %c0_200 = arith.constant 0 : index
      %199 = vector.load %arg2[%c24, %c0_199, %c0_200] : memref<25x6x128xbf16, #tpu.memory_space<vmem>>, vector<1x6x128xbf16>
      %200 = vector.shape_cast %199 : vector<1x6x128xbf16> to vector<6x128xbf16>
      %cst_201 = arith.constant dense<0.000000e+00> : vector<30x128xf32>
      %201 = tpu.matmul %198, %200, %cst_201 {dimension_numbers = #tpu.dot_dimension_numbers<[1], [0], [0], [1], [0, 0, 1, 1], [], []>} : vector<30x6xbf16>, vector<6x128xbf16>, vector<30x128xf32> -> vector<30x128xf32>
      %202 = arith.addf %194, %201 : vector<30x128xf32>
      %203 = vector.broadcast %0 : vector<1x128xf32> to vector<30x128xf32>
      %204 = arith.addf %202, %203 : vector<30x128xf32>
      %cst_202 = arith.constant 0.000000e+00 : f32
      %205 = vector.broadcast %cst_202 : f32 to vector<30x128xf32>
      %206 = arith.maximumf %204, %205 : vector<30x128xf32>
      %207 = arith.truncf %206 : vector<30x128xf32> to vector<30x128xbf16>
      %c0_203 = arith.constant 0 : index
      %208 = arith.index_cast %arg5 : i32 to index
      %c0_204 = arith.constant 0 : index
      %c0_205 = arith.constant 0 : index
      %209 = vector.load %arg4[%c0_203, %208, %c0_204, %c0_205] : memref<1x30x30x128xbf16, #tpu.memory_space<vmem>>, vector<1x1x30x128xbf16>
      %210 = vector.shape_cast %209 : vector<1x1x30x128xbf16> to vector<30x128xbf16>
      %211 = vector.shape_cast %207 : vector<30x128xbf16> to vector<1x1x30x128xbf16>
      tpu.vector_store %arg4[%c0_203, %208, %c0_204, %c0_205], %211 {strides = array<i32>} : memref<1x30x30x128xbf16, #tpu.memory_space<vmem>>, vector<1x1x30x128xbf16>,
    }
    %c30_i32_1 = arith.constant 30 : i32
    return
  }
  func.func @transform_0(%arg0: i32) -> (i32, i32, i32, i32, i32) {
    %c0_i32 = arith.constant 0 : i32
    %c0_i32_0 = arith.constant 0 : i32
    %c0_i32_1 = arith.constant 0 : i32
    %c0_i32_2 = arith.constant 0 : i32
    %c0_i32_3 = arith.constant 0 : i32
    return %arg0, %c0_i32, %c0_i32_0, %c0_i32_1, %c0_i32_2 : i32, i32, i32, i32, i32
  }
  func.func @transform_1(%arg0: i32) -> (i32, i32, i32) {
    %c0_i32 = arith.constant 0 : i32
    %c0_i32_0 = arith.constant 0 : i32
    %c0_i32_1 = arith.constant 0 : i32
    %c0_i32_2 = arith.constant 0 : i32
    return %c0_i32, %c0_i32_0, %c0_i32_1 : i32, i32, i32
  }
  func.func @transform_2(%arg0: i32) -> (i32, i32) {
    %c0_i32 = arith.constant 0 : i32
    %c0_i32_0 = arith.constant 0 : i32
    %c0_i32_1 = arith.constant 0 : i32
    return %c0_i32, %c0_i32_0 : i32, i32
  }
  func.func @transform_3(%arg0: i32) -> (i32, i32, i32, i32) {
    %c0_i32 = arith.constant 0 : i32
    %c0_i32_0 = arith.constant 0 : i32
    %c0_i32_1 = arith.constant 0 : i32
    %c0_i32_2 = arith.constant 0 : i32
    return %arg0, %c0_i32, %c0_i32_0, %c0_i32_1 : i32, i32, i32, i32
  }
}

module attributes {stable_mosaic.version = 11 : i64} {
  func.func @_conv_kernel(%arg0: i32, %arg1: memref<1x4x15x15x128xbf16, #tpu.memory_space<vmem>>, %arg2: memref<25x128x128xbf16, #tpu.memory_space<vmem>>, %arg3: memref<1x128xf32, #tpu.memory_space<vmem>>, %arg4: memref<1x13x13x128xbf16, #tpu.memory_space<vmem>>) attributes {dimension_semantics = [#tpu.dimension_semantics<parallel>], iteration_bounds = array<i64: 2>, scalar_prefetch = 0 : i64, scratch_operands = 0 : i64, tpu.core_type = #tpu.core_type<tc>, window_params = [{transform_indices = @transform_0, window_bounds = array<i64: 1, 4, 15, 15, 128>}, {pipeline_mode = #tpu.pipeline_mode<synchronous>, transform_indices = @transform_1, window_bounds = array<i64: 25, 128, 128>}, {pipeline_mode = #tpu.pipeline_mode<synchronous>, transform_indices = @transform_2, window_bounds = array<i64: 1, 128>}, {transform_indices = @transform_3, window_bounds = array<i64: 1, 13, 13, 128>}]} {
    %c0 = arith.constant 0 : index
    %c0_0 = arith.constant 0 : index
    %0 = vector.load %arg3[%c0, %c0_0] : memref<1x128xf32, #tpu.memory_space<vmem>>, vector<1x128xf32>
    %c0_i32 = arith.constant 0 : i32
    %c13_i32 = arith.constant 13 : i32
    %1 = arith.addi %c0_i32, %c13_i32 : i32
    %c1_i32 = arith.constant 1 : i32
    scf.for %arg5 = %c0_i32 to %1 step %c1_i32  : i32 {
      %cst = arith.constant 0.000000e+00 : f32
      %2 = vector.broadcast %cst : f32 to vector<13x128xf32>
      %c0_i32_2 = arith.constant 0 : i32
      %3 = arith.addi %arg5, %c0_i32_2 : i32
      %c0_3 = arith.constant 0 : index
      %c0_4 = arith.constant 0 : index
      %4 = arith.index_cast %3 : i32 to index
      %c0_5 = arith.constant 0 : index
      %c0_6 = arith.constant 0 : index
      %5 = vector.load %arg1[%c0_3, %c0_4, %4, %c0_5, %c0_6] : memref<1x4x15x15x128xbf16, #tpu.memory_space<vmem>>, vector<1x1x1x13x128xbf16>
      %6 = vector.shape_cast %5 : vector<1x1x1x13x128xbf16> to vector<13x128xbf16>
      %c0_7 = arith.constant 0 : index
      %c0_8 = arith.constant 0 : index
      %c0_9 = arith.constant 0 : index
      %7 = vector.load %arg2[%c0_7, %c0_8, %c0_9] : memref<25x128x128xbf16, #tpu.memory_space<vmem>>, vector<1x128x128xbf16>
      %8 = vector.shape_cast %7 : vector<1x128x128xbf16> to vector<128x128xbf16>
      %cst_10 = arith.constant dense<0.000000e+00> : vector<13x128xf32>
      %9 = tpu.matmul %6, %8, %cst_10 {dimension_numbers = #tpu.dot_dimension_numbers<[1], [0], [0], [1], [0, 0, 1, 1], [], []>} : vector<13x128xbf16>, vector<128x128xbf16>, vector<13x128xf32> -> vector<13x128xf32>
      %10 = arith.addf %2, %9 : vector<13x128xf32>
      %c0_i32_11 = arith.constant 0 : i32
      %11 = arith.addi %arg5, %c0_i32_11 : i32
      %c0_12 = arith.constant 0 : index
      %c1 = arith.constant 1 : index
      %12 = arith.index_cast %11 : i32 to index
      %c0_13 = arith.constant 0 : index
      %c0_14 = arith.constant 0 : index
      %13 = vector.load %arg1[%c0_12, %c1, %12, %c0_13, %c0_14] : memref<1x4x15x15x128xbf16, #tpu.memory_space<vmem>>, vector<1x1x1x13x128xbf16>
      %14 = vector.shape_cast %13 : vector<1x1x1x13x128xbf16> to vector<13x128xbf16>
      %c1_15 = arith.constant 1 : index
      %c0_16 = arith.constant 0 : index
      %c0_17 = arith.constant 0 : index
      %15 = vector.load %arg2[%c1_15, %c0_16, %c0_17] : memref<25x128x128xbf16, #tpu.memory_space<vmem>>, vector<1x128x128xbf16>
      %16 = vector.shape_cast %15 : vector<1x128x128xbf16> to vector<128x128xbf16>
      %cst_18 = arith.constant dense<0.000000e+00> : vector<13x128xf32>
      %17 = tpu.matmul %14, %16, %cst_18 {dimension_numbers = #tpu.dot_dimension_numbers<[1], [0], [0], [1], [0, 0, 1, 1], [], []>} : vector<13x128xbf16>, vector<128x128xbf16>, vector<13x128xf32> -> vector<13x128xf32>
      %18 = arith.addf %10, %17 : vector<13x128xf32>
      %c0_i32_19 = arith.constant 0 : i32
      %19 = arith.addi %arg5, %c0_i32_19 : i32
      %c0_20 = arith.constant 0 : index
      %c0_21 = arith.constant 0 : index
      %20 = arith.index_cast %19 : i32 to index
      %c1_22 = arith.constant 1 : index
      %c0_23 = arith.constant 0 : index
      %21 = vector.load %arg1[%c0_20, %c0_21, %20, %c1_22, %c0_23] : memref<1x4x15x15x128xbf16, #tpu.memory_space<vmem>>, vector<1x1x1x13x128xbf16>
      %22 = vector.shape_cast %21 : vector<1x1x1x13x128xbf16> to vector<13x128xbf16>
      %c2 = arith.constant 2 : index
      %c0_24 = arith.constant 0 : index
      %c0_25 = arith.constant 0 : index
      %23 = vector.load %arg2[%c2, %c0_24, %c0_25] : memref<25x128x128xbf16, #tpu.memory_space<vmem>>, vector<1x128x128xbf16>
      %24 = vector.shape_cast %23 : vector<1x128x128xbf16> to vector<128x128xbf16>
      %cst_26 = arith.constant dense<0.000000e+00> : vector<13x128xf32>
      %25 = tpu.matmul %22, %24, %cst_26 {dimension_numbers = #tpu.dot_dimension_numbers<[1], [0], [0], [1], [0, 0, 1, 1], [], []>} : vector<13x128xbf16>, vector<128x128xbf16>, vector<13x128xf32> -> vector<13x128xf32>
      %26 = arith.addf %18, %25 : vector<13x128xf32>
      %c0_i32_27 = arith.constant 0 : i32
      %27 = arith.addi %arg5, %c0_i32_27 : i32
      %c0_28 = arith.constant 0 : index
      %c1_29 = arith.constant 1 : index
      %28 = arith.index_cast %27 : i32 to index
      %c1_30 = arith.constant 1 : index
      %c0_31 = arith.constant 0 : index
      %29 = vector.load %arg1[%c0_28, %c1_29, %28, %c1_30, %c0_31] : memref<1x4x15x15x128xbf16, #tpu.memory_space<vmem>>, vector<1x1x1x13x128xbf16>
      %30 = vector.shape_cast %29 : vector<1x1x1x13x128xbf16> to vector<13x128xbf16>
      %c3 = arith.constant 3 : index
      %c0_32 = arith.constant 0 : index
      %c0_33 = arith.constant 0 : index
      %31 = vector.load %arg2[%c3, %c0_32, %c0_33] : memref<25x128x128xbf16, #tpu.memory_space<vmem>>, vector<1x128x128xbf16>
      %32 = vector.shape_cast %31 : vector<1x128x128xbf16> to vector<128x128xbf16>
      %cst_34 = arith.constant dense<0.000000e+00> : vector<13x128xf32>
      %33 = tpu.matmul %30, %32, %cst_34 {dimension_numbers = #tpu.dot_dimension_numbers<[1], [0], [0], [1], [0, 0, 1, 1], [], []>} : vector<13x128xbf16>, vector<128x128xbf16>, vector<13x128xf32> -> vector<13x128xf32>
      %34 = arith.addf %26, %33 : vector<13x128xf32>
      %c0_i32_35 = arith.constant 0 : i32
      %35 = arith.addi %arg5, %c0_i32_35 : i32
      %c0_36 = arith.constant 0 : index
      %c0_37 = arith.constant 0 : index
      %36 = arith.index_cast %35 : i32 to index
      %c2_38 = arith.constant 2 : index
      %c0_39 = arith.constant 0 : index
      %37 = vector.load %arg1[%c0_36, %c0_37, %36, %c2_38, %c0_39] : memref<1x4x15x15x128xbf16, #tpu.memory_space<vmem>>, vector<1x1x1x13x128xbf16>
      %38 = vector.shape_cast %37 : vector<1x1x1x13x128xbf16> to vector<13x128xbf16>
      %c4 = arith.constant 4 : index
      %c0_40 = arith.constant 0 : index
      %c0_41 = arith.constant 0 : index
      %39 = vector.load %arg2[%c4, %c0_40, %c0_41] : memref<25x128x128xbf16, #tpu.memory_space<vmem>>, vector<1x128x128xbf16>
      %40 = vector.shape_cast %39 : vector<1x128x128xbf16> to vector<128x128xbf16>
      %cst_42 = arith.constant dense<0.000000e+00> : vector<13x128xf32>
      %41 = tpu.matmul %38, %40, %cst_42 {dimension_numbers = #tpu.dot_dimension_numbers<[1], [0], [0], [1], [0, 0, 1, 1], [], []>} : vector<13x128xbf16>, vector<128x128xbf16>, vector<13x128xf32> -> vector<13x128xf32>
      %42 = arith.addf %34, %41 : vector<13x128xf32>
      %c0_i32_43 = arith.constant 0 : i32
      %43 = arith.addi %arg5, %c0_i32_43 : i32
      %c0_44 = arith.constant 0 : index
      %c2_45 = arith.constant 2 : index
      %44 = arith.index_cast %43 : i32 to index
      %c0_46 = arith.constant 0 : index
      %c0_47 = arith.constant 0 : index
      %45 = vector.load %arg1[%c0_44, %c2_45, %44, %c0_46, %c0_47] : memref<1x4x15x15x128xbf16, #tpu.memory_space<vmem>>, vector<1x1x1x13x128xbf16>
      %46 = vector.shape_cast %45 : vector<1x1x1x13x128xbf16> to vector<13x128xbf16>
      %c5 = arith.constant 5 : index
      %c0_48 = arith.constant 0 : index
      %c0_49 = arith.constant 0 : index
      %47 = vector.load %arg2[%c5, %c0_48, %c0_49] : memref<25x128x128xbf16, #tpu.memory_space<vmem>>, vector<1x128x128xbf16>
      %48 = vector.shape_cast %47 : vector<1x128x128xbf16> to vector<128x128xbf16>
      %cst_50 = arith.constant dense<0.000000e+00> : vector<13x128xf32>
      %49 = tpu.matmul %46, %48, %cst_50 {dimension_numbers = #tpu.dot_dimension_numbers<[1], [0], [0], [1], [0, 0, 1, 1], [], []>} : vector<13x128xbf16>, vector<128x128xbf16>, vector<13x128xf32> -> vector<13x128xf32>
      %50 = arith.addf %42, %49 : vector<13x128xf32>
      %c0_i32_51 = arith.constant 0 : i32
      %51 = arith.addi %arg5, %c0_i32_51 : i32
      %c0_52 = arith.constant 0 : index
      %c3_53 = arith.constant 3 : index
      %52 = arith.index_cast %51 : i32 to index
      %c0_54 = arith.constant 0 : index
      %c0_55 = arith.constant 0 : index
      %53 = vector.load %arg1[%c0_52, %c3_53, %52, %c0_54, %c0_55] : memref<1x4x15x15x128xbf16, #tpu.memory_space<vmem>>, vector<1x1x1x13x128xbf16>
      %54 = vector.shape_cast %53 : vector<1x1x1x13x128xbf16> to vector<13x128xbf16>
      %c6 = arith.constant 6 : index
      %c0_56 = arith.constant 0 : index
      %c0_57 = arith.constant 0 : index
      %55 = vector.load %arg2[%c6, %c0_56, %c0_57] : memref<25x128x128xbf16, #tpu.memory_space<vmem>>, vector<1x128x128xbf16>
      %56 = vector.shape_cast %55 : vector<1x128x128xbf16> to vector<128x128xbf16>
      %cst_58 = arith.constant dense<0.000000e+00> : vector<13x128xf32>
      %57 = tpu.matmul %54, %56, %cst_58 {dimension_numbers = #tpu.dot_dimension_numbers<[1], [0], [0], [1], [0, 0, 1, 1], [], []>} : vector<13x128xbf16>, vector<128x128xbf16>, vector<13x128xf32> -> vector<13x128xf32>
      %58 = arith.addf %50, %57 : vector<13x128xf32>
      %c0_i32_59 = arith.constant 0 : i32
      %59 = arith.addi %arg5, %c0_i32_59 : i32
      %c0_60 = arith.constant 0 : index
      %c2_61 = arith.constant 2 : index
      %60 = arith.index_cast %59 : i32 to index
      %c1_62 = arith.constant 1 : index
      %c0_63 = arith.constant 0 : index
      %61 = vector.load %arg1[%c0_60, %c2_61, %60, %c1_62, %c0_63] : memref<1x4x15x15x128xbf16, #tpu.memory_space<vmem>>, vector<1x1x1x13x128xbf16>
      %62 = vector.shape_cast %61 : vector<1x1x1x13x128xbf16> to vector<13x128xbf16>
      %c7 = arith.constant 7 : index
      %c0_64 = arith.constant 0 : index
      %c0_65 = arith.constant 0 : index
      %63 = vector.load %arg2[%c7, %c0_64, %c0_65] : memref<25x128x128xbf16, #tpu.memory_space<vmem>>, vector<1x128x128xbf16>
      %64 = vector.shape_cast %63 : vector<1x128x128xbf16> to vector<128x128xbf16>
      %cst_66 = arith.constant dense<0.000000e+00> : vector<13x128xf32>
      %65 = tpu.matmul %62, %64, %cst_66 {dimension_numbers = #tpu.dot_dimension_numbers<[1], [0], [0], [1], [0, 0, 1, 1], [], []>} : vector<13x128xbf16>, vector<128x128xbf16>, vector<13x128xf32> -> vector<13x128xf32>
      %66 = arith.addf %58, %65 : vector<13x128xf32>
      %c0_i32_67 = arith.constant 0 : i32
      %67 = arith.addi %arg5, %c0_i32_67 : i32
      %c0_68 = arith.constant 0 : index
      %c3_69 = arith.constant 3 : index
      %68 = arith.index_cast %67 : i32 to index
      %c1_70 = arith.constant 1 : index
      %c0_71 = arith.constant 0 : index
      %69 = vector.load %arg1[%c0_68, %c3_69, %68, %c1_70, %c0_71] : memref<1x4x15x15x128xbf16, #tpu.memory_space<vmem>>, vector<1x1x1x13x128xbf16>
      %70 = vector.shape_cast %69 : vector<1x1x1x13x128xbf16> to vector<13x128xbf16>
      %c8 = arith.constant 8 : index
      %c0_72 = arith.constant 0 : index
      %c0_73 = arith.constant 0 : index
      %71 = vector.load %arg2[%c8, %c0_72, %c0_73] : memref<25x128x128xbf16, #tpu.memory_space<vmem>>, vector<1x128x128xbf16>
      %72 = vector.shape_cast %71 : vector<1x128x128xbf16> to vector<128x128xbf16>
      %cst_74 = arith.constant dense<0.000000e+00> : vector<13x128xf32>
      %73 = tpu.matmul %70, %72, %cst_74 {dimension_numbers = #tpu.dot_dimension_numbers<[1], [0], [0], [1], [0, 0, 1, 1], [], []>} : vector<13x128xbf16>, vector<128x128xbf16>, vector<13x128xf32> -> vector<13x128xf32>
      %74 = arith.addf %66, %73 : vector<13x128xf32>
      %c0_i32_75 = arith.constant 0 : i32
      %75 = arith.addi %arg5, %c0_i32_75 : i32
      %c0_76 = arith.constant 0 : index
      %c2_77 = arith.constant 2 : index
      %76 = arith.index_cast %75 : i32 to index
      %c2_78 = arith.constant 2 : index
      %c0_79 = arith.constant 0 : index
      %77 = vector.load %arg1[%c0_76, %c2_77, %76, %c2_78, %c0_79] : memref<1x4x15x15x128xbf16, #tpu.memory_space<vmem>>, vector<1x1x1x13x128xbf16>
      %78 = vector.shape_cast %77 : vector<1x1x1x13x128xbf16> to vector<13x128xbf16>
      %c9 = arith.constant 9 : index
      %c0_80 = arith.constant 0 : index
      %c0_81 = arith.constant 0 : index
      %79 = vector.load %arg2[%c9, %c0_80, %c0_81] : memref<25x128x128xbf16, #tpu.memory_space<vmem>>, vector<1x128x128xbf16>
      %80 = vector.shape_cast %79 : vector<1x128x128xbf16> to vector<128x128xbf16>
      %cst_82 = arith.constant dense<0.000000e+00> : vector<13x128xf32>
      %81 = tpu.matmul %78, %80, %cst_82 {dimension_numbers = #tpu.dot_dimension_numbers<[1], [0], [0], [1], [0, 0, 1, 1], [], []>} : vector<13x128xbf16>, vector<128x128xbf16>, vector<13x128xf32> -> vector<13x128xf32>
      %82 = arith.addf %74, %81 : vector<13x128xf32>
      %c1_i32_83 = arith.constant 1 : i32
      %83 = arith.addi %arg5, %c1_i32_83 : i32
      %c0_84 = arith.constant 0 : index
      %c0_85 = arith.constant 0 : index
      %84 = arith.index_cast %83 : i32 to index
      %c0_86 = arith.constant 0 : index
      %c0_87 = arith.constant 0 : index
      %85 = vector.load %arg1[%c0_84, %c0_85, %84, %c0_86, %c0_87] : memref<1x4x15x15x128xbf16, #tpu.memory_space<vmem>>, vector<1x1x1x13x128xbf16>
      %86 = vector.shape_cast %85 : vector<1x1x1x13x128xbf16> to vector<13x128xbf16>
      %c10 = arith.constant 10 : index
      %c0_88 = arith.constant 0 : index
      %c0_89 = arith.constant 0 : index
      %87 = vector.load %arg2[%c10, %c0_88, %c0_89] : memref<25x128x128xbf16, #tpu.memory_space<vmem>>, vector<1x128x128xbf16>
      %88 = vector.shape_cast %87 : vector<1x128x128xbf16> to vector<128x128xbf16>
      %cst_90 = arith.constant dense<0.000000e+00> : vector<13x128xf32>
      %89 = tpu.matmul %86, %88, %cst_90 {dimension_numbers = #tpu.dot_dimension_numbers<[1], [0], [0], [1], [0, 0, 1, 1], [], []>} : vector<13x128xbf16>, vector<128x128xbf16>, vector<13x128xf32> -> vector<13x128xf32>
      %90 = arith.addf %82, %89 : vector<13x128xf32>
      %c1_i32_91 = arith.constant 1 : i32
      %91 = arith.addi %arg5, %c1_i32_91 : i32
      %c0_92 = arith.constant 0 : index
      %c1_93 = arith.constant 1 : index
      %92 = arith.index_cast %91 : i32 to index
      %c0_94 = arith.constant 0 : index
      %c0_95 = arith.constant 0 : index
      %93 = vector.load %arg1[%c0_92, %c1_93, %92, %c0_94, %c0_95] : memref<1x4x15x15x128xbf16, #tpu.memory_space<vmem>>, vector<1x1x1x13x128xbf16>
      %94 = vector.shape_cast %93 : vector<1x1x1x13x128xbf16> to vector<13x128xbf16>
      %c11 = arith.constant 11 : index
      %c0_96 = arith.constant 0 : index
      %c0_97 = arith.constant 0 : index
      %95 = vector.load %arg2[%c11, %c0_96, %c0_97] : memref<25x128x128xbf16, #tpu.memory_space<vmem>>, vector<1x128x128xbf16>
      %96 = vector.shape_cast %95 : vector<1x128x128xbf16> to vector<128x128xbf16>
      %cst_98 = arith.constant dense<0.000000e+00> : vector<13x128xf32>
      %97 = tpu.matmul %94, %96, %cst_98 {dimension_numbers = #tpu.dot_dimension_numbers<[1], [0], [0], [1], [0, 0, 1, 1], [], []>} : vector<13x128xbf16>, vector<128x128xbf16>, vector<13x128xf32> -> vector<13x128xf32>
      %98 = arith.addf %90, %97 : vector<13x128xf32>
      %c1_i32_99 = arith.constant 1 : i32
      %99 = arith.addi %arg5, %c1_i32_99 : i32
      %c0_100 = arith.constant 0 : index
      %c0_101 = arith.constant 0 : index
      %100 = arith.index_cast %99 : i32 to index
      %c1_102 = arith.constant 1 : index
      %c0_103 = arith.constant 0 : index
      %101 = vector.load %arg1[%c0_100, %c0_101, %100, %c1_102, %c0_103] : memref<1x4x15x15x128xbf16, #tpu.memory_space<vmem>>, vector<1x1x1x13x128xbf16>
      %102 = vector.shape_cast %101 : vector<1x1x1x13x128xbf16> to vector<13x128xbf16>
      %c12 = arith.constant 12 : index
      %c0_104 = arith.constant 0 : index
      %c0_105 = arith.constant 0 : index
      %103 = vector.load %arg2[%c12, %c0_104, %c0_105] : memref<25x128x128xbf16, #tpu.memory_space<vmem>>, vector<1x128x128xbf16>
      %104 = vector.shape_cast %103 : vector<1x128x128xbf16> to vector<128x128xbf16>
      %cst_106 = arith.constant dense<0.000000e+00> : vector<13x128xf32>
      %105 = tpu.matmul %102, %104, %cst_106 {dimension_numbers = #tpu.dot_dimension_numbers<[1], [0], [0], [1], [0, 0, 1, 1], [], []>} : vector<13x128xbf16>, vector<128x128xbf16>, vector<13x128xf32> -> vector<13x128xf32>
      %106 = arith.addf %98, %105 : vector<13x128xf32>
      %c1_i32_107 = arith.constant 1 : i32
      %107 = arith.addi %arg5, %c1_i32_107 : i32
      %c0_108 = arith.constant 0 : index
      %c1_109 = arith.constant 1 : index
      %108 = arith.index_cast %107 : i32 to index
      %c1_110 = arith.constant 1 : index
      %c0_111 = arith.constant 0 : index
      %109 = vector.load %arg1[%c0_108, %c1_109, %108, %c1_110, %c0_111] : memref<1x4x15x15x128xbf16, #tpu.memory_space<vmem>>, vector<1x1x1x13x128xbf16>
      %110 = vector.shape_cast %109 : vector<1x1x1x13x128xbf16> to vector<13x128xbf16>
      %c13 = arith.constant 13 : index
      %c0_112 = arith.constant 0 : index
      %c0_113 = arith.constant 0 : index
      %111 = vector.load %arg2[%c13, %c0_112, %c0_113] : memref<25x128x128xbf16, #tpu.memory_space<vmem>>, vector<1x128x128xbf16>
      %112 = vector.shape_cast %111 : vector<1x128x128xbf16> to vector<128x128xbf16>
      %cst_114 = arith.constant dense<0.000000e+00> : vector<13x128xf32>
      %113 = tpu.matmul %110, %112, %cst_114 {dimension_numbers = #tpu.dot_dimension_numbers<[1], [0], [0], [1], [0, 0, 1, 1], [], []>} : vector<13x128xbf16>, vector<128x128xbf16>, vector<13x128xf32> -> vector<13x128xf32>
      %114 = arith.addf %106, %113 : vector<13x128xf32>
      %c1_i32_115 = arith.constant 1 : i32
      %115 = arith.addi %arg5, %c1_i32_115 : i32
      %c0_116 = arith.constant 0 : index
      %c0_117 = arith.constant 0 : index
      %116 = arith.index_cast %115 : i32 to index
      %c2_118 = arith.constant 2 : index
      %c0_119 = arith.constant 0 : index
      %117 = vector.load %arg1[%c0_116, %c0_117, %116, %c2_118, %c0_119] : memref<1x4x15x15x128xbf16, #tpu.memory_space<vmem>>, vector<1x1x1x13x128xbf16>
      %118 = vector.shape_cast %117 : vector<1x1x1x13x128xbf16> to vector<13x128xbf16>
      %c14 = arith.constant 14 : index
      %c0_120 = arith.constant 0 : index
      %c0_121 = arith.constant 0 : index
      %119 = vector.load %arg2[%c14, %c0_120, %c0_121] : memref<25x128x128xbf16, #tpu.memory_space<vmem>>, vector<1x128x128xbf16>
      %120 = vector.shape_cast %119 : vector<1x128x128xbf16> to vector<128x128xbf16>
      %cst_122 = arith.constant dense<0.000000e+00> : vector<13x128xf32>
      %121 = tpu.matmul %118, %120, %cst_122 {dimension_numbers = #tpu.dot_dimension_numbers<[1], [0], [0], [1], [0, 0, 1, 1], [], []>} : vector<13x128xbf16>, vector<128x128xbf16>, vector<13x128xf32> -> vector<13x128xf32>
      %122 = arith.addf %114, %121 : vector<13x128xf32>
      %c1_i32_123 = arith.constant 1 : i32
      %123 = arith.addi %arg5, %c1_i32_123 : i32
      %c0_124 = arith.constant 0 : index
      %c2_125 = arith.constant 2 : index
      %124 = arith.index_cast %123 : i32 to index
      %c0_126 = arith.constant 0 : index
      %c0_127 = arith.constant 0 : index
      %125 = vector.load %arg1[%c0_124, %c2_125, %124, %c0_126, %c0_127] : memref<1x4x15x15x128xbf16, #tpu.memory_space<vmem>>, vector<1x1x1x13x128xbf16>
      %126 = vector.shape_cast %125 : vector<1x1x1x13x128xbf16> to vector<13x128xbf16>
      %c15 = arith.constant 15 : index
      %c0_128 = arith.constant 0 : index
      %c0_129 = arith.constant 0 : index
      %127 = vector.load %arg2[%c15, %c0_128, %c0_129] : memref<25x128x128xbf16, #tpu.memory_space<vmem>>, vector<1x128x128xbf16>
      %128 = vector.shape_cast %127 : vector<1x128x128xbf16> to vector<128x128xbf16>
      %cst_130 = arith.constant dense<0.000000e+00> : vector<13x128xf32>
      %129 = tpu.matmul %126, %128, %cst_130 {dimension_numbers = #tpu.dot_dimension_numbers<[1], [0], [0], [1], [0, 0, 1, 1], [], []>} : vector<13x128xbf16>, vector<128x128xbf16>, vector<13x128xf32> -> vector<13x128xf32>
      %130 = arith.addf %122, %129 : vector<13x128xf32>
      %c1_i32_131 = arith.constant 1 : i32
      %131 = arith.addi %arg5, %c1_i32_131 : i32
      %c0_132 = arith.constant 0 : index
      %c3_133 = arith.constant 3 : index
      %132 = arith.index_cast %131 : i32 to index
      %c0_134 = arith.constant 0 : index
      %c0_135 = arith.constant 0 : index
      %133 = vector.load %arg1[%c0_132, %c3_133, %132, %c0_134, %c0_135] : memref<1x4x15x15x128xbf16, #tpu.memory_space<vmem>>, vector<1x1x1x13x128xbf16>
      %134 = vector.shape_cast %133 : vector<1x1x1x13x128xbf16> to vector<13x128xbf16>
      %c16 = arith.constant 16 : index
      %c0_136 = arith.constant 0 : index
      %c0_137 = arith.constant 0 : index
      %135 = vector.load %arg2[%c16, %c0_136, %c0_137] : memref<25x128x128xbf16, #tpu.memory_space<vmem>>, vector<1x128x128xbf16>
      %136 = vector.shape_cast %135 : vector<1x128x128xbf16> to vector<128x128xbf16>
      %cst_138 = arith.constant dense<0.000000e+00> : vector<13x128xf32>
      %137 = tpu.matmul %134, %136, %cst_138 {dimension_numbers = #tpu.dot_dimension_numbers<[1], [0], [0], [1], [0, 0, 1, 1], [], []>} : vector<13x128xbf16>, vector<128x128xbf16>, vector<13x128xf32> -> vector<13x128xf32>
      %138 = arith.addf %130, %137 : vector<13x128xf32>
      %c1_i32_139 = arith.constant 1 : i32
      %139 = arith.addi %arg5, %c1_i32_139 : i32
      %c0_140 = arith.constant 0 : index
      %c2_141 = arith.constant 2 : index
      %140 = arith.index_cast %139 : i32 to index
      %c1_142 = arith.constant 1 : index
      %c0_143 = arith.constant 0 : index
      %141 = vector.load %arg1[%c0_140, %c2_141, %140, %c1_142, %c0_143] : memref<1x4x15x15x128xbf16, #tpu.memory_space<vmem>>, vector<1x1x1x13x128xbf16>
      %142 = vector.shape_cast %141 : vector<1x1x1x13x128xbf16> to vector<13x128xbf16>
      %c17 = arith.constant 17 : index
      %c0_144 = arith.constant 0 : index
      %c0_145 = arith.constant 0 : index
      %143 = vector.load %arg2[%c17, %c0_144, %c0_145] : memref<25x128x128xbf16, #tpu.memory_space<vmem>>, vector<1x128x128xbf16>
      %144 = vector.shape_cast %143 : vector<1x128x128xbf16> to vector<128x128xbf16>
      %cst_146 = arith.constant dense<0.000000e+00> : vector<13x128xf32>
      %145 = tpu.matmul %142, %144, %cst_146 {dimension_numbers = #tpu.dot_dimension_numbers<[1], [0], [0], [1], [0, 0, 1, 1], [], []>} : vector<13x128xbf16>, vector<128x128xbf16>, vector<13x128xf32> -> vector<13x128xf32>
      %146 = arith.addf %138, %145 : vector<13x128xf32>
      %c1_i32_147 = arith.constant 1 : i32
      %147 = arith.addi %arg5, %c1_i32_147 : i32
      %c0_148 = arith.constant 0 : index
      %c3_149 = arith.constant 3 : index
      %148 = arith.index_cast %147 : i32 to index
      %c1_150 = arith.constant 1 : index
      %c0_151 = arith.constant 0 : index
      %149 = vector.load %arg1[%c0_148, %c3_149, %148, %c1_150, %c0_151] : memref<1x4x15x15x128xbf16, #tpu.memory_space<vmem>>, vector<1x1x1x13x128xbf16>
      %150 = vector.shape_cast %149 : vector<1x1x1x13x128xbf16> to vector<13x128xbf16>
      %c18 = arith.constant 18 : index
      %c0_152 = arith.constant 0 : index
      %c0_153 = arith.constant 0 : index
      %151 = vector.load %arg2[%c18, %c0_152, %c0_153] : memref<25x128x128xbf16, #tpu.memory_space<vmem>>, vector<1x128x128xbf16>
      %152 = vector.shape_cast %151 : vector<1x128x128xbf16> to vector<128x128xbf16>
      %cst_154 = arith.constant dense<0.000000e+00> : vector<13x128xf32>
      %153 = tpu.matmul %150, %152, %cst_154 {dimension_numbers = #tpu.dot_dimension_numbers<[1], [0], [0], [1], [0, 0, 1, 1], [], []>} : vector<13x128xbf16>, vector<128x128xbf16>, vector<13x128xf32> -> vector<13x128xf32>
      %154 = arith.addf %146, %153 : vector<13x128xf32>
      %c1_i32_155 = arith.constant 1 : i32
      %155 = arith.addi %arg5, %c1_i32_155 : i32
      %c0_156 = arith.constant 0 : index
      %c2_157 = arith.constant 2 : index
      %156 = arith.index_cast %155 : i32 to index
      %c2_158 = arith.constant 2 : index
      %c0_159 = arith.constant 0 : index
      %157 = vector.load %arg1[%c0_156, %c2_157, %156, %c2_158, %c0_159] : memref<1x4x15x15x128xbf16, #tpu.memory_space<vmem>>, vector<1x1x1x13x128xbf16>
      %158 = vector.shape_cast %157 : vector<1x1x1x13x128xbf16> to vector<13x128xbf16>
      %c19 = arith.constant 19 : index
      %c0_160 = arith.constant 0 : index
      %c0_161 = arith.constant 0 : index
      %159 = vector.load %arg2[%c19, %c0_160, %c0_161] : memref<25x128x128xbf16, #tpu.memory_space<vmem>>, vector<1x128x128xbf16>
      %160 = vector.shape_cast %159 : vector<1x128x128xbf16> to vector<128x128xbf16>
      %cst_162 = arith.constant dense<0.000000e+00> : vector<13x128xf32>
      %161 = tpu.matmul %158, %160, %cst_162 {dimension_numbers = #tpu.dot_dimension_numbers<[1], [0], [0], [1], [0, 0, 1, 1], [], []>} : vector<13x128xbf16>, vector<128x128xbf16>, vector<13x128xf32> -> vector<13x128xf32>
      %162 = arith.addf %154, %161 : vector<13x128xf32>
      %c2_i32 = arith.constant 2 : i32
      %163 = arith.addi %arg5, %c2_i32 : i32
      %c0_163 = arith.constant 0 : index
      %c0_164 = arith.constant 0 : index
      %164 = arith.index_cast %163 : i32 to index
      %c0_165 = arith.constant 0 : index
      %c0_166 = arith.constant 0 : index
      %165 = vector.load %arg1[%c0_163, %c0_164, %164, %c0_165, %c0_166] : memref<1x4x15x15x128xbf16, #tpu.memory_space<vmem>>, vector<1x1x1x13x128xbf16>
      %166 = vector.shape_cast %165 : vector<1x1x1x13x128xbf16> to vector<13x128xbf16>
      %c20 = arith.constant 20 : index
      %c0_167 = arith.constant 0 : index
      %c0_168 = arith.constant 0 : index
      %167 = vector.load %arg2[%c20, %c0_167, %c0_168] : memref<25x128x128xbf16, #tpu.memory_space<vmem>>, vector<1x128x128xbf16>
      %168 = vector.shape_cast %167 : vector<1x128x128xbf16> to vector<128x128xbf16>
      %cst_169 = arith.constant dense<0.000000e+00> : vector<13x128xf32>
      %169 = tpu.matmul %166, %168, %cst_169 {dimension_numbers = #tpu.dot_dimension_numbers<[1], [0], [0], [1], [0, 0, 1, 1], [], []>} : vector<13x128xbf16>, vector<128x128xbf16>, vector<13x128xf32> -> vector<13x128xf32>
      %170 = arith.addf %162, %169 : vector<13x128xf32>
      %c2_i32_170 = arith.constant 2 : i32
      %171 = arith.addi %arg5, %c2_i32_170 : i32
      %c0_171 = arith.constant 0 : index
      %c1_172 = arith.constant 1 : index
      %172 = arith.index_cast %171 : i32 to index
      %c0_173 = arith.constant 0 : index
      %c0_174 = arith.constant 0 : index
      %173 = vector.load %arg1[%c0_171, %c1_172, %172, %c0_173, %c0_174] : memref<1x4x15x15x128xbf16, #tpu.memory_space<vmem>>, vector<1x1x1x13x128xbf16>
      %174 = vector.shape_cast %173 : vector<1x1x1x13x128xbf16> to vector<13x128xbf16>
      %c21 = arith.constant 21 : index
      %c0_175 = arith.constant 0 : index
      %c0_176 = arith.constant 0 : index
      %175 = vector.load %arg2[%c21, %c0_175, %c0_176] : memref<25x128x128xbf16, #tpu.memory_space<vmem>>, vector<1x128x128xbf16>
      %176 = vector.shape_cast %175 : vector<1x128x128xbf16> to vector<128x128xbf16>
      %cst_177 = arith.constant dense<0.000000e+00> : vector<13x128xf32>
      %177 = tpu.matmul %174, %176, %cst_177 {dimension_numbers = #tpu.dot_dimension_numbers<[1], [0], [0], [1], [0, 0, 1, 1], [], []>} : vector<13x128xbf16>, vector<128x128xbf16>, vector<13x128xf32> -> vector<13x128xf32>
      %178 = arith.addf %170, %177 : vector<13x128xf32>
      %c2_i32_178 = arith.constant 2 : i32
      %179 = arith.addi %arg5, %c2_i32_178 : i32
      %c0_179 = arith.constant 0 : index
      %c0_180 = arith.constant 0 : index
      %180 = arith.index_cast %179 : i32 to index
      %c1_181 = arith.constant 1 : index
      %c0_182 = arith.constant 0 : index
      %181 = vector.load %arg1[%c0_179, %c0_180, %180, %c1_181, %c0_182] : memref<1x4x15x15x128xbf16, #tpu.memory_space<vmem>>, vector<1x1x1x13x128xbf16>
      %182 = vector.shape_cast %181 : vector<1x1x1x13x128xbf16> to vector<13x128xbf16>
      %c22 = arith.constant 22 : index
      %c0_183 = arith.constant 0 : index
      %c0_184 = arith.constant 0 : index
      %183 = vector.load %arg2[%c22, %c0_183, %c0_184] : memref<25x128x128xbf16, #tpu.memory_space<vmem>>, vector<1x128x128xbf16>
      %184 = vector.shape_cast %183 : vector<1x128x128xbf16> to vector<128x128xbf16>
      %cst_185 = arith.constant dense<0.000000e+00> : vector<13x128xf32>
      %185 = tpu.matmul %182, %184, %cst_185 {dimension_numbers = #tpu.dot_dimension_numbers<[1], [0], [0], [1], [0, 0, 1, 1], [], []>} : vector<13x128xbf16>, vector<128x128xbf16>, vector<13x128xf32> -> vector<13x128xf32>
      %186 = arith.addf %178, %185 : vector<13x128xf32>
      %c2_i32_186 = arith.constant 2 : i32
      %187 = arith.addi %arg5, %c2_i32_186 : i32
      %c0_187 = arith.constant 0 : index
      %c1_188 = arith.constant 1 : index
      %188 = arith.index_cast %187 : i32 to index
      %c1_189 = arith.constant 1 : index
      %c0_190 = arith.constant 0 : index
      %189 = vector.load %arg1[%c0_187, %c1_188, %188, %c1_189, %c0_190] : memref<1x4x15x15x128xbf16, #tpu.memory_space<vmem>>, vector<1x1x1x13x128xbf16>
      %190 = vector.shape_cast %189 : vector<1x1x1x13x128xbf16> to vector<13x128xbf16>
      %c23 = arith.constant 23 : index
      %c0_191 = arith.constant 0 : index
      %c0_192 = arith.constant 0 : index
      %191 = vector.load %arg2[%c23, %c0_191, %c0_192] : memref<25x128x128xbf16, #tpu.memory_space<vmem>>, vector<1x128x128xbf16>
      %192 = vector.shape_cast %191 : vector<1x128x128xbf16> to vector<128x128xbf16>
      %cst_193 = arith.constant dense<0.000000e+00> : vector<13x128xf32>
      %193 = tpu.matmul %190, %192, %cst_193 {dimension_numbers = #tpu.dot_dimension_numbers<[1], [0], [0], [1], [0, 0, 1, 1], [], []>} : vector<13x128xbf16>, vector<128x128xbf16>, vector<13x128xf32> -> vector<13x128xf32>
      %194 = arith.addf %186, %193 : vector<13x128xf32>
      %c2_i32_194 = arith.constant 2 : i32
      %195 = arith.addi %arg5, %c2_i32_194 : i32
      %c0_195 = arith.constant 0 : index
      %c0_196 = arith.constant 0 : index
      %196 = arith.index_cast %195 : i32 to index
      %c2_197 = arith.constant 2 : index
      %c0_198 = arith.constant 0 : index
      %197 = vector.load %arg1[%c0_195, %c0_196, %196, %c2_197, %c0_198] : memref<1x4x15x15x128xbf16, #tpu.memory_space<vmem>>, vector<1x1x1x13x128xbf16>
      %198 = vector.shape_cast %197 : vector<1x1x1x13x128xbf16> to vector<13x128xbf16>
      %c24 = arith.constant 24 : index
      %c0_199 = arith.constant 0 : index
      %c0_200 = arith.constant 0 : index
      %199 = vector.load %arg2[%c24, %c0_199, %c0_200] : memref<25x128x128xbf16, #tpu.memory_space<vmem>>, vector<1x128x128xbf16>
      %200 = vector.shape_cast %199 : vector<1x128x128xbf16> to vector<128x128xbf16>
      %cst_201 = arith.constant dense<0.000000e+00> : vector<13x128xf32>
      %201 = tpu.matmul %198, %200, %cst_201 {dimension_numbers = #tpu.dot_dimension_numbers<[1], [0], [0], [1], [0, 0, 1, 1], [], []>} : vector<13x128xbf16>, vector<128x128xbf16>, vector<13x128xf32> -> vector<13x128xf32>
      %202 = arith.addf %194, %201 : vector<13x128xf32>
      %203 = vector.broadcast %0 : vector<1x128xf32> to vector<13x128xf32>
      %204 = arith.addf %202, %203 : vector<13x128xf32>
      %cst_202 = arith.constant 0.000000e+00 : f32
      %205 = vector.broadcast %cst_202 : f32 to vector<13x128xf32>
      %206 = arith.maximumf %204, %205 : vector<13x128xf32>
      %207 = arith.truncf %206 : vector<13x128xf32> to vector<13x128xbf16>
      %c0_203 = arith.constant 0 : index
      %208 = arith.index_cast %arg5 : i32 to index
      %c0_204 = arith.constant 0 : index
      %c0_205 = arith.constant 0 : index
      %209 = vector.load %arg4[%c0_203, %208, %c0_204, %c0_205] : memref<1x13x13x128xbf16, #tpu.memory_space<vmem>>, vector<1x1x13x128xbf16>
      %210 = vector.shape_cast %209 : vector<1x1x13x128xbf16> to vector<13x128xbf16>
      %211 = vector.shape_cast %207 : vector<13x128xbf16> to vector<1x1x13x128xbf16>
      tpu.vector_store %arg4[%c0_203, %208, %c0_204, %c0_205], %211 {strides = array<i32>} : memref<1x13x13x128xbf16, #tpu.memory_space<vmem>>, vector<1x1x13x128xbf16>,
    }
    %c13_i32_1 = arith.constant 13 : i32
    return
  }
  func.func @transform_0(%arg0: i32) -> (i32, i32, i32, i32, i32) {
    %c0_i32 = arith.constant 0 : i32
    %c0_i32_0 = arith.constant 0 : i32
    %c0_i32_1 = arith.constant 0 : i32
    %c0_i32_2 = arith.constant 0 : i32
    %c0_i32_3 = arith.constant 0 : i32
    return %arg0, %c0_i32, %c0_i32_0, %c0_i32_1, %c0_i32_2 : i32, i32, i32, i32, i32
  }
  func.func @transform_1(%arg0: i32) -> (i32, i32, i32) {
    %c0_i32 = arith.constant 0 : i32
    %c0_i32_0 = arith.constant 0 : i32
    %c0_i32_1 = arith.constant 0 : i32
    %c0_i32_2 = arith.constant 0 : i32
    return %c0_i32, %c0_i32_0, %c0_i32_1 : i32, i32, i32
  }
  func.func @transform_2(%arg0: i32) -> (i32, i32) {
    %c0_i32 = arith.constant 0 : i32
    %c0_i32_0 = arith.constant 0 : i32
    %c0_i32_1 = arith.constant 0 : i32
    return %c0_i32, %c0_i32_0 : i32, i32
  }
  func.func @transform_3(%arg0: i32) -> (i32, i32, i32, i32) {
    %c0_i32 = arith.constant 0 : i32
    %c0_i32_0 = arith.constant 0 : i32
    %c0_i32_1 = arith.constant 0 : i32
    %c0_i32_2 = arith.constant 0 : i32
    return %arg0, %c0_i32, %c0_i32_0, %c0_i32_1 : i32, i32, i32, i32
  }
}

module attributes {stable_mosaic.version = 11 : i64} {
  func.func @_conv_kernel(%arg0: i32, %arg1: memref<1x1x5x5x128xbf16, #tpu.memory_space<vmem>>, %arg2: memref<9x128x128xbf16, #tpu.memory_space<vmem>>, %arg3: memref<1x128xf32, #tpu.memory_space<vmem>>, %arg4: memref<1x3x3x128xbf16, #tpu.memory_space<vmem>>) attributes {dimension_semantics = [#tpu.dimension_semantics<parallel>], iteration_bounds = array<i64: 2>, scalar_prefetch = 0 : i64, scratch_operands = 0 : i64, tpu.core_type = #tpu.core_type<tc>, window_params = [{transform_indices = @transform_0, window_bounds = array<i64: 1, 1, 5, 5, 128>}, {pipeline_mode = #tpu.pipeline_mode<synchronous>, transform_indices = @transform_1, window_bounds = array<i64: 9, 128, 128>}, {pipeline_mode = #tpu.pipeline_mode<synchronous>, transform_indices = @transform_2, window_bounds = array<i64: 1, 128>}, {transform_indices = @transform_3, window_bounds = array<i64: 1, 3, 3, 128>}]} {
    %c0 = arith.constant 0 : index
    %c0_0 = arith.constant 0 : index
    %0 = vector.load %arg3[%c0, %c0_0] : memref<1x128xf32, #tpu.memory_space<vmem>>, vector<1x128xf32>
    %c0_i32 = arith.constant 0 : i32
    %c3_i32 = arith.constant 3 : i32
    %1 = arith.addi %c0_i32, %c3_i32 : i32
    %c1_i32 = arith.constant 1 : i32
    scf.for %arg5 = %c0_i32 to %1 step %c1_i32  : i32 {
      %cst = arith.constant 0.000000e+00 : f32
      %2 = vector.broadcast %cst : f32 to vector<3x128xf32>
      %c0_i32_2 = arith.constant 0 : i32
      %3 = arith.addi %arg5, %c0_i32_2 : i32
      %c0_3 = arith.constant 0 : index
      %c0_4 = arith.constant 0 : index
      %4 = arith.index_cast %3 : i32 to index
      %c0_5 = arith.constant 0 : index
      %c0_6 = arith.constant 0 : index
      %5 = vector.load %arg1[%c0_3, %c0_4, %4, %c0_5, %c0_6] : memref<1x1x5x5x128xbf16, #tpu.memory_space<vmem>>, vector<1x1x1x3x128xbf16>
      %6 = vector.shape_cast %5 : vector<1x1x1x3x128xbf16> to vector<3x128xbf16>
      %c0_7 = arith.constant 0 : index
      %c0_8 = arith.constant 0 : index
      %c0_9 = arith.constant 0 : index
      %7 = vector.load %arg2[%c0_7, %c0_8, %c0_9] : memref<9x128x128xbf16, #tpu.memory_space<vmem>>, vector<1x128x128xbf16>
      %8 = vector.shape_cast %7 : vector<1x128x128xbf16> to vector<128x128xbf16>
      %cst_10 = arith.constant dense<0.000000e+00> : vector<3x128xf32>
      %9 = tpu.matmul %6, %8, %cst_10 {dimension_numbers = #tpu.dot_dimension_numbers<[1], [0], [0], [1], [0, 0, 1, 1], [], []>} : vector<3x128xbf16>, vector<128x128xbf16>, vector<3x128xf32> -> vector<3x128xf32>
      %10 = arith.addf %2, %9 : vector<3x128xf32>
      %c0_i32_11 = arith.constant 0 : i32
      %11 = arith.addi %arg5, %c0_i32_11 : i32
      %c0_12 = arith.constant 0 : index
      %c0_13 = arith.constant 0 : index
      %12 = arith.index_cast %11 : i32 to index
      %c1 = arith.constant 1 : index
      %c0_14 = arith.constant 0 : index
      %13 = vector.load %arg1[%c0_12, %c0_13, %12, %c1, %c0_14] : memref<1x1x5x5x128xbf16, #tpu.memory_space<vmem>>, vector<1x1x1x3x128xbf16>
      %14 = vector.shape_cast %13 : vector<1x1x1x3x128xbf16> to vector<3x128xbf16>
      %c1_15 = arith.constant 1 : index
      %c0_16 = arith.constant 0 : index
      %c0_17 = arith.constant 0 : index
      %15 = vector.load %arg2[%c1_15, %c0_16, %c0_17] : memref<9x128x128xbf16, #tpu.memory_space<vmem>>, vector<1x128x128xbf16>
      %16 = vector.shape_cast %15 : vector<1x128x128xbf16> to vector<128x128xbf16>
      %cst_18 = arith.constant dense<0.000000e+00> : vector<3x128xf32>
      %17 = tpu.matmul %14, %16, %cst_18 {dimension_numbers = #tpu.dot_dimension_numbers<[1], [0], [0], [1], [0, 0, 1, 1], [], []>} : vector<3x128xbf16>, vector<128x128xbf16>, vector<3x128xf32> -> vector<3x128xf32>
      %18 = arith.addf %10, %17 : vector<3x128xf32>
      %c0_i32_19 = arith.constant 0 : i32
      %19 = arith.addi %arg5, %c0_i32_19 : i32
      %c0_20 = arith.constant 0 : index
      %c0_21 = arith.constant 0 : index
      %20 = arith.index_cast %19 : i32 to index
      %c2 = arith.constant 2 : index
      %c0_22 = arith.constant 0 : index
      %21 = vector.load %arg1[%c0_20, %c0_21, %20, %c2, %c0_22] : memref<1x1x5x5x128xbf16, #tpu.memory_space<vmem>>, vector<1x1x1x3x128xbf16>
      %22 = vector.shape_cast %21 : vector<1x1x1x3x128xbf16> to vector<3x128xbf16>
      %c2_23 = arith.constant 2 : index
      %c0_24 = arith.constant 0 : index
      %c0_25 = arith.constant 0 : index
      %23 = vector.load %arg2[%c2_23, %c0_24, %c0_25] : memref<9x128x128xbf16, #tpu.memory_space<vmem>>, vector<1x128x128xbf16>
      %24 = vector.shape_cast %23 : vector<1x128x128xbf16> to vector<128x128xbf16>
      %cst_26 = arith.constant dense<0.000000e+00> : vector<3x128xf32>
      %25 = tpu.matmul %22, %24, %cst_26 {dimension_numbers = #tpu.dot_dimension_numbers<[1], [0], [0], [1], [0, 0, 1, 1], [], []>} : vector<3x128xbf16>, vector<128x128xbf16>, vector<3x128xf32> -> vector<3x128xf32>
      %26 = arith.addf %18, %25 : vector<3x128xf32>
      %c1_i32_27 = arith.constant 1 : i32
      %27 = arith.addi %arg5, %c1_i32_27 : i32
      %c0_28 = arith.constant 0 : index
      %c0_29 = arith.constant 0 : index
      %28 = arith.index_cast %27 : i32 to index
      %c0_30 = arith.constant 0 : index
      %c0_31 = arith.constant 0 : index
      %29 = vector.load %arg1[%c0_28, %c0_29, %28, %c0_30, %c0_31] : memref<1x1x5x5x128xbf16, #tpu.memory_space<vmem>>, vector<1x1x1x3x128xbf16>
      %30 = vector.shape_cast %29 : vector<1x1x1x3x128xbf16> to vector<3x128xbf16>
      %c3 = arith.constant 3 : index
      %c0_32 = arith.constant 0 : index
      %c0_33 = arith.constant 0 : index
      %31 = vector.load %arg2[%c3, %c0_32, %c0_33] : memref<9x128x128xbf16, #tpu.memory_space<vmem>>, vector<1x128x128xbf16>
      %32 = vector.shape_cast %31 : vector<1x128x128xbf16> to vector<128x128xbf16>
      %cst_34 = arith.constant dense<0.000000e+00> : vector<3x128xf32>
      %33 = tpu.matmul %30, %32, %cst_34 {dimension_numbers = #tpu.dot_dimension_numbers<[1], [0], [0], [1], [0, 0, 1, 1], [], []>} : vector<3x128xbf16>, vector<128x128xbf16>, vector<3x128xf32> -> vector<3x128xf32>
      %34 = arith.addf %26, %33 : vector<3x128xf32>
      %c1_i32_35 = arith.constant 1 : i32
      %35 = arith.addi %arg5, %c1_i32_35 : i32
      %c0_36 = arith.constant 0 : index
      %c0_37 = arith.constant 0 : index
      %36 = arith.index_cast %35 : i32 to index
      %c1_38 = arith.constant 1 : index
      %c0_39 = arith.constant 0 : index
      %37 = vector.load %arg1[%c0_36, %c0_37, %36, %c1_38, %c0_39] : memref<1x1x5x5x128xbf16, #tpu.memory_space<vmem>>, vector<1x1x1x3x128xbf16>
      %38 = vector.shape_cast %37 : vector<1x1x1x3x128xbf16> to vector<3x128xbf16>
      %c4 = arith.constant 4 : index
      %c0_40 = arith.constant 0 : index
      %c0_41 = arith.constant 0 : index
      %39 = vector.load %arg2[%c4, %c0_40, %c0_41] : memref<9x128x128xbf16, #tpu.memory_space<vmem>>, vector<1x128x128xbf16>
      %40 = vector.shape_cast %39 : vector<1x128x128xbf16> to vector<128x128xbf16>
      %cst_42 = arith.constant dense<0.000000e+00> : vector<3x128xf32>
      %41 = tpu.matmul %38, %40, %cst_42 {dimension_numbers = #tpu.dot_dimension_numbers<[1], [0], [0], [1], [0, 0, 1, 1], [], []>} : vector<3x128xbf16>, vector<128x128xbf16>, vector<3x128xf32> -> vector<3x128xf32>
      %42 = arith.addf %34, %41 : vector<3x128xf32>
      %c1_i32_43 = arith.constant 1 : i32
      %43 = arith.addi %arg5, %c1_i32_43 : i32
      %c0_44 = arith.constant 0 : index
      %c0_45 = arith.constant 0 : index
      %44 = arith.index_cast %43 : i32 to index
      %c2_46 = arith.constant 2 : index
      %c0_47 = arith.constant 0 : index
      %45 = vector.load %arg1[%c0_44, %c0_45, %44, %c2_46, %c0_47] : memref<1x1x5x5x128xbf16, #tpu.memory_space<vmem>>, vector<1x1x1x3x128xbf16>
      %46 = vector.shape_cast %45 : vector<1x1x1x3x128xbf16> to vector<3x128xbf16>
      %c5 = arith.constant 5 : index
      %c0_48 = arith.constant 0 : index
      %c0_49 = arith.constant 0 : index
      %47 = vector.load %arg2[%c5, %c0_48, %c0_49] : memref<9x128x128xbf16, #tpu.memory_space<vmem>>, vector<1x128x128xbf16>
      %48 = vector.shape_cast %47 : vector<1x128x128xbf16> to vector<128x128xbf16>
      %cst_50 = arith.constant dense<0.000000e+00> : vector<3x128xf32>
      %49 = tpu.matmul %46, %48, %cst_50 {dimension_numbers = #tpu.dot_dimension_numbers<[1], [0], [0], [1], [0, 0, 1, 1], [], []>} : vector<3x128xbf16>, vector<128x128xbf16>, vector<3x128xf32> -> vector<3x128xf32>
      %50 = arith.addf %42, %49 : vector<3x128xf32>
      %c2_i32 = arith.constant 2 : i32
      %51 = arith.addi %arg5, %c2_i32 : i32
      %c0_51 = arith.constant 0 : index
      %c0_52 = arith.constant 0 : index
      %52 = arith.index_cast %51 : i32 to index
      %c0_53 = arith.constant 0 : index
      %c0_54 = arith.constant 0 : index
      %53 = vector.load %arg1[%c0_51, %c0_52, %52, %c0_53, %c0_54] : memref<1x1x5x5x128xbf16, #tpu.memory_space<vmem>>, vector<1x1x1x3x128xbf16>
      %54 = vector.shape_cast %53 : vector<1x1x1x3x128xbf16> to vector<3x128xbf16>
      %c6 = arith.constant 6 : index
      %c0_55 = arith.constant 0 : index
      %c0_56 = arith.constant 0 : index
      %55 = vector.load %arg2[%c6, %c0_55, %c0_56] : memref<9x128x128xbf16, #tpu.memory_space<vmem>>, vector<1x128x128xbf16>
      %56 = vector.shape_cast %55 : vector<1x128x128xbf16> to vector<128x128xbf16>
      %cst_57 = arith.constant dense<0.000000e+00> : vector<3x128xf32>
      %57 = tpu.matmul %54, %56, %cst_57 {dimension_numbers = #tpu.dot_dimension_numbers<[1], [0], [0], [1], [0, 0, 1, 1], [], []>} : vector<3x128xbf16>, vector<128x128xbf16>, vector<3x128xf32> -> vector<3x128xf32>
      %58 = arith.addf %50, %57 : vector<3x128xf32>
      %c2_i32_58 = arith.constant 2 : i32
      %59 = arith.addi %arg5, %c2_i32_58 : i32
      %c0_59 = arith.constant 0 : index
      %c0_60 = arith.constant 0 : index
      %60 = arith.index_cast %59 : i32 to index
      %c1_61 = arith.constant 1 : index
      %c0_62 = arith.constant 0 : index
      %61 = vector.load %arg1[%c0_59, %c0_60, %60, %c1_61, %c0_62] : memref<1x1x5x5x128xbf16, #tpu.memory_space<vmem>>, vector<1x1x1x3x128xbf16>
      %62 = vector.shape_cast %61 : vector<1x1x1x3x128xbf16> to vector<3x128xbf16>
      %c7 = arith.constant 7 : index
      %c0_63 = arith.constant 0 : index
      %c0_64 = arith.constant 0 : index
      %63 = vector.load %arg2[%c7, %c0_63, %c0_64] : memref<9x128x128xbf16, #tpu.memory_space<vmem>>, vector<1x128x128xbf16>
      %64 = vector.shape_cast %63 : vector<1x128x128xbf16> to vector<128x128xbf16>
      %cst_65 = arith.constant dense<0.000000e+00> : vector<3x128xf32>
      %65 = tpu.matmul %62, %64, %cst_65 {dimension_numbers = #tpu.dot_dimension_numbers<[1], [0], [0], [1], [0, 0, 1, 1], [], []>} : vector<3x128xbf16>, vector<128x128xbf16>, vector<3x128xf32> -> vector<3x128xf32>
      %66 = arith.addf %58, %65 : vector<3x128xf32>
      %c2_i32_66 = arith.constant 2 : i32
      %67 = arith.addi %arg5, %c2_i32_66 : i32
      %c0_67 = arith.constant 0 : index
      %c0_68 = arith.constant 0 : index
      %68 = arith.index_cast %67 : i32 to index
      %c2_69 = arith.constant 2 : index
      %c0_70 = arith.constant 0 : index
      %69 = vector.load %arg1[%c0_67, %c0_68, %68, %c2_69, %c0_70] : memref<1x1x5x5x128xbf16, #tpu.memory_space<vmem>>, vector<1x1x1x3x128xbf16>
      %70 = vector.shape_cast %69 : vector<1x1x1x3x128xbf16> to vector<3x128xbf16>
      %c8 = arith.constant 8 : index
      %c0_71 = arith.constant 0 : index
      %c0_72 = arith.constant 0 : index
      %71 = vector.load %arg2[%c8, %c0_71, %c0_72] : memref<9x128x128xbf16, #tpu.memory_space<vmem>>, vector<1x128x128xbf16>
      %72 = vector.shape_cast %71 : vector<1x128x128xbf16> to vector<128x128xbf16>
      %cst_73 = arith.constant dense<0.000000e+00> : vector<3x128xf32>
      %73 = tpu.matmul %70, %72, %cst_73 {dimension_numbers = #tpu.dot_dimension_numbers<[1], [0], [0], [1], [0, 0, 1, 1], [], []>} : vector<3x128xbf16>, vector<128x128xbf16>, vector<3x128xf32> -> vector<3x128xf32>
      %74 = arith.addf %66, %73 : vector<3x128xf32>
      %75 = vector.broadcast %0 : vector<1x128xf32> to vector<3x128xf32>
      %76 = arith.addf %74, %75 : vector<3x128xf32>
      %cst_74 = arith.constant 0.000000e+00 : f32
      %77 = vector.broadcast %cst_74 : f32 to vector<3x128xf32>
      %78 = arith.maximumf %76, %77 : vector<3x128xf32>
      %79 = arith.truncf %78 : vector<3x128xf32> to vector<3x128xbf16>
      %c0_75 = arith.constant 0 : index
      %80 = arith.index_cast %arg5 : i32 to index
      %c0_76 = arith.constant 0 : index
      %c0_77 = arith.constant 0 : index
      %81 = vector.load %arg4[%c0_75, %80, %c0_76, %c0_77] : memref<1x3x3x128xbf16, #tpu.memory_space<vmem>>, vector<1x1x3x128xbf16>
      %82 = vector.shape_cast %81 : vector<1x1x3x128xbf16> to vector<3x128xbf16>
      %83 = vector.shape_cast %79 : vector<3x128xbf16> to vector<1x1x3x128xbf16>
      tpu.vector_store %arg4[%c0_75, %80, %c0_76, %c0_77], %83 {strides = array<i32>} : memref<1x3x3x128xbf16, #tpu.memory_space<vmem>>, vector<1x1x3x128xbf16>,
    }
    %c3_i32_1 = arith.constant 3 : i32
    return
  }
  func.func @transform_0(%arg0: i32) -> (i32, i32, i32, i32, i32) {
    %c0_i32 = arith.constant 0 : i32
    %c0_i32_0 = arith.constant 0 : i32
    %c0_i32_1 = arith.constant 0 : i32
    %c0_i32_2 = arith.constant 0 : i32
    %c0_i32_3 = arith.constant 0 : i32
    return %arg0, %c0_i32, %c0_i32_0, %c0_i32_1, %c0_i32_2 : i32, i32, i32, i32, i32
  }
  func.func @transform_1(%arg0: i32) -> (i32, i32, i32) {
    %c0_i32 = arith.constant 0 : i32
    %c0_i32_0 = arith.constant 0 : i32
    %c0_i32_1 = arith.constant 0 : i32
    %c0_i32_2 = arith.constant 0 : i32
    return %c0_i32, %c0_i32_0, %c0_i32_1 : i32, i32, i32
  }
  func.func @transform_2(%arg0: i32) -> (i32, i32) {
    %c0_i32 = arith.constant 0 : i32
    %c0_i32_0 = arith.constant 0 : i32
    %c0_i32_1 = arith.constant 0 : i32
    return %c0_i32, %c0_i32_0 : i32, i32
  }
  func.func @transform_3(%arg0: i32) -> (i32, i32, i32, i32) {
    %c0_i32 = arith.constant 0 : i32
    %c0_i32_0 = arith.constant 0 : i32
    %c0_i32_1 = arith.constant 0 : i32
    %c0_i32_2 = arith.constant 0 : i32
    return %arg0, %c0_i32, %c0_i32_0, %c0_i32_1 : i32, i32, i32, i32
  }
}

module attributes {stable_mosaic.version = 11 : i64} {
  func.func @_conv_kernel(%arg0: i32, %arg1: memref<1x4x7x7x128xbf16, #tpu.memory_space<vmem>>, %arg2: memref<25x128x128xbf16, #tpu.memory_space<vmem>>, %arg3: memref<1x128xf32, #tpu.memory_space<vmem>>, %arg4: memref<1x5x5x128xbf16, #tpu.memory_space<vmem>>) attributes {dimension_semantics = [#tpu.dimension_semantics<parallel>], iteration_bounds = array<i64: 2>, scalar_prefetch = 0 : i64, scratch_operands = 0 : i64, tpu.core_type = #tpu.core_type<tc>, window_params = [{transform_indices = @transform_0, window_bounds = array<i64: 1, 4, 7, 7, 128>}, {pipeline_mode = #tpu.pipeline_mode<synchronous>, transform_indices = @transform_1, window_bounds = array<i64: 25, 128, 128>}, {pipeline_mode = #tpu.pipeline_mode<synchronous>, transform_indices = @transform_2, window_bounds = array<i64: 1, 128>}, {transform_indices = @transform_3, window_bounds = array<i64: 1, 5, 5, 128>}]} {
    %c0 = arith.constant 0 : index
    %c0_0 = arith.constant 0 : index
    %0 = vector.load %arg3[%c0, %c0_0] : memref<1x128xf32, #tpu.memory_space<vmem>>, vector<1x128xf32>
    %c0_i32 = arith.constant 0 : i32
    %c5_i32 = arith.constant 5 : i32
    %1 = arith.addi %c0_i32, %c5_i32 : i32
    %c1_i32 = arith.constant 1 : i32
    scf.for %arg5 = %c0_i32 to %1 step %c1_i32  : i32 {
      %cst = arith.constant 0.000000e+00 : f32
      %2 = vector.broadcast %cst : f32 to vector<5x128xf32>
      %c0_i32_2 = arith.constant 0 : i32
      %3 = arith.addi %arg5, %c0_i32_2 : i32
      %c0_3 = arith.constant 0 : index
      %c0_4 = arith.constant 0 : index
      %4 = arith.index_cast %3 : i32 to index
      %c0_5 = arith.constant 0 : index
      %c0_6 = arith.constant 0 : index
      %5 = vector.load %arg1[%c0_3, %c0_4, %4, %c0_5, %c0_6] : memref<1x4x7x7x128xbf16, #tpu.memory_space<vmem>>, vector<1x1x1x5x128xbf16>
      %6 = vector.shape_cast %5 : vector<1x1x1x5x128xbf16> to vector<5x128xbf16>
      %c0_7 = arith.constant 0 : index
      %c0_8 = arith.constant 0 : index
      %c0_9 = arith.constant 0 : index
      %7 = vector.load %arg2[%c0_7, %c0_8, %c0_9] : memref<25x128x128xbf16, #tpu.memory_space<vmem>>, vector<1x128x128xbf16>
      %8 = vector.shape_cast %7 : vector<1x128x128xbf16> to vector<128x128xbf16>
      %cst_10 = arith.constant dense<0.000000e+00> : vector<5x128xf32>
      %9 = tpu.matmul %6, %8, %cst_10 {dimension_numbers = #tpu.dot_dimension_numbers<[1], [0], [0], [1], [0, 0, 1, 1], [], []>} : vector<5x128xbf16>, vector<128x128xbf16>, vector<5x128xf32> -> vector<5x128xf32>
      %10 = arith.addf %2, %9 : vector<5x128xf32>
      %c0_i32_11 = arith.constant 0 : i32
      %11 = arith.addi %arg5, %c0_i32_11 : i32
      %c0_12 = arith.constant 0 : index
      %c1 = arith.constant 1 : index
      %12 = arith.index_cast %11 : i32 to index
      %c0_13 = arith.constant 0 : index
      %c0_14 = arith.constant 0 : index
      %13 = vector.load %arg1[%c0_12, %c1, %12, %c0_13, %c0_14] : memref<1x4x7x7x128xbf16, #tpu.memory_space<vmem>>, vector<1x1x1x5x128xbf16>
      %14 = vector.shape_cast %13 : vector<1x1x1x5x128xbf16> to vector<5x128xbf16>
      %c1_15 = arith.constant 1 : index
      %c0_16 = arith.constant 0 : index
      %c0_17 = arith.constant 0 : index
      %15 = vector.load %arg2[%c1_15, %c0_16, %c0_17] : memref<25x128x128xbf16, #tpu.memory_space<vmem>>, vector<1x128x128xbf16>
      %16 = vector.shape_cast %15 : vector<1x128x128xbf16> to vector<128x128xbf16>
      %cst_18 = arith.constant dense<0.000000e+00> : vector<5x128xf32>
      %17 = tpu.matmul %14, %16, %cst_18 {dimension_numbers = #tpu.dot_dimension_numbers<[1], [0], [0], [1], [0, 0, 1, 1], [], []>} : vector<5x128xbf16>, vector<128x128xbf16>, vector<5x128xf32> -> vector<5x128xf32>
      %18 = arith.addf %10, %17 : vector<5x128xf32>
      %c0_i32_19 = arith.constant 0 : i32
      %19 = arith.addi %arg5, %c0_i32_19 : i32
      %c0_20 = arith.constant 0 : index
      %c0_21 = arith.constant 0 : index
      %20 = arith.index_cast %19 : i32 to index
      %c1_22 = arith.constant 1 : index
      %c0_23 = arith.constant 0 : index
      %21 = vector.load %arg1[%c0_20, %c0_21, %20, %c1_22, %c0_23] : memref<1x4x7x7x128xbf16, #tpu.memory_space<vmem>>, vector<1x1x1x5x128xbf16>
      %22 = vector.shape_cast %21 : vector<1x1x1x5x128xbf16> to vector<5x128xbf16>
      %c2 = arith.constant 2 : index
      %c0_24 = arith.constant 0 : index
      %c0_25 = arith.constant 0 : index
      %23 = vector.load %arg2[%c2, %c0_24, %c0_25] : memref<25x128x128xbf16, #tpu.memory_space<vmem>>, vector<1x128x128xbf16>
      %24 = vector.shape_cast %23 : vector<1x128x128xbf16> to vector<128x128xbf16>
      %cst_26 = arith.constant dense<0.000000e+00> : vector<5x128xf32>
      %25 = tpu.matmul %22, %24, %cst_26 {dimension_numbers = #tpu.dot_dimension_numbers<[1], [0], [0], [1], [0, 0, 1, 1], [], []>} : vector<5x128xbf16>, vector<128x128xbf16>, vector<5x128xf32> -> vector<5x128xf32>
      %26 = arith.addf %18, %25 : vector<5x128xf32>
      %c0_i32_27 = arith.constant 0 : i32
      %27 = arith.addi %arg5, %c0_i32_27 : i32
      %c0_28 = arith.constant 0 : index
      %c1_29 = arith.constant 1 : index
      %28 = arith.index_cast %27 : i32 to index
      %c1_30 = arith.constant 1 : index
      %c0_31 = arith.constant 0 : index
      %29 = vector.load %arg1[%c0_28, %c1_29, %28, %c1_30, %c0_31] : memref<1x4x7x7x128xbf16, #tpu.memory_space<vmem>>, vector<1x1x1x5x128xbf16>
      %30 = vector.shape_cast %29 : vector<1x1x1x5x128xbf16> to vector<5x128xbf16>
      %c3 = arith.constant 3 : index
      %c0_32 = arith.constant 0 : index
      %c0_33 = arith.constant 0 : index
      %31 = vector.load %arg2[%c3, %c0_32, %c0_33] : memref<25x128x128xbf16, #tpu.memory_space<vmem>>, vector<1x128x128xbf16>
      %32 = vector.shape_cast %31 : vector<1x128x128xbf16> to vector<128x128xbf16>
      %cst_34 = arith.constant dense<0.000000e+00> : vector<5x128xf32>
      %33 = tpu.matmul %30, %32, %cst_34 {dimension_numbers = #tpu.dot_dimension_numbers<[1], [0], [0], [1], [0, 0, 1, 1], [], []>} : vector<5x128xbf16>, vector<128x128xbf16>, vector<5x128xf32> -> vector<5x128xf32>
      %34 = arith.addf %26, %33 : vector<5x128xf32>
      %c0_i32_35 = arith.constant 0 : i32
      %35 = arith.addi %arg5, %c0_i32_35 : i32
      %c0_36 = arith.constant 0 : index
      %c0_37 = arith.constant 0 : index
      %36 = arith.index_cast %35 : i32 to index
      %c2_38 = arith.constant 2 : index
      %c0_39 = arith.constant 0 : index
      %37 = vector.load %arg1[%c0_36, %c0_37, %36, %c2_38, %c0_39] : memref<1x4x7x7x128xbf16, #tpu.memory_space<vmem>>, vector<1x1x1x5x128xbf16>
      %38 = vector.shape_cast %37 : vector<1x1x1x5x128xbf16> to vector<5x128xbf16>
      %c4 = arith.constant 4 : index
      %c0_40 = arith.constant 0 : index
      %c0_41 = arith.constant 0 : index
      %39 = vector.load %arg2[%c4, %c0_40, %c0_41] : memref<25x128x128xbf16, #tpu.memory_space<vmem>>, vector<1x128x128xbf16>
      %40 = vector.shape_cast %39 : vector<1x128x128xbf16> to vector<128x128xbf16>
      %cst_42 = arith.constant dense<0.000000e+00> : vector<5x128xf32>
      %41 = tpu.matmul %38, %40, %cst_42 {dimension_numbers = #tpu.dot_dimension_numbers<[1], [0], [0], [1], [0, 0, 1, 1], [], []>} : vector<5x128xbf16>, vector<128x128xbf16>, vector<5x128xf32> -> vector<5x128xf32>
      %42 = arith.addf %34, %41 : vector<5x128xf32>
      %c0_i32_43 = arith.constant 0 : i32
      %43 = arith.addi %arg5, %c0_i32_43 : i32
      %c0_44 = arith.constant 0 : index
      %c2_45 = arith.constant 2 : index
      %44 = arith.index_cast %43 : i32 to index
      %c0_46 = arith.constant 0 : index
      %c0_47 = arith.constant 0 : index
      %45 = vector.load %arg1[%c0_44, %c2_45, %44, %c0_46, %c0_47] : memref<1x4x7x7x128xbf16, #tpu.memory_space<vmem>>, vector<1x1x1x5x128xbf16>
      %46 = vector.shape_cast %45 : vector<1x1x1x5x128xbf16> to vector<5x128xbf16>
      %c5 = arith.constant 5 : index
      %c0_48 = arith.constant 0 : index
      %c0_49 = arith.constant 0 : index
      %47 = vector.load %arg2[%c5, %c0_48, %c0_49] : memref<25x128x128xbf16, #tpu.memory_space<vmem>>, vector<1x128x128xbf16>
      %48 = vector.shape_cast %47 : vector<1x128x128xbf16> to vector<128x128xbf16>
      %cst_50 = arith.constant dense<0.000000e+00> : vector<5x128xf32>
      %49 = tpu.matmul %46, %48, %cst_50 {dimension_numbers = #tpu.dot_dimension_numbers<[1], [0], [0], [1], [0, 0, 1, 1], [], []>} : vector<5x128xbf16>, vector<128x128xbf16>, vector<5x128xf32> -> vector<5x128xf32>
      %50 = arith.addf %42, %49 : vector<5x128xf32>
      %c0_i32_51 = arith.constant 0 : i32
      %51 = arith.addi %arg5, %c0_i32_51 : i32
      %c0_52 = arith.constant 0 : index
      %c3_53 = arith.constant 3 : index
      %52 = arith.index_cast %51 : i32 to index
      %c0_54 = arith.constant 0 : index
      %c0_55 = arith.constant 0 : index
      %53 = vector.load %arg1[%c0_52, %c3_53, %52, %c0_54, %c0_55] : memref<1x4x7x7x128xbf16, #tpu.memory_space<vmem>>, vector<1x1x1x5x128xbf16>
      %54 = vector.shape_cast %53 : vector<1x1x1x5x128xbf16> to vector<5x128xbf16>
      %c6 = arith.constant 6 : index
      %c0_56 = arith.constant 0 : index
      %c0_57 = arith.constant 0 : index
      %55 = vector.load %arg2[%c6, %c0_56, %c0_57] : memref<25x128x128xbf16, #tpu.memory_space<vmem>>, vector<1x128x128xbf16>
      %56 = vector.shape_cast %55 : vector<1x128x128xbf16> to vector<128x128xbf16>
      %cst_58 = arith.constant dense<0.000000e+00> : vector<5x128xf32>
      %57 = tpu.matmul %54, %56, %cst_58 {dimension_numbers = #tpu.dot_dimension_numbers<[1], [0], [0], [1], [0, 0, 1, 1], [], []>} : vector<5x128xbf16>, vector<128x128xbf16>, vector<5x128xf32> -> vector<5x128xf32>
      %58 = arith.addf %50, %57 : vector<5x128xf32>
      %c0_i32_59 = arith.constant 0 : i32
      %59 = arith.addi %arg5, %c0_i32_59 : i32
      %c0_60 = arith.constant 0 : index
      %c2_61 = arith.constant 2 : index
      %60 = arith.index_cast %59 : i32 to index
      %c1_62 = arith.constant 1 : index
      %c0_63 = arith.constant 0 : index
      %61 = vector.load %arg1[%c0_60, %c2_61, %60, %c1_62, %c0_63] : memref<1x4x7x7x128xbf16, #tpu.memory_space<vmem>>, vector<1x1x1x5x128xbf16>
      %62 = vector.shape_cast %61 : vector<1x1x1x5x128xbf16> to vector<5x128xbf16>
      %c7 = arith.constant 7 : index
      %c0_64 = arith.constant 0 : index
      %c0_65 = arith.constant 0 : index
      %63 = vector.load %arg2[%c7, %c0_64, %c0_65] : memref<25x128x128xbf16, #tpu.memory_space<vmem>>, vector<1x128x128xbf16>
      %64 = vector.shape_cast %63 : vector<1x128x128xbf16> to vector<128x128xbf16>
      %cst_66 = arith.constant dense<0.000000e+00> : vector<5x128xf32>
      %65 = tpu.matmul %62, %64, %cst_66 {dimension_numbers = #tpu.dot_dimension_numbers<[1], [0], [0], [1], [0, 0, 1, 1], [], []>} : vector<5x128xbf16>, vector<128x128xbf16>, vector<5x128xf32> -> vector<5x128xf32>
      %66 = arith.addf %58, %65 : vector<5x128xf32>
      %c0_i32_67 = arith.constant 0 : i32
      %67 = arith.addi %arg5, %c0_i32_67 : i32
      %c0_68 = arith.constant 0 : index
      %c3_69 = arith.constant 3 : index
      %68 = arith.index_cast %67 : i32 to index
      %c1_70 = arith.constant 1 : index
      %c0_71 = arith.constant 0 : index
      %69 = vector.load %arg1[%c0_68, %c3_69, %68, %c1_70, %c0_71] : memref<1x4x7x7x128xbf16, #tpu.memory_space<vmem>>, vector<1x1x1x5x128xbf16>
      %70 = vector.shape_cast %69 : vector<1x1x1x5x128xbf16> to vector<5x128xbf16>
      %c8 = arith.constant 8 : index
      %c0_72 = arith.constant 0 : index
      %c0_73 = arith.constant 0 : index
      %71 = vector.load %arg2[%c8, %c0_72, %c0_73] : memref<25x128x128xbf16, #tpu.memory_space<vmem>>, vector<1x128x128xbf16>
      %72 = vector.shape_cast %71 : vector<1x128x128xbf16> to vector<128x128xbf16>
      %cst_74 = arith.constant dense<0.000000e+00> : vector<5x128xf32>
      %73 = tpu.matmul %70, %72, %cst_74 {dimension_numbers = #tpu.dot_dimension_numbers<[1], [0], [0], [1], [0, 0, 1, 1], [], []>} : vector<5x128xbf16>, vector<128x128xbf16>, vector<5x128xf32> -> vector<5x128xf32>
      %74 = arith.addf %66, %73 : vector<5x128xf32>
      %c0_i32_75 = arith.constant 0 : i32
      %75 = arith.addi %arg5, %c0_i32_75 : i32
      %c0_76 = arith.constant 0 : index
      %c2_77 = arith.constant 2 : index
      %76 = arith.index_cast %75 : i32 to index
      %c2_78 = arith.constant 2 : index
      %c0_79 = arith.constant 0 : index
      %77 = vector.load %arg1[%c0_76, %c2_77, %76, %c2_78, %c0_79] : memref<1x4x7x7x128xbf16, #tpu.memory_space<vmem>>, vector<1x1x1x5x128xbf16>
      %78 = vector.shape_cast %77 : vector<1x1x1x5x128xbf16> to vector<5x128xbf16>
      %c9 = arith.constant 9 : index
      %c0_80 = arith.constant 0 : index
      %c0_81 = arith.constant 0 : index
      %79 = vector.load %arg2[%c9, %c0_80, %c0_81] : memref<25x128x128xbf16, #tpu.memory_space<vmem>>, vector<1x128x128xbf16>
      %80 = vector.shape_cast %79 : vector<1x128x128xbf16> to vector<128x128xbf16>
      %cst_82 = arith.constant dense<0.000000e+00> : vector<5x128xf32>
      %81 = tpu.matmul %78, %80, %cst_82 {dimension_numbers = #tpu.dot_dimension_numbers<[1], [0], [0], [1], [0, 0, 1, 1], [], []>} : vector<5x128xbf16>, vector<128x128xbf16>, vector<5x128xf32> -> vector<5x128xf32>
      %82 = arith.addf %74, %81 : vector<5x128xf32>
      %c1_i32_83 = arith.constant 1 : i32
      %83 = arith.addi %arg5, %c1_i32_83 : i32
      %c0_84 = arith.constant 0 : index
      %c0_85 = arith.constant 0 : index
      %84 = arith.index_cast %83 : i32 to index
      %c0_86 = arith.constant 0 : index
      %c0_87 = arith.constant 0 : index
      %85 = vector.load %arg1[%c0_84, %c0_85, %84, %c0_86, %c0_87] : memref<1x4x7x7x128xbf16, #tpu.memory_space<vmem>>, vector<1x1x1x5x128xbf16>
      %86 = vector.shape_cast %85 : vector<1x1x1x5x128xbf16> to vector<5x128xbf16>
      %c10 = arith.constant 10 : index
      %c0_88 = arith.constant 0 : index
      %c0_89 = arith.constant 0 : index
      %87 = vector.load %arg2[%c10, %c0_88, %c0_89] : memref<25x128x128xbf16, #tpu.memory_space<vmem>>, vector<1x128x128xbf16>
      %88 = vector.shape_cast %87 : vector<1x128x128xbf16> to vector<128x128xbf16>
      %cst_90 = arith.constant dense<0.000000e+00> : vector<5x128xf32>
      %89 = tpu.matmul %86, %88, %cst_90 {dimension_numbers = #tpu.dot_dimension_numbers<[1], [0], [0], [1], [0, 0, 1, 1], [], []>} : vector<5x128xbf16>, vector<128x128xbf16>, vector<5x128xf32> -> vector<5x128xf32>
      %90 = arith.addf %82, %89 : vector<5x128xf32>
      %c1_i32_91 = arith.constant 1 : i32
      %91 = arith.addi %arg5, %c1_i32_91 : i32
      %c0_92 = arith.constant 0 : index
      %c1_93 = arith.constant 1 : index
      %92 = arith.index_cast %91 : i32 to index
      %c0_94 = arith.constant 0 : index
      %c0_95 = arith.constant 0 : index
      %93 = vector.load %arg1[%c0_92, %c1_93, %92, %c0_94, %c0_95] : memref<1x4x7x7x128xbf16, #tpu.memory_space<vmem>>, vector<1x1x1x5x128xbf16>
      %94 = vector.shape_cast %93 : vector<1x1x1x5x128xbf16> to vector<5x128xbf16>
      %c11 = arith.constant 11 : index
      %c0_96 = arith.constant 0 : index
      %c0_97 = arith.constant 0 : index
      %95 = vector.load %arg2[%c11, %c0_96, %c0_97] : memref<25x128x128xbf16, #tpu.memory_space<vmem>>, vector<1x128x128xbf16>
      %96 = vector.shape_cast %95 : vector<1x128x128xbf16> to vector<128x128xbf16>
      %cst_98 = arith.constant dense<0.000000e+00> : vector<5x128xf32>
      %97 = tpu.matmul %94, %96, %cst_98 {dimension_numbers = #tpu.dot_dimension_numbers<[1], [0], [0], [1], [0, 0, 1, 1], [], []>} : vector<5x128xbf16>, vector<128x128xbf16>, vector<5x128xf32> -> vector<5x128xf32>
      %98 = arith.addf %90, %97 : vector<5x128xf32>
      %c1_i32_99 = arith.constant 1 : i32
      %99 = arith.addi %arg5, %c1_i32_99 : i32
      %c0_100 = arith.constant 0 : index
      %c0_101 = arith.constant 0 : index
      %100 = arith.index_cast %99 : i32 to index
      %c1_102 = arith.constant 1 : index
      %c0_103 = arith.constant 0 : index
      %101 = vector.load %arg1[%c0_100, %c0_101, %100, %c1_102, %c0_103] : memref<1x4x7x7x128xbf16, #tpu.memory_space<vmem>>, vector<1x1x1x5x128xbf16>
      %102 = vector.shape_cast %101 : vector<1x1x1x5x128xbf16> to vector<5x128xbf16>
      %c12 = arith.constant 12 : index
      %c0_104 = arith.constant 0 : index
      %c0_105 = arith.constant 0 : index
      %103 = vector.load %arg2[%c12, %c0_104, %c0_105] : memref<25x128x128xbf16, #tpu.memory_space<vmem>>, vector<1x128x128xbf16>
      %104 = vector.shape_cast %103 : vector<1x128x128xbf16> to vector<128x128xbf16>
      %cst_106 = arith.constant dense<0.000000e+00> : vector<5x128xf32>
      %105 = tpu.matmul %102, %104, %cst_106 {dimension_numbers = #tpu.dot_dimension_numbers<[1], [0], [0], [1], [0, 0, 1, 1], [], []>} : vector<5x128xbf16>, vector<128x128xbf16>, vector<5x128xf32> -> vector<5x128xf32>
      %106 = arith.addf %98, %105 : vector<5x128xf32>
      %c1_i32_107 = arith.constant 1 : i32
      %107 = arith.addi %arg5, %c1_i32_107 : i32
      %c0_108 = arith.constant 0 : index
      %c1_109 = arith.constant 1 : index
      %108 = arith.index_cast %107 : i32 to index
      %c1_110 = arith.constant 1 : index
      %c0_111 = arith.constant 0 : index
      %109 = vector.load %arg1[%c0_108, %c1_109, %108, %c1_110, %c0_111] : memref<1x4x7x7x128xbf16, #tpu.memory_space<vmem>>, vector<1x1x1x5x128xbf16>
      %110 = vector.shape_cast %109 : vector<1x1x1x5x128xbf16> to vector<5x128xbf16>
      %c13 = arith.constant 13 : index
      %c0_112 = arith.constant 0 : index
      %c0_113 = arith.constant 0 : index
      %111 = vector.load %arg2[%c13, %c0_112, %c0_113] : memref<25x128x128xbf16, #tpu.memory_space<vmem>>, vector<1x128x128xbf16>
      %112 = vector.shape_cast %111 : vector<1x128x128xbf16> to vector<128x128xbf16>
      %cst_114 = arith.constant dense<0.000000e+00> : vector<5x128xf32>
      %113 = tpu.matmul %110, %112, %cst_114 {dimension_numbers = #tpu.dot_dimension_numbers<[1], [0], [0], [1], [0, 0, 1, 1], [], []>} : vector<5x128xbf16>, vector<128x128xbf16>, vector<5x128xf32> -> vector<5x128xf32>
      %114 = arith.addf %106, %113 : vector<5x128xf32>
      %c1_i32_115 = arith.constant 1 : i32
      %115 = arith.addi %arg5, %c1_i32_115 : i32
      %c0_116 = arith.constant 0 : index
      %c0_117 = arith.constant 0 : index
      %116 = arith.index_cast %115 : i32 to index
      %c2_118 = arith.constant 2 : index
      %c0_119 = arith.constant 0 : index
      %117 = vector.load %arg1[%c0_116, %c0_117, %116, %c2_118, %c0_119] : memref<1x4x7x7x128xbf16, #tpu.memory_space<vmem>>, vector<1x1x1x5x128xbf16>
      %118 = vector.shape_cast %117 : vector<1x1x1x5x128xbf16> to vector<5x128xbf16>
      %c14 = arith.constant 14 : index
      %c0_120 = arith.constant 0 : index
      %c0_121 = arith.constant 0 : index
      %119 = vector.load %arg2[%c14, %c0_120, %c0_121] : memref<25x128x128xbf16, #tpu.memory_space<vmem>>, vector<1x128x128xbf16>
      %120 = vector.shape_cast %119 : vector<1x128x128xbf16> to vector<128x128xbf16>
      %cst_122 = arith.constant dense<0.000000e+00> : vector<5x128xf32>
      %121 = tpu.matmul %118, %120, %cst_122 {dimension_numbers = #tpu.dot_dimension_numbers<[1], [0], [0], [1], [0, 0, 1, 1], [], []>} : vector<5x128xbf16>, vector<128x128xbf16>, vector<5x128xf32> -> vector<5x128xf32>
      %122 = arith.addf %114, %121 : vector<5x128xf32>
      %c1_i32_123 = arith.constant 1 : i32
      %123 = arith.addi %arg5, %c1_i32_123 : i32
      %c0_124 = arith.constant 0 : index
      %c2_125 = arith.constant 2 : index
      %124 = arith.index_cast %123 : i32 to index
      %c0_126 = arith.constant 0 : index
      %c0_127 = arith.constant 0 : index
      %125 = vector.load %arg1[%c0_124, %c2_125, %124, %c0_126, %c0_127] : memref<1x4x7x7x128xbf16, #tpu.memory_space<vmem>>, vector<1x1x1x5x128xbf16>
      %126 = vector.shape_cast %125 : vector<1x1x1x5x128xbf16> to vector<5x128xbf16>
      %c15 = arith.constant 15 : index
      %c0_128 = arith.constant 0 : index
      %c0_129 = arith.constant 0 : index
      %127 = vector.load %arg2[%c15, %c0_128, %c0_129] : memref<25x128x128xbf16, #tpu.memory_space<vmem>>, vector<1x128x128xbf16>
      %128 = vector.shape_cast %127 : vector<1x128x128xbf16> to vector<128x128xbf16>
      %cst_130 = arith.constant dense<0.000000e+00> : vector<5x128xf32>
      %129 = tpu.matmul %126, %128, %cst_130 {dimension_numbers = #tpu.dot_dimension_numbers<[1], [0], [0], [1], [0, 0, 1, 1], [], []>} : vector<5x128xbf16>, vector<128x128xbf16>, vector<5x128xf32> -> vector<5x128xf32>
      %130 = arith.addf %122, %129 : vector<5x128xf32>
      %c1_i32_131 = arith.constant 1 : i32
      %131 = arith.addi %arg5, %c1_i32_131 : i32
      %c0_132 = arith.constant 0 : index
      %c3_133 = arith.constant 3 : index
      %132 = arith.index_cast %131 : i32 to index
      %c0_134 = arith.constant 0 : index
      %c0_135 = arith.constant 0 : index
      %133 = vector.load %arg1[%c0_132, %c3_133, %132, %c0_134, %c0_135] : memref<1x4x7x7x128xbf16, #tpu.memory_space<vmem>>, vector<1x1x1x5x128xbf16>
      %134 = vector.shape_cast %133 : vector<1x1x1x5x128xbf16> to vector<5x128xbf16>
      %c16 = arith.constant 16 : index
      %c0_136 = arith.constant 0 : index
      %c0_137 = arith.constant 0 : index
      %135 = vector.load %arg2[%c16, %c0_136, %c0_137] : memref<25x128x128xbf16, #tpu.memory_space<vmem>>, vector<1x128x128xbf16>
      %136 = vector.shape_cast %135 : vector<1x128x128xbf16> to vector<128x128xbf16>
      %cst_138 = arith.constant dense<0.000000e+00> : vector<5x128xf32>
      %137 = tpu.matmul %134, %136, %cst_138 {dimension_numbers = #tpu.dot_dimension_numbers<[1], [0], [0], [1], [0, 0, 1, 1], [], []>} : vector<5x128xbf16>, vector<128x128xbf16>, vector<5x128xf32> -> vector<5x128xf32>
      %138 = arith.addf %130, %137 : vector<5x128xf32>
      %c1_i32_139 = arith.constant 1 : i32
      %139 = arith.addi %arg5, %c1_i32_139 : i32
      %c0_140 = arith.constant 0 : index
      %c2_141 = arith.constant 2 : index
      %140 = arith.index_cast %139 : i32 to index
      %c1_142 = arith.constant 1 : index
      %c0_143 = arith.constant 0 : index
      %141 = vector.load %arg1[%c0_140, %c2_141, %140, %c1_142, %c0_143] : memref<1x4x7x7x128xbf16, #tpu.memory_space<vmem>>, vector<1x1x1x5x128xbf16>
      %142 = vector.shape_cast %141 : vector<1x1x1x5x128xbf16> to vector<5x128xbf16>
      %c17 = arith.constant 17 : index
      %c0_144 = arith.constant 0 : index
      %c0_145 = arith.constant 0 : index
      %143 = vector.load %arg2[%c17, %c0_144, %c0_145] : memref<25x128x128xbf16, #tpu.memory_space<vmem>>, vector<1x128x128xbf16>
      %144 = vector.shape_cast %143 : vector<1x128x128xbf16> to vector<128x128xbf16>
      %cst_146 = arith.constant dense<0.000000e+00> : vector<5x128xf32>
      %145 = tpu.matmul %142, %144, %cst_146 {dimension_numbers = #tpu.dot_dimension_numbers<[1], [0], [0], [1], [0, 0, 1, 1], [], []>} : vector<5x128xbf16>, vector<128x128xbf16>, vector<5x128xf32> -> vector<5x128xf32>
      %146 = arith.addf %138, %145 : vector<5x128xf32>
      %c1_i32_147 = arith.constant 1 : i32
      %147 = arith.addi %arg5, %c1_i32_147 : i32
      %c0_148 = arith.constant 0 : index
      %c3_149 = arith.constant 3 : index
      %148 = arith.index_cast %147 : i32 to index
      %c1_150 = arith.constant 1 : index
      %c0_151 = arith.constant 0 : index
      %149 = vector.load %arg1[%c0_148, %c3_149, %148, %c1_150, %c0_151] : memref<1x4x7x7x128xbf16, #tpu.memory_space<vmem>>, vector<1x1x1x5x128xbf16>
      %150 = vector.shape_cast %149 : vector<1x1x1x5x128xbf16> to vector<5x128xbf16>
      %c18 = arith.constant 18 : index
      %c0_152 = arith.constant 0 : index
      %c0_153 = arith.constant 0 : index
      %151 = vector.load %arg2[%c18, %c0_152, %c0_153] : memref<25x128x128xbf16, #tpu.memory_space<vmem>>, vector<1x128x128xbf16>
      %152 = vector.shape_cast %151 : vector<1x128x128xbf16> to vector<128x128xbf16>
      %cst_154 = arith.constant dense<0.000000e+00> : vector<5x128xf32>
      %153 = tpu.matmul %150, %152, %cst_154 {dimension_numbers = #tpu.dot_dimension_numbers<[1], [0], [0], [1], [0, 0, 1, 1], [], []>} : vector<5x128xbf16>, vector<128x128xbf16>, vector<5x128xf32> -> vector<5x128xf32>
      %154 = arith.addf %146, %153 : vector<5x128xf32>
      %c1_i32_155 = arith.constant 1 : i32
      %155 = arith.addi %arg5, %c1_i32_155 : i32
      %c0_156 = arith.constant 0 : index
      %c2_157 = arith.constant 2 : index
      %156 = arith.index_cast %155 : i32 to index
      %c2_158 = arith.constant 2 : index
      %c0_159 = arith.constant 0 : index
      %157 = vector.load %arg1[%c0_156, %c2_157, %156, %c2_158, %c0_159] : memref<1x4x7x7x128xbf16, #tpu.memory_space<vmem>>, vector<1x1x1x5x128xbf16>
      %158 = vector.shape_cast %157 : vector<1x1x1x5x128xbf16> to vector<5x128xbf16>
      %c19 = arith.constant 19 : index
      %c0_160 = arith.constant 0 : index
      %c0_161 = arith.constant 0 : index
      %159 = vector.load %arg2[%c19, %c0_160, %c0_161] : memref<25x128x128xbf16, #tpu.memory_space<vmem>>, vector<1x128x128xbf16>
      %160 = vector.shape_cast %159 : vector<1x128x128xbf16> to vector<128x128xbf16>
      %cst_162 = arith.constant dense<0.000000e+00> : vector<5x128xf32>
      %161 = tpu.matmul %158, %160, %cst_162 {dimension_numbers = #tpu.dot_dimension_numbers<[1], [0], [0], [1], [0, 0, 1, 1], [], []>} : vector<5x128xbf16>, vector<128x128xbf16>, vector<5x128xf32> -> vector<5x128xf32>
      %162 = arith.addf %154, %161 : vector<5x128xf32>
      %c2_i32 = arith.constant 2 : i32
      %163 = arith.addi %arg5, %c2_i32 : i32
      %c0_163 = arith.constant 0 : index
      %c0_164 = arith.constant 0 : index
      %164 = arith.index_cast %163 : i32 to index
      %c0_165 = arith.constant 0 : index
      %c0_166 = arith.constant 0 : index
      %165 = vector.load %arg1[%c0_163, %c0_164, %164, %c0_165, %c0_166] : memref<1x4x7x7x128xbf16, #tpu.memory_space<vmem>>, vector<1x1x1x5x128xbf16>
      %166 = vector.shape_cast %165 : vector<1x1x1x5x128xbf16> to vector<5x128xbf16>
      %c20 = arith.constant 20 : index
      %c0_167 = arith.constant 0 : index
      %c0_168 = arith.constant 0 : index
      %167 = vector.load %arg2[%c20, %c0_167, %c0_168] : memref<25x128x128xbf16, #tpu.memory_space<vmem>>, vector<1x128x128xbf16>
      %168 = vector.shape_cast %167 : vector<1x128x128xbf16> to vector<128x128xbf16>
      %cst_169 = arith.constant dense<0.000000e+00> : vector<5x128xf32>
      %169 = tpu.matmul %166, %168, %cst_169 {dimension_numbers = #tpu.dot_dimension_numbers<[1], [0], [0], [1], [0, 0, 1, 1], [], []>} : vector<5x128xbf16>, vector<128x128xbf16>, vector<5x128xf32> -> vector<5x128xf32>
      %170 = arith.addf %162, %169 : vector<5x128xf32>
      %c2_i32_170 = arith.constant 2 : i32
      %171 = arith.addi %arg5, %c2_i32_170 : i32
      %c0_171 = arith.constant 0 : index
      %c1_172 = arith.constant 1 : index
      %172 = arith.index_cast %171 : i32 to index
      %c0_173 = arith.constant 0 : index
      %c0_174 = arith.constant 0 : index
      %173 = vector.load %arg1[%c0_171, %c1_172, %172, %c0_173, %c0_174] : memref<1x4x7x7x128xbf16, #tpu.memory_space<vmem>>, vector<1x1x1x5x128xbf16>
      %174 = vector.shape_cast %173 : vector<1x1x1x5x128xbf16> to vector<5x128xbf16>
      %c21 = arith.constant 21 : index
      %c0_175 = arith.constant 0 : index
      %c0_176 = arith.constant 0 : index
      %175 = vector.load %arg2[%c21, %c0_175, %c0_176] : memref<25x128x128xbf16, #tpu.memory_space<vmem>>, vector<1x128x128xbf16>
      %176 = vector.shape_cast %175 : vector<1x128x128xbf16> to vector<128x128xbf16>
      %cst_177 = arith.constant dense<0.000000e+00> : vector<5x128xf32>
      %177 = tpu.matmul %174, %176, %cst_177 {dimension_numbers = #tpu.dot_dimension_numbers<[1], [0], [0], [1], [0, 0, 1, 1], [], []>} : vector<5x128xbf16>, vector<128x128xbf16>, vector<5x128xf32> -> vector<5x128xf32>
      %178 = arith.addf %170, %177 : vector<5x128xf32>
      %c2_i32_178 = arith.constant 2 : i32
      %179 = arith.addi %arg5, %c2_i32_178 : i32
      %c0_179 = arith.constant 0 : index
      %c0_180 = arith.constant 0 : index
      %180 = arith.index_cast %179 : i32 to index
      %c1_181 = arith.constant 1 : index
      %c0_182 = arith.constant 0 : index
      %181 = vector.load %arg1[%c0_179, %c0_180, %180, %c1_181, %c0_182] : memref<1x4x7x7x128xbf16, #tpu.memory_space<vmem>>, vector<1x1x1x5x128xbf16>
      %182 = vector.shape_cast %181 : vector<1x1x1x5x128xbf16> to vector<5x128xbf16>
      %c22 = arith.constant 22 : index
      %c0_183 = arith.constant 0 : index
      %c0_184 = arith.constant 0 : index
      %183 = vector.load %arg2[%c22, %c0_183, %c0_184] : memref<25x128x128xbf16, #tpu.memory_space<vmem>>, vector<1x128x128xbf16>
      %184 = vector.shape_cast %183 : vector<1x128x128xbf16> to vector<128x128xbf16>
      %cst_185 = arith.constant dense<0.000000e+00> : vector<5x128xf32>
      %185 = tpu.matmul %182, %184, %cst_185 {dimension_numbers = #tpu.dot_dimension_numbers<[1], [0], [0], [1], [0, 0, 1, 1], [], []>} : vector<5x128xbf16>, vector<128x128xbf16>, vector<5x128xf32> -> vector<5x128xf32>
      %186 = arith.addf %178, %185 : vector<5x128xf32>
      %c2_i32_186 = arith.constant 2 : i32
      %187 = arith.addi %arg5, %c2_i32_186 : i32
      %c0_187 = arith.constant 0 : index
      %c1_188 = arith.constant 1 : index
      %188 = arith.index_cast %187 : i32 to index
      %c1_189 = arith.constant 1 : index
      %c0_190 = arith.constant 0 : index
      %189 = vector.load %arg1[%c0_187, %c1_188, %188, %c1_189, %c0_190] : memref<1x4x7x7x128xbf16, #tpu.memory_space<vmem>>, vector<1x1x1x5x128xbf16>
      %190 = vector.shape_cast %189 : vector<1x1x1x5x128xbf16> to vector<5x128xbf16>
      %c23 = arith.constant 23 : index
      %c0_191 = arith.constant 0 : index
      %c0_192 = arith.constant 0 : index
      %191 = vector.load %arg2[%c23, %c0_191, %c0_192] : memref<25x128x128xbf16, #tpu.memory_space<vmem>>, vector<1x128x128xbf16>
      %192 = vector.shape_cast %191 : vector<1x128x128xbf16> to vector<128x128xbf16>
      %cst_193 = arith.constant dense<0.000000e+00> : vector<5x128xf32>
      %193 = tpu.matmul %190, %192, %cst_193 {dimension_numbers = #tpu.dot_dimension_numbers<[1], [0], [0], [1], [0, 0, 1, 1], [], []>} : vector<5x128xbf16>, vector<128x128xbf16>, vector<5x128xf32> -> vector<5x128xf32>
      %194 = arith.addf %186, %193 : vector<5x128xf32>
      %c2_i32_194 = arith.constant 2 : i32
      %195 = arith.addi %arg5, %c2_i32_194 : i32
      %c0_195 = arith.constant 0 : index
      %c0_196 = arith.constant 0 : index
      %196 = arith.index_cast %195 : i32 to index
      %c2_197 = arith.constant 2 : index
      %c0_198 = arith.constant 0 : index
      %197 = vector.load %arg1[%c0_195, %c0_196, %196, %c2_197, %c0_198] : memref<1x4x7x7x128xbf16, #tpu.memory_space<vmem>>, vector<1x1x1x5x128xbf16>
      %198 = vector.shape_cast %197 : vector<1x1x1x5x128xbf16> to vector<5x128xbf16>
      %c24 = arith.constant 24 : index
      %c0_199 = arith.constant 0 : index
      %c0_200 = arith.constant 0 : index
      %199 = vector.load %arg2[%c24, %c0_199, %c0_200] : memref<25x128x128xbf16, #tpu.memory_space<vmem>>, vector<1x128x128xbf16>
      %200 = vector.shape_cast %199 : vector<1x128x128xbf16> to vector<128x128xbf16>
      %cst_201 = arith.constant dense<0.000000e+00> : vector<5x128xf32>
      %201 = tpu.matmul %198, %200, %cst_201 {dimension_numbers = #tpu.dot_dimension_numbers<[1], [0], [0], [1], [0, 0, 1, 1], [], []>} : vector<5x128xbf16>, vector<128x128xbf16>, vector<5x128xf32> -> vector<5x128xf32>
      %202 = arith.addf %194, %201 : vector<5x128xf32>
      %203 = vector.broadcast %0 : vector<1x128xf32> to vector<5x128xf32>
      %204 = arith.addf %202, %203 : vector<5x128xf32>
      %cst_202 = arith.constant 0.000000e+00 : f32
      %205 = vector.broadcast %cst_202 : f32 to vector<5x128xf32>
      %206 = arith.maximumf %204, %205 : vector<5x128xf32>
      %207 = arith.truncf %206 : vector<5x128xf32> to vector<5x128xbf16>
      %c0_203 = arith.constant 0 : index
      %208 = arith.index_cast %arg5 : i32 to index
      %c0_204 = arith.constant 0 : index
      %c0_205 = arith.constant 0 : index
      %209 = vector.load %arg4[%c0_203, %208, %c0_204, %c0_205] : memref<1x5x5x128xbf16, #tpu.memory_space<vmem>>, vector<1x1x5x128xbf16>
      %210 = vector.shape_cast %209 : vector<1x1x5x128xbf16> to vector<5x128xbf16>
      %211 = vector.shape_cast %207 : vector<5x128xbf16> to vector<1x1x5x128xbf16>
      tpu.vector_store %arg4[%c0_203, %208, %c0_204, %c0_205], %211 {strides = array<i32>} : memref<1x5x5x128xbf16, #tpu.memory_space<vmem>>, vector<1x1x5x128xbf16>,
    }
    %c5_i32_1 = arith.constant 5 : i32
    return
  }
  func.func @transform_0(%arg0: i32) -> (i32, i32, i32, i32, i32) {
    %c0_i32 = arith.constant 0 : i32
    %c0_i32_0 = arith.constant 0 : i32
    %c0_i32_1 = arith.constant 0 : i32
    %c0_i32_2 = arith.constant 0 : i32
    %c0_i32_3 = arith.constant 0 : i32
    return %arg0, %c0_i32, %c0_i32_0, %c0_i32_1, %c0_i32_2 : i32, i32, i32, i32, i32
  }
  func.func @transform_1(%arg0: i32) -> (i32, i32, i32) {
    %c0_i32 = arith.constant 0 : i32
    %c0_i32_0 = arith.constant 0 : i32
    %c0_i32_1 = arith.constant 0 : i32
    %c0_i32_2 = arith.constant 0 : i32
    return %c0_i32, %c0_i32_0, %c0_i32_1 : i32, i32, i32
  }
  func.func @transform_2(%arg0: i32) -> (i32, i32) {
    %c0_i32 = arith.constant 0 : i32
    %c0_i32_0 = arith.constant 0 : i32
    %c0_i32_1 = arith.constant 0 : i32
    return %c0_i32, %c0_i32_0 : i32, i32
  }
  func.func @transform_3(%arg0: i32) -> (i32, i32, i32, i32) {
    %c0_i32 = arith.constant 0 : i32
    %c0_i32_0 = arith.constant 0 : i32
    %c0_i32_1 = arith.constant 0 : i32
    %c0_i32_2 = arith.constant 0 : i32
    return %arg0, %c0_i32, %c0_i32_0, %c0_i32_1 : i32, i32, i32, i32
  }
}

module attributes {stable_mosaic.version = 11 : i64} {
  func.func @_conv_kernel(%arg0: i32, %arg1: memref<1x1x3x3x128xbf16, #tpu.memory_space<vmem>>, %arg2: memref<9x128x128xbf16, #tpu.memory_space<vmem>>, %arg3: memref<1x128xf32, #tpu.memory_space<vmem>>, %arg4: memref<1x1x1x128xbf16, #tpu.memory_space<vmem>>) attributes {dimension_semantics = [#tpu.dimension_semantics<parallel>], iteration_bounds = array<i64: 2>, scalar_prefetch = 0 : i64, scratch_operands = 0 : i64, tpu.core_type = #tpu.core_type<tc>, window_params = [{transform_indices = @transform_0, window_bounds = array<i64: 1, 1, 3, 3, 128>}, {pipeline_mode = #tpu.pipeline_mode<synchronous>, transform_indices = @transform_1, window_bounds = array<i64: 9, 128, 128>}, {pipeline_mode = #tpu.pipeline_mode<synchronous>, transform_indices = @transform_2, window_bounds = array<i64: 1, 128>}, {transform_indices = @transform_3, window_bounds = array<i64: 1, 1, 1, 128>}]} {
    %c0 = arith.constant 0 : index
    %c0_0 = arith.constant 0 : index
    %0 = vector.load %arg3[%c0, %c0_0] : memref<1x128xf32, #tpu.memory_space<vmem>>, vector<1x128xf32>
    %c0_i32 = arith.constant 0 : i32
    %cst = arith.constant 0.000000e+00 : f32
    %1 = vector.broadcast %cst : f32 to vector<1x128xf32>
    %c0_i32_1 = arith.constant 0 : i32
    %2 = arith.addi %c0_i32, %c0_i32_1 : i32
    %c0_2 = arith.constant 0 : index
    %c0_3 = arith.constant 0 : index
    %3 = arith.index_cast %2 : i32 to index
    %c0_4 = arith.constant 0 : index
    %c0_5 = arith.constant 0 : index
    %4 = vector.load %arg1[%c0_2, %c0_3, %3, %c0_4, %c0_5] : memref<1x1x3x3x128xbf16, #tpu.memory_space<vmem>>, vector<1x1x1x1x128xbf16>
    %5 = vector.shape_cast %4 : vector<1x1x1x1x128xbf16> to vector<1x128xbf16>
    %c0_6 = arith.constant 0 : index
    %c0_7 = arith.constant 0 : index
    %c0_8 = arith.constant 0 : index
    %6 = vector.load %arg2[%c0_6, %c0_7, %c0_8] : memref<9x128x128xbf16, #tpu.memory_space<vmem>>, vector<1x128x128xbf16>
    %7 = vector.shape_cast %6 : vector<1x128x128xbf16> to vector<128x128xbf16>
    %cst_9 = arith.constant dense<0.000000e+00> : vector<1x128xf32>
    %8 = tpu.matmul %5, %7, %cst_9 {dimension_numbers = #tpu.dot_dimension_numbers<[1], [0], [0], [1], [0, 0, 1, 1], [], []>} : vector<1x128xbf16>, vector<128x128xbf16>, vector<1x128xf32> -> vector<1x128xf32>
    %9 = arith.addf %1, %8 : vector<1x128xf32>
    %c0_i32_10 = arith.constant 0 : i32
    %10 = arith.addi %c0_i32, %c0_i32_10 : i32
    %c0_11 = arith.constant 0 : index
    %c0_12 = arith.constant 0 : index
    %11 = arith.index_cast %10 : i32 to index
    %c1 = arith.constant 1 : index
    %c0_13 = arith.constant 0 : index
    %12 = vector.load %arg1[%c0_11, %c0_12, %11, %c1, %c0_13] : memref<1x1x3x3x128xbf16, #tpu.memory_space<vmem>>, vector<1x1x1x1x128xbf16>
    %13 = vector.shape_cast %12 : vector<1x1x1x1x128xbf16> to vector<1x128xbf16>
    %c1_14 = arith.constant 1 : index
    %c0_15 = arith.constant 0 : index
    %c0_16 = arith.constant 0 : index
    %14 = vector.load %arg2[%c1_14, %c0_15, %c0_16] : memref<9x128x128xbf16, #tpu.memory_space<vmem>>, vector<1x128x128xbf16>
    %15 = vector.shape_cast %14 : vector<1x128x128xbf16> to vector<128x128xbf16>
    %cst_17 = arith.constant dense<0.000000e+00> : vector<1x128xf32>
    %16 = tpu.matmul %13, %15, %cst_17 {dimension_numbers = #tpu.dot_dimension_numbers<[1], [0], [0], [1], [0, 0, 1, 1], [], []>} : vector<1x128xbf16>, vector<128x128xbf16>, vector<1x128xf32> -> vector<1x128xf32>
    %17 = arith.addf %9, %16 : vector<1x128xf32>
    %c0_i32_18 = arith.constant 0 : i32
    %18 = arith.addi %c0_i32, %c0_i32_18 : i32
    %c0_19 = arith.constant 0 : index
    %c0_20 = arith.constant 0 : index
    %19 = arith.index_cast %18 : i32 to index
    %c2 = arith.constant 2 : index
    %c0_21 = arith.constant 0 : index
    %20 = vector.load %arg1[%c0_19, %c0_20, %19, %c2, %c0_21] : memref<1x1x3x3x128xbf16, #tpu.memory_space<vmem>>, vector<1x1x1x1x128xbf16>
    %21 = vector.shape_cast %20 : vector<1x1x1x1x128xbf16> to vector<1x128xbf16>
    %c2_22 = arith.constant 2 : index
    %c0_23 = arith.constant 0 : index
    %c0_24 = arith.constant 0 : index
    %22 = vector.load %arg2[%c2_22, %c0_23, %c0_24] : memref<9x128x128xbf16, #tpu.memory_space<vmem>>, vector<1x128x128xbf16>
    %23 = vector.shape_cast %22 : vector<1x128x128xbf16> to vector<128x128xbf16>
    %cst_25 = arith.constant dense<0.000000e+00> : vector<1x128xf32>
    %24 = tpu.matmul %21, %23, %cst_25 {dimension_numbers = #tpu.dot_dimension_numbers<[1], [0], [0], [1], [0, 0, 1, 1], [], []>} : vector<1x128xbf16>, vector<128x128xbf16>, vector<1x128xf32> -> vector<1x128xf32>
    %25 = arith.addf %17, %24 : vector<1x128xf32>
    %c1_i32 = arith.constant 1 : i32
    %26 = arith.addi %c0_i32, %c1_i32 : i32
    %c0_26 = arith.constant 0 : index
    %c0_27 = arith.constant 0 : index
    %27 = arith.index_cast %26 : i32 to index
    %c0_28 = arith.constant 0 : index
    %c0_29 = arith.constant 0 : index
    %28 = vector.load %arg1[%c0_26, %c0_27, %27, %c0_28, %c0_29] : memref<1x1x3x3x128xbf16, #tpu.memory_space<vmem>>, vector<1x1x1x1x128xbf16>
    %29 = vector.shape_cast %28 : vector<1x1x1x1x128xbf16> to vector<1x128xbf16>
    %c3 = arith.constant 3 : index
    %c0_30 = arith.constant 0 : index
    %c0_31 = arith.constant 0 : index
    %30 = vector.load %arg2[%c3, %c0_30, %c0_31] : memref<9x128x128xbf16, #tpu.memory_space<vmem>>, vector<1x128x128xbf16>
    %31 = vector.shape_cast %30 : vector<1x128x128xbf16> to vector<128x128xbf16>
    %cst_32 = arith.constant dense<0.000000e+00> : vector<1x128xf32>
    %32 = tpu.matmul %29, %31, %cst_32 {dimension_numbers = #tpu.dot_dimension_numbers<[1], [0], [0], [1], [0, 0, 1, 1], [], []>} : vector<1x128xbf16>, vector<128x128xbf16>, vector<1x128xf32> -> vector<1x128xf32>
    %33 = arith.addf %25, %32 : vector<1x128xf32>
    %c1_i32_33 = arith.constant 1 : i32
    %34 = arith.addi %c0_i32, %c1_i32_33 : i32
    %c0_34 = arith.constant 0 : index
    %c0_35 = arith.constant 0 : index
    %35 = arith.index_cast %34 : i32 to index
    %c1_36 = arith.constant 1 : index
    %c0_37 = arith.constant 0 : index
    %36 = vector.load %arg1[%c0_34, %c0_35, %35, %c1_36, %c0_37] : memref<1x1x3x3x128xbf16, #tpu.memory_space<vmem>>, vector<1x1x1x1x128xbf16>
    %37 = vector.shape_cast %36 : vector<1x1x1x1x128xbf16> to vector<1x128xbf16>
    %c4 = arith.constant 4 : index
    %c0_38 = arith.constant 0 : index
    %c0_39 = arith.constant 0 : index
    %38 = vector.load %arg2[%c4, %c0_38, %c0_39] : memref<9x128x128xbf16, #tpu.memory_space<vmem>>, vector<1x128x128xbf16>
    %39 = vector.shape_cast %38 : vector<1x128x128xbf16> to vector<128x128xbf16>
    %cst_40 = arith.constant dense<0.000000e+00> : vector<1x128xf32>
    %40 = tpu.matmul %37, %39, %cst_40 {dimension_numbers = #tpu.dot_dimension_numbers<[1], [0], [0], [1], [0, 0, 1, 1], [], []>} : vector<1x128xbf16>, vector<128x128xbf16>, vector<1x128xf32> -> vector<1x128xf32>
    %41 = arith.addf %33, %40 : vector<1x128xf32>
    %c1_i32_41 = arith.constant 1 : i32
    %42 = arith.addi %c0_i32, %c1_i32_41 : i32
    %c0_42 = arith.constant 0 : index
    %c0_43 = arith.constant 0 : index
    %43 = arith.index_cast %42 : i32 to index
    %c2_44 = arith.constant 2 : index
    %c0_45 = arith.constant 0 : index
    %44 = vector.load %arg1[%c0_42, %c0_43, %43, %c2_44, %c0_45] : memref<1x1x3x3x128xbf16, #tpu.memory_space<vmem>>, vector<1x1x1x1x128xbf16>
    %45 = vector.shape_cast %44 : vector<1x1x1x1x128xbf16> to vector<1x128xbf16>
    %c5 = arith.constant 5 : index
    %c0_46 = arith.constant 0 : index
    %c0_47 = arith.constant 0 : index
    %46 = vector.load %arg2[%c5, %c0_46, %c0_47] : memref<9x128x128xbf16, #tpu.memory_space<vmem>>, vector<1x128x128xbf16>
    %47 = vector.shape_cast %46 : vector<1x128x128xbf16> to vector<128x128xbf16>
    %cst_48 = arith.constant dense<0.000000e+00> : vector<1x128xf32>
    %48 = tpu.matmul %45, %47, %cst_48 {dimension_numbers = #tpu.dot_dimension_numbers<[1], [0], [0], [1], [0, 0, 1, 1], [], []>} : vector<1x128xbf16>, vector<128x128xbf16>, vector<1x128xf32> -> vector<1x128xf32>
    %49 = arith.addf %41, %48 : vector<1x128xf32>
    %c2_i32 = arith.constant 2 : i32
    %50 = arith.addi %c0_i32, %c2_i32 : i32
    %c0_49 = arith.constant 0 : index
    %c0_50 = arith.constant 0 : index
    %51 = arith.index_cast %50 : i32 to index
    %c0_51 = arith.constant 0 : index
    %c0_52 = arith.constant 0 : index
    %52 = vector.load %arg1[%c0_49, %c0_50, %51, %c0_51, %c0_52] : memref<1x1x3x3x128xbf16, #tpu.memory_space<vmem>>, vector<1x1x1x1x128xbf16>
    %53 = vector.shape_cast %52 : vector<1x1x1x1x128xbf16> to vector<1x128xbf16>
    %c6 = arith.constant 6 : index
    %c0_53 = arith.constant 0 : index
    %c0_54 = arith.constant 0 : index
    %54 = vector.load %arg2[%c6, %c0_53, %c0_54] : memref<9x128x128xbf16, #tpu.memory_space<vmem>>, vector<1x128x128xbf16>
    %55 = vector.shape_cast %54 : vector<1x128x128xbf16> to vector<128x128xbf16>
    %cst_55 = arith.constant dense<0.000000e+00> : vector<1x128xf32>
    %56 = tpu.matmul %53, %55, %cst_55 {dimension_numbers = #tpu.dot_dimension_numbers<[1], [0], [0], [1], [0, 0, 1, 1], [], []>} : vector<1x128xbf16>, vector<128x128xbf16>, vector<1x128xf32> -> vector<1x128xf32>
    %57 = arith.addf %49, %56 : vector<1x128xf32>
    %c2_i32_56 = arith.constant 2 : i32
    %58 = arith.addi %c0_i32, %c2_i32_56 : i32
    %c0_57 = arith.constant 0 : index
    %c0_58 = arith.constant 0 : index
    %59 = arith.index_cast %58 : i32 to index
    %c1_59 = arith.constant 1 : index
    %c0_60 = arith.constant 0 : index
    %60 = vector.load %arg1[%c0_57, %c0_58, %59, %c1_59, %c0_60] : memref<1x1x3x3x128xbf16, #tpu.memory_space<vmem>>, vector<1x1x1x1x128xbf16>
    %61 = vector.shape_cast %60 : vector<1x1x1x1x128xbf16> to vector<1x128xbf16>
    %c7 = arith.constant 7 : index
    %c0_61 = arith.constant 0 : index
    %c0_62 = arith.constant 0 : index
    %62 = vector.load %arg2[%c7, %c0_61, %c0_62] : memref<9x128x128xbf16, #tpu.memory_space<vmem>>, vector<1x128x128xbf16>
    %63 = vector.shape_cast %62 : vector<1x128x128xbf16> to vector<128x128xbf16>
    %cst_63 = arith.constant dense<0.000000e+00> : vector<1x128xf32>
    %64 = tpu.matmul %61, %63, %cst_63 {dimension_numbers = #tpu.dot_dimension_numbers<[1], [0], [0], [1], [0, 0, 1, 1], [], []>} : vector<1x128xbf16>, vector<128x128xbf16>, vector<1x128xf32> -> vector<1x128xf32>
    %65 = arith.addf %57, %64 : vector<1x128xf32>
    %c2_i32_64 = arith.constant 2 : i32
    %66 = arith.addi %c0_i32, %c2_i32_64 : i32
    %c0_65 = arith.constant 0 : index
    %c0_66 = arith.constant 0 : index
    %67 = arith.index_cast %66 : i32 to index
    %c2_67 = arith.constant 2 : index
    %c0_68 = arith.constant 0 : index
    %68 = vector.load %arg1[%c0_65, %c0_66, %67, %c2_67, %c0_68] : memref<1x1x3x3x128xbf16, #tpu.memory_space<vmem>>, vector<1x1x1x1x128xbf16>
    %69 = vector.shape_cast %68 : vector<1x1x1x1x128xbf16> to vector<1x128xbf16>
    %c8 = arith.constant 8 : index
    %c0_69 = arith.constant 0 : index
    %c0_70 = arith.constant 0 : index
    %70 = vector.load %arg2[%c8, %c0_69, %c0_70] : memref<9x128x128xbf16, #tpu.memory_space<vmem>>, vector<1x128x128xbf16>
    %71 = vector.shape_cast %70 : vector<1x128x128xbf16> to vector<128x128xbf16>
    %cst_71 = arith.constant dense<0.000000e+00> : vector<1x128xf32>
    %72 = tpu.matmul %69, %71, %cst_71 {dimension_numbers = #tpu.dot_dimension_numbers<[1], [0], [0], [1], [0, 0, 1, 1], [], []>} : vector<1x128xbf16>, vector<128x128xbf16>, vector<1x128xf32> -> vector<1x128xf32>
    %73 = arith.addf %65, %72 : vector<1x128xf32>
    %74 = arith.addf %73, %0 : vector<1x128xf32>
    %cst_72 = arith.constant 0.000000e+00 : f32
    %75 = vector.broadcast %cst_72 : f32 to vector<1x128xf32>
    %76 = arith.maximumf %74, %75 : vector<1x128xf32>
    %77 = arith.truncf %76 : vector<1x128xf32> to vector<1x128xbf16>
    %c0_73 = arith.constant 0 : index
    %78 = arith.index_cast %c0_i32 : i32 to index
    %c0_74 = arith.constant 0 : index
    %c0_75 = arith.constant 0 : index
    %79 = vector.load %arg4[%c0_73, %78, %c0_74, %c0_75] : memref<1x1x1x128xbf16, #tpu.memory_space<vmem>>, vector<1x1x1x128xbf16>
    %80 = vector.shape_cast %79 : vector<1x1x1x128xbf16> to vector<1x128xbf16>
    %81 = vector.shape_cast %77 : vector<1x128xbf16> to vector<1x1x1x128xbf16>
    tpu.vector_store %arg4[%c0_73, %78, %c0_74, %c0_75], %81 {strides = array<i32>} : memref<1x1x1x128xbf16, #tpu.memory_space<vmem>>, vector<1x1x1x128xbf16>,
    %c1_i32_76 = arith.constant 1 : i32
    return
  }
  func.func @transform_0(%arg0: i32) -> (i32, i32, i32, i32, i32) {
    %c0_i32 = arith.constant 0 : i32
    %c0_i32_0 = arith.constant 0 : i32
    %c0_i32_1 = arith.constant 0 : i32
    %c0_i32_2 = arith.constant 0 : i32
    %c0_i32_3 = arith.constant 0 : i32
    return %arg0, %c0_i32, %c0_i32_0, %c0_i32_1, %c0_i32_2 : i32, i32, i32, i32, i32
  }
  func.func @transform_1(%arg0: i32) -> (i32, i32, i32) {
    %c0_i32 = arith.constant 0 : i32
    %c0_i32_0 = arith.constant 0 : i32
    %c0_i32_1 = arith.constant 0 : i32
    %c0_i32_2 = arith.constant 0 : i32
    return %c0_i32, %c0_i32_0, %c0_i32_1 : i32, i32, i32
  }
  func.func @transform_2(%arg0: i32) -> (i32, i32) {
    %c0_i32 = arith.constant 0 : i32
    %c0_i32_0 = arith.constant 0 : i32
    %c0_i32_1 = arith.constant 0 : i32
    return %c0_i32, %c0_i32_0 : i32, i32
  }
  func.func @transform_3(%arg0: i32) -> (i32, i32, i32, i32) {
    %c0_i32 = arith.constant 0 : i32
    %c0_i32_0 = arith.constant 0 : i32
    %c0_i32_1 = arith.constant 0 : i32
    %c0_i32_2 = arith.constant 0 : i32
    return %arg0, %c0_i32, %c0_i32_0, %c0_i32_1 : i32, i32, i32, i32
  }
}

module attributes {stable_mosaic.version = 11 : i64} {
  func.func @_fc_kernel(%arg0: i32, %arg1: memref<8x256xbf16, #tpu.memory_space<vmem>>, %arg2: memref<256x1024xbf16, #tpu.memory_space<vmem>>, %arg3: memref<1x1024xf32, #tpu.memory_space<vmem>>, %arg4: memref<1024x512xbf16, #tpu.memory_space<vmem>>, %arg5: memref<1x512xf32, #tpu.memory_space<vmem>>, %arg6: memref<512x256xbf16, #tpu.memory_space<vmem>>, %arg7: memref<1x256xf32, #tpu.memory_space<vmem>>, %arg8: memref<256x128xbf16, #tpu.memory_space<vmem>>, %arg9: memref<1x128xf32, #tpu.memory_space<vmem>>, %arg10: memref<8x128xf32, #tpu.memory_space<vmem>>) attributes {dimension_semantics = [#tpu.dimension_semantics<arbitrary>], iteration_bounds = array<i64: 1>, scalar_prefetch = 0 : i64, scratch_operands = 0 : i64, tpu.core_type = #tpu.core_type<tc>, window_params = [{pipeline_mode = #tpu.pipeline_mode<synchronous>, transform_indices = @transform_0, window_bounds = array<i64: 8, 256>}, {pipeline_mode = #tpu.pipeline_mode<synchronous>, transform_indices = @transform_1, window_bounds = array<i64: 256, 1024>}, {pipeline_mode = #tpu.pipeline_mode<synchronous>, transform_indices = @transform_2, window_bounds = array<i64: 1, 1024>}, {pipeline_mode = #tpu.pipeline_mode<synchronous>, transform_indices = @transform_3, window_bounds = array<i64: 1024, 512>}, {pipeline_mode = #tpu.pipeline_mode<synchronous>, transform_indices = @transform_4, window_bounds = array<i64: 1, 512>}, {pipeline_mode = #tpu.pipeline_mode<synchronous>, transform_indices = @transform_5, window_bounds = array<i64: 512, 256>}, {pipeline_mode = #tpu.pipeline_mode<synchronous>, transform_indices = @transform_6, window_bounds = array<i64: 1, 256>}, {pipeline_mode = #tpu.pipeline_mode<synchronous>, transform_indices = @transform_7, window_bounds = array<i64: 256, 128>}, {pipeline_mode = #tpu.pipeline_mode<synchronous>, transform_indices = @transform_8, window_bounds = array<i64: 1, 128>}, {pipeline_mode = #tpu.pipeline_mode<synchronous>, transform_indices = @transform_9, window_bounds = array<i64: 8, 128>}]} {
    %c0 = arith.constant 0 : index
    %c0_0 = arith.constant 0 : index
    %0 = vector.load %arg1[%c0, %c0_0] : memref<8x256xbf16, #tpu.memory_space<vmem>>, vector<8x256xbf16>
    %c0_1 = arith.constant 0 : index
    %c0_2 = arith.constant 0 : index
    %1 = vector.load %arg2[%c0_1, %c0_2] : memref<256x1024xbf16, #tpu.memory_space<vmem>>, vector<256x1024xbf16>
    %cst = arith.constant dense<0.000000e+00> : vector<8x1024xf32>
    %2 = tpu.matmul %0, %1, %cst {dimension_numbers = #tpu.dot_dimension_numbers<[1], [0], [0], [1], [0, 0, 1, 1], [], []>} : vector<8x256xbf16>, vector<256x1024xbf16>, vector<8x1024xf32> -> vector<8x1024xf32>
    %c0_3 = arith.constant 0 : index
    %c0_4 = arith.constant 0 : index
    %3 = vector.load %arg3[%c0_3, %c0_4] : memref<1x1024xf32, #tpu.memory_space<vmem>>, vector<1x1024xf32>
    %4 = vector.broadcast %3 : vector<1x1024xf32> to vector<8x1024xf32>
    %5 = arith.addf %2, %4 : vector<8x1024xf32>
    %cst_5 = arith.constant 0.000000e+00 : f32
    %6 = vector.broadcast %cst_5 : f32 to vector<8x1024xf32>
    %7 = arith.maximumf %5, %6 : vector<8x1024xf32>
    %8 = arith.truncf %7 : vector<8x1024xf32> to vector<8x1024xbf16>
    %c0_6 = arith.constant 0 : index
    %c0_7 = arith.constant 0 : index
    %9 = vector.load %arg4[%c0_6, %c0_7] : memref<1024x512xbf16, #tpu.memory_space<vmem>>, vector<1024x512xbf16>
    %cst_8 = arith.constant dense<0.000000e+00> : vector<8x512xf32>
    %10 = tpu.matmul %8, %9, %cst_8 {dimension_numbers = #tpu.dot_dimension_numbers<[1], [0], [0], [1], [0, 0, 1, 1], [], []>} : vector<8x1024xbf16>, vector<1024x512xbf16>, vector<8x512xf32> -> vector<8x512xf32>
    %c0_9 = arith.constant 0 : index
    %c0_10 = arith.constant 0 : index
    %11 = vector.load %arg5[%c0_9, %c0_10] : memref<1x512xf32, #tpu.memory_space<vmem>>, vector<1x512xf32>
    %12 = vector.broadcast %11 : vector<1x512xf32> to vector<8x512xf32>
    %13 = arith.addf %10, %12 : vector<8x512xf32>
    %cst_11 = arith.constant 0.000000e+00 : f32
    %14 = vector.broadcast %cst_11 : f32 to vector<8x512xf32>
    %15 = arith.maximumf %13, %14 : vector<8x512xf32>
    %16 = arith.truncf %15 : vector<8x512xf32> to vector<8x512xbf16>
    %c0_12 = arith.constant 0 : index
    %c0_13 = arith.constant 0 : index
    %17 = vector.load %arg6[%c0_12, %c0_13] : memref<512x256xbf16, #tpu.memory_space<vmem>>, vector<512x256xbf16>
    %cst_14 = arith.constant dense<0.000000e+00> : vector<8x256xf32>
    %18 = tpu.matmul %16, %17, %cst_14 {dimension_numbers = #tpu.dot_dimension_numbers<[1], [0], [0], [1], [0, 0, 1, 1], [], []>} : vector<8x512xbf16>, vector<512x256xbf16>, vector<8x256xf32> -> vector<8x256xf32>
    %c0_15 = arith.constant 0 : index
    %c0_16 = arith.constant 0 : index
    %19 = vector.load %arg7[%c0_15, %c0_16] : memref<1x256xf32, #tpu.memory_space<vmem>>, vector<1x256xf32>
    %20 = vector.broadcast %19 : vector<1x256xf32> to vector<8x256xf32>
    %21 = arith.addf %18, %20 : vector<8x256xf32>
    %cst_17 = arith.constant 0.000000e+00 : f32
    %22 = vector.broadcast %cst_17 : f32 to vector<8x256xf32>
    %23 = arith.maximumf %21, %22 : vector<8x256xf32>
    %24 = arith.truncf %23 : vector<8x256xf32> to vector<8x256xbf16>
    %c0_18 = arith.constant 0 : index
    %c0_19 = arith.constant 0 : index
    %25 = vector.load %arg8[%c0_18, %c0_19] : memref<256x128xbf16, #tpu.memory_space<vmem>>, vector<256x128xbf16>
    %cst_20 = arith.constant dense<0.000000e+00> : vector<8x128xf32>
    %26 = tpu.matmul %24, %25, %cst_20 {dimension_numbers = #tpu.dot_dimension_numbers<[1], [0], [0], [1], [0, 0, 1, 1], [], []>} : vector<8x256xbf16>, vector<256x128xbf16>, vector<8x128xf32> -> vector<8x128xf32>
    %c0_21 = arith.constant 0 : index
    %c0_22 = arith.constant 0 : index
    %27 = vector.load %arg9[%c0_21, %c0_22] : memref<1x128xf32, #tpu.memory_space<vmem>>, vector<1x128xf32>
    %28 = vector.broadcast %27 : vector<1x128xf32> to vector<8x128xf32>
    %29 = arith.addf %26, %28 : vector<8x128xf32>
    %c0_23 = arith.constant 0 : index
    %c0_24 = arith.constant 0 : index
    %30 = vector.load %arg10[%c0_23, %c0_24] : memref<8x128xf32, #tpu.memory_space<vmem>>, vector<8x128xf32>
    tpu.vector_store %arg10[%c0_23, %c0_24], %29 {strides = array<i32>} : memref<8x128xf32, #tpu.memory_space<vmem>>, vector<8x128xf32>,
    return
  }
  func.func @transform_0(%arg0: i32) -> (i32, i32) {
    %c0_i32 = arith.constant 0 : i32
    %c0_i32_0 = arith.constant 0 : i32
    %c0_i32_1 = arith.constant 0 : i32
    return %c0_i32, %c0_i32_0 : i32, i32
  }
  func.func @transform_1(%arg0: i32) -> (i32, i32) {
    %c0_i32 = arith.constant 0 : i32
    %c0_i32_0 = arith.constant 0 : i32
    %c0_i32_1 = arith.constant 0 : i32
    return %c0_i32, %c0_i32_0 : i32, i32
  }
  func.func @transform_2(%arg0: i32) -> (i32, i32) {
    %c0_i32 = arith.constant 0 : i32
    %c0_i32_0 = arith.constant 0 : i32
    %c0_i32_1 = arith.constant 0 : i32
    return %c0_i32, %c0_i32_0 : i32, i32
  }
  func.func @transform_3(%arg0: i32) -> (i32, i32) {
    %c0_i32 = arith.constant 0 : i32
    %c0_i32_0 = arith.constant 0 : i32
    %c0_i32_1 = arith.constant 0 : i32
    return %c0_i32, %c0_i32_0 : i32, i32
  }
  func.func @transform_4(%arg0: i32) -> (i32, i32) {
    %c0_i32 = arith.constant 0 : i32
    %c0_i32_0 = arith.constant 0 : i32
    %c0_i32_1 = arith.constant 0 : i32
    return %c0_i32, %c0_i32_0 : i32, i32
  }
  func.func @transform_5(%arg0: i32) -> (i32, i32) {
    %c0_i32 = arith.constant 0 : i32
    %c0_i32_0 = arith.constant 0 : i32
    %c0_i32_1 = arith.constant 0 : i32
    return %c0_i32, %c0_i32_0 : i32, i32
  }
  func.func @transform_6(%arg0: i32) -> (i32, i32) {
    %c0_i32 = arith.constant 0 : i32
    %c0_i32_0 = arith.constant 0 : i32
    %c0_i32_1 = arith.constant 0 : i32
    return %c0_i32, %c0_i32_0 : i32, i32
  }
  func.func @transform_7(%arg0: i32) -> (i32, i32) {
    %c0_i32 = arith.constant 0 : i32
    %c0_i32_0 = arith.constant 0 : i32
    %c0_i32_1 = arith.constant 0 : i32
    return %c0_i32, %c0_i32_0 : i32, i32
  }
  func.func @transform_8(%arg0: i32) -> (i32, i32) {
    %c0_i32 = arith.constant 0 : i32
    %c0_i32_0 = arith.constant 0 : i32
    %c0_i32_1 = arith.constant 0 : i32
    return %c0_i32, %c0_i32_0 : i32, i32
  }
  func.func @transform_9(%arg0: i32) -> (i32, i32) {
    %c0_i32 = arith.constant 0 : i32
    %c0_i32_0 = arith.constant 0 : i32
    %c0_i32_1 = arith.constant 0 : i32
    return %c0_i32, %c0_i32_0 : i32, i32
  }
}

</mosaic_0001>

<bundles_post_ra>
// kernel: pilotnet_forward.6
= control target key start
LH: loop header
LB: loop body
LE: loop exit
PB: predicated region body
PF: predicated region fallthrough
CT: control target
= control target key end

     0   :  { %s1865_s12 = smov 0   ;;  %s2177_s0 = inlined_call_operand.vmem [shape: bf16[2,4,32,32,6], index: 0, kind: input, shape index: {}]   ;;  %s2178_s1 = inlined_call_operand.vmem [shape: bf16[25,6,128], index: 1, kind: input, shape index: {}]   ;;  %s2179_s2 = inlined_call_operand.vmem [shape: f32[1,128], index: 2, kind: input, shape index: {}]   ;;  %s2180_s3 = inlined_call_operand.vmem [shape: bf16[2,30,30,128], index: 3, kind: output, shape index: {}]  }
   0x1 LB: > { %s1530_s13 = sadd.s32 4294967295, %s1839_s12   ;;  %p1534_p0 = scmp.ge.s32.totalorder %s1839_s12, 1  ;;  %s1839_s12 = sphi %s1865_s12, %s13_s12  }
   0x2   : > { %p137_p1 = scmp.lt.s32.totalorder %s1839_s12, 3 }
   0x4   : > { %p138_p2 = pnand %p1534_p0, %p137_p1 }
   0x5   : > { %p161_p3 = scmp.lt.s32.totalorder (!%p138_p2), %s1530_s13, 1  ;;  %s1888_s24 = smov (!%p138_p2), 0  }
   0x6   : > { %141 = sbr.rel (%p138_p2) target bundleno = 364 (0x16c), region = 32 }
   0xb   : > { %v1876_v0 = vld [vmem:[%s2179_s2] sm:$0x1]  ;;  %s2182_s13 = smov (!%p161_p3, %s1530_s13), 1 }
   0xc   : > { %s1702_s16 = sshll.u32 %s2182_s13, 11  ;;  %s1762_s17 = smul.u32 480, %s2182_s13 }
   0xd   : > { %s1881_s20 = scalar_lea.vmem %s2177_s0, %s1702_s16 }
   0xe   : > { %s1886_s23 = scalar_lea.vmem %s2180_s3, %s1762_s17 }
   0xf LB: >> { %v1546_v1 = vld [vmem:[%s2178_s1 + $0x4] sm:$0x7]  ;;  %vm213_vm0 = vcmask 1042432   ;;  %v186_v2 = vld [vmem:[%s2178_s1] sm:$0x7]  ;;  %s1703_s6 = sshll.u32 %s1843_s24, 4  ;;  %s1843_s24 = sphi %s1888_s24, %s178_s24  }
  0x10   : >> { %v215_v3 = vsel %vm213_vm0, %v1546_v1, 0  ;;  %v253_v4 = vsel %vm213_vm0, %v186_v2, 0  ;;  %v1555_v5 = vld [vmem:[%s2178_s1 + $0x8] sm:$0x7]  ;;  %v1559_v6 = vld [vmem:[%s2178_s1 + $0xc] sm:$0x7]  ;;  %s1913_s7 = scalar_lea.vmem %s1881_s20, %s1703_s6 }
  0x11   : >> { %224 = vmatpush.bf16.msra.mxu0 %v215_v3  ;;  %1761 = vmatpush.bf16.msra.mxu1 %v215_v3  ;;  %vm206_vm1 = vcmask 48128   ;;  %v302_v7 = vsel %vm213_vm0, %v1555_v5, 0  ;;  %v354_v8 = vsel %vm213_vm0, %v1559_v6, 0  ;;  %v1562_v9 = vld [vmem:[%s2178_s1 + $0x10] sm:$0x7]  ;;  %v1705_v12 = vld [vmem:[%s1913_s7 + $0x200] sm:$0xff] }
  0x12   : >> { %311 = vmatpush.bf16.msra.mxu2 %v302_v7  ;;  %v1580_v10 = vld [vmem:[%s2178_s1 + $0x18] sm:$0x7]  ;;  %v1588_v11 = vld [vmem:[%s2178_s1 + $0x1c] sm:$0x7]  ;;  %v1544_v13 = vld [vmem:[%s1913_s7 + $0x208] sm:$0xff]   ;;  %363 = vmatpush.bf16.msra.mxu3 %v354_v8  ;;  %v396_v16 = vsel %vm213_vm0, %v1562_v9, 0 }
  0x13   : >> { %v1817_v14 = vld [vmem:[%s1913_s7 + $0x208] sm:$0xf]   ;;  %v1834_v15 = vld [vmem:[%s1913_s7 + $0x208] sm:$0x70]  ;;  %v498_v17 = vsel %vm213_vm0, %v1580_v10, 0  ;;  %v1718_v18 = vld [vmem:[%s1913_s7] sm:$0xff]  }
  0x14   : >> { %v1932_v19 = vld [vmem:[%s1913_s7 + $0x8] sm:$0xff]   ;;  %v550_v21 = vsel %vm213_vm0, %v1588_v11, 0  ;;  %1551 = vmatmul.msk.bf16.vlgmr.msra.gmra.mxu0 %vm206_vm1, %v1705_v12  ;;  %v335_v22 = vshll.u32 %v1705_v12, 16  ;;  %v281_v23 = vshrl.u32 %v1718_v18, 16  ;;  %v1571_v24 = vld [vmem:[%s2178_s1 + $0x14] sm:$0x7]  ;;  %v1818_v25 = vor.u32 %v1834_v15, %v1817_v14 }
  0x15   : >> { %262 = vmatpush.bf16.msrb.mxu1 %v253_v4  ;;  %v1935_v20 = vld [vmem:[%s1913_s7 + $0x8] sm:$0xf]   ;;  %405 = vmatpush.bf16.msrb.mxu0 %v396_v16  ;;  %v283_v26 = vshll.u32 %v1718_v18, 16  ;;  %v333_v27 = vshrl.u32 %v1705_v12, 16  ;;  %v1592_v28 = vld [vmem:[%s2178_s1 + $0x20] sm:$0x7] }
  0x16   : >> { %507 = vmatpush.bf16.msrb.mxu2 %v498_v17  ;;  %559 = vmatpush.bf16.msrb.mxu3 %v550_v21  ;;  %v337_v29 = vrot.slane %v335_v22, 1  ;;  %v1742_v30 = vld [vmem:[%s1913_s7] sm:$0xf0]  ;;  %v1743_v31 = vld [vmem:[%s1913_s7] sm:$0xe]  ;;  %v447_v32 = vsel %vm213_vm0, %v1571_v24, 0 }
  0x17   : >> { %1552 = vmatmul.msk.bf16.vlgmr.msra.gmra.mxu1 %vm206_vm1, %v1818_v25  ;;  %v285_v33 = vrot.slane %v283_v26, 1  ;;  %v340_v34 = vshll.u32 %v1544_v13, 16  ;;  %v602_v35 = vsel %vm213_vm0, %v1592_v28, 0  ;;  %vm280_vm2 = vsmask.f32 7424  ;;  %v1968_v53 = vld [vmem:[%s1913_s7 + $0x408] sm:$0xff]  }
  0x18   : >> { %v288_v36 = vshll.u32 %v1932_v19, 16  ;;  %v338_v37 = vor.u32 %v337_v29, %v333_v27  ;;  %v1744_v40 = vor.u32 %v1743_v31, %v1742_v30  ;;  %v387_v45 = vrot.slane %v1932_v19, 1  ;;  %v1604_v46 = vld [vmem:[%s2178_s1 + $0x28] sm:$0x7]  ;;  %v1613_v50 = vld [vmem:[%s2178_s1 + $0x2c] sm:$0x7] }
  0x19   : >> { %456 = vmatpush.bf16.msra.mxu1 %v447_v32  ;;  %611 = vmatpush.bf16.msra.mxu0 %v602_v35  ;;  %v286_v38 = vor.u32 %v285_v33, %v281_v23  ;;  %v342_v39 = vrot.slane %v340_v34, 1  ;;  %vm385_vm3 = vcmask 1046528   ;;  %v695_v47 = vsel %vm213_vm0, %v1604_v46, 0  ;;  %v1971_v54 = vld [vmem:[%s1913_s7 + $0x408] sm:$0xf]   ;;  %v1745_v59 = vld [vmem:[%s1913_s7 + $0x400] sm:$0xff]  }
  0x1a   : >> { %v290_v41 = vrot.slane %v288_v36, 1  ;;  %v386_v44 = vrot.slane %v1744_v40, 1  ;;  %v344_v49 = vshrl.u32 %v1544_v13, 16  ;;  %v292_v51 = vshrl.u32 %v1932_v19, 16  ;;  %v1596_v55 = vld [vmem:[%s2178_s1 + $0x24] sm:$0x7] }
  0x1b   : >> { %v343_v42 = vsel %vm280_vm2, %v338_v37, %v342_v39  ;;  %v746_v52 = vsel %vm213_vm0, %v1613_v50, 0  ;;  %v643_v57 = vsel %vm213_vm0, %v1596_v55, 0  ;;  %v1819_v60 = vld [vmem:[%s1913_s7 + $0x8] sm:$0x70]  ;;  %v531_v61 = vshll.u32 %v1745_v59, 16  ;;  %v1708_v7 = vld [vmem:[%s1913_s7 + $0x600] sm:$0xff] }
  0x1c   : >> { %v291_v43 = vsel %vm280_vm2, %v286_v38, %v290_v41  ;;  %1560 = vmatmul.msk.bf16.vlgmr.msra.gmra.mxu3 %vm206_vm1, %v343_v42  ;;  %v388_v48 = vsel %vm385_vm3, %v386_v44, %v387_v45  ;;  %v346_v56 = vor.u32 %v344_v49, %v342_v39  ;;  %v294_v58 = vor.u32 %v292_v51, %v290_v41  ;;  %v1621_v62 = vld [vmem:[%s2178_s1 + $0x30] sm:$0x7]  ;;  %v1578_v63 = vld [vmem:[%s1913_s7 + $0x608] sm:$0xff]   ;;  %v1629_v17 = vld [vmem:[%s2178_s1 + $0x38] sm:$0x7]  ;;  %s178_s24 = sadd.s32 1, %s1843_s24  }
  0x1d   : >> { %1556 = vmatmul.msk.bf16.vlgmr.msra.gmra.mxu2 %vm206_vm1, %v291_v43  ;;  %755 = vmatpush.bf16.msra.mxu3 %v746_v52  ;;  %v1785_v1 = vld [vmem:[%s1913_s7 + $0x608] sm:$0xf]   ;;  %v798_v2 = vsel %vm213_vm0, %v1621_v62, 0  ;;  %v529_v3 = vshrl.u32 %v1745_v59, 16  ;;  %v533_v4 = vrot.slane %v531_v61, 1  ;;  %v536_v5 = vshll.u32 %v1968_v53, 16 }
  0x1e   : >> { %704 = vmatpush.bf16.msra.mxu2 %v695_v47  ;;  %v1782_v6 = vor.u32 %v1819_v60, %v1935_v20  ;;  %v583_v8 = vshll.u32 %v1708_v7, 16  ;;  %v581_v11 = vshrl.u32 %v1708_v7, 16  ;;  %v588_v14 = vshll.u32 %v1578_v63, 16  ;;  %v1820_v20 = vld [vmem:[%s1913_s7 + $0x608] sm:$0x70]  ;;  %v2020_v31 = vld [vmem:[%s1913_s7 + $0x18] sm:$0xff]  }
  0x1f   : >> { %v534_v9 = vor.u32 %v533_v4, %v529_v3  ;;  %v538_v10 = vrot.slane %v536_v5, 1  ;;  %v540_v21 = vshrl.u32 %v1968_v53, 16  ;;  %v1638_v22 = vld [vmem:[%s2178_s1 + $0x3c] sm:$0x7]  ;;  %v1625_v24 = vld [vmem:[%s2178_s1 + $0x34] sm:$0x7]  ;;  %v1786_v27 = vor.u32 %v1820_v20, %v1785_v1 }
  0x20   : >> { %v585_v13 = vrot.slane %v583_v8, 1  ;;  %v590_v16 = vrot.slane %v588_v14, 1  ;;  %v942_v23 = vsel %vm213_vm0, %v1638_v22, 0  ;;  %v850_v26 = vsel %vm213_vm0, %v1625_v24, 0  ;;  %v1821_v29 = vld [vmem:[%s1913_s7 + $0x408] sm:$0x70] }
  0x21   : >> { %v539_v12 = vsel %vm280_vm2, %v534_v9, %v538_v10  ;;  %v542_v25 = vor.u32 %v540_v21, %v538_v10  ;;  %v592_v28 = vshrl.u32 %v1578_v63, 16  ;;  %v1647_v30 = vld [vmem:[%s2178_s1 + $0x40] sm:$0x7]  ;;  %v1793_v32 = vld [vmem:[%s1913_s7 + $0x18] sm:$0xf]   ;;  %v1790_v35 = vor.u32 %v1821_v29, %v1971_v54  ;;  %v1749_v36 = vld [vmem:[%s1913_s7 + $0x10] sm:$0xff]  }
  0x22   : >> { %v586_v15 = vor.u32 %v585_v13, %v581_v11  ;;  %v993_v33 = vsel %vm213_vm0, %v1647_v30, 0  ;;  %v779_v37 = vshll.u32 %v1749_v36, 16  ;;  %v777_v38 = vshrl.u32 %v1749_v36, 16  ;;  %v1710_v39 = vld [vmem:[%s1913_s7 + $0x210] sm:$0xff]  ;;  %v1746_v42 = vld [vmem:[%s1913_s7 + $0x400] sm:$0xf0] }
  0x23   : >> { %v594_v34 = vor.u32 %v592_v28, %v590_v16  ;;  %v784_v41 = vshll.u32 %v2020_v31, 16  ;;  %v1747_v43 = vld [vmem:[%s1913_s7 + $0x400] sm:$0xe]  ;;  %v1659_v47 = vld [vmem:[%s2178_s1 + $0x48] sm:$0x7]  ;;  %v634_v50 = vrot.slane %v1968_v53, 1 }
  0x24   : >> { %1563 = vmatmul.msk.bf16.vlgmr.msrb.gmra.mxu0 %vm206_vm1, %v388_v48  ;;  %v591_v19 = vsel %vm280_vm2, %v586_v15, %v590_v16  ;;  %v781_v40 = vrot.slane %v779_v37, 1  ;;  %v1748_v44 = vor.u32 %v1747_v43, %v1746_v42  ;;  %v1097_v48 = vsel %vm213_vm0, %v1659_v47, 0  ;;  %v2041_v52 = vld [vmem:[%s1913_s7 + $0x218] sm:$0xff]   ;;  %v1655_v53 = vld [vmem:[%s2178_s1 + $0x44] sm:$0x7]  ;;  %v2070_v10 = vld [vmem:[%s1913_s7 + $0x410] sm:$0xff]  }
  0x25   : >> { %807 = vmatpush.bf16.msrb.mxu0 %v798_v2  ;;  %v786_v46 = vrot.slane %v784_v41, 1  ;;  %v1825_v54 = vld [vmem:[%s1913_s7 + $0x218] sm:$0xf]   ;;  %v1835_v55 = vld [vmem:[%s1913_s7 + $0x218] sm:$0x70]  ;;  %v1045_v61 = vsel %vm213_vm0, %v1655_v53, 0 }
  0x26   : >> { %v633_v49 = vrot.slane %v1748_v44, 1  ;;  %v1826_v60 = vor.u32 %v1835_v55, %v1825_v54  ;;  %v788_v63 = vshrl.u32 %v2020_v31, 16  ;;  %v1671_v1 = vld [vmem:[%s2178_s1 + $0x50] sm:$0x7]  ;;  %v1750_v3 = vld [vmem:[%s1913_s7 + $0x10] sm:$0xf0] }
  0x27   : >> { %1553 = vmatmul.msk.bf16.vlgmr.msrb.gmra.mxu1 %vm206_vm1, %v1718_v18  ;;  %v891_v18 = vsel %vm213_vm0, %v1629_v17, 0  ;;  %v1190_v2 = vsel %vm213_vm0, %v1671_v1, 0  ;;  %v1751_v4 = vld [vmem:[%s1913_s7 + $0x10] sm:$0xe]  ;;  %v882_v8 = vrot.slane %v2020_v31, 1  ;;  %v831_v9 = vshll.u32 %v1710_v39, 16 }
  0x28   : >> { %652 = vmatpush.bf16.msrb.mxu1 %v643_v57  ;;  %v635_v57 = vsel %vm385_vm3, %v633_v49, %v634_v50  ;;  %v790_v5 = vor.u32 %v788_v63, %v786_v46  ;;  %v829_v13 = vshrl.u32 %v1710_v39, 16  ;;  %v1713_v15 = vld [vmem:[%s1913_s7 + $0x610] sm:$0xff]  ;;  %v1836_v20 = vld [vmem:[%s1913_s7 + $0x418] sm:$0x70]  ;;  %v1688_v21 = vld [vmem:[%s2178_s1 + $0x58] sm:$0x7] }
  0x29   : >> { %v833_v14 = vrot.slane %v831_v9, 1  ;;  %v1293_v22 = vsel %vm213_vm0, %v1688_v21, 0  ;;  %v1692_v24 = vld [vmem:[%s2178_s1 + $0x5c] sm:$0x7]  ;;  %v1797_v29 = vld [vmem:[%s1913_s7 + $0x618] sm:$0xf]  }
  0x2a   : >> { %v1645_v28 = vld [vmem:[%s1913_s7 + $0x618] sm:$0xff]   ;;  %v1076_v42 = vshrl.u32 %v1713_v15, 16  ;;  %v1024_v55 = vshrl.u32 %v2070_v10, 16  ;;  %v1757_v63 = vld [vmem:[%s1913_s7 + $0x20] sm:$0xff]   ;;  %p175_p4 = scmp.ge.s32.totalorder %s178_s24, 30  }
  0x2b   : >> { %v834_v16 = vor.u32 %v833_v14, %v829_v13  ;;  %v1831_v30 = vld [vmem:[%s1913_s7 + $0x618] sm:$0x70]  ;;  %v1083_v41 = vshll.u32 %v1645_v28, 16  ;;  %v1801_v13 = vld [vmem:[%s1913_s7 + $0x28] sm:$0xf]  }
  0x2c   : >> { %1561 = vmatmul.msk.bf16.gmra.mxu3 %vm206_vm1, %v346_v56  ;;  %v1822_v56 = vld [vmem:[%s1913_s7 + $0x18] sm:$0x70]  ;;  %v1798_v37 = vor.u32 %v1831_v30, %v1797_v29  ;;  %v1832_v14 = vld [vmem:[%s1913_s7 + $0x28] sm:$0x70] }
  0x2d   : >> { %1557 = vmatmul.msk.bf16.gmra.mxu2 %vm206_vm1, %v294_v58  ;;  %v1663_v58 = vld [vmem:[%s2178_s1 + $0x4c] sm:$0x7]  ;;  %v1794_v62 = vor.u32 %v1822_v56, %v1793_v32  ;;  %v1078_v32 = vshll.u32 %v1713_v15, 16  ;;  %v1085_v49 = vrot.slane %v1083_v41, 1 }
  0x2f   : >> { %v1080_v43 = vrot.slane %v1078_v32, 1 }
  0x34   : >> { %1564 = vmatmul.msk.bf16.gmra.mxu0 %vm206_vm1, %v387_v45  ;;  %v782_v45 = vor.u32 %v781_v40, %v777_v38 }
  0x36   : >> { %v787_v51 = vsel %vm280_vm2, %v782_v45, %v786_v46 }
  0x37   : >> { %1554 = vmatmul.msk.bf16.gmra.mxu1 %vm206_vm1, %v1782_v6  ;;  %v1752_v6 = vor.u32 %v1751_v4, %v1750_v3  ;;  %v1087_v4 = vshrl.u32 %v1645_v28, 16 }
  0x3c   : >> { %1589 = vmatmul.msk.bf16.vlgmr.msrb.gmra.mxu3 %vm206_vm1, %v539_v12  ;;  %v836_v12 = vshll.u32 %v2041_v52, 16 }
  0x3d   : >> { %1585 = vmatmul.msk.bf16.vlgmr.msrb.gmra.mxu2 %vm206_vm1, %v1708_v7  ;;  %951 = vmatpush.bf16.msrb.mxu3 %v942_v23  ;;  %v881_v7 = vrot.slane %v1752_v6, 1  ;;  %v2131_v6 = vld [vmem:[%s1913_s7 + $0x228] sm:$0xf]  }
  0x3e   : >> { %900 = vmatpush.bf16.msrb.mxu2 %v891_v18  ;;  %v838_v17 = vrot.slane %v836_v12, 1  ;;  %v2079_v18 = vld [vmem:[%s1913_s7 + $0x418] sm:$0xff]   ;;  %v2135_v12 = vld [vmem:[%s1913_s7 + $0x28] sm:$0xff]  }
  0x3f   : >> { %v883_v11 = vsel %vm385_vm3, %v881_v7, %v882_v8  ;;  %v1129_v47 = vrot.slane %v2079_v18, 1 }
  0x40   : >> { %v839_v23 = vsel %vm280_vm2, %v834_v16, %v838_v17 }
  0x44   : >> { %1593 = vmatmul.msk.bf16.vlgmr.msra.gmra.mxu0 %vm206_vm1, %v591_v19  ;;  %v1829_v19 = vld [vmem:[%s1913_s7 + $0x418] sm:$0xf]  }
  0x45   : >> { %1002 = vmatpush.bf16.msra.mxu0 %v993_v33  ;;  %v1754_v33 = vld [vmem:[%s1913_s7 + $0x410] sm:$0xf0] }
  0x47   : >> { %1572 = vmatmul.msk.bf16.vlgmr.msra.gmra.mxu1 %vm206_vm1, %v1745_v59  ;;  %v1138_v59 = vsel %vm213_vm0, %v1663_v58, 0  ;;  %v1031_v58 = vshll.u32 %v2079_v18, 16 }
  0x48   : >> { %859 = vmatpush.bf16.msra.mxu1 %v850_v26  ;;  %v1345_v26 = vsel %vm213_vm0, %v1692_v24, 0 }
  0x4c   : >> { %1590 = vmatmul.msk.bf16.gmra.mxu3 %vm206_vm1, %v542_v25  ;;  %v1830_v25 = vor.u32 %v1836_v20, %v1829_v19 }
  0x4d   : >> { %1586 = vmatmul.msk.bf16.gmra.mxu2 %vm206_vm1, %v1786_v27  ;;  %v1680_v27 = vld [vmem:[%s2178_s1 + $0x54] sm:$0x7] }
  0x4e   : >> { %v1241_v31 = vsel %vm213_vm0, %v1680_v27, 0  ;;  %v1802_v27 = vor.u32 %v1832_v14, %v1801_v13 }
  0x54   : >> { %1594 = vmatmul.msk.bf16.gmra.mxu0 %vm206_vm1, %v594_v34  ;;  %v1755_v34 = vld [vmem:[%s1913_s7 + $0x410] sm:$0xe] }
  0x55   : >> { %v1756_v40 = vor.u32 %v1755_v34, %v1754_v33  ;;  %v1272_v33 = vshrl.u32 %v1757_v63, 16 }
  0x57   : >> { %1573 = vmatmul.msk.bf16.gmra.mxu1 %vm206_vm1, %v1790_v35  ;;  %v840_v35 = vshrl.u32 %v2041_v52, 16  ;;  %v1128_v46 = vrot.slane %v1756_v40, 1 }
  0x59   : >> { %v842_v44 = vor.u32 %v840_v35, %v838_v17  ;;  %v1130_v52 = vsel %vm385_vm3, %v1128_v46, %v1129_v47  ;;  %v1279_v35 = vshll.u32 %v2135_v12, 16 }
  0x5c   : >> { %1618 = vmatmul.msk.bf16.vlgmr.msra.gmra.mxu3 %vm206_vm1, %v1710_v39 }
  0x5d   : >> { %1605 = vmatmul.msk.bf16.vlgmr.msra.gmra.mxu2 %vm206_vm1, %v1749_v36  ;;  %1147 = vmatpush.bf16.msra.mxu3 %v1138_v59  ;;  %v1696_v36 = vld [vmem:[%s2178_s1 + $0x60] sm:$0x7] }
  0x5e   : >> { %1106 = vmatpush.bf16.msra.mxu2 %v1097_v48  ;;  %v1386_v38 = vsel %vm213_vm0, %v1696_v36, 0  ;;  %v1081_v48 = vor.u32 %v1080_v43, %v1076_v42  ;;  %v1281_v42 = vrot.slane %v1279_v35, 1  ;;  %v1758_v43 = vld [vmem:[%s1913_s7 + $0x20] sm:$0xf0] }
  0x60   : >> { %v1086_v54 = vsel %vm280_vm2, %v1081_v48, %v1085_v49 }
  0x64   : >> { %1622 = vmatmul.msk.bf16.vlgmr.msrb.gmra.mxu0 %vm206_vm1, %v787_v51 }
  0x65   : >> { %1199 = vmatpush.bf16.msrb.mxu0 %v1190_v2 }
  0x67   : >> { %1597 = vmatmul.msk.bf16.vlgmr.msrb.gmra.mxu1 %vm206_vm1, %v635_v57 }
  0x68   : >> { %1054 = vmatpush.bf16.msrb.mxu1 %v1045_v61  ;;  %v1033_v61 = vrot.slane %v1031_v58, 1 }
  0x6c   : >> { %1619 = vmatmul.msk.bf16.gmra.mxu3 %vm206_vm1, %v1826_v60 }
  0x6d   : >> { %1606 = vmatmul.msk.bf16.gmra.mxu2 %vm206_vm1, %v1794_v62 }
  0x74   : >> { %1623 = vmatmul.msk.bf16.gmra.mxu0 %vm206_vm1, %v790_v5  ;;  %v2128_v5 = vld [vmem:[%s1913_s7 + $0x228] sm:$0xff]  }
  0x77   : >> { %1598 = vmatmul.msk.bf16.gmra.mxu1 %vm206_vm1, %v634_v50  ;;  %v1026_v50 = vshll.u32 %v2070_v10, 16 }
  0x79   : >> { %v1028_v56 = vrot.slane %v1026_v50, 1 }
  0x7b   : >> { %v1029_v53 = vor.u32 %v1028_v56, %v1024_v55 }
  0x7c   : >> { %1639 = vmatmul.msk.bf16.vlgmr.msrb.gmra.mxu3 %vm206_vm1, %v2070_v10 }
  0x7d   : >> { %1630 = vmatmul.msk.bf16.vlgmr.msrb.gmra.mxu2 %vm206_vm1, %v883_v11  ;;  %1354 = vmatpush.bf16.msrb.mxu3 %v1345_v26  ;;  %v1034_v2 = vsel %vm280_vm2, %v1029_v53, %v1033_v61  ;;  %v1089_v11 = vor.u32 %v1087_v4, %v1085_v49  ;;  %v1335_v4 = vshrl.u32 %v2128_v5, 16 }
  0x7e   : >> { %1302 = vmatpush.bf16.msrb.mxu2 %v1293_v22  ;;  %v1274_v22 = vshll.u32 %v1757_v63, 16 }
  0x80   : >> { %v1276_v34 = vrot.slane %v1274_v22, 1 }
  0x82   : >> { %v1277_v41 = vor.u32 %v1276_v34, %v1272_v33 }
  0x84   : >> { %1652 = vmatmul.msk.bf16.vlgmr.msra.gmra.mxu0 %vm206_vm1, %v1713_v15  ;;  %v1715_v15 = vld [vmem:[%s1913_s7 + $0x220] sm:$0xff] }
  0x85   : >> { %1395 = vmatpush.bf16.msra.mxu0 %v1386_v38  ;;  %v1326_v21 = vshll.u32 %v1715_v15, 16  ;;  %v1324_v29 = vshrl.u32 %v1715_v15, 16 }
  0x87   : >> { %1626 = vmatmul.msk.bf16.vlgmr.msra.gmra.mxu1 %vm206_vm1, %v839_v23  ;;  %v1328_v30 = vrot.slane %v1326_v21, 1  ;;  %v1833_v21 = vld [vmem:[%s1913_s7 + $0x228] sm:$0x70] }
  0x88   : >> { %1250 = vmatpush.bf16.msra.mxu1 %v1241_v31  ;;  %v1331_v31 = vshll.u32 %v2128_v5, 16 }
  0x8a   : >> { %v1333_v40 = vrot.slane %v1331_v31, 1 }
  0x8c   : >> { %1640 = vmatmul.msk.bf16.gmra.mxu3 %vm206_vm1, %v1830_v25  ;;  %v1035_v25 = vshrl.u32 %v2079_v18, 16 }
  0x8d   : >> { %1631 = vmatmul.msk.bf16.gmra.mxu2 %vm206_vm1, %v882_v8 }
  0x8e   : >> { %v1037_v36 = vor.u32 %v1035_v25, %v1033_v61 }
  0x91   : >> { %v226_v39 = vpop.f32.mrf.mxu0 }
  0x94   : >> { %v2110_v45 = vpop.f32.mrf.mxu1  ;;  %1653 = vmatmul.msk.bf16.gmra.mxu0 %vm206_vm1, %v1798_v37 }
  0x97   : >> { %1627 = vmatmul.msk.bf16.gmra.mxu1 %vm206_vm1, %v842_v44  ;;  %v1759_v44 = vld [vmem:[%s1913_s7 + $0x20] sm:$0xe]  ;;  %s1427_s7 = scalar_lea.vmem %s1886_s23, %s1703_s6 }
  0x99   : >> { %v228_v51 = vpop.f32.mrf.mxu0 }
  0x9c   : >> { %v2119_v57 = vpop.f32.mrf.mxu1  ;;  %1664 = vmatmul.msk.bf16.vlgmr.msra.gmra.mxu3 %vm206_vm1, %v1130_v52 }
  0x9d   : >> { %1660 = vmatmul.msk.bf16.vlgmr.msra.gmra.mxu2 %vm206_vm1, %v1086_v54  ;;  %v1282_v54 = vsel %vm280_vm2, %v1277_v41, %v1281_v42 }
  0x9f   : >> { %v365_v59 = vpop.f32.mrf.mxu3 }
  0xa0   : >> { %v313_v60 = vpop.f32.mrf.mxu2 }
  0xa1   : >> { %v407_v62 = vpop.f32.mrf.mxu0 }
  0xa4   : >> { %v264_v1 = vpop.f32.mrf.mxu1  ;;  %1672 = vmatmul.msk.bf16.vlgmr.msrb.gmra.mxu0 %vm206_vm1, %v1757_v63 }
  0xa5   : >> { %v265_v3 = vadd.f32 %v264_v1, %v226_v39  ;;  %v1329_v39 = vor.u32 %v1328_v30, %v1324_v29 }
  0xa7   : >> { %v323_v7 = vadd.f32 %v313_v60, %v265_v3  ;;  %1656 = vmatmul.msk.bf16.vlgmr.msrb.gmra.mxu1 %vm206_vm1, %v1034_v2  ;;  %v367_v8 = vpop.f32.mrf.mxu3  ;;  %v1334_v50 = vsel %vm280_vm2, %v1329_v39, %v1333_v40 }
  0xa8   : >> { %v315_v9 = vpop.f32.mrf.mxu2 }
  0xa9   : >> { %v409_v10 = vpop.f32.mrf.mxu0  ;;  %v375_v16 = vadd.f32 %v365_v59, %v323_v7  ;;  %v1377_v59 = vrot.slane %v2135_v12, 1  ;;  %v1283_v7 = vshrl.u32 %v2135_v12, 16 }
  0xab   : >> { %v417_v17 = vadd.f32 %v407_v62, %v375_v16  ;;  %v1285_v14 = vor.u32 %v1283_v7, %v1281_v42 }
  0xac   : >> { %v266_v19 = vpop.f32.mrf.mxu1  ;;  %1665 = vmatmul.msk.bf16.gmra.mxu3 %vm206_vm1, %v1129_v47 }
  0xad   : >> { %v267_v20 = vadd.f32 %v266_v19, %v228_v51  ;;  %1661 = vmatmul.msk.bf16.gmra.mxu2 %vm206_vm1, %v1089_v11  ;;  %v1760_v51 = vor.u32 %v1759_v44, %v1758_v43  ;;  %v1337_v11 = vor.u32 %v1335_v4, %v1333_v40 }
  0xaf   : >> { %v324_v23 = vadd.f32 %v315_v9, %v267_v20  ;;  %v370_v24 = vpop.f32.mrf.mxu3  ;;  %v1376_v58 = vrot.slane %v1760_v51, 1 }
  0xb0   : >> { %v318_v26 = vpop.f32.mrf.mxu2 }
  0xb1   : >> { %v412_v28 = vpop.f32.mrf.mxu0  ;;  %v376_v32 = vadd.f32 %v367_v8, %v324_v23  ;;  %v1378_v63 = vsel %vm385_vm3, %v1376_v58, %v1377_v59 }
  0xb3   : >> { %v418_v37 = vadd.f32 %v409_v10, %v376_v32 }
  0xb4   : >> { %v269_v38 = vpop.f32.mrf.mxu1  ;;  %1673 = vmatmul.msk.bf16.gmra.mxu0 %vm206_vm1, %v1802_v27 }
  0xb5   : >> { %v270_v18 = vadd.f32 %v269_v38, %v2110_v45 }
  0xb7   : >> { %v325_v46 = vadd.f32 %v318_v26, %v270_v18  ;;  %1657 = vmatmul.msk.bf16.gmra.mxu1 %vm206_vm1, %v1037_v36  ;;  %v372_v47 = vpop.f32.mrf.mxu3 }
  0xb8   : >> { %v320_v48 = vpop.f32.mrf.mxu2 }
  0xb9   : >> { %v414_v49 = vpop.f32.mrf.mxu0  ;;  %v377_v52 = vadd.f32 %v370_v24, %v325_v46 }
  0xbb   : >> { %v419_v55 = vadd.f32 %v412_v28, %v377_v52 }
  0xbc   : >> { %v271_v45 = vpop.f32.mrf.mxu1  ;;  %1693 = vmatmul.msk.bf16.vlgmr.msrb.gmra.mxu3 %vm206_vm1, %v1334_v50 }
  0xbd   : >> { %v272_v56 = vadd.f32 %v271_v45, %v2119_v57  ;;  %1689 = vmatmul.msk.bf16.vlgmr.msrb.gmra.mxu2 %vm206_vm1, %v1282_v54 }
  0xbf   : >> { %v326_v53 = vadd.f32 %v320_v48, %v272_v56  ;;  %v561_v60 = vpop.f32.mrf.mxu3 }
  0xc0   : >> { %v509_v61 = vpop.f32.mrf.mxu2 }
  0xc1   : >> { %v613_v62 = vpop.f32.mrf.mxu0  ;;  %v378_v1 = vadd.f32 %v372_v47, %v326_v53 }
  0xc3   : >> { %v420_v2 = vadd.f32 %v414_v49, %v378_v1 }
  0xc4   : >> { %v458_v3 = vpop.f32.mrf.mxu1  ;;  %1697 = vmatmul.msk.bf16.vlgmr.msra.gmra.mxu0 %vm206_vm1, %v1378_v63 }
  0xc5   : >> { %v468_v57 = vadd.f32 %v458_v3, %v417_v17 }
  0xc7   : >> { %v519_v8 = vadd.f32 %v509_v61, %v468_v57  ;;  %1685 = vmatmul.msk.bf16.vlgmr.msra.gmra.mxu1 %vm206_vm1, %v1715_v15  ;;  %v563_v9 = vpop.f32.mrf.mxu3  ;;  %v1806_v15 = vor.u32 %v1833_v21, %v2131_v6 }
  0xc8   : >> { %v511_v10 = vpop.f32.mrf.mxu2 }
  0xc9   : >> { %v615_v13 = vpop.f32.mrf.mxu0  ;;  %v571_v16 = vadd.f32 %v561_v60, %v519_v8 }
  0xcb   : >> { %v623_v19 = vadd.f32 %v613_v62, %v571_v16 }
  0xcc   : >> { %v460_v20 = vpop.f32.mrf.mxu1  ;;  %1694 = vmatmul.msk.bf16.gmra.mxu3 %vm206_vm1, %v1337_v11 }
  0xcd   : >> { %v469_v22 = vadd.f32 %v460_v20, %v418_v37  ;;  %1690 = vmatmul.msk.bf16.gmra.mxu2 %vm206_vm1, %v1285_v14 }
  0xcf   : >> { %v520_v5 = vadd.f32 %v511_v10, %v469_v22  ;;  %v566_v17 = vpop.f32.mrf.mxu3 }
  0xd0   : >> { %v514_v12 = vpop.f32.mrf.mxu2 }
  0xd1   : >> { %v618_v23 = vpop.f32.mrf.mxu0  ;;  %v572_v24 = vadd.f32 %v563_v9, %v520_v5 }
  0xd3   : >> { %v624_v25 = vadd.f32 %v615_v13, %v572_v24 }
  0xd4   : >> { %v463_v26 = vpop.f32.mrf.mxu1  ;;  %1698 = vmatmul.msk.bf16.gmra.mxu0 %vm206_vm1, %v1377_v59 }
  0xd5   : >> { %v470_v27 = vadd.f32 %v463_v26, %v419_v55 }
  0xd7   : >> { %v521_v28 = vadd.f32 %v514_v12, %v470_v27  ;;  %1686 = vmatmul.msk.bf16.gmra.mxu1 %vm206_vm1, %v1806_v15  ;;  %v568_v29 = vpop.f32.mrf.mxu3 }
  0xd8   : >> { %v516_v30 = vpop.f32.mrf.mxu2 }
  0xd9   : >> { %v620_v31 = vpop.f32.mrf.mxu0  ;;  %v573_v32 = vadd.f32 %v566_v17, %v521_v28 }
  0xdb   : >> { %v625_v33 = vadd.f32 %v618_v23, %v573_v32 }
  0xdc   : >> { %v465_v34 = vpop.f32.mrf.mxu1 }
  0xdd   : >> { %v471_v35 = vadd.f32 %v465_v34, %v420_v2 }
  0xdf   : >> { %v522_v36 = vadd.f32 %v516_v30, %v471_v35  ;;  %v757_v37 = vpop.f32.mrf.mxu3 }
  0xe0   : >> { %v706_v38 = vpop.f32.mrf.mxu2 }
  0xe1   : >> { %v809_v18 = vpop.f32.mrf.mxu0  ;;  %v574_v6 = vadd.f32 %v568_v29, %v522_v36 }
  0xe3   : >> { %v626_v39 = vadd.f32 %v620_v31, %v574_v6 }
  0xe4   : >> { %v654_v40 = vpop.f32.mrf.mxu1 }
  0xe5   : >> { %v664_v41 = vadd.f32 %v654_v40, %v623_v19 }
  0xe7   : >> { %v716_v42 = vadd.f32 %v706_v38, %v664_v41  ;;  %v759_v43 = vpop.f32.mrf.mxu3 }
  0xe8   : >> { %v708_v44 = vpop.f32.mrf.mxu2 }
  0xe9   : >> { %v811_v46 = vpop.f32.mrf.mxu0  ;;  %v767_v47 = vadd.f32 %v757_v37, %v716_v42 }
  0xeb   : >> { %v819_v48 = vadd.f32 %v809_v18, %v767_v47 }
  0xec   : >> { %v656_v49 = vpop.f32.mrf.mxu1 }
  0xed   : >> { %v665_v50 = vadd.f32 %v656_v49, %v624_v25 }
  0xef   : >> { %v717_v51 = vadd.f32 %v708_v44, %v665_v50  ;;  %v762_v52 = vpop.f32.mrf.mxu3 }
  0xf0   : >> { %v711_v54 = vpop.f32.mrf.mxu2 }
  0xf1   : >> { %v814_v55 = vpop.f32.mrf.mxu0  ;;  %v768_v45 = vadd.f32 %v759_v43, %v717_v51 }
  0xf3   : >> { %v820_v56 = vadd.f32 %v811_v46, %v768_v45 }
  0xf4   : >> { %v659_v58 = vpop.f32.mrf.mxu1 }
  0xf5   : >> { %v666_v59 = vadd.f32 %v659_v58, %v625_v33 }
  0xf7   : >> { %v718_v53 = vadd.f32 %v711_v54, %v666_v59  ;;  %v764_v60 = vpop.f32.mrf.mxu3 }
  0xf8   : >> { %v713_v61 = vpop.f32.mrf.mxu2 }
  0xf9   : >> { %v816_v62 = vpop.f32.mrf.mxu0  ;;  %v769_v63 = vadd.f32 %v762_v52, %v718_v53 }
  0xfb   : >> { %v821_v1 = vadd.f32 %v814_v55, %v769_v63 }
  0xfc   : >> { %v661_v2 = vpop.f32.mrf.mxu1 }
  0xfd   : >> { %v667_v3 = vadd.f32 %v661_v2, %v626_v39 }
  0xff   : >> { %v719_v4 = vadd.f32 %v713_v61, %v667_v3  ;;  %v953_v57 = vpop.f32.mrf.mxu3 }
 0x100   : >> { %v902_v7 = vpop.f32.mrf.mxu2 }
 0x101   : >> { %v1004_v8 = vpop.f32.mrf.mxu0  ;;  %v770_v9 = vadd.f32 %v764_v60, %v719_v4 }
 0x103   : >> { %v822_v10 = vadd.f32 %v816_v62, %v770_v9 }
 0x104   : >> { %v861_v11 = vpop.f32.mrf.mxu1 }
 0x105   : >> { %v871_v30 = vadd.f32 %v861_v11, %v819_v48 }
 0x107   : >> { %v955_v13 = vpop.f32.mrf.mxu3  ;;  %v912_v33 = vadd.f32 %v902_v7, %v871_v30 }
 0x108   : >> { %v904_v14 = vpop.f32.mrf.mxu2 }
 0x109   : >> { %v1006_v16 = vpop.f32.mrf.mxu0  ;;  %v963_v37 = vadd.f32 %v953_v57, %v912_v33 }
 0x10b   : >> { %v1014_v39 = vadd.f32 %v1004_v8, %v963_v37 }
 0x10c   : >> { %v863_v19 = vpop.f32.mrf.mxu1 }
 0x10d   : >> { %v872_v36 = vadd.f32 %v863_v19, %v820_v56 }
 0x10f   : >> { %v958_v20 = vpop.f32.mrf.mxu3  ;;  %v913_v6 = vadd.f32 %v904_v14, %v872_v36 }
 0x110   : >> { %v907_v21 = vpop.f32.mrf.mxu2 }
 0x111   : >> { %v1009_v22 = vpop.f32.mrf.mxu0  ;;  %v964_v44 = vadd.f32 %v955_v13, %v913_v6 }
 0x113   : >> { %v1015_v50 = vadd.f32 %v1006_v16, %v964_v44  ;;  %v1412_v16 = vperm.slane %v1876_v0, 0 }
 0x114   : >> { %v866_v5 = vpop.f32.mrf.mxu1 }
 0x115   : >> { %v873_v43 = vadd.f32 %v866_v5, %v821_v1 }
 0x117   : >> { %v960_v17 = vpop.f32.mrf.mxu3  ;;  %v914_v48 = vadd.f32 %v907_v21, %v873_v43 }
 0x118   : >> { %v909_v12 = vpop.f32.mrf.mxu2 }
 0x119   : >> { %v1011_v23 = vpop.f32.mrf.mxu0  ;;  %v965_v45 = vadd.f32 %v958_v20, %v914_v48 }
 0x11b   : >> { %v1016_v62 = vadd.f32 %v1009_v22, %v965_v45 }
 0x11c   : >> { %v868_v24 = vpop.f32.mrf.mxu1 }
 0x11d   : >> { %v874_v55 = vadd.f32 %v868_v24, %v822_v10 }
 0x11f   : >> { %v1149_v15 = vpop.f32.mrf.mxu3  ;;  %v915_v61 = vadd.f32 %v909_v12, %v874_v55 }
 0x120   : >> { %v1108_v25 = vpop.f32.mrf.mxu2 }
 0x121   : >> { %v1201_v26 = vpop.f32.mrf.mxu0  ;;  %v966_v4 = vadd.f32 %v960_v17, %v915_v61 }
 0x123   : >> { %v1017_v10 = vadd.f32 %v1011_v23, %v966_v4 }
 0x124   : >> { %v1056_v27 = vpop.f32.mrf.mxu1 }
 0x125   : >> { %v1066_v40 = vadd.f32 %v1056_v27, %v1014_v39 }
 0x127   : >> { %v1151_v28 = vpop.f32.mrf.mxu3  ;;  %v1118_v47 = vadd.f32 %v1108_v25, %v1066_v40 }
 0x128   : >> { %v1110_v29 = vpop.f32.mrf.mxu2 }
 0x129   : >> { %v1203_v31 = vpop.f32.mrf.mxu0  ;;  %v1159_v52 = vadd.f32 %v1149_v15, %v1118_v47 }
 0x12b   : >> { %v1211_v59 = vadd.f32 %v1201_v26, %v1159_v52 }
 0x12c   : >> { %v1058_v32 = vpop.f32.mrf.mxu1 }
 0x12d   : >> { %v1067_v51 = vadd.f32 %v1058_v32, %v1015_v50 }
 0x12f   : >> { %v1154_v34 = vpop.f32.mrf.mxu3  ;;  %v1119_v58 = vadd.f32 %v1110_v29, %v1067_v51 }
 0x130   : >> { %v1113_v35 = vpop.f32.mrf.mxu2 }
 0x131   : >> { %v1206_v38 = vpop.f32.mrf.mxu0  ;;  %v1160_v3 = vadd.f32 %v1151_v28, %v1119_v58 }
 0x133   : >> { %v1212_v9 = vadd.f32 %v1203_v31, %v1160_v3 }
 0x134   : >> { %v1061_v18 = vpop.f32.mrf.mxu1 }
 0x135   : >> { %v1068_v1 = vadd.f32 %v1061_v18, %v1016_v62 }
 0x137   : >> { %v1156_v42 = vpop.f32.mrf.mxu3  ;;  %v1120_v7 = vadd.f32 %v1113_v35, %v1068_v1 }
 0x138   : >> { %v1115_v41 = vpop.f32.mrf.mxu2 }
 0x139   : >> { %v1208_v46 = vpop.f32.mrf.mxu0  ;;  %v1161_v22 = vadd.f32 %v1154_v34, %v1120_v7 }
 0x13b   : >> { %v1213_v25 = vadd.f32 %v1206_v38, %v1161_v22 }
 0x13c   : >> { %v1063_v49 = vpop.f32.mrf.mxu1 }
 0x13d   : >> { %v1069_v20 = vadd.f32 %v1063_v49, %v1017_v10 }
 0x13f   : >> { %v1356_v56 = vpop.f32.mrf.mxu3  ;;  %v1121_v24 = vadd.f32 %v1115_v41, %v1069_v20 }
 0x140   : >> { %v1304_v54 = vpop.f32.mrf.mxu2 }
 0x141   : >> { %v1397_v53 = vpop.f32.mrf.mxu0  ;;  %v1162_v33 = vadd.f32 %v1156_v42, %v1121_v24 }
 0x143   : >> { %v1214_v18 = vadd.f32 %v1208_v46, %v1162_v33 }
 0x144   : >> { %v1252_v60 = vpop.f32.mrf.mxu1 }
 0x145   : >> { %v1262_v63 = vadd.f32 %v1252_v60, %v1211_v59 }
 0x147   : >> { %v1314_v2 = vadd.f32 %v1304_v54, %v1262_v63  ;;  %v1358_v11 = vpop.f32.mrf.mxu3 }
 0x148   : >> { %v1306_v57 = vpop.f32.mrf.mxu2 }
 0x149   : >> { %v1366_v8 = vadd.f32 %v1356_v56, %v1314_v2  ;;  %v1399_v19 = vpop.f32.mrf.mxu0 }
 0x14b   : >> { %v1407_v21 = vadd.f32 %v1397_v53, %v1366_v8 }
 0x14c   : >> { %v1254_v13 = vpop.f32.mrf.mxu1 }
 0x14d   : >> { %v1263_v14 = vadd.f32 %v1254_v13, %v1212_v9  ;;  %v1414_v17 = vadd.f32 %v1412_v16, %v1407_v21 }
 0x14f   : >> { %v1315_v5 = vadd.f32 %v1306_v57, %v1263_v14  ;;  %v1361_v23 = vpop.f32.mrf.mxu3  ;;  %v1418_v30 = vmax.f32 %v1414_v17, 0.0 }
 0x150   : >> { %v1309_v26 = vpop.f32.mrf.mxu2 }
 0x151   : >> { %v1367_v12 = vadd.f32 %v1358_v11, %v1315_v5  ;;  %v1402_v35 = vpop.f32.mrf.mxu0 }
 0x153   : >> { %v1408_v15 = vadd.f32 %v1399_v19, %v1367_v12 }
 0x154   : >> { %v1257_v27 = vpop.f32.mrf.mxu1 }
 0x155   : >> { %v1415_v28 = vadd.f32 %v1412_v16, %v1408_v15  ;;  %v1264_v29 = vadd.f32 %v1257_v27, %v1213_v25 }
 0x157   : >> { %v1419_v31 = vmax.f32 %v1415_v28, 0.0  ;;  %v1316_v32 = vadd.f32 %v1309_v26, %v1264_v29  ;;  %v1363_v44 = vpop.f32.mrf.mxu3 }
 0x158   : >> { %v1311_v40 = vpop.f32.mrf.mxu2 }
 0x159   : >> { %v1740_v36 = vpack.c.bf16 %v1419_v31, %v1418_v30  ;;  %v1368_v37 = vadd.f32 %v1361_v23, %v1316_v32  ;;  %v1404_v48 = vpop.f32.mrf.mxu0 }
 0x15b   : >> { %1741 = vst [vmem:[%s1427_s7] sm:$0xff] %v1740_v36   ;;  %v1409_v34 = vadd.f32 %v1402_v35, %v1368_v37 }
 0x15c   : >> { %v1259_v6 = vpop.f32.mrf.mxu1 }
 0x15d   : >> { %v1416_v39 = vadd.f32 %v1412_v16, %v1409_v34  ;;  %v1265_v38 = vadd.f32 %v1259_v6, %v1214_v18 }
 0x15f   : >> { %v1420_v41 = vmax.f32 %v1416_v39, 0.0  ;;  %v1317_v43 = vadd.f32 %v1311_v40, %v1265_v38 }
 0x161   : >> { %v1424_v47 = vpack.c.bf16 %v1420_v41, %v1420_v41  ;;  %v1369_v49 = vadd.f32 %v1363_v44, %v1317_v43 }
 0x163   : >> { %1430 = vst [vmem:[%s1427_s7 + $0x8] sm:$0xf] %v1424_v47  ;;  %v1410_v42 = vadd.f32 %v1404_v48, %v1369_v49 }
 0x165   : >> { %v1417_v50 = vadd.f32 %v1412_v16, %v1410_v42 }
 0x167   : >> { %v1421_v51 = vmax.f32 %v1417_v50, 0.0  ;;  %177 = sbr.rel (!%p175_p4) target bundleno = 15 (0xf), region = 104 }
 0x169   : >> { %v1425_v52 = vpack.c.bf16 %v1421_v51, %v1421_v51 }
 0x16b   : >> { %1431 = vst [vmem:[%s1427_s7 + $0xc] sm:$0x7] %v1425_v52 }
 0x16c PF: > { %s13_s12 = sadd.s32 1, %s1839_s12  }
 0x16d   : > { %p10_p5 = scmp.ge.s32.totalorder %s13_s12, 4  }
 0x16f   :  { %12 = sbr.rel (!%p10_p5) target bundleno = 1 (0x1), region = 115 }

// kernel: pilotnet_forward.9
= control target key start
LH: loop header
LB: loop body
LE: loop exit
PB: predicated region body
PF: predicated region fallthrough
CT: control target
= control target key end

     0   :  { %s1591_s12 = smov 0   ;;  %s1854_s0 = inlined_call_operand.vmem [shape: bf16[2,1,5,5,128], index: 0, kind: input, shape index: {}]   ;;  %s1855_s1 = inlined_call_operand.vmem [shape: bf16[9,128,128], index: 1, kind: input, shape index: {}]   ;;  %s1856_s2 = inlined_call_operand.vmem [shape: f32[1,128], index: 2, kind: input, shape index: {}]   ;;  %s1857_s3 = inlined_call_operand.vmem [shape: bf16[2,3,3,128], index: 3, kind: output, shape index: {}]  }
   0x1 LB: > { %s1032_s13 = sadd.s32 4294967295, %s1565_s12   ;;  %p1036_p0 = scmp.ge.s32.totalorder %s1565_s12, 1  ;;  %s1565_s12 = sphi %s1591_s12, %s13_s12  }
   0x2   : > { %p137_p1 = scmp.lt.s32.totalorder %s1565_s12, 3 }
   0x4   : > { %p138_p2 = pnand %p1036_p0, %p137_p1 }
   0x5   : > { %p161_p3 = scmp.lt.s32.totalorder (!%p138_p2), %s1032_s13, 1  ;;  %s1614_s24 = smov (!%p138_p2), 0  }
   0x6   : > { %141 = sbr.rel (%p138_p2) target bundleno = 248 (0xf8), region = 32 }
   0xb   : > { %v1602_v0 = vld [vmem:[%s1856_s2] sm:$0x1]  ;;  %s1859_s13 = smov (!%p161_p3, %s1032_s13), 1 }
   0xc   : > { %s1537_s16 = smul.u32 20, %s1859_s13 }
   0xd   : > { %s1538_s17 = smul.u32 6, %s1859_s13 }
   0xe   : > { %s1607_s20 = scalar_lea.vmem %s1854_s0, %s1537_s16 }
   0xf   : > { %s1612_s23 = scalar_lea.vmem %s1857_s3, %s1538_s17 }
  0x10 LB: >> { %v1480_v1 = vld [vmem:[%s1855_s1 + $0x78] sm:$0xff]  ;;  %v1479_v5 = vld [vmem:[%s1855_s1 + $0x70] sm:$0xff]  ;;  %v1478_v9 = vld [vmem:[%s1855_s1 + $0x68] sm:$0xff]  ;;  %s1039_s7 = sshll.u32 %s1569_s24, 2  ;;  %vm956_vm0 = vcmask 1041408   ;;  %s1569_s24 = sphi %s1614_s24, %s177_s24  }
  0x11   : >> { %v1488_v2 = vld [vmem:[%s1855_s1 + $0xb8] sm:$0xff]  ;;  %273 = vmatpush.bf16.msra.mxu0 %v1480_v1  ;;  %v1487_v6 = vld [vmem:[%s1855_s1 + $0xb0] sm:$0xff]  ;;  %v1486_v10 = vld [vmem:[%s1855_s1 + $0xa8] sm:$0xff]  ;;  %s1675_s13 = scalar_lea.vmem %s1607_s20, %s1039_s7  ;;  %vm957_vm1 = vsmask.f32 1280 }
  0x12   : >> { %v1496_v3 = vld [vmem:[%s1855_s1 + $0xf8] sm:$0xff]  ;;  %418 = vmatpush.bf16.msra.mxu2 %v1488_v2  ;;  %v1495_v7 = vld [vmem:[%s1855_s1 + $0xf0] sm:$0xff]  ;;  %v1494_v11 = vld [vmem:[%s1855_s1 + $0xe8] sm:$0xff] }
  0x13   : >> { %v1472_v4 = vld [vmem:[%s1855_s1 + $0x38] sm:$0xff]  ;;  %501 = vmatpush.bf16.msra.mxu3 %v1496_v3  ;;  %v1471_v8 = vld [vmem:[%s1855_s1 + $0x30] sm:$0xff]  ;;  %v1470_v12 = vld [vmem:[%s1855_s1 + $0x28] sm:$0xff] }
  0x14   : >> { %334 = vmatpush.bf16.msra.mxu1 %v1472_v4  ;;  %v1477_v13 = vld [vmem:[%s1855_s1 + $0x60] sm:$0xff]  ;;  %v1476_v17 = vld [vmem:[%s1855_s1 + $0x58] sm:$0xff]  ;;  %v1475_v22 = vld [vmem:[%s1855_s1 + $0x50] sm:$0xff] }
  0x15   : >> { %274 = vmatpush.bf16.msra.mxu0 %v1479_v5  ;;  %v1485_v14 = vld [vmem:[%s1855_s1 + $0xa0] sm:$0xff]  ;;  %v1484_v18 = vld [vmem:[%s1855_s1 + $0x98] sm:$0xff]  ;;  %v1483_v23 = vld [vmem:[%s1855_s1 + $0x90] sm:$0xff] }
  0x16   : >> { %419 = vmatpush.bf16.msra.mxu2 %v1487_v6  ;;  %v1493_v15 = vld [vmem:[%s1855_s1 + $0xe0] sm:$0xff]  ;;  %v1492_v19 = vld [vmem:[%s1855_s1 + $0xd8] sm:$0xff]  ;;  %v1491_v25 = vld [vmem:[%s1855_s1 + $0xd0] sm:$0xff] }
  0x17   : >> { %502 = vmatpush.bf16.msra.mxu3 %v1495_v7  ;;  %v1469_v16 = vld [vmem:[%s1855_s1 + $0x20] sm:$0xff]  ;;  %v1468_v20 = vld [vmem:[%s1855_s1 + $0x18] sm:$0xff]  ;;  %v1467_v26 = vld [vmem:[%s1855_s1 + $0x10] sm:$0xff] }
  0x18   : >> { %335 = vmatpush.bf16.msra.mxu1 %v1471_v8  ;;  %v180_v21 = vld [vmem:[%s1675_s13] sm:$0x3]  ;;  %v1474_v29 = vld [vmem:[%s1855_s1 + $0x48] sm:$0xff]  ;;  %v1504_v40 = vld [vmem:[%s1855_s1 + $0x138] sm:$0xff] }
  0x19   : >> { %275 = vmatpush.bf16.msra.mxu0 %v1478_v9  ;;  %v215_v24 = vunpack.c.l.b16 %v180_v21  ;;  %v347_v27 = vld [vmem:[%s1675_s13] sm:$0x6]  ;;  %v1482_v30 = vld [vmem:[%s1855_s1 + $0x88] sm:$0xff]  ;;  %v1520_v41 = vld [vmem:[%s1855_s1 + $0x1b8] sm:$0xff] }
  0x1a   : >> { %420 = vmatpush.bf16.msra.mxu2 %v1486_v10  ;;  %v366_v31 = vunpack.c.l.b16 %v347_v27  ;;  %v1490_v33 = vld [vmem:[%s1855_s1 + $0xc8] sm:$0xff]  ;;  %v1473_v35 = vld [vmem:[%s1855_s1 + $0x40] sm:$0xff]  ;;  %v1528_v44 = vld [vmem:[%s1855_s1 + $0x1f8] sm:$0xff] }
  0x1b   : >> { %503 = vmatpush.bf16.msra.mxu3 %v1494_v11  ;;  %v216_v28 = vpack.c.b16 %v215_v24, %v215_v24  ;;  %v1466_v34 = vld [vmem:[%s1855_s1 + $0x8] sm:$0xff]  ;;  %v1481_v36 = vld [vmem:[%s1855_s1 + $0x80] sm:$0xff]  ;;  %v1512_v45 = vld [vmem:[%s1855_s1 + $0x178] sm:$0xff] }
  0x1c   : >> { %336 = vmatpush.bf16.msra.mxu1 %v1470_v12  ;;  %v367_v37 = vpack.c.b16 %v366_v31, %v366_v31  ;;  %v1489_v42 = vld [vmem:[%s1855_s1 + $0xc0] sm:$0xff]  ;;  %v1503_v48 = vld [vmem:[%s1855_s1 + $0x130] sm:$0xff]  ;;  %v1502_v53 = vld [vmem:[%s1855_s1 + $0x128] sm:$0xff] }
  0x1d   : >> { %276 = vmatpush.bf16.msra.mxu0 %v1477_v13  ;;  %v220_v32 = vshll.u32 %v216_v28, 16  ;;  %v218_v38 = vshrl.u32 %v216_v28, 16  ;;  %v1465_v43 = vld [vmem:[%s1855_s1] sm:$0xff]  ;;  %v1519_v49 = vld [vmem:[%s1855_s1 + $0x1b0] sm:$0xff]  ;;  %v1518_v54 = vld [vmem:[%s1855_s1 + $0x1a8] sm:$0xff] }
  0x1e   : >> { %421 = vmatpush.bf16.msra.mxu2 %v1485_v14  ;;  %v368_v46 = vrot.slane %v367_v37, 1  ;;  %v1527_v50 = vld [vmem:[%s1855_s1 + $0x1f0] sm:$0xff]  ;;  %v1169_v52 = vld [vmem:[%s1675_s13 + $0x4] sm:$0x3]  ;;  %v1526_v55 = vld [vmem:[%s1855_s1 + $0x1e8] sm:$0xff] }
  0x1f   : >> { %504 = vmatpush.bf16.msra.mxu3 %v1493_v15  ;;  %v222_v39 = vrot.slane %v220_v32, 1  ;;  %v1511_v51 = vld [vmem:[%s1855_s1 + $0x170] sm:$0xff]  ;;  %v1510_v56 = vld [vmem:[%s1855_s1 + $0x168] sm:$0xff]  ;;  %v1501_v57 = vld [vmem:[%s1855_s1 + $0x120] sm:$0xff]  ;;  %v533_v62 = vunpack.c.l.b16 %v1169_v52 }
  0x20   : >> { %337 = vmatpush.bf16.msra.mxu1 %v1469_v16  ;;  %v1517_v58 = vld [vmem:[%s1855_s1 + $0x1a0] sm:$0xff]  ;;  %v1316_v61 = vld [vmem:[%s1675_s13 + $0x8] sm:$0x3]  ;;  %v1500_v63 = vld [vmem:[%s1855_s1 + $0x118] sm:$0xff] }
  0x21   : >> { %277 = vmatpush.bf16.msra.mxu0 %v1476_v17  ;;  %v223_v47 = vor.u32 %v222_v39, %v218_v38  ;;  %v1525_v59 = vld [vmem:[%s1855_s1 + $0x1e0] sm:$0xff]  ;;  %v1516_v1 = vld [vmem:[%s1855_s1 + $0x198] sm:$0xff]  ;;  %v791_v2 = vunpack.c.l.b16 %v1316_v61  ;;  %v534_v5 = vpack.c.b16 %v533_v62, %v533_v62  ;;  %v1499_v6 = vld [vmem:[%s1855_s1 + $0x110] sm:$0xff] }
  0x22   : >> { %422 = vmatpush.bf16.msra.mxu2 %v1484_v18  ;;  %v1509_v60 = vld [vmem:[%s1855_s1 + $0x160] sm:$0xff]  ;;  %v1524_v3 = vld [vmem:[%s1855_s1 + $0x1d8] sm:$0xff]  ;;  %v1515_v7 = vld [vmem:[%s1855_s1 + $0x190] sm:$0xff] }
  0x23   : >> { %505 = vmatpush.bf16.msra.mxu3 %v1492_v19  ;;  %v1508_v4 = vld [vmem:[%s1855_s1 + $0x158] sm:$0xff]  ;;  %v792_v8 = vpack.c.b16 %v791_v2, %v791_v2  ;;  %v1523_v9 = vld [vmem:[%s1855_s1 + $0x1d0] sm:$0xff]  ;;  %v538_v11 = vshll.u32 %v534_v5, 16  ;;  %v1266_v12 = vld [vmem:[%s1675_s13 + $0x4] sm:$0x6]  ;;  %v536_v19 = vshrl.u32 %v534_v5, 16 }
  0x24   : >> { %338 = vmatpush.bf16.msra.mxu1 %v1468_v20  ;;  %v1507_v10 = vld [vmem:[%s1855_s1 + $0x150] sm:$0xff]  ;;  %v1498_v13 = vld [vmem:[%s1855_s1 + $0x108] sm:$0xff]  ;;  %v624_v18 = vunpack.c.l.b16 %v1266_v12  ;;  %v1505_v27 = vld [vmem:[%s1855_s1 + $0x140] sm:$0xff] }
  0x25   : >> { %278 = vmatpush.bf16.msra.mxu0 %v1475_v22  ;;  %v1514_v14 = vld [vmem:[%s1855_s1 + $0x188] sm:$0xff]  ;;  %v796_v15 = vshll.u32 %v792_v8, 16  ;;  %v540_v20 = vrot.slane %v538_v11, 1  ;;  %v1513_v22 = vld [vmem:[%s1855_s1 + $0x180] sm:$0xff]  ;;  %v794_v24 = vshrl.u32 %v792_v8, 16  ;;  %vm958_vm2 = vmand %vm956_vm0, %vm957_vm1 }
  0x26   : >> { %423 = vmatpush.bf16.msra.mxu2 %v1483_v23  ;;  %v1522_v16 = vld [vmem:[%s1855_s1 + $0x1c8] sm:$0xff]  ;;  %v1536_v23 = vld [vmem:[%s1855_s1 + $0x238] sm:$0xff]  ;;  %v625_v28 = vpack.c.b16 %v624_v18, %v624_v18 }
  0x27   : >> { %506 = vmatpush.bf16.msra.mxu3 %v1491_v25  ;;  %v1506_v17 = vld [vmem:[%s1855_s1 + $0x148] sm:$0xff]  ;;  %v798_v25 = vrot.slane %v796_v15, 1 }
  0x28   : >> { %339 = vmatpush.bf16.msra.mxu1 %v1467_v26  ;;  %v1521_v26 = vld [vmem:[%s1855_s1 + $0x1c0] sm:$0xff]  ;;  %v626_v32 = vrot.slane %v625_v28, 1  ;;  %v1413_v37 = vld [vmem:[%s1675_s13 + $0x8] sm:$0x6]  ;;  %s1462_s13 = sshll.u32 %s1569_s24, 1  ;;  %s177_s24 = sadd.s32 1, %s1569_s24  }
  0x29   : >> { %279 = vmatpush.bf16.msra.mxu0 %v1474_v29  ;;  %v541_v29 = vor.u32 %v540_v20, %v536_v19  ;;  %v799_v31 = vor.u32 %v798_v25, %v794_v24  ;;  %v882_v38 = vunpack.c.l.b16 %v1413_v37  ;;  %v1530_v39 = vld [vmem:[%s1855_s1 + $0x208] sm:$0xff]  ;;  %s955_s10 = scalar_lea.vmem %s1612_s23, %s1462_s13  ;;  %p174_p4 = scmp.ge.s32.totalorder %s177_s24, 3  }
  0x2a   : >> { %424 = vmatpush.bf16.msra.mxu2 %v1482_v30  ;;  %v1535_v30 = vld [vmem:[%s1855_s1 + $0x230] sm:$0xff]  ;;  %v959_v8 = vld [vmem:[%s955_s10] sm:$0x3] }
  0x2b   : >> { %507 = vmatpush.bf16.msra.mxu3 %v1490_v33  ;;  %v1534_v33 = vld [vmem:[%s1855_s1 + $0x228] sm:$0xff] }
  0x2c   : >> { %340 = vmatpush.bf16.msra.mxu1 %v1466_v34  ;;  %v1533_v34 = vld [vmem:[%s1855_s1 + $0x220] sm:$0xff] }
  0x2d   : >> { %280 = vmatpush.bf16.msra.mxu0 %v1473_v35  ;;  %v1532_v35 = vld [vmem:[%s1855_s1 + $0x218] sm:$0xff] }
  0x2e   : >> { %425 = vmatpush.bf16.msra.mxu2 %v1481_v36  ;;  %v1531_v36 = vld [vmem:[%s1855_s1 + $0x210] sm:$0xff] }
  0x2f   : >> { %508 = vmatpush.bf16.msra.mxu3 %v1489_v42 }
  0x30   : >> { %341 = vmatpush.bf16.msra.mxu1 %v1465_v43  ;;  %281 = vmatmul.bf16.vlgmr.msra.gmra.mxu0 %v223_v47 }
  0x31   : >> { %591 = vmatpush.bf16.msrb.mxu0 %v1504_v40  ;;  %426 = vmatmul.bf16.vlgmr.msra.gmra.mxu2 %v368_v46  ;;  %v883_v40 = vpack.c.b16 %v882_v38, %v882_v38 }
  0x32   : >> { %759 = vmatpush.bf16.msrb.mxu2 %v1520_v41  ;;  %509 = vmatmul.bf16.vlgmr.msra.gmra.mxu3 %v1169_v52  ;;  %v1529_v41 = vld [vmem:[%s1855_s1 + $0x200] sm:$0xff] }
  0x33   : >> { %849 = vmatpush.bf16.msrb.mxu3 %v1528_v44  ;;  %342 = vmatmul.bf16.vlgmr.msra.gmra.mxu1 %v180_v21  ;;  %v1497_v21 = vld [vmem:[%s1855_s1 + $0x100] sm:$0xff]  ;;  %v884_v42 = vrot.slane %v883_v40, 1 }
  0x34   : >> { %676 = vmatpush.bf16.msrb.mxu1 %v1512_v45 }
  0x35   : >> { %592 = vmatpush.bf16.msrb.mxu0 %v1503_v48 }
  0x36   : >> { %760 = vmatpush.bf16.msrb.mxu2 %v1519_v49 }
  0x37   : >> { %850 = vmatpush.bf16.msrb.mxu3 %v1527_v50 }
  0x38   : >> { %677 = vmatpush.bf16.msrb.mxu1 %v1511_v51 }
  0x39   : >> { %593 = vmatpush.bf16.msrb.mxu0 %v1502_v53 }
  0x3a   : >> { %761 = vmatpush.bf16.msrb.mxu2 %v1518_v54 }
  0x3b   : >> { %851 = vmatpush.bf16.msrb.mxu3 %v1526_v55 }
  0x3c   : >> { %678 = vmatpush.bf16.msrb.mxu1 %v1510_v56 }
  0x3d   : >> { %594 = vmatpush.bf16.msrb.mxu0 %v1501_v57 }
  0x3e   : >> { %762 = vmatpush.bf16.msrb.mxu2 %v1517_v58 }
  0x3f   : >> { %852 = vmatpush.bf16.msrb.mxu3 %v1525_v59 }
  0x40   : >> { %679 = vmatpush.bf16.msrb.mxu1 %v1509_v60 }
  0x41   : >> { %595 = vmatpush.bf16.msrb.mxu0 %v1500_v63 }
  0x42   : >> { %763 = vmatpush.bf16.msrb.mxu2 %v1516_v1 }
  0x43   : >> { %853 = vmatpush.bf16.msrb.mxu3 %v1524_v3  ;;  %v949_v3 = vperm.slane %v1602_v0, 0 }
  0x44   : >> { %680 = vmatpush.bf16.msrb.mxu1 %v1508_v4 }
  0x45   : >> { %596 = vmatpush.bf16.msrb.mxu0 %v1499_v6 }
  0x46   : >> { %764 = vmatpush.bf16.msrb.mxu2 %v1515_v7 }
  0x47   : >> { %854 = vmatpush.bf16.msrb.mxu3 %v1523_v9 }
  0x48   : >> { %681 = vmatpush.bf16.msrb.mxu1 %v1507_v10 }
  0x49   : >> { %597 = vmatpush.bf16.msrb.mxu0 %v1498_v13 }
  0x4a   : >> { %765 = vmatpush.bf16.msrb.mxu2 %v1514_v14 }
  0x4b   : >> { %855 = vmatpush.bf16.msrb.mxu3 %v1522_v16 }
  0x4c   : >> { %682 = vmatpush.bf16.msrb.mxu1 %v1506_v17 }
  0x4d   : >> { %598 = vmatpush.bf16.msrb.mxu0 %v1497_v21 }
  0x4e   : >> { %766 = vmatpush.bf16.msrb.mxu2 %v1513_v22 }
  0x4f   : >> { %856 = vmatpush.bf16.msrb.mxu3 %v1521_v26 }
  0x50   : >> { %683 = vmatpush.bf16.msrb.mxu1 %v1505_v27  ;;  %599 = vmatmul.bf16.vlgmr.msrb.gmra.mxu0 %v541_v29 }
  0x51   : >> { %934 = vmatpush.bf16.msra.mxu0 %v1536_v23  ;;  %767 = vmatmul.bf16.vlgmr.msrb.gmra.mxu2 %v1316_v61 }
  0x52   : >> { %857 = vmatmul.bf16.vlgmr.msrb.gmra.mxu3 %v799_v31 }
  0x53   : >> { %684 = vmatmul.bf16.vlgmr.msrb.gmra.mxu1 %v626_v32 }
  0x55   : >> { %935 = vmatpush.bf16.msra.mxu0 %v1535_v30 }
  0x59   : >> { %936 = vmatpush.bf16.msra.mxu0 %v1534_v33 }
  0x5d   : >> { %937 = vmatpush.bf16.msra.mxu0 %v1533_v34 }
  0x61   : >> { %938 = vmatpush.bf16.msra.mxu0 %v1532_v35 }
  0x65   : >> { %939 = vmatpush.bf16.msra.mxu0 %v1531_v36 }
  0x69   : >> { %940 = vmatpush.bf16.msra.mxu0 %v1530_v39 }
  0x6d   : >> { %941 = vmatpush.bf16.msra.mxu0 %v1529_v41 }
  0x70   : >> { %942 = vmatmul.bf16.vlgmr.msra.gmra.mxu0 %v884_v42 }
  0xad   : >> { %v282_v43 = vpop.f32.mrf.mxu0 }
  0xb0   : >> { %v343_v44 = vpop.f32.mrf.mxu1 }
  0xb1   : >> { %v344_v53 = vadd.f32 %v343_v44, %v282_v43 }
  0xb4   : >> { %v427_v45 = vpop.f32.mrf.mxu2 }
  0xb5   : >> { %v510_v46 = vpop.f32.mrf.mxu3  ;;  %v284_v47 = vpop.f32.mrf.mxu0  ;;  %v431_v55 = vadd.f32 %v427_v45, %v344_v53 }
  0xb7   : >> { %v514_v59 = vadd.f32 %v510_v46, %v431_v55 }
  0xb8   : >> { %v345_v48 = vpop.f32.mrf.mxu1 }
  0xbc   : >> { %v429_v49 = vpop.f32.mrf.mxu2 }
  0xbd   : >> { %v512_v50 = vpop.f32.mrf.mxu3 }
  0xcd   : >> { %v600_v51 = vpop.f32.mrf.mxu0 }
  0xce   : >> { %v604_v61 = vadd.f32 %v600_v51, %v514_v59 }
  0xd0   : >> { %v685_v52 = vpop.f32.mrf.mxu1 }
  0xd1   : >> { %v689_v63 = vadd.f32 %v685_v52, %v604_v61 }
  0xd4   : >> { %v768_v54 = vpop.f32.mrf.mxu2 }
  0xd5   : >> { %v858_v56 = vpop.f32.mrf.mxu3  ;;  %v602_v57 = vpop.f32.mrf.mxu0  ;;  %v772_v1 = vadd.f32 %v768_v54, %v689_v63 }
  0xd7   : >> { %v862_v2 = vadd.f32 %v858_v56, %v772_v1 }
  0xd8   : >> { %v687_v58 = vpop.f32.mrf.mxu1 }
  0xdc   : >> { %v770_v60 = vpop.f32.mrf.mxu2 }
  0xdd   : >> { %v860_v62 = vpop.f32.mrf.mxu3 }
  0xed   : >> { %v943_v4 = vpop.f32.mrf.mxu0 }
  0xee   : >> { %v947_v5 = vadd.f32 %v943_v4, %v862_v2 }
  0xf0   : >> { %v951_v6 = vadd.f32 %v949_v3, %v947_v5 }
  0xf2   : >> { %v952_v7 = vmax.f32 %v951_v6, 0.0 }
  0xf3   : > { %176 = sbr.rel (!%p174_p4) target bundleno = 16 (0x10), region = 81 }
  0xf4   : >> { %v953_v9 = vpack.c.bf16 %v952_v7, %v952_v7 }
  0xf5   : >> { %v945_v10 = vpop.f32.mrf.mxu0 }
  0xf6   : >> { %v960_v11 = vsel %vm958_vm2, %v953_v9, %v959_v8 }
  0xf7   : >> { %961 = vst [vmem:[%s955_s10] sm:$0x3] %v960_v11 }
  0xf8 PF: > { %s13_s12 = sadd.s32 1, %s1565_s12  }
  0xf9   : > { %p10_p5 = scmp.ge.s32.totalorder %s13_s12, 4  }
  0xfb   :  { %12 = sbr.rel (!%p10_p5) target bundleno = 1 (0x1), region = 92 }

// kernel: pilotnet_forward.10
= control target key start
LH: loop header
LB: loop body
LE: loop exit
PB: predicated region body
PF: predicated region fallthrough
CT: control target
= control target key end

     0   :  { %s1513_s12 = smov 0   ;;  %s1761_s0 = inlined_call_operand.vmem [shape: bf16[2,1,3,3,128], index: 0, kind: input, shape index: {}]   ;;  %s1762_s1 = inlined_call_operand.vmem [shape: bf16[9,128,128], index: 1, kind: input, shape index: {}]   ;;  %s1763_s2 = inlined_call_operand.vmem [shape: f32[1,128], index: 2, kind: input, shape index: {}]   ;;  %s1764_s3 = inlined_call_operand.vmem [shape: bf16[2,1,1,128], index: 3, kind: output, shape index: {}]  }
   0x1 LB: > { %s976_s13 = sadd.s32 4294967295, %s1491_s12   ;;  %p980_p0 = scmp.ge.s32.totalorder %s1491_s12, 1  ;;  %s1491_s12 = sphi %s1513_s12, %s13_s12  }
   0x2   : > { %p137_p1 = scmp.lt.s32.totalorder %s1491_s12, 3 }
   0x4   : > { %p138_p2 = pnand %p980_p0, %p137_p1 }
   0x5   : > { %p159_p3 = scmp.lt.s32.totalorder (!%p138_p2), %s976_s13, 1 }
   0x6   : > { %141 = sbr.rel (%p138_p2) target bundleno = 243 (0xf3), region = 32 }
   0xb   : > { %v1419_v0 = vld [vmem:[%s1762_s1 + $0x78] sm:$0xff]  ;;  %v1418_v4 = vld [vmem:[%s1762_s1 + $0x70] sm:$0xff]  ;;  %s1766_s13 = smov (!%p159_p3, %s976_s13), 1  ;;  %v1417_v8 = vld [vmem:[%s1762_s1 + $0x68] sm:$0xff]  ;;  %vm923_vm0 = vcmask 1040384  }
   0xc   : > { %v1427_v1 = vld [vmem:[%s1762_s1 + $0xb8] sm:$0xff]  ;;  %256 = vmatpush.bf16.msra.mxu0 %v1419_v0  ;;  %v1426_v5 = vld [vmem:[%s1762_s1 + $0xb0] sm:$0xff]  ;;  %v1425_v9 = vld [vmem:[%s1762_s1 + $0xa8] sm:$0xff]  ;;  %s1476_s11 = smul.u32 6, %s1766_s13  ;;  %s166_s19 = scalar_lea.vmem %s1764_s3, %s1766_s13  ;;  %vm924_vm1 = vsmask.f32 256 }
   0xd   : > { %v1435_v2 = vld [vmem:[%s1762_s1 + $0xf8] sm:$0xff]  ;;  %402 = vmatpush.bf16.msra.mxu2 %v1427_v1  ;;  %v1434_v6 = vld [vmem:[%s1762_s1 + $0xf0] sm:$0xff]  ;;  %v1433_v10 = vld [vmem:[%s1762_s1 + $0xe8] sm:$0xff] }
   0xe   : > { %v1411_v3 = vld [vmem:[%s1762_s1 + $0x38] sm:$0xff]  ;;  %483 = vmatpush.bf16.msra.mxu3 %v1435_v2  ;;  %v1410_v7 = vld [vmem:[%s1762_s1 + $0x30] sm:$0xff]  ;;  %v1409_v11 = vld [vmem:[%s1762_s1 + $0x28] sm:$0xff]  ;;  %s1575_s24 = scalar_lea.vmem %s1761_s0, %s1476_s11 }
   0xf   : > { %317 = vmatpush.bf16.msra.mxu1 %v1411_v3  ;;  %v1416_v12 = vld [vmem:[%s1762_s1 + $0x60] sm:$0xff]  ;;  %v1415_v16 = vld [vmem:[%s1762_s1 + $0x58] sm:$0xff]  ;;  %v1414_v21 = vld [vmem:[%s1762_s1 + $0x50] sm:$0xff] }
  0x10   : > { %257 = vmatpush.bf16.msra.mxu0 %v1418_v4  ;;  %v1424_v13 = vld [vmem:[%s1762_s1 + $0xa0] sm:$0xff]  ;;  %v1423_v17 = vld [vmem:[%s1762_s1 + $0x98] sm:$0xff]  ;;  %v1422_v22 = vld [vmem:[%s1762_s1 + $0x90] sm:$0xff] }
  0x11   : > { %403 = vmatpush.bf16.msra.mxu2 %v1426_v5  ;;  %v1432_v14 = vld [vmem:[%s1762_s1 + $0xe0] sm:$0xff]  ;;  %v1431_v18 = vld [vmem:[%s1762_s1 + $0xd8] sm:$0xff]  ;;  %v1430_v23 = vld [vmem:[%s1762_s1 + $0xd0] sm:$0xff] }
  0x12   : > { %484 = vmatpush.bf16.msra.mxu3 %v1434_v6  ;;  %v1408_v15 = vld [vmem:[%s1762_s1 + $0x20] sm:$0xff]  ;;  %v1407_v19 = vld [vmem:[%s1762_s1 + $0x18] sm:$0xff]  ;;  %v1406_v24 = vld [vmem:[%s1762_s1 + $0x10] sm:$0xff] }
  0x13   : > { %318 = vmatpush.bf16.msra.mxu1 %v1410_v7  ;;  %v168_v20 = vld [vmem:[%s1575_s24] sm:$0x1]  ;;  %v330_v25 = vld [vmem:[%s1575_s24] sm:$0x2]  ;;  %v1413_v26 = vld [vmem:[%s1762_s1 + $0x48] sm:$0xff] }
  0x14   : > { %258 = vmatpush.bf16.msra.mxu0 %v1417_v8  ;;  %203 = vst [vmem:[#allocation1] ss:$4 sm:$0xff] %v168_v20  ;;  %v1421_v27 = vld [vmem:[%s1762_s1 + $0x88] sm:$0xff]  ;;  %v1412_v31 = vld [vmem:[%s1762_s1 + $0x40] sm:$0xff]  ;;  %v1443_v33 = vld [vmem:[%s1762_s1 + $0x138] sm:$0xff] }
  0x15   : > { %404 = vmatpush.bf16.msra.mxu2 %v1425_v9  ;;  %v1429_v28 = vld [vmem:[%s1762_s1 + $0xc8] sm:$0xff]  ;;  %v1420_v32 = vld [vmem:[%s1762_s1 + $0x80] sm:$0xff]  ;;  %v1459_v34 = vld [vmem:[%s1762_s1 + $0x1b8] sm:$0xff] }
  0x16   : > { %485 = vmatpush.bf16.msra.mxu3 %v1433_v10  ;;  %v1405_v29 = vld [vmem:[%s1762_s1 + $0x8] sm:$0xff]  ;;  %v1428_v35 = vld [vmem:[%s1762_s1 + $0xc0] sm:$0xff]  ;;  %v1467_v37 = vld [vmem:[%s1762_s1 + $0x1f8] sm:$0xff] }
  0x17   : > { %319 = vmatpush.bf16.msra.mxu1 %v1409_v11  ;;  %v1404_v36 = vld [vmem:[%s1762_s1] sm:$0xff]  ;;  %v1451_v38 = vld [vmem:[%s1762_s1 + $0x178] sm:$0xff]  ;;  %v1442_v41 = vld [vmem:[%s1762_s1 + $0x130] sm:$0xff] }
  0x18   : > { %259 = vmatpush.bf16.msra.mxu0 %v1416_v12  ;;  %v1110_v39 = vld [vmem:[%s1575_s24 + $0x2] sm:$0x1]  ;;  %v1458_v42 = vld [vmem:[%s1762_s1 + $0x1b0] sm:$0xff]  ;;  %v1441_v47 = vld [vmem:[%s1762_s1 + $0x128] sm:$0xff] }
  0x19   : > { %405 = vmatpush.bf16.msra.mxu2 %v1424_v13  ;;  %v1466_v45 = vld [vmem:[%s1762_s1 + $0x1f0] sm:$0xff]  ;;  %v1457_v48 = vld [vmem:[%s1762_s1 + $0x1a8] sm:$0xff]  ;;  %v1207_v51 = vld [vmem:[%s1575_s24 + $0x2] sm:$0x2] }
  0x1a   : > { %486 = vmatpush.bf16.msra.mxu3 %v1432_v14  ;;  %v1450_v46 = vld [vmem:[%s1762_s1 + $0x170] sm:$0xff]  ;;  %v1465_v49 = vld [vmem:[%s1762_s1 + $0x1e8] sm:$0xff]  ;;  %v1440_v52 = vld [vmem:[%s1762_s1 + $0x120] sm:$0xff] }
  0x1b   : > { %320 = vmatpush.bf16.msra.mxu1 %v1408_v15  ;;  %v204_v30 = vld.sshfl [vmem:[#allocation1] sm:$0xff pattern:$0x73625140]  ;;  %v1449_v50 = vld [vmem:[%s1762_s1 + $0x168] sm:$0xff]  ;;  %v1439_v57 = vld [vmem:[%s1762_s1 + $0x118] sm:$0xff] }
  0x1c   : > { %260 = vmatpush.bf16.msra.mxu0 %v1415_v16  ;;  %349 = vst [vmem:[#allocation1] ss:$4 sm:$0xff] %v330_v25  ;;  %v205_v40 = vshrl.u32 %v204_v30, 16  ;;  %v1456_v53 = vld [vmem:[%s1762_s1 + $0x1a0] sm:$0xff]  ;;  %v1455_v58 = vld [vmem:[%s1762_s1 + $0x198] sm:$0xff]  ;;  %v1438_v62 = vld [vmem:[%s1762_s1 + $0x110] sm:$0xff] }
  0x1d   : > { %406 = vmatpush.bf16.msra.mxu2 %v1423_v17  ;;  %v1464_v55 = vld [vmem:[%s1762_s1 + $0x1e0] sm:$0xff]  ;;  %v1463_v59 = vld [vmem:[%s1762_s1 + $0x1d8] sm:$0xff]  ;;  %v1454_v63 = vld [vmem:[%s1762_s1 + $0x190] sm:$0xff] }
  0x1e   : > { %487 = vmatpush.bf16.msra.mxu3 %v1431_v18  ;;  %v1448_v56 = vld [vmem:[%s1762_s1 + $0x160] sm:$0xff]  ;;  %v1447_v60 = vld [vmem:[%s1762_s1 + $0x158] sm:$0xff]  ;;  %v1462_v1 = vld [vmem:[%s1762_s1 + $0x1d0] sm:$0xff] }
  0x1f   : > { %321 = vmatpush.bf16.msra.mxu1 %v1407_v19  ;;  %v1256_v61 = vld [vmem:[%s1575_s24 + $0x4] sm:$0x1]  ;;  %v1446_v2 = vld [vmem:[%s1762_s1 + $0x150] sm:$0xff]  ;;  %v1437_v3 = vld [vmem:[%s1762_s1 + $0x108] sm:$0xff] }
  0x20   : > { %261 = vmatpush.bf16.msra.mxu0 %v1414_v21  ;;  %v1453_v4 = vld [vmem:[%s1762_s1 + $0x188] sm:$0xff]  ;;  %v1353_v7 = vld [vmem:[%s1575_s24 + $0x4] sm:$0x2]  ;;  %v1475_v11 = vld [vmem:[%s1762_s1 + $0x238] sm:$0xff] }
  0x21   : > { %407 = vmatpush.bf16.msra.mxu2 %v1422_v22  ;;  %v1461_v5 = vld [vmem:[%s1762_s1 + $0x1c8] sm:$0xff]  ;;  %v1436_v8 = vld [vmem:[%s1762_s1 + $0x100] sm:$0xff]  ;;  %v1474_v15 = vld [vmem:[%s1762_s1 + $0x230] sm:$0xff] }
  0x22   : > { %488 = vmatpush.bf16.msra.mxu3 %v1430_v23  ;;  %v1445_v6 = vld [vmem:[%s1762_s1 + $0x148] sm:$0xff]  ;;  %v1452_v9 = vld [vmem:[%s1762_s1 + $0x180] sm:$0xff]  ;;  %v1470_v21 = vld [vmem:[%s1762_s1 + $0x210] sm:$0xff] }
  0x23   : > { %322 = vmatpush.bf16.msra.mxu1 %v1406_v24  ;;  %v350_v43 = vld.sshfl [vmem:[#allocation1] sm:$0xff pattern:$0x73625140]  ;;  %v1473_v18 = vld [vmem:[%s1762_s1 + $0x228] sm:$0xff]  ;;  %vm925_vm2 = vmand %vm923_vm0, %vm924_vm1 }
  0x24   : > { %262 = vmatpush.bf16.msra.mxu0 %v1413_v26  ;;  %v352_v44 = vrot.slane %v350_v43, 1  ;;  %515 = vst [vmem:[#allocation1] ss:$4 sm:$0xff] %v1110_v39  ;;  %v1460_v12 = vld [vmem:[%s1762_s1 + $0x1c0] sm:$0xff]  ;;  %v1469_v22 = vld [vmem:[%s1762_s1 + $0x208] sm:$0xff] }
  0x25   : > { %408 = vmatpush.bf16.msra.mxu2 %v1421_v27  ;;  %v1444_v13 = vld [vmem:[%s1762_s1 + $0x140] sm:$0xff] }
  0x26   : > { %489 = vmatpush.bf16.msra.mxu3 %v1429_v28  ;;  %v1472_v19 = vld [vmem:[%s1762_s1 + $0x220] sm:$0xff] }
  0x27   : > { %323 = vmatpush.bf16.msra.mxu1 %v1405_v29  ;;  %v1468_v23 = vld [vmem:[%s1762_s1 + $0x200] sm:$0xff] }
  0x28   : > { %263 = vmatpush.bf16.msra.mxu0 %v1412_v31 }
  0x29   : > { %409 = vmatpush.bf16.msra.mxu2 %v1420_v32 }
  0x2a   : > { %490 = vmatpush.bf16.msra.mxu3 %v1428_v35 }
  0x2b   : > { %324 = vmatpush.bf16.msra.mxu1 %v1404_v36  ;;  %264 = vmatmul.bf16.vlgmr.msra.gmra.mxu0 %v205_v40  ;;  %v516_v54 = vld.sshfl [vmem:[#allocation1] sm:$0xff pattern:$0x73625140] }
  0x2c   : > { %568 = vmatpush.bf16.msrb.mxu0 %v1443_v33  ;;  %410 = vmatmul.bf16.vlgmr.msra.gmra.mxu2 %v352_v44  ;;  %601 = vst [vmem:[#allocation1] ss:$4 sm:$0xff] %v1207_v51  ;;  %v517_v14 = vshrl.u32 %v516_v54, 16  ;;  %v926_v54 = vld [vmem:[%s166_s19] sm:$0x1] }
  0x2d   : > { %735 = vmatpush.bf16.msrb.mxu2 %v1459_v34  ;;  %491 = vmatmul.bf16.vlgmr.msra.gmra.mxu3 %v1110_v39 }
  0x2e   : > { %820 = vmatpush.bf16.msrb.mxu3 %v1467_v37  ;;  %325 = vmatmul.bf16.vlgmr.msra.gmra.mxu1 %v168_v20  ;;  %v1471_v20 = vld [vmem:[%s1762_s1 + $0x218] sm:$0xff] }
  0x2f   : > { %654 = vmatpush.bf16.msrb.mxu1 %v1451_v38 }
  0x30   : > { %569 = vmatpush.bf16.msrb.mxu0 %v1442_v41 }
  0x31   : > { %736 = vmatpush.bf16.msrb.mxu2 %v1458_v42 }
  0x32   : > { %821 = vmatpush.bf16.msrb.mxu3 %v1466_v45 }
  0x33   : > { %655 = vmatpush.bf16.msrb.mxu1 %v1450_v46  ;;  %v602_v0 = vld.sshfl [vmem:[#allocation1] sm:$0xff pattern:$0x73625140] }
  0x34   : > { %570 = vmatpush.bf16.msrb.mxu0 %v1441_v47  ;;  %767 = vst [vmem:[#allocation1] ss:$4 sm:$0xff] %v1256_v61  ;;  %v604_v17 = vrot.slane %v602_v0, 1 }
  0x35   : > { %737 = vmatpush.bf16.msrb.mxu2 %v1457_v48 }
  0x36   : > { %822 = vmatpush.bf16.msrb.mxu3 %v1465_v49  ;;  %v167_v49 = vld [vmem:[%s1763_s2] sm:$0x1] }
  0x37   : > { %656 = vmatpush.bf16.msrb.mxu1 %v1449_v50 }
  0x38   : > { %571 = vmatpush.bf16.msrb.mxu0 %v1440_v52 }
  0x39   : > { %738 = vmatpush.bf16.msrb.mxu2 %v1456_v53 }
  0x3a   : > { %823 = vmatpush.bf16.msrb.mxu3 %v1464_v55 }
  0x3b   : > { %657 = vmatpush.bf16.msrb.mxu1 %v1448_v56  ;;  %v768_v10 = vld.sshfl [vmem:[#allocation1] sm:$0xff pattern:$0x73625140] }
  0x3c   : > { %572 = vmatpush.bf16.msrb.mxu0 %v1439_v57  ;;  %853 = vst [vmem:[#allocation1] ss:$4 sm:$0xff] %v1353_v7  ;;  %v769_v16 = vshrl.u32 %v768_v10, 16 }
  0x3d   : > { %739 = vmatpush.bf16.msrb.mxu2 %v1455_v58 }
  0x3e   : > { %824 = vmatpush.bf16.msrb.mxu3 %v1463_v59 }
  0x3f   : > { %658 = vmatpush.bf16.msrb.mxu1 %v1447_v60 }
  0x40   : > { %573 = vmatpush.bf16.msrb.mxu0 %v1438_v62 }
  0x41   : > { %740 = vmatpush.bf16.msrb.mxu2 %v1454_v63 }
  0x42   : > { %825 = vmatpush.bf16.msrb.mxu3 %v1462_v1 }
  0x43   : > { %659 = vmatpush.bf16.msrb.mxu1 %v1446_v2  ;;  %v854_v24 = vld.sshfl [vmem:[#allocation1] sm:$0xff pattern:$0x73625140] }
  0x44   : > { %574 = vmatpush.bf16.msrb.mxu0 %v1437_v3  ;;  %v856_v25 = vrot.slane %v854_v24, 1 }
  0x45   : > { %741 = vmatpush.bf16.msrb.mxu2 %v1453_v4 }
  0x46   : > { %826 = vmatpush.bf16.msrb.mxu3 %v1461_v5 }
  0x47   : > { %660 = vmatpush.bf16.msrb.mxu1 %v1445_v6 }
  0x48   : > { %575 = vmatpush.bf16.msrb.mxu0 %v1436_v8 }
  0x49   : > { %742 = vmatpush.bf16.msrb.mxu2 %v1452_v9 }
  0x4a   : > { %827 = vmatpush.bf16.msrb.mxu3 %v1460_v12 }
  0x4b   : > { %661 = vmatpush.bf16.msrb.mxu1 %v1444_v13  ;;  %576 = vmatmul.bf16.vlgmr.msrb.gmra.mxu0 %v517_v14 }
  0x4c   : > { %906 = vmatpush.bf16.msra.mxu0 %v1475_v11  ;;  %743 = vmatmul.bf16.vlgmr.msrb.gmra.mxu2 %v1256_v61 }
  0x4d   : > { %828 = vmatmul.bf16.vlgmr.msrb.gmra.mxu3 %v769_v16 }
  0x4e   : > { %662 = vmatmul.bf16.vlgmr.msrb.gmra.mxu1 %v604_v17 }
  0x50   : > { %907 = vmatpush.bf16.msra.mxu0 %v1474_v15 }
  0x54   : > { %908 = vmatpush.bf16.msra.mxu0 %v1473_v18 }
  0x58   : > { %909 = vmatpush.bf16.msra.mxu0 %v1472_v19 }
  0x5c   : > { %910 = vmatpush.bf16.msra.mxu0 %v1471_v20 }
  0x60   : > { %911 = vmatpush.bf16.msra.mxu0 %v1470_v21 }
  0x64   : > { %912 = vmatpush.bf16.msra.mxu0 %v1469_v22 }
  0x68   : > { %913 = vmatpush.bf16.msra.mxu0 %v1468_v23 }
  0x6b   : > { %914 = vmatmul.bf16.vlgmr.msra.gmra.mxu0 %v856_v25 }
  0xa8   : > { %v265_v26 = vpop.f32.mrf.mxu0 }
  0xab   : > { %v326_v27 = vpop.f32.mrf.mxu1 }
  0xac   : > { %v327_v36 = vadd.f32 %v326_v27, %v265_v26 }
  0xaf   : > { %v411_v28 = vpop.f32.mrf.mxu2 }
  0xb0   : > { %v492_v29 = vpop.f32.mrf.mxu3  ;;  %v267_v30 = vpop.f32.mrf.mxu0  ;;  %v415_v38 = vadd.f32 %v411_v28, %v327_v36 }
  0xb2   : > { %v496_v42 = vadd.f32 %v492_v29, %v415_v38 }
  0xb3   : > { %v328_v31 = vpop.f32.mrf.mxu1 }
  0xb7   : > { %v413_v32 = vpop.f32.mrf.mxu2 }
  0xb8   : > { %v494_v33 = vpop.f32.mrf.mxu3 }
  0xc8   : > { %v577_v34 = vpop.f32.mrf.mxu0 }
  0xc9   : > { %v581_v44 = vadd.f32 %v577_v34, %v496_v42 }
  0xcb   : > { %v663_v35 = vpop.f32.mrf.mxu1 }
  0xcc   : > { %v667_v46 = vadd.f32 %v663_v35, %v581_v44 }
  0xcf   : > { %v744_v37 = vpop.f32.mrf.mxu2 }
  0xd0   : > { %v829_v39 = vpop.f32.mrf.mxu3  ;;  %v579_v40 = vpop.f32.mrf.mxu0  ;;  %v748_v47 = vadd.f32 %v744_v37, %v667_v46 }
  0xd2   : > { %v833_v48 = vadd.f32 %v829_v39, %v748_v47 }
  0xd3   : > { %v665_v41 = vpop.f32.mrf.mxu1 }
  0xd7   : > { %v746_v43 = vpop.f32.mrf.mxu2 }
  0xd8   : > { %v831_v45 = vpop.f32.mrf.mxu3 }
  0xe8   : > { %v915_v50 = vpop.f32.mrf.mxu0 }
  0xe9   : > { %v919_v51 = vadd.f32 %v915_v50, %v833_v48 }
  0xeb   : > { %v920_v52 = vadd.f32 %v919_v51, %v167_v49 }
  0xed   : > { %v921_v53 = vmax.f32 %v920_v52, 0.0 }
  0xef   : > { %v922_v55 = vpack.c.bf16 %v921_v53, %v921_v53 }
  0xf0   : > { %v917_v56 = vpop.f32.mrf.mxu0 }
  0xf1   : > { %v927_v57 = vsel %vm925_vm2, %v922_v55, %v926_v54 }
  0xf2   : > { %928 = vst [vmem:[%s166_s19] sm:$0x1] %v927_v57 }
  0xf3 PF: > { %s13_s12 = sadd.s32 1, %s1491_s12  }
  0xf4   : > { %p10_p4 = scmp.ge.s32.totalorder %s13_s12, 4  }
  0xf6   :  { %12 = sbr.rel (!%p10_p4) target bundleno = 1 (0x1), region = 72 }

// kernel: pilotnet_forward.7
= control target key start
LH: loop header
LB: loop body
LE: loop exit
PB: predicated region body
PF: predicated region fallthrough
CT: control target
= control target key end

     0   :  { %s4127_s12 = smov 0   ;;  %s4821_s0 = inlined_call_operand.vmem [shape: bf16[2,4,15,15,128], index: 0, kind: input, shape index: {}]   ;;  %s4822_s1 = inlined_call_operand.vmem [shape: bf16[25,128,128], index: 1, kind: input, shape index: {}]   ;;  %s4823_s2 = inlined_call_operand.vmem [shape: f32[1,128], index: 2, kind: input, shape index: {}]   ;;  %s4824_s3 = inlined_call_operand.vmem [shape: bf16[2,13,13,128], index: 3, kind: output, shape index: {}]  }
   0x1 LB: > { %s2551_s13 = sadd.s32 4294967295, %s4101_s12   ;;  %p2555_p0 = scmp.ge.s32.totalorder %s4101_s12, 1  ;;  %s4101_s12 = sphi %s4127_s12, %s13_s12  }
   0x2   : > { %p137_p1 = scmp.lt.s32.totalorder %s4101_s12, 3 }
   0x4   : > { %p138_p2 = pnand %p2555_p0, %p137_p1 }
   0x5   : > { %p161_p3 = scmp.lt.s32.totalorder (!%p138_p2), %s2551_s13, 1  ;;  %s4150_s24 = smov (!%p138_p2), 0  }
   0x6   : > { %141 = sbr.rel (%p138_p2) target bundleno = 384 (0x180), region = 32 }
   0xb   : > { %v4138_v0 = vld [vmem:[%s4823_s2] sm:$0x1]  ;;  %s4826_s13 = smov (!%p161_p3, %s2551_s13), 1 }
   0xc   : > { %s4073_s16 = smul.u32 480, %s4826_s13 }
   0xd   : > { %s4074_s17 = smul.u32 104, %s4826_s13 }
   0xe   : > { %s4143_s20 = scalar_lea.vmem %s4821_s0, %s4073_s16 }
   0xf   : > { %s4148_s23 = scalar_lea.vmem %s4824_s3, %s4074_s17 }
  0x10 LB: >> { %v3868_v1 = vld [vmem:[%s4822_s1 + $0x78] sm:$0xff]  ;;  %v3867_v5 = vld [vmem:[%s4822_s1 + $0x70] sm:$0xff]  ;;  %v3866_v9 = vld [vmem:[%s4822_s1 + $0x68] sm:$0xff]  ;;  %s3849_s30 = sshll.u32 %s4105_s24, 3  ;;  %vm2447_vm0 = vcmask 1042432   ;;  %s177_s24 = sadd.s32 1, %s4105_s24   ;;  %s4105_s24 = sphi %s4150_s24, %s177_s24  }
  0x11   : >> { %v3876_v2 = vld [vmem:[%s4822_s1 + $0xb8] sm:$0xff]  ;;  %275 = vmatpush.bf16.msra.mxu0 %v3868_v1  ;;  %v3875_v6 = vld [vmem:[%s4822_s1 + $0xb0] sm:$0xff]  ;;  %v3874_v10 = vld [vmem:[%s4822_s1 + $0xa8] sm:$0xff]  ;;  %s4207_s8 = scalar_lea.vmem %s4143_s20, %s3849_s30  ;;  %vm2448_vm1 = vsmask.f32 2304  ;;  %p174_p4 = scmp.ge.s32.totalorder %s177_s24, 13  }
  0x12   : >> { %v3858_v3 = vld [vmem:[%s4822_s1 + $0x38] sm:$0xff]  ;;  %430 = vmatpush.bf16.msra.mxu2 %v3876_v2  ;;  %v3857_v7 = vld [vmem:[%s4822_s1 + $0x30] sm:$0xff]  ;;  %v3856_v11 = vld [vmem:[%s4822_s1 + $0x28] sm:$0xff] }
  0x13   : >> { %v3884_v4 = vld [vmem:[%s4822_s1 + $0xf8] sm:$0xff]  ;;  %343 = vmatpush.bf16.msra.mxu1 %v3858_v3  ;;  %v3883_v8 = vld [vmem:[%s4822_s1 + $0xf0] sm:$0xff]  ;;  %v3882_v12 = vld [vmem:[%s4822_s1 + $0xe8] sm:$0xff] }
  0x14   : >> { %519 = vmatpush.bf16.msra.mxu3 %v3884_v4  ;;  %v3865_v13 = vld [vmem:[%s4822_s1 + $0x60] sm:$0xff]  ;;  %v3864_v17 = vld [vmem:[%s4822_s1 + $0x58] sm:$0xff]  ;;  %v3863_v25 = vld [vmem:[%s4822_s1 + $0x50] sm:$0xff] }
  0x15   : >> { %276 = vmatpush.bf16.msra.mxu0 %v3867_v5  ;;  %v3873_v14 = vld [vmem:[%s4822_s1 + $0xa0] sm:$0xff]  ;;  %v3872_v18 = vld [vmem:[%s4822_s1 + $0x98] sm:$0xff]  ;;  %v3871_v26 = vld [vmem:[%s4822_s1 + $0x90] sm:$0xff] }
  0x16   : >> { %431 = vmatpush.bf16.msra.mxu2 %v3875_v6  ;;  %v3855_v15 = vld [vmem:[%s4822_s1 + $0x20] sm:$0xff]  ;;  %v3854_v19 = vld [vmem:[%s4822_s1 + $0x18] sm:$0xff]  ;;  %v3853_v28 = vld [vmem:[%s4822_s1 + $0x10] sm:$0xff] }
  0x17   : >> { %344 = vmatpush.bf16.msra.mxu1 %v3857_v7  ;;  %v3881_v16 = vld [vmem:[%s4822_s1 + $0xe0] sm:$0xff]  ;;  %v3880_v20 = vld [vmem:[%s4822_s1 + $0xd8] sm:$0xff]  ;;  %v3879_v29 = vld [vmem:[%s4822_s1 + $0xd0] sm:$0xff] }
  0x18   : >> { %520 = vmatpush.bf16.msra.mxu3 %v3883_v8  ;;  %v2618_v21 = vld [vmem:[%s4207_s8] sm:$0xf]  ;;  %v2582_v22 = vld [vmem:[%s4207_s8 + $0x78] sm:$0xf]  ;;  %v3860_v23 = vld [vmem:[%s4207_s8 + $0x78] sm:$0x70] }
  0x19   : >> { %277 = vmatpush.bf16.msra.mxu0 %v3866_v9  ;;  %v3850_v24 = vld [vmem:[%s4207_s8] sm:$0x70]  ;;  %v2583_v30 = vor.u32 %v3860_v23, %v2582_v22  ;;  %v3862_v31 = vld [vmem:[%s4822_s1 + $0x48] sm:$0xff]  ;;  %v3893_v41 = vld [vmem:[%s4822_s1 + $0x138] sm:$0xff] }
  0x1a   : >> { %432 = vmatpush.bf16.msra.mxu2 %v3874_v10  ;;  %v2619_v27 = vor.u32 %v3850_v24, %v2618_v21  ;;  %v3870_v32 = vld [vmem:[%s4822_s1 + $0x88] sm:$0xff]  ;;  %v3861_v37 = vld [vmem:[%s4822_s1 + $0x40] sm:$0xff]  ;;  %v3913_v42 = vld [vmem:[%s4822_s1 + $0x1b8] sm:$0xff] }
  0x1b   : >> { %345 = vmatpush.bf16.msra.mxu1 %v3856_v11  ;;  %v3852_v34 = vld [vmem:[%s4822_s1 + $0x8] sm:$0xff]  ;;  %v466_v36 = vshll.u32 %v2583_v30, 16  ;;  %v3869_v38 = vld [vmem:[%s4822_s1 + $0x80] sm:$0xff]  ;;  %v464_v45 = vshrl.u32 %v2583_v30, 16  ;;  %v3903_v47 = vld [vmem:[%s4822_s1 + $0x178] sm:$0xff] }
  0x1c   : >> { %521 = vmatpush.bf16.msra.mxu3 %v3882_v12  ;;  %v377_v33 = vshll.u32 %v2619_v27, 16  ;;  %v3878_v35 = vld [vmem:[%s4822_s1 + $0xc8] sm:$0xff]  ;;  %v375_v39 = vshrl.u32 %v2619_v27, 16  ;;  %v3851_v43 = vld [vmem:[%s4822_s1] sm:$0xff]  ;;  %v3921_v48 = vld [vmem:[%s4822_s1 + $0x1f8] sm:$0xff] }
  0x1d   : >> { %278 = vmatpush.bf16.msra.mxu0 %v3865_v13  ;;  %v3877_v44 = vld [vmem:[%s4822_s1 + $0xc0] sm:$0xff]  ;;  %v468_v46 = vrot.slane %v466_v36, 1  ;;  %v3892_v50 = vld [vmem:[%s4822_s1 + $0x130] sm:$0xff]  ;;  %v3891_v55 = vld [vmem:[%s4822_s1 + $0x128] sm:$0xff] }
  0x1e   : >> { %433 = vmatpush.bf16.msra.mxu2 %v3873_v14  ;;  %v379_v40 = vrot.slane %v377_v33, 1  ;;  %v3912_v51 = vld [vmem:[%s4822_s1 + $0x1b0] sm:$0xff]  ;;  %v3911_v56 = vld [vmem:[%s4822_s1 + $0x1a8] sm:$0xff]  ;;  %v3890_v59 = vld [vmem:[%s4822_s1 + $0x120] sm:$0xff] }
  0x1f   : >> { %346 = vmatpush.bf16.msra.mxu1 %v3855_v15  ;;  %v469_v52 = vor.u32 %v468_v46, %v464_v45  ;;  %v3902_v53 = vld [vmem:[%s4822_s1 + $0x170] sm:$0xff]  ;;  %v3901_v57 = vld [vmem:[%s4822_s1 + $0x168] sm:$0xff]  ;;  %v3910_v60 = vld [vmem:[%s4822_s1 + $0x1a0] sm:$0xff] }
  0x20   : >> { %522 = vmatpush.bf16.msra.mxu3 %v3881_v16  ;;  %v380_v49 = vor.u32 %v379_v40, %v375_v39  ;;  %v3920_v54 = vld [vmem:[%s4822_s1 + $0x1f0] sm:$0xff]  ;;  %v3919_v58 = vld [vmem:[%s4822_s1 + $0x1e8] sm:$0xff]  ;;  %v3900_v61 = vld [vmem:[%s4822_s1 + $0x160] sm:$0xff] }
  0x21   : >> { %279 = vmatpush.bf16.msra.mxu0 %v3864_v17  ;;  %v3918_v62 = vld [vmem:[%s4822_s1 + $0x1e0] sm:$0xff]  ;;  %v3889_v63 = vld [vmem:[%s4822_s1 + $0x118] sm:$0xff]  ;;  %v2822_v4 = vld [vmem:[%s4207_s8 + $0xf0] sm:$0xf] }
  0x22   : >> { %434 = vmatpush.bf16.msra.mxu2 %v3872_v18  ;;  %v3909_v1 = vld [vmem:[%s4822_s1 + $0x198] sm:$0xff]  ;;  %v3895_v5 = vld [vmem:[%s4207_s8 + $0xf0] sm:$0x70]  ;;  %v3887_v11 = vld [vmem:[%s4822_s1 + $0x108] sm:$0xff] }
  0x23   : >> { %347 = vmatpush.bf16.msra.mxu1 %v3854_v19  ;;  %v3899_v2 = vld [vmem:[%s4822_s1 + $0x158] sm:$0xff]  ;;  %v3888_v6 = vld [vmem:[%s4822_s1 + $0x110] sm:$0xff]  ;;  %v2823_v8 = vor.u32 %v3895_v5, %v2822_v4  ;;  %v3907_v12 = vld [vmem:[%s4822_s1 + $0x188] sm:$0xff] }
  0x24   : >> { %523 = vmatpush.bf16.msra.mxu3 %v3880_v20  ;;  %v3917_v3 = vld [vmem:[%s4822_s1 + $0x1d8] sm:$0xff]  ;;  %v3908_v7 = vld [vmem:[%s4822_s1 + $0x190] sm:$0xff]  ;;  %v2766_v13 = vld [vmem:[%s4207_s8] sm:$0xe] }
  0x25   : >> { %280 = vmatpush.bf16.msra.mxu0 %v3863_v25  ;;  %v3898_v9 = vld [vmem:[%s4822_s1 + $0x150] sm:$0xff]  ;;  %v3885_v14 = vld [vmem:[%s4207_s8] sm:$0xf0]  ;;  %v829_v15 = vshll.u32 %v2823_v8, 16  ;;  %v3897_v16 = vld [vmem:[%s4822_s1 + $0x148] sm:$0xff]  ;;  %v827_v25 = vshrl.u32 %v2823_v8, 16 }
  0x26   : >> { %435 = vmatpush.bf16.msra.mxu2 %v3871_v26  ;;  %v3916_v10 = vld [vmem:[%s4822_s1 + $0x1d0] sm:$0xff]  ;;  %v3915_v17 = vld [vmem:[%s4822_s1 + $0x1c8] sm:$0xff]  ;;  %v3886_v18 = vld [vmem:[%s4822_s1 + $0x100] sm:$0xff]  ;;  %v2767_v19 = vor.u32 %v3885_v14, %v2766_v13 }
  0x27   : >> { %348 = vmatpush.bf16.msra.mxu1 %v3853_v28  ;;  %v3906_v20 = vld [vmem:[%s4822_s1 + $0x180] sm:$0xff]  ;;  %v2878_v21 = vld [vmem:[%s4207_s8 + $0x168] sm:$0xf]  ;;  %v3905_v22 = vld [vmem:[%s4207_s8 + $0x168] sm:$0x70]  ;;  %v831_v26 = vrot.slane %v829_v15, 1 }
  0x28   : >> { %524 = vmatpush.bf16.msra.mxu3 %v3879_v29  ;;  %v3929_v23 = vld [vmem:[%s4822_s1 + $0x238] sm:$0xff]  ;;  %v3914_v28 = vld [vmem:[%s4822_s1 + $0x1c0] sm:$0xff]  ;;  %v559_v29 = vrot.slane %v2767_v19, 1  ;;  %v3937_v36 = vld [vmem:[%s4822_s1 + $0x270] sm:$0xff] }
  0x29   : >> { %281 = vmatpush.bf16.msra.mxu0 %v3862_v31  ;;  %v3947_v24 = vld [vmem:[%s4822_s1 + $0x2b8] sm:$0xff]  ;;  %v832_v33 = vor.u32 %v831_v26, %v827_v25  ;;  %v3945_v39 = vld [vmem:[%s4822_s1 + $0x2a8] sm:$0xff]  ;;  %v3954_v45 = vld [vmem:[%s4822_s1 + $0x2e0] sm:$0xff] }
  0x2a   : >> { %436 = vmatpush.bf16.msra.mxu2 %v3870_v32  ;;  %v3938_v31 = vld [vmem:[%s4822_s1 + $0x278] sm:$0xff]  ;;  %v3936_v40 = vld [vmem:[%s4822_s1 + $0x268] sm:$0xff]  ;;  %v3972_v19 = vld [vmem:[%s4822_s1 + $0x370] sm:$0xff] }
  0x2b   : >> { %349 = vmatpush.bf16.msra.mxu1 %v3852_v34  ;;  %v3957_v32 = vld [vmem:[%s4822_s1 + $0x2f8] sm:$0xff]  ;;  %v3928_v34 = vld [vmem:[%s4822_s1 + $0x230] sm:$0xff]  ;;  %v3962_v25 = vld [vmem:[%s4822_s1 + $0x320] sm:$0xff] }
  0x2c   : >> { %525 = vmatpush.bf16.msra.mxu3 %v3878_v35  ;;  %v3946_v35 = vld [vmem:[%s4822_s1 + $0x2b0] sm:$0xff]  ;;  %v3925_v46 = vld [vmem:[%s4822_s1 + $0x218] sm:$0xff]  ;;  %v3979_v26 = vld [vmem:[%s4822_s1 + $0x3a0] sm:$0xff] }
  0x2d   : >> { %282 = vmatpush.bf16.msra.mxu0 %v3861_v37  ;;  %v3956_v37 = vld [vmem:[%s4822_s1 + $0x2f0] sm:$0xff]  ;;  %v3965_v4 = vld [vmem:[%s4822_s1 + $0x338] sm:$0xff]  ;;  %vm2449_vm2 = vmand %vm2447_vm0, %vm2448_vm1 }
  0x2e   : >> { %437 = vmatpush.bf16.msra.mxu2 %v3869_v38  ;;  %v3927_v38 = vld [vmem:[%s4822_s1 + $0x228] sm:$0xff]  ;;  %v3982_v5 = vld [vmem:[%s4822_s1 + $0x3b8] sm:$0xff] }
  0x2f   : >> { %350 = vmatpush.bf16.msra.mxu1 %v3851_v43  ;;  %v3944_v43 = vld [vmem:[%s4822_s1 + $0x2a0] sm:$0xff]  ;;  %v3973_v13 = vld [vmem:[%s4822_s1 + $0x378] sm:$0xff] }
  0x30   : >> { %526 = vmatpush.bf16.msra.mxu3 %v3877_v44  ;;  %283 = vmatmul.bf16.vlgmr.msra.gmra.mxu0 %v2583_v30  ;;  %v4369_v30 = vor.u32 %v3905_v22, %v2878_v21  ;;  %v3935_v44 = vld [vmem:[%s4822_s1 + $0x260] sm:$0xff]  ;;  %v3992_v14 = vld [vmem:[%s4822_s1 + $0x3f8] sm:$0xff]  ;;  %v3963_v21 = vld [vmem:[%s4822_s1 + $0x328] sm:$0xff] }
  0x31   : >> { %609 = vmatpush.bf16.msrb.mxu0 %v3893_v41  ;;  %438 = vmatmul.bf16.vlgmr.msra.gmra.mxu2 %v380_v49  ;;  %v3955_v41 = vld [vmem:[%s4822_s1 + $0x2e8] sm:$0xff]  ;;  %v3953_v49 = vld [vmem:[%s4822_s1 + $0x2d8] sm:$0xff] }
  0x32   : >> { %793 = vmatpush.bf16.msrb.mxu2 %v3913_v42  ;;  %351 = vmatmul.bf16.vlgmr.msra.gmra.mxu1 %v2619_v27  ;;  %v3896_v27 = vld [vmem:[%s4822_s1 + $0x140] sm:$0xff]  ;;  %v3980_v22 = vld [vmem:[%s4822_s1 + $0x3a8] sm:$0xff] }
  0x33   : >> { %701 = vmatpush.bf16.msrb.mxu1 %v3903_v47  ;;  %527 = vmatmul.bf16.vlgmr.msra.gmra.mxu3 %v469_v52  ;;  %v3926_v42 = vld [vmem:[%s4822_s1 + $0x220] sm:$0xff]  ;;  %v3943_v47 = vld [vmem:[%s4822_s1 + $0x298] sm:$0xff]  ;;  %v3933_v52 = vld [vmem:[%s4822_s1 + $0x250] sm:$0xff] }
  0x34   : >> { %882 = vmatpush.bf16.msrb.mxu3 %v3921_v48  ;;  %v3934_v48 = vld [vmem:[%s4822_s1 + $0x258] sm:$0xff] }
  0x35   : >> { %610 = vmatpush.bf16.msrb.mxu0 %v3892_v50  ;;  %v3924_v50 = vld [vmem:[%s4822_s1 + $0x210] sm:$0xff] }
  0x36   : >> { %794 = vmatpush.bf16.msrb.mxu2 %v3912_v51  ;;  %v3942_v51 = vld [vmem:[%s4822_s1 + $0x290] sm:$0xff] }
  0x37   : >> { %702 = vmatpush.bf16.msrb.mxu1 %v3902_v53  ;;  %v3952_v53 = vld [vmem:[%s4822_s1 + $0x2d0] sm:$0xff] }
  0x38   : >> { %883 = vmatpush.bf16.msrb.mxu3 %v3920_v54  ;;  %v918_v54 = vshll.u32 %v4369_v30, 16 }
  0x39   : >> { %611 = vmatpush.bf16.msrb.mxu0 %v3891_v55  ;;  %v3923_v55 = vld [vmem:[%s4822_s1 + $0x208] sm:$0xff] }
  0x3a   : >> { %795 = vmatpush.bf16.msrb.mxu2 %v3911_v56  ;;  %v3941_v56 = vld [vmem:[%s4822_s1 + $0x288] sm:$0xff] }
  0x3b   : >> { %703 = vmatpush.bf16.msrb.mxu1 %v3901_v57  ;;  %v3932_v57 = vld [vmem:[%s4822_s1 + $0x248] sm:$0xff] }
  0x3c   : >> { %884 = vmatpush.bf16.msrb.mxu3 %v3919_v58  ;;  %v3951_v58 = vld [vmem:[%s4822_s1 + $0x2c8] sm:$0xff] }
  0x3d   : >> { %612 = vmatpush.bf16.msrb.mxu0 %v3890_v59  ;;  %v3028_v59 = vld [vmem:[%s4207_s8 + $0xf0] sm:$0xe] }
  0x3e   : >> { %796 = vmatpush.bf16.msrb.mxu2 %v3910_v60  ;;  %v3930_v60 = vld [vmem:[%s4207_s8 + $0xf0] sm:$0xf0] }
  0x3f   : >> { %704 = vmatpush.bf16.msrb.mxu1 %v3900_v61  ;;  %v916_v61 = vshrl.u32 %v4369_v30, 16 }
  0x40   : >> { %885 = vmatpush.bf16.msrb.mxu3 %v3918_v62  ;;  %v920_v62 = vrot.slane %v918_v54, 1 }
  0x41   : >> { %613 = vmatpush.bf16.msrb.mxu0 %v3889_v63  ;;  %v3922_v63 = vld [vmem:[%s4822_s1 + $0x200] sm:$0xff] }
  0x42   : >> { %797 = vmatpush.bf16.msrb.mxu2 %v3909_v1  ;;  %v3940_v1 = vld [vmem:[%s4822_s1 + $0x280] sm:$0xff] }
  0x43   : >> { %705 = vmatpush.bf16.msrb.mxu1 %v3899_v2  ;;  %v3083_v2 = vld [vmem:[%s4207_s8 + $0x8] sm:$0xf] }
  0x44   : >> { %886 = vmatpush.bf16.msrb.mxu3 %v3917_v3  ;;  %v3939_v3 = vld [vmem:[%s4207_s8 + $0x8] sm:$0x70] }
  0x45   : >> { %614 = vmatpush.bf16.msrb.mxu0 %v3888_v6  ;;  %v3931_v6 = vld [vmem:[%s4822_s1 + $0x240] sm:$0xff] }
  0x46   : >> { %798 = vmatpush.bf16.msrb.mxu2 %v3908_v7  ;;  %v3029_v7 = vor.u32 %v3930_v60, %v3028_v59  ;;  %v4010_v60 = vld [vmem:[%s4822_s1 + $0x478] sm:$0xff] }
  0x47   : >> { %706 = vmatpush.bf16.msrb.mxu1 %v3898_v9  ;;  %v3139_v9 = vld [vmem:[%s4207_s8 + $0x80] sm:$0xf] }
  0x48   : >> { %887 = vmatpush.bf16.msrb.mxu3 %v3916_v10  ;;  %v3949_v10 = vld [vmem:[%s4207_s8 + $0x80] sm:$0x70]  ;;  %v1011_v15 = vrot.slane %v3029_v7, 1  ;;  %v4008_v7 = vld [vmem:[%s4822_s1 + $0x468] sm:$0xff] }
  0x49   : >> { %615 = vmatpush.bf16.msrb.mxu0 %v3887_v11  ;;  %v921_v11 = vor.u32 %v920_v62, %v916_v61  ;;  %v4027_v61 = vld [vmem:[%s4822_s1 + $0x4f8] sm:$0xff] }
  0x4a   : >> { %799 = vmatpush.bf16.msrb.mxu2 %v3907_v12  ;;  %v4476_v12 = vor.u32 %v3939_v3, %v3083_v2  ;;  %v4017_v2 = vld [vmem:[%s4822_s1 + $0x4b0] sm:$0xff] }
  0x4b   : >> { %707 = vmatpush.bf16.msrb.mxu1 %v3897_v16  ;;  %v4484_v16 = vor.u32 %v3949_v10, %v3139_v9  ;;  %v4009_v3 = vld [vmem:[%s4822_s1 + $0x470] sm:$0xff]  ;;  %v3999_v9 = vld [vmem:[%s4822_s1 + $0x420] sm:$0xff] }
  0x4c   : >> { %888 = vmatpush.bf16.msrb.mxu3 %v3915_v17  ;;  %v3964_v17 = vld [vmem:[%s4822_s1 + $0x330] sm:$0xff]  ;;  %v4015_v10 = vld [vmem:[%s4822_s1 + $0x4a0] sm:$0xff] }
  0x4d   : >> { %616 = vmatpush.bf16.msrb.mxu0 %v3886_v18  ;;  %v3981_v18 = vld [vmem:[%s4822_s1 + $0x3b0] sm:$0xff] }
  0x4e   : >> { %800 = vmatpush.bf16.msrb.mxu2 %v3906_v20  ;;  %v3991_v20 = vld [vmem:[%s4822_s1 + $0x3f0] sm:$0xff] }
  0x4f   : >> { %708 = vmatpush.bf16.msrb.mxu1 %v3896_v27  ;;  %v3970_v27 = vld [vmem:[%s4822_s1 + $0x360] sm:$0xff] }
  0x50   : >> { %889 = vmatpush.bf16.msrb.mxu3 %v3914_v28  ;;  %617 = vmatmul.bf16.vlgmr.msrb.gmra.mxu0 %v559_v29  ;;  %v3989_v28 = vld [vmem:[%s4822_s1 + $0x3e0] sm:$0xff]  ;;  %v3961_v29 = vld [vmem:[%s4822_s1 + $0x318] sm:$0xff] }
  0x51   : >> { %971 = vmatpush.bf16.msra.mxu0 %v3929_v23  ;;  %801 = vmatmul.bf16.vlgmr.msrb.gmra.mxu2 %v4369_v30  ;;  %v3971_v23 = vld [vmem:[%s4822_s1 + $0x368] sm:$0xff]  ;;  %v3978_v30 = vld [vmem:[%s4822_s1 + $0x398] sm:$0xff] }
  0x52   : >> { %1154 = vmatpush.bf16.msra.mxu2 %v3947_v24  ;;  %709 = vmatmul.bf16.vlgmr.msrb.gmra.mxu1 %v2823_v8  ;;  %v3950_v8 = vld [vmem:[%s4822_s1 + $0x2c0] sm:$0xff]  ;;  %v3990_v24 = vld [vmem:[%s4822_s1 + $0x3e8] sm:$0xff] }
  0x53   : >> { %1061 = vmatpush.bf16.msra.mxu1 %v3938_v31  ;;  %890 = vmatmul.bf16.vlgmr.msrb.gmra.mxu3 %v832_v33  ;;  %v3969_v31 = vld [vmem:[%s4822_s1 + $0x358] sm:$0xff]  ;;  %v3960_v33 = vld [vmem:[%s4822_s1 + $0x310] sm:$0xff] }
  0x54   : >> { %1246 = vmatpush.bf16.msra.mxu3 %v3957_v32  ;;  %v3988_v32 = vld [vmem:[%s4822_s1 + $0x3d8] sm:$0xff] }
  0x55   : >> { %972 = vmatpush.bf16.msra.mxu0 %v3928_v34  ;;  %v3977_v34 = vld [vmem:[%s4822_s1 + $0x390] sm:$0xff] }
  0x56   : >> { %1155 = vmatpush.bf16.msra.mxu2 %v3946_v35  ;;  %v3968_v35 = vld [vmem:[%s4822_s1 + $0x350] sm:$0xff] }
  0x57   : >> { %1062 = vmatpush.bf16.msra.mxu1 %v3937_v36  ;;  %v3987_v36 = vld [vmem:[%s4822_s1 + $0x3d0] sm:$0xff] }
  0x58   : >> { %1247 = vmatpush.bf16.msra.mxu3 %v3956_v37  ;;  %v3959_v37 = vld [vmem:[%s4822_s1 + $0x308] sm:$0xff] }
  0x59   : >> { %973 = vmatpush.bf16.msra.mxu0 %v3927_v38  ;;  %v1282_v38 = vshll.u32 %v4476_v12, 16 }
  0x5a   : >> { %1156 = vmatpush.bf16.msra.mxu2 %v3945_v39  ;;  %v3976_v39 = vld [vmem:[%s4822_s1 + $0x388] sm:$0xff] }
  0x5b   : >> { %1063 = vmatpush.bf16.msra.mxu1 %v3936_v40  ;;  %v3289_v40 = vld [vmem:[%s4207_s8 + $0x8] sm:$0xe] }
  0x5c   : >> { %1248 = vmatpush.bf16.msra.mxu3 %v3955_v41  ;;  %v3974_v41 = vld [vmem:[%s4207_s8 + $0x8] sm:$0xf0] }
  0x5d   : >> { %974 = vmatpush.bf16.msra.mxu0 %v3926_v42  ;;  %v1371_v42 = vshll.u32 %v4484_v16, 16 }
  0x5e   : >> { %1157 = vmatpush.bf16.msra.mxu2 %v3944_v43  ;;  %v3967_v43 = vld [vmem:[%s4822_s1 + $0x348] sm:$0xff] }
  0x5f   : >> { %1064 = vmatpush.bf16.msra.mxu1 %v3935_v44  ;;  %v3986_v44 = vld [vmem:[%s4822_s1 + $0x3c8] sm:$0xff]  ;;  %v1373_v54 = vrot.slane %v1371_v42, 1  ;;  %v4020_v42 = vld [vmem:[%s4822_s1 + $0x4c0] sm:$0xff] }
  0x60   : >> { %1249 = vmatpush.bf16.msra.mxu3 %v3954_v45  ;;  %v1280_v45 = vshrl.u32 %v4476_v12, 16 }
  0x61   : >> { %975 = vmatpush.bf16.msra.mxu0 %v3925_v46  ;;  %v1284_v46 = vrot.slane %v1282_v38, 1 }
  0x62   : >> { %1158 = vmatpush.bf16.msra.mxu2 %v3943_v47  ;;  %v3290_v47 = vor.u32 %v3974_v41, %v3289_v40  ;;  %v4003_v41 = vld [vmem:[%s4822_s1 + $0x440] sm:$0xff] }
  0x63   : >> { %1065 = vmatpush.bf16.msra.mxu1 %v3934_v48  ;;  %v3958_v48 = vld [vmem:[%s4822_s1 + $0x300] sm:$0xff] }
  0x64   : >> { %1250 = vmatpush.bf16.msra.mxu3 %v3953_v49  ;;  %v3975_v49 = vld [vmem:[%s4822_s1 + $0x380] sm:$0xff]  ;;  %v1464_v59 = vrot.slane %v3290_v47, 1 }
  0x65   : >> { %976 = vmatpush.bf16.msra.mxu0 %v3924_v50  ;;  %v4002_v50 = vld [vmem:[%s4822_s1 + $0x438] sm:$0xff] }
  0x66   : >> { %1159 = vmatpush.bf16.msra.mxu2 %v3942_v51  ;;  %v4018_v51 = vld [vmem:[%s4822_s1 + $0x4b8] sm:$0xff] }
  0x67   : >> { %1066 = vmatpush.bf16.msra.mxu1 %v3933_v52  ;;  %v3966_v52 = vld [vmem:[%s4822_s1 + $0x340] sm:$0xff] }
  0x68   : >> { %1251 = vmatpush.bf16.msra.mxu3 %v3952_v53  ;;  %v1369_v53 = vshrl.u32 %v4484_v16, 16 }
  0x69   : >> { %977 = vmatpush.bf16.msra.mxu0 %v3923_v55  ;;  %v3985_v55 = vld [vmem:[%s4822_s1 + $0x3c0] sm:$0xff] }
  0x6a   : >> { %1160 = vmatpush.bf16.msra.mxu2 %v3941_v56  ;;  %v3345_v56 = vld [vmem:[%s4207_s8 + $0xf8] sm:$0xf]  ;;  %v1374_v62 = vor.u32 %v1373_v54, %v1369_v53  ;;  %v4052_v53 = vld [vmem:[%s4822_s1 + $0x5a8] sm:$0xff] }
  0x6b   : >> { %1067 = vmatpush.bf16.msra.mxu1 %v3932_v57  ;;  %v3984_v57 = vld [vmem:[%s4207_s8 + $0xf8] sm:$0x70]  ;;  %v4044_v54 = vld [vmem:[%s4822_s1 + $0x568] sm:$0xff] }
  0x6c   : >> { %1252 = vmatpush.bf16.msra.mxu3 %v3951_v58  ;;  %v1285_v58 = vor.u32 %v1284_v46, %v1280_v45  ;;  %v4062_v45 = vld [vmem:[%s4822_s1 + $0x5f8] sm:$0xff] }
  0x6d   : >> { %978 = vmatpush.bf16.msra.mxu0 %v3922_v63  ;;  %v4592_v63 = vor.u32 %v3984_v57, %v3345_v56  ;;  %v4033_v56 = vld [vmem:[%s4822_s1 + $0x520] sm:$0xff] }
  0x6e   : >> { %1161 = vmatpush.bf16.msra.mxu2 %v3940_v1  ;;  %v4001_v1 = vld [vmem:[%s4822_s1 + $0x430] sm:$0xff]  ;;  %v4051_v57 = vld [vmem:[%s4822_s1 + $0x5a0] sm:$0xff] }
  0x6f   : >> { %1068 = vmatpush.bf16.msra.mxu1 %v3931_v6  ;;  %v4016_v6 = vld [vmem:[%s4822_s1 + $0x4a8] sm:$0xff]  ;;  %v1732_v38 = vshrl.u32 %v4592_v63, 16 }
  0x70   : >> { %1253 = vmatpush.bf16.msra.mxu3 %v3950_v8  ;;  %979 = vmatmul.bf16.vlgmr.msra.gmra.mxu0 %v921_v11  ;;  %v4025_v8 = vld [vmem:[%s4822_s1 + $0x4e8] sm:$0xff]  ;;  %v4007_v11 = vld [vmem:[%s4822_s1 + $0x460] sm:$0xff] }
  0x71   : >> { %1335 = vmatpush.bf16.msrb.mxu0 %v3965_v4  ;;  %1162 = vmatmul.bf16.vlgmr.msra.gmra.mxu2 %v4476_v12  ;;  %v4026_v4 = vld [vmem:[%s4822_s1 + $0x4f0] sm:$0xff]  ;;  %v4024_v12 = vld [vmem:[%s4822_s1 + $0x4e0] sm:$0xff] }
  0x72   : >> { %1514 = vmatpush.bf16.msrb.mxu2 %v3982_v5  ;;  %1069 = vmatmul.bf16.vlgmr.msra.gmra.mxu1 %v1011_v15  ;;  %v4000_v5 = vld [vmem:[%s4822_s1 + $0x428] sm:$0xff]  ;;  %v3401_v15 = vld [vmem:[%s4207_s8 + $0x170] sm:$0xf] }
  0x73   : >> { %1424 = vmatpush.bf16.msrb.mxu1 %v3973_v13  ;;  %1254 = vmatmul.bf16.vlgmr.msra.gmra.mxu3 %v4484_v16  ;;  %v3998_v13 = vld [vmem:[%s4822_s1 + $0x418] sm:$0xff]  ;;  %v3994_v16 = vld [vmem:[%s4207_s8 + $0x170] sm:$0x70] }
  0x74   : >> { %1606 = vmatpush.bf16.msrb.mxu3 %v3992_v14  ;;  %v4014_v14 = vld [vmem:[%s4822_s1 + $0x498] sm:$0xff] }
  0x75   : >> { %1336 = vmatpush.bf16.msrb.mxu0 %v3964_v17  ;;  %v4006_v17 = vld [vmem:[%s4822_s1 + $0x458] sm:$0xff] }
  0x76   : >> { %1515 = vmatpush.bf16.msrb.mxu2 %v3981_v18  ;;  %v4023_v18 = vld [vmem:[%s4822_s1 + $0x4d8] sm:$0xff] }
  0x77   : >> { %1425 = vmatpush.bf16.msrb.mxu1 %v3972_v19  ;;  %v3402_v19 = vor.u32 %v3994_v16, %v3401_v15  ;;  %v4040_v15 = vld [vmem:[%s4822_s1 + $0x548] sm:$0xff] }
  0x78   : >> { %1607 = vmatpush.bf16.msrb.mxu3 %v3991_v20  ;;  %v3997_v20 = vld [vmem:[%s4822_s1 + $0x410] sm:$0xff]  ;;  %v4056_v16 = vld [vmem:[%s4822_s1 + $0x5c8] sm:$0xff] }
  0x79   : >> { %1337 = vmatpush.bf16.msrb.mxu0 %v3963_v21  ;;  %v4013_v21 = vld [vmem:[%s4822_s1 + $0x490] sm:$0xff] }
  0x7a   : >> { %1516 = vmatpush.bf16.msrb.mxu2 %v3980_v22  ;;  %v4005_v22 = vld [vmem:[%s4822_s1 + $0x450] sm:$0xff] }
  0x7b   : >> { %1426 = vmatpush.bf16.msrb.mxu1 %v3971_v23  ;;  %v4022_v23 = vld [vmem:[%s4822_s1 + $0x4d0] sm:$0xff] }
  0x7c   : >> { %1608 = vmatpush.bf16.msrb.mxu3 %v3990_v24  ;;  %v1823_v24 = vshll.u32 %v3402_v19, 16 }
  0x7d   : >> { %1338 = vmatpush.bf16.msrb.mxu0 %v3962_v25  ;;  %v3996_v25 = vld [vmem:[%s4822_s1 + $0x408] sm:$0xff] }
  0x7e   : >> { %1517 = vmatpush.bf16.msrb.mxu2 %v3979_v26  ;;  %v4012_v26 = vld [vmem:[%s4822_s1 + $0x488] sm:$0xff] }
  0x7f   : >> { %1427 = vmatpush.bf16.msrb.mxu1 %v3970_v27  ;;  %v4004_v27 = vld [vmem:[%s4822_s1 + $0x448] sm:$0xff] }
  0x80   : >> { %1609 = vmatpush.bf16.msrb.mxu3 %v3989_v28  ;;  %v1734_v28 = vshll.u32 %v4592_v63, 16 }
  0x81   : >> { %1339 = vmatpush.bf16.msrb.mxu0 %v3961_v29  ;;  %v4021_v29 = vld [vmem:[%s4822_s1 + $0x4c8] sm:$0xff] }
  0x82   : >> { %1518 = vmatpush.bf16.msrb.mxu2 %v3978_v30  ;;  %v3551_v30 = vld [vmem:[%s4207_s8 + $0xf8] sm:$0xe] }
  0x83   : >> { %1428 = vmatpush.bf16.msrb.mxu1 %v3969_v31  ;;  %v4019_v31 = vld [vmem:[%s4207_s8 + $0xf8] sm:$0xf0] }
  0x84   : >> { %1610 = vmatpush.bf16.msrb.mxu3 %v3988_v32  ;;  %v1821_v32 = vshrl.u32 %v3402_v19, 16  ;;  %v3552_v40 = vor.u32 %v4019_v31, %v3551_v30  ;;  %v4068_v30 = vld [vmem:[%s4822_s1 + $0x620] sm:$0xff]  ;;  %v4067_v31 = vld [vmem:[%s4822_s1 + $0x618] sm:$0xff] }
  0x85   : >> { %1340 = vmatpush.bf16.msrb.mxu0 %v3960_v33  ;;  %v1825_v33 = vrot.slane %v1823_v24, 1  ;;  %v4039_v24 = vld [vmem:[%s4822_s1 + $0x540] sm:$0xff] }
  0x86   : >> { %1519 = vmatpush.bf16.msrb.mxu2 %v3977_v34  ;;  %v3995_v34 = vld [vmem:[%s4822_s1 + $0x400] sm:$0xff]  ;;  %v1916_v47 = vrot.slane %v3552_v40, 1 }
  0x87   : >> { %1429 = vmatpush.bf16.msrb.mxu1 %v3968_v35  ;;  %v4011_v35 = vld [vmem:[%s4822_s1 + $0x480] sm:$0xff] }
  0x88   : >> { %1611 = vmatpush.bf16.msrb.mxu3 %v3987_v36  ;;  %v4036_v36 = vld [vmem:[%s4822_s1 + $0x538] sm:$0xff] }
  0x89   : >> { %1341 = vmatpush.bf16.msrb.mxu0 %v3959_v37  ;;  %v4054_v37 = vld [vmem:[%s4822_s1 + $0x5b8] sm:$0xff] }
  0x8a   : >> { %1520 = vmatpush.bf16.msrb.mxu2 %v3976_v39  ;;  %v1736_v39 = vrot.slane %v1734_v28, 1  ;;  %v4070_v28 = vld [vmem:[%s4822_s1 + $0x630] sm:$0xff] }
  0x8b   : >> { %1430 = vmatpush.bf16.msrb.mxu1 %v3967_v43  ;;  %v1826_v43 = vor.u32 %v1825_v33, %v1821_v32  ;;  %v4066_v32 = vld [vmem:[%s4822_s1 + $0x610] sm:$0xff]  ;;  %v4065_v33 = vld [vmem:[%s4822_s1 + $0x608] sm:$0xff] }
  0x8c   : >> { %1612 = vmatpush.bf16.msrb.mxu3 %v3986_v44  ;;  %v4046_v44 = vld [vmem:[%s4822_s1 + $0x578] sm:$0xff]  ;;  %v1737_v46 = vor.u32 %v1736_v39, %v1732_v38 }
  0x8d   : >> { %1342 = vmatpush.bf16.msrb.mxu0 %v3958_v48  ;;  %v4035_v48 = vld [vmem:[%s4822_s1 + $0x530] sm:$0xff] }
  0x8e   : >> { %1521 = vmatpush.bf16.msrb.mxu2 %v3975_v49  ;;  %v4053_v49 = vld [vmem:[%s4822_s1 + $0x5b0] sm:$0xff] }
  0x8f   : >> { %1431 = vmatpush.bf16.msrb.mxu1 %v3966_v52  ;;  %v4034_v52 = vld [vmem:[%s4822_s1 + $0x528] sm:$0xff] }
  0x90   : >> { %1613 = vmatpush.bf16.msrb.mxu3 %v3985_v55  ;;  %1343 = vmatmul.bf16.vlgmr.msrb.gmra.mxu0 %v1285_v58  ;;  %v4060_v55 = vld [vmem:[%s4822_s1 + $0x5e8] sm:$0xff]  ;;  %v4043_v58 = vld [vmem:[%s4822_s1 + $0x560] sm:$0xff] }
  0x91   : >> { %1698 = vmatpush.bf16.msra.mxu0 %v4002_v50  ;;  %1522 = vmatmul.bf16.vlgmr.msrb.gmra.mxu2 %v1464_v59  ;;  %v4045_v50 = vld [vmem:[%s4822_s1 + $0x570] sm:$0xff]  ;;  %v4059_v59 = vld [vmem:[%s4822_s1 + $0x5e0] sm:$0xff] }
  0x92   : >> { %1876 = vmatpush.bf16.msra.mxu2 %v4018_v51  ;;  %1432 = vmatmul.bf16.vlgmr.msrb.gmra.mxu1 %v1374_v62  ;;  %v4061_v51 = vld [vmem:[%s4822_s1 + $0x5f0] sm:$0xff] }
  0x93   : >> { %1787 = vmatpush.bf16.msra.mxu1 %v4010_v60  ;;  %1614 = vmatmul.bf16.vlgmr.msrb.gmra.mxu3 %v4592_v63  ;;  %v4032_v60 = vld [vmem:[%s4822_s1 + $0x518] sm:$0xff]  ;;  %v3606_v62 = vld [vmem:[%s4207_s8 + $0x10] sm:$0xf]  ;;  %v4028_v63 = vld [vmem:[%s4207_s8 + $0x10] sm:$0x70] }
  0x94   : >> { %1966 = vmatpush.bf16.msra.mxu3 %v4027_v61  ;;  %v4050_v61 = vld [vmem:[%s4822_s1 + $0x598] sm:$0xff] }
  0x95   : >> { %1699 = vmatpush.bf16.msra.mxu0 %v4001_v1  ;;  %v4042_v1 = vld [vmem:[%s4822_s1 + $0x558] sm:$0xff] }
  0x96   : >> { %1877 = vmatpush.bf16.msra.mxu2 %v4017_v2  ;;  %v4058_v2 = vld [vmem:[%s4822_s1 + $0x5d8] sm:$0xff] }
  0x97   : >> { %1788 = vmatpush.bf16.msra.mxu1 %v4009_v3  ;;  %v3662_v3 = vld [vmem:[%s4207_s8 + $0x88] sm:$0xf] }
  0x98   : >> { %1967 = vmatpush.bf16.msra.mxu3 %v4026_v4  ;;  %v4038_v4 = vld [vmem:[%s4207_s8 + $0x88] sm:$0x70] }
  0x99   : >> { %1700 = vmatpush.bf16.msra.mxu0 %v4000_v5  ;;  %v3607_v5 = vor.u32 %v4028_v63, %v3606_v62 }
  0x9a   : >> { %1878 = vmatpush.bf16.msra.mxu2 %v4016_v6  ;;  %v4031_v6 = vld [vmem:[%s4822_s1 + $0x510] sm:$0xff] }
  0x9b   : >> { %1789 = vmatpush.bf16.msra.mxu1 %v4008_v7  ;;  %v4049_v7 = vld [vmem:[%s4822_s1 + $0x590] sm:$0xff] }
  0x9c   : >> { %1968 = vmatpush.bf16.msra.mxu3 %v4025_v8  ;;  %v3663_v8 = vor.u32 %v4038_v4, %v3662_v3 }
  0x9d   : >> { %1701 = vmatpush.bf16.msra.mxu0 %v3999_v9  ;;  %v4041_v9 = vld [vmem:[%s4822_s1 + $0x550] sm:$0xff] }
  0x9e   : >> { %1879 = vmatpush.bf16.msra.mxu2 %v4015_v10  ;;  %v4057_v10 = vld [vmem:[%s4822_s1 + $0x5d0] sm:$0xff] }
  0x9f   : >> { %1790 = vmatpush.bf16.msra.mxu1 %v4007_v11  ;;  %v2187_v11 = vshll.u32 %v3607_v5, 16 }
  0xa0   : >> { %1969 = vmatpush.bf16.msra.mxu3 %v4024_v12  ;;  %v4030_v12 = vld [vmem:[%s4822_s1 + $0x508] sm:$0xff] }
  0xa1   : >> { %1702 = vmatpush.bf16.msra.mxu0 %v3998_v13  ;;  %v4048_v13 = vld [vmem:[%s4822_s1 + $0x588] sm:$0xff] }
  0xa2   : >> { %1880 = vmatpush.bf16.msra.mxu2 %v4014_v14  ;;  %v2276_v14 = vshll.u32 %v3663_v8, 16 }
  0xa3   : >> { %1791 = vmatpush.bf16.msra.mxu1 %v4006_v17  ;;  %v2185_v17 = vshrl.u32 %v3607_v5, 16 }
  0xa4   : >> { %1970 = vmatpush.bf16.msra.mxu3 %v4023_v18  ;;  %v2189_v18 = vrot.slane %v2187_v11, 1 }
  0xa5   : >> { %1703 = vmatpush.bf16.msra.mxu0 %v3997_v20  ;;  %v4047_v20 = vld [vmem:[%s4822_s1 + $0x580] sm:$0xff] }
  0xa6   : >> { %1881 = vmatpush.bf16.msra.mxu2 %v4013_v21  ;;  %v4071_v21 = vld [vmem:[%s4822_s1 + $0x638] sm:$0xff] }
  0xa7   : >> { %1792 = vmatpush.bf16.msra.mxu1 %v4005_v22  ;;  %v2274_v22 = vshrl.u32 %v3663_v8, 16 }
  0xa8   : >> { %1971 = vmatpush.bf16.msra.mxu3 %v4022_v23  ;;  %v2278_v23 = vrot.slane %v2276_v14, 1 }
  0xa9   : >> { %1704 = vmatpush.bf16.msra.mxu0 %v3996_v25  ;;  %v4055_v25 = vld [vmem:[%s4822_s1 + $0x5c0] sm:$0xff] }
  0xaa   : >> { %1882 = vmatpush.bf16.msra.mxu2 %v4012_v26  ;;  %v2190_v26 = vor.u32 %v2189_v18, %v2185_v17 }
  0xab   : >> { %1793 = vmatpush.bf16.msra.mxu1 %v4004_v27  ;;  %v2279_v27 = vor.u32 %v2278_v23, %v2274_v22 }
  0xac   : >> { %1972 = vmatpush.bf16.msra.mxu3 %v4021_v29  ;;  %v4069_v29 = vld [vmem:[%s4822_s1 + $0x628] sm:$0xff] }
  0xad   : >> { %1705 = vmatpush.bf16.msra.mxu0 %v3995_v34  ;;  %v3812_v34 = vld [vmem:[%s4207_s8 + $0x10] sm:$0xe]  ;;  %v284_v39 = vpop.f32.mrf.mxu0 }
  0xae   : >> { %1883 = vmatpush.bf16.msra.mxu2 %v4011_v35  ;;  %v4063_v35 = vld [vmem:[%s4207_s8 + $0x10] sm:$0xf0]  ;;  %s2445_s8 = scalar_lea.vmem %s4148_s23, %s3849_s30 }
  0xaf   : >> { %1794 = vmatpush.bf16.msra.mxu1 %v4003_v41  ;;  %v352_v40 = vpop.f32.mrf.mxu1 }
  0xb0   : >> { %1973 = vmatpush.bf16.msra.mxu3 %v4020_v42  ;;  %1706 = vmatmul.bf16.vlgmr.msra.gmra.mxu0 %v3402_v19  ;;  %v4029_v19 = vld [vmem:[%s4822_s1 + $0x500] sm:$0xff] }
  0xb1   : >> { %2059 = vmatpush.bf16.msrb.mxu0 %v4036_v36  ;;  %1884 = vmatmul.bf16.vlgmr.msra.gmra.mxu2 %v1826_v43  ;;  %v3813_v36 = vor.u32 %v4063_v35, %v3812_v34 }
  0xb2   : >> { %2240 = vmatpush.bf16.msrb.mxu2 %v4054_v37  ;;  %1795 = vmatmul.bf16.vlgmr.msra.gmra.mxu1 %v1737_v46  ;;  %v4064_v37 = vld [vmem:[%s4822_s1 + $0x600] sm:$0xff] }
  0xb3   : >> { %2151 = vmatpush.bf16.msrb.mxu1 %v4046_v44  ;;  %1974 = vmatmul.bf16.vlgmr.msra.gmra.mxu3 %v1916_v47  ;;  %v2369_v38 = vrot.slane %v3813_v36, 1 }
  0xb4   : >> { %2329 = vmatpush.bf16.msrb.mxu3 %v4062_v45  ;;  %v439_v41 = vpop.f32.mrf.mxu2 }
  0xb5   : >> { %2060 = vmatpush.bf16.msrb.mxu0 %v4035_v48  ;;  %v286_v42 = vpop.f32.mrf.mxu0 }
  0xb6   : >> { %2241 = vmatpush.bf16.msrb.mxu2 %v4053_v49  ;;  %v528_v43 = vpop.f32.mrf.mxu3 }
  0xb7   : >> { %2152 = vmatpush.bf16.msrb.mxu1 %v4045_v50  ;;  %v354_v44 = vpop.f32.mrf.mxu1 }
  0xb8   : >> { %2330 = vmatpush.bf16.msrb.mxu3 %v4061_v51  ;;  %v355_v62 = vadd.f32 %v354_v44, %v286_v42 }
  0xb9   : >> { %2061 = vmatpush.bf16.msrb.mxu0 %v4034_v52 }
  0xba   : >> { %2242 = vmatpush.bf16.msrb.mxu2 %v4052_v53  ;;  %v353_v53 = vadd.f32 %v352_v40, %v284_v39 }
  0xbb   : >> { %2153 = vmatpush.bf16.msrb.mxu1 %v4044_v54 }
  0xbc   : >> { %2331 = vmatpush.bf16.msrb.mxu3 %v4060_v55  ;;  %v441_v45 = vpop.f32.mrf.mxu2 }
  0xbd   : >> { %2062 = vmatpush.bf16.msrb.mxu0 %v4033_v56  ;;  %v444_v56 = vadd.f32 %v439_v41, %v353_v53 }
  0xbe   : >> { %2243 = vmatpush.bf16.msrb.mxu2 %v4051_v57  ;;  %v530_v47 = vpop.f32.mrf.mxu3 }
  0xbf   : >> { %2154 = vmatpush.bf16.msrb.mxu1 %v4043_v58 }
  0xc0   : >> { %2332 = vmatpush.bf16.msrb.mxu3 %v4059_v59  ;;  %v533_v59 = vadd.f32 %v528_v43, %v444_v56 }
  0xc1   : >> { %2063 = vmatpush.bf16.msrb.mxu0 %v4032_v60 }
  0xc2   : >> { %2244 = vmatpush.bf16.msrb.mxu2 %v4050_v61 }
  0xc3   : >> { %2155 = vmatpush.bf16.msrb.mxu1 %v4042_v1 }
  0xc4   : >> { %2333 = vmatpush.bf16.msrb.mxu3 %v4058_v2  ;;  %v445_v2 = vadd.f32 %v441_v45, %v355_v62 }
  0xc5   : >> { %2064 = vmatpush.bf16.msrb.mxu0 %v4031_v6 }
  0xc6   : >> { %2245 = vmatpush.bf16.msrb.mxu2 %v4049_v7  ;;  %v534_v7 = vadd.f32 %v530_v47, %v445_v2  ;;  %v2436_v2 = vperm.slane %v4138_v0, 0 }
  0xc7   : >> { %2156 = vmatpush.bf16.msrb.mxu1 %v4041_v9 }
  0xc8   : >> { %2334 = vmatpush.bf16.msrb.mxu3 %v4057_v10 }
  0xc9   : >> { %2065 = vmatpush.bf16.msrb.mxu0 %v4030_v12 }
  0xca   : >> { %2246 = vmatpush.bf16.msrb.mxu2 %v4048_v13 }
  0xcb   : >> { %2157 = vmatpush.bf16.msrb.mxu1 %v4040_v15 }
  0xcc   : >> { %2335 = vmatpush.bf16.msrb.mxu3 %v4056_v16 }
  0xcd   : >> { %2066 = vmatpush.bf16.msrb.mxu0 %v4029_v19  ;;  %v618_v46 = vpop.f32.mrf.mxu0 }
  0xce   : >> { %2247 = vmatpush.bf16.msrb.mxu2 %v4047_v20  ;;  %v623_v63 = vadd.f32 %v618_v46, %v533_v59 }
  0xcf   : >> { %2158 = vmatpush.bf16.msrb.mxu1 %v4039_v24  ;;  %v710_v48 = vpop.f32.mrf.mxu1 }
  0xd0   : >> { %2336 = vmatpush.bf16.msrb.mxu3 %v4055_v25  ;;  %2067 = vmatmul.bf16.vlgmr.msrb.gmra.mxu0 %v3607_v5  ;;  %v715_v3 = vadd.f32 %v710_v48, %v623_v63 }
  0xd1   : >> { %2419 = vmatpush.bf16.msra.mxu0 %v4071_v21  ;;  %2248 = vmatmul.bf16.vlgmr.msrb.gmra.mxu2 %v2190_v26 }
  0xd2   : >> { %2159 = vmatmul.bf16.vlgmr.msrb.gmra.mxu1 %v3663_v8 }
  0xd3   : >> { %2337 = vmatmul.bf16.vlgmr.msrb.gmra.mxu3 %v2279_v27 }
  0xd4   : >> { %v802_v49 = vpop.f32.mrf.mxu2 }
  0xd5   : >> { %2420 = vmatpush.bf16.msra.mxu0 %v4070_v28  ;;  %v620_v50 = vpop.f32.mrf.mxu0  ;;  %v807_v8 = vadd.f32 %v802_v49, %v715_v3 }
  0xd6   : >> { %v891_v51 = vpop.f32.mrf.mxu3  ;;  %v624_v9 = vadd.f32 %v620_v50, %v534_v7 }
  0xd7   : >> { %v712_v52 = vpop.f32.mrf.mxu1  ;;  %v896_v11 = vadd.f32 %v891_v51, %v807_v8 }
  0xd8   : >> { %v716_v13 = vadd.f32 %v712_v52, %v624_v9 }
  0xd9   : >> { %2421 = vmatpush.bf16.msra.mxu0 %v4069_v29 }
  0xdc   : >> { %v804_v54 = vpop.f32.mrf.mxu2 }
  0xdd   : >> { %2422 = vmatpush.bf16.msra.mxu0 %v4068_v30  ;;  %v808_v16 = vadd.f32 %v804_v54, %v716_v13 }
  0xde   : >> { %v893_v57 = vpop.f32.mrf.mxu3 }
  0xdf   : >> { %v897_v20 = vadd.f32 %v893_v57, %v808_v16 }
  0xe1   : >> { %2423 = vmatpush.bf16.msra.mxu0 %v4067_v31 }
  0xe5   : >> { %2424 = vmatpush.bf16.msra.mxu0 %v4066_v32 }
  0xe9   : >> { %2425 = vmatpush.bf16.msra.mxu0 %v4065_v33 }
  0xed   : >> { %2426 = vmatpush.bf16.msra.mxu0 %v4064_v37  ;;  %v980_v55 = vpop.f32.mrf.mxu0 }
  0xee   : >> { %v985_v14 = vadd.f32 %v980_v55, %v896_v11 }
  0xef   : >> { %v1070_v58 = vpop.f32.mrf.mxu1 }
  0xf0   : >> { %2427 = vmatmul.bf16.vlgmr.msra.gmra.mxu0 %v2369_v38  ;;  %v1075_v18 = vadd.f32 %v1070_v58, %v985_v14 }
  0xf4   : >> { %v1163_v60 = vpop.f32.mrf.mxu2 }
  0xf5   : >> { %v982_v61 = vpop.f32.mrf.mxu0  ;;  %v1168_v21 = vadd.f32 %v1163_v60, %v1075_v18 }
  0xf6   : >> { %v1255_v1 = vpop.f32.mrf.mxu3  ;;  %v986_v22 = vadd.f32 %v982_v61, %v897_v20 }
  0xf7   : >> { %v1072_v4 = vpop.f32.mrf.mxu1  ;;  %v1260_v24 = vadd.f32 %v1255_v1, %v1168_v21 }
  0xf8   : >> { %v1076_v27 = vadd.f32 %v1072_v4, %v986_v22 }
  0xfc   : >> { %v1165_v5 = vpop.f32.mrf.mxu2 }
  0xfd   : >> { %v1169_v29 = vadd.f32 %v1165_v5, %v1076_v27 }
  0xfe   : >> { %v1257_v10 = vpop.f32.mrf.mxu3 }
  0xff   : >> { %v1261_v33 = vadd.f32 %v1257_v10, %v1169_v29 }
 0x10d   : >> { %v1344_v6 = vpop.f32.mrf.mxu0 }
 0x10e   : >> { %v1349_v28 = vadd.f32 %v1344_v6, %v1260_v24 }
 0x10f   : >> { %v1433_v12 = vpop.f32.mrf.mxu1 }
 0x110   : >> { %v1438_v31 = vadd.f32 %v1433_v12, %v1349_v28 }
 0x114   : >> { %v1523_v15 = vpop.f32.mrf.mxu2 }
 0x115   : >> { %v1346_v17 = vpop.f32.mrf.mxu0  ;;  %v1528_v34 = vadd.f32 %v1523_v15, %v1438_v31 }
 0x116   : >> { %v1615_v19 = vpop.f32.mrf.mxu3  ;;  %v1350_v36 = vadd.f32 %v1346_v17, %v1261_v33  ;;  %v2450_v17 = vld [vmem:[%s2445_s8 + $0x4] sm:$0x7] }
 0x117   : >> { %v1435_v23 = vpop.f32.mrf.mxu1  ;;  %v1620_v38 = vadd.f32 %v1615_v19, %v1528_v34 }
 0x118   : >> { %v1439_v40 = vadd.f32 %v1435_v23, %v1350_v36 }
 0x11c   : >> { %v1525_v25 = vpop.f32.mrf.mxu2 }
 0x11d   : >> { %v1529_v42 = vadd.f32 %v1525_v25, %v1439_v40 }
 0x11e   : >> { %v1617_v30 = vpop.f32.mrf.mxu3 }
 0x11f   : >> { %v1621_v47 = vadd.f32 %v1617_v30, %v1529_v42 }
 0x12d   : >> { %v1707_v26 = vpop.f32.mrf.mxu0 }
 0x12e   : >> { %v1712_v41 = vadd.f32 %v1707_v26, %v1620_v38 }
 0x12f   : >> { %v1796_v32 = vpop.f32.mrf.mxu1 }
 0x130   : >> { %v1801_v44 = vadd.f32 %v1796_v32, %v1712_v41 }
 0x134   : >> { %v1885_v35 = vpop.f32.mrf.mxu2 }
 0x135   : >> { %v1709_v37 = vpop.f32.mrf.mxu0  ;;  %v1890_v48 = vadd.f32 %v1885_v35, %v1801_v44 }
 0x136   : >> { %v1975_v39 = vpop.f32.mrf.mxu3  ;;  %v1713_v49 = vadd.f32 %v1709_v37, %v1621_v47 }
 0x137   : >> { %v1798_v43 = vpop.f32.mrf.mxu1  ;;  %v1980_v51 = vadd.f32 %v1975_v39, %v1890_v48 }
 0x138   : >> { %v1802_v53 = vadd.f32 %v1798_v43, %v1713_v49 }
 0x13c   : >> { %v1887_v45 = vpop.f32.mrf.mxu2 }
 0x13d   : >> { %v1891_v56 = vadd.f32 %v1887_v45, %v1802_v53 }
 0x13e   : >> { %v1977_v50 = vpop.f32.mrf.mxu3 }
 0x13f   : >> { %v1981_v60 = vadd.f32 %v1977_v50, %v1891_v56 }
 0x14d   : >> { %v2068_v46 = vpop.f32.mrf.mxu0 }
 0x14e   : >> { %v2073_v54 = vadd.f32 %v2068_v46, %v1980_v51 }
 0x14f   : >> { %v2160_v52 = vpop.f32.mrf.mxu1 }
 0x150   : >> { %v2165_v58 = vadd.f32 %v2160_v52, %v2073_v54 }
 0x154   : >> { %v2249_v55 = vpop.f32.mrf.mxu2 }
 0x155   : >> { %v2070_v57 = vpop.f32.mrf.mxu0  ;;  %v2254_v61 = vadd.f32 %v2249_v55, %v2165_v58 }
 0x156   : >> { %v2338_v59 = vpop.f32.mrf.mxu3  ;;  %v2074_v62 = vadd.f32 %v2070_v57, %v1981_v60 }
 0x157   : >> { %v2162_v63 = vpop.f32.mrf.mxu1  ;;  %v2343_v1 = vadd.f32 %v2338_v59, %v2254_v61 }
 0x158   : >> { %v2166_v5 = vadd.f32 %v2162_v63, %v2074_v62 }
 0x15c   : >> { %v2251_v3 = vpop.f32.mrf.mxu2 }
 0x15d   : >> { %v2255_v7 = vadd.f32 %v2251_v3, %v2166_v5 }
 0x15e   : >> { %v2340_v9 = vpop.f32.mrf.mxu3 }
 0x15f   : >> { %v2344_v11 = vadd.f32 %v2340_v9, %v2255_v7 }
 0x16d   : >> { %v2428_v4 = vpop.f32.mrf.mxu0 }
 0x16e   : >> { %v2433_v6 = vadd.f32 %v2428_v4, %v2343_v1 }
 0x170   : >> { %v2438_v8 = vadd.f32 %v2436_v2, %v2433_v6 }
 0x172   : >> { %v2440_v10 = vmax.f32 %v2438_v8, 0.0 }
 0x174   : >> { %v2442_v12 = vpack.c.bf16 %v2440_v10, %v2440_v10 }
 0x175   : >> { %v2430_v13 = vpop.f32.mrf.mxu0 }
 0x176   : >> { %2446 = vst [vmem:[%s2445_s8] sm:$0xf] %v2442_v12  ;;  %v2434_v14 = vadd.f32 %v2430_v13, %v2344_v11 }
 0x178   : >> { %v2439_v15 = vadd.f32 %v2436_v2, %v2434_v14 }
 0x17a   : >> { %v2441_v16 = vmax.f32 %v2439_v15, 0.0 }
 0x17b   : > { %176 = sbr.rel (!%p174_p4) target bundleno = 16 (0x10), region = 104 }
 0x17c   : >> { %v2443_v18 = vpack.c.bf16 %v2441_v16, %v2441_v16 }
 0x17e   : >> { %v2451_v19 = vsel %vm2449_vm2, %v2443_v18, %v2450_v17 }
 0x17f   : >> { %2452 = vst [vmem:[%s2445_s8 + $0x4] sm:$0x7] %v2451_v19 }
 0x180 PF: > { %s13_s12 = sadd.s32 1, %s4101_s12  }
 0x181   : > { %p10_p5 = scmp.ge.s32.totalorder %s13_s12, 4  }
 0x183   :  { %12 = sbr.rel (!%p10_p5) target bundleno = 1 (0x1), region = 115 }

// kernel: pilotnet_forward.8
= control target key start
LH: loop header
LB: loop body
LE: loop exit
PB: predicated region body
PF: predicated region fallthrough
CT: control target
= control target key end

     0   :  { %s3905_s12 = smov 0   ;;  %s4580_s0 = inlined_call_operand.vmem [shape: bf16[2,4,7,7,128], index: 0, kind: input, shape index: {}]   ;;  %s4581_s1 = inlined_call_operand.vmem [shape: bf16[25,128,128], index: 1, kind: input, shape index: {}]   ;;  %s4582_s2 = inlined_call_operand.vmem [shape: f32[1,128], index: 2, kind: input, shape index: {}]   ;;  %s4583_s3 = inlined_call_operand.vmem [shape: bf16[2,5,5,128], index: 3, kind: output, shape index: {}]  }
   0x1 LB: > { %s2434_s13 = sadd.s32 4294967295, %s3879_s12   ;;  %p2438_p0 = scmp.ge.s32.totalorder %s3879_s12, 1  ;;  %s3879_s12 = sphi %s3905_s12, %s13_s12  }
   0x2   : > { %p137_p1 = scmp.lt.s32.totalorder %s3879_s12, 3 }
   0x4   : > { %p138_p2 = pnand %p2438_p0, %p137_p1 }
   0x5   : > { %p161_p3 = scmp.lt.s32.totalorder (!%p138_p2), %s2434_s13, 1  ;;  %s3928_s24 = smov (!%p138_p2), 0  }
   0x6   : > { %141 = sbr.rel (%p138_p2) target bundleno = 376 (0x178), region = 32 }
   0xb   : > { %v3916_v0 = vld [vmem:[%s4582_s2] sm:$0x1]  ;;  %s4585_s13 = smov (!%p161_p3, %s2434_s13), 1 }
   0xc   : > { %s3851_s16 = smul.u32 112, %s4585_s13 }
   0xd   : > { %s3852_s17 = smul.u32 20, %s4585_s13 }
   0xe   : > { %s3921_s20 = scalar_lea.vmem %s4580_s0, %s3851_s16 }
   0xf   : > { %s3926_s23 = scalar_lea.vmem %s4583_s3, %s3852_s17 }
  0x10 LB: >> { %v3666_v1 = vld [vmem:[%s4581_s1 + $0x78] sm:$0xff]  ;;  %v3665_v5 = vld [vmem:[%s4581_s1 + $0x70] sm:$0xff]  ;;  %v3664_v9 = vld [vmem:[%s4581_s1 + $0x68] sm:$0xff]  ;;  %s2441_s30 = sshll.u32 %s3883_s24, 2  ;;  %vm2337_vm0 = vcmask 1042432   ;;  %s177_s24 = sadd.s32 1, %s3883_s24   ;;  %s3883_s24 = sphi %s3928_s24, %s177_s24  }
  0x11   : >> { %v3674_v2 = vld [vmem:[%s4581_s1 + $0xb8] sm:$0xff]  ;;  %266 = vmatpush.bf16.msra.mxu0 %v3666_v1  ;;  %v3673_v6 = vld [vmem:[%s4581_s1 + $0xb0] sm:$0xff]  ;;  %v3672_v10 = vld [vmem:[%s4581_s1 + $0xa8] sm:$0xff]  ;;  %s3985_s8 = scalar_lea.vmem %s3921_s20, %s2441_s30  ;;  %vm2338_vm1 = vsmask.f32 2304  ;;  %p174_p4 = scmp.ge.s32.totalorder %s177_s24, 5  }
  0x12   : >> { %v3658_v3 = vld [vmem:[%s4581_s1 + $0x38] sm:$0xff]  ;;  %416 = vmatpush.bf16.msra.mxu2 %v3674_v2  ;;  %v3657_v7 = vld [vmem:[%s4581_s1 + $0x30] sm:$0xff]  ;;  %v3656_v11 = vld [vmem:[%s4581_s1 + $0x28] sm:$0xff] }
  0x13   : >> { %v3682_v4 = vld [vmem:[%s4581_s1 + $0xf8] sm:$0xff]  ;;  %327 = vmatpush.bf16.msra.mxu1 %v3658_v3  ;;  %v3681_v8 = vld [vmem:[%s4581_s1 + $0xf0] sm:$0xff]  ;;  %v3680_v12 = vld [vmem:[%s4581_s1 + $0xe8] sm:$0xff] }
  0x14   : >> { %506 = vmatpush.bf16.msra.mxu3 %v3682_v4  ;;  %v3663_v13 = vld [vmem:[%s4581_s1 + $0x60] sm:$0xff]  ;;  %v3662_v17 = vld [vmem:[%s4581_s1 + $0x58] sm:$0xff]  ;;  %v3661_v24 = vld [vmem:[%s4581_s1 + $0x50] sm:$0xff] }
  0x15   : >> { %267 = vmatpush.bf16.msra.mxu0 %v3665_v5  ;;  %v3671_v14 = vld [vmem:[%s4581_s1 + $0xa0] sm:$0xff]  ;;  %v3670_v18 = vld [vmem:[%s4581_s1 + $0x98] sm:$0xff]  ;;  %v3669_v25 = vld [vmem:[%s4581_s1 + $0x90] sm:$0xff] }
  0x16   : >> { %417 = vmatpush.bf16.msra.mxu2 %v3673_v6  ;;  %v3655_v15 = vld [vmem:[%s4581_s1 + $0x20] sm:$0xff]  ;;  %v3654_v19 = vld [vmem:[%s4581_s1 + $0x18] sm:$0xff]  ;;  %v3653_v27 = vld [vmem:[%s4581_s1 + $0x10] sm:$0xff] }
  0x17   : >> { %328 = vmatpush.bf16.msra.mxu1 %v3657_v7  ;;  %v3679_v16 = vld [vmem:[%s4581_s1 + $0xe0] sm:$0xff]  ;;  %v3678_v20 = vld [vmem:[%s4581_s1 + $0xd8] sm:$0xff]  ;;  %v3677_v28 = vld [vmem:[%s4581_s1 + $0xd0] sm:$0xff] }
  0x18   : >> { %507 = vmatpush.bf16.msra.mxu3 %v3681_v8  ;;  %v180_v21 = vld [vmem:[%s3985_s8] sm:$0x7]  ;;  %v2443_v23 = vld [vmem:[%s3985_s8 + $0x1c] sm:$0x7]  ;;  %v3660_v31 = vld [vmem:[%s4581_s1 + $0x48] sm:$0xff] }
  0x19   : >> { %268 = vmatpush.bf16.msra.mxu0 %v3664_v9  ;;  %v358_v22 = vunpack.c.l.b16 %v180_v21  ;;  %v448_v26 = vunpack.c.l.b16 %v2443_v23  ;;  %v3668_v32 = vld [vmem:[%s4581_s1 + $0x88] sm:$0xff]  ;;  %v3659_v37 = vld [vmem:[%s4581_s1 + $0x40] sm:$0xff]  ;;  %v3690_v41 = vld [vmem:[%s4581_s1 + $0x138] sm:$0xff] }
  0x1a   : >> { %418 = vmatpush.bf16.msra.mxu2 %v3672_v10  ;;  %v3652_v34 = vld [vmem:[%s4581_s1 + $0x8] sm:$0xff]  ;;  %v3667_v38 = vld [vmem:[%s4581_s1 + $0x80] sm:$0xff]  ;;  %v3706_v42 = vld [vmem:[%s4581_s1 + $0x1b8] sm:$0xff] }
  0x1b   : >> { %329 = vmatpush.bf16.msra.mxu1 %v3656_v11  ;;  %v359_v29 = vpack.c.b16 %v358_v22, %v358_v22  ;;  %v449_v30 = vpack.c.b16 %v448_v26, %v448_v26  ;;  %v3676_v35 = vld [vmem:[%s4581_s1 + $0xc8] sm:$0xff]  ;;  %v3651_v43 = vld [vmem:[%s4581_s1] sm:$0xff]  ;;  %v3698_v47 = vld [vmem:[%s4581_s1 + $0x178] sm:$0xff] }
  0x1c   : >> { %508 = vmatpush.bf16.msra.mxu3 %v3680_v12  ;;  %v3675_v44 = vld [vmem:[%s4581_s1 + $0xc0] sm:$0xff]  ;;  %v3714_v48 = vld [vmem:[%s4581_s1 + $0x1f8] sm:$0xff]  ;;  %v3689_v50 = vld [vmem:[%s4581_s1 + $0x130] sm:$0xff] }
  0x1d   : >> { %269 = vmatpush.bf16.msra.mxu0 %v3663_v13  ;;  %v363_v33 = vshll.u32 %v359_v29, 16  ;;  %v453_v36 = vshll.u32 %v449_v30, 16  ;;  %v361_v39 = vshrl.u32 %v359_v29, 16  ;;  %v451_v45 = vshrl.u32 %v449_v30, 16  ;;  %v3705_v51 = vld [vmem:[%s4581_s1 + $0x1b0] sm:$0xff]  ;;  %v3688_v55 = vld [vmem:[%s4581_s1 + $0x128] sm:$0xff]  ;;  %vm2339_vm2 = vmand %vm2337_vm0, %vm2338_vm1 }
  0x1e   : >> { %419 = vmatpush.bf16.msra.mxu2 %v3671_v14  ;;  %v3697_v53 = vld [vmem:[%s4581_s1 + $0x170] sm:$0xff]  ;;  %v3704_v56 = vld [vmem:[%s4581_s1 + $0x1a8] sm:$0xff]  ;;  %v3687_v59 = vld [vmem:[%s4581_s1 + $0x120] sm:$0xff] }
  0x1f   : >> { %330 = vmatpush.bf16.msra.mxu1 %v3655_v15  ;;  %v365_v40 = vrot.slane %v363_v33, 1  ;;  %v455_v46 = vrot.slane %v453_v36, 1  ;;  %v3713_v54 = vld [vmem:[%s4581_s1 + $0x1f0] sm:$0xff]  ;;  %v3696_v57 = vld [vmem:[%s4581_s1 + $0x168] sm:$0xff]  ;;  %v3703_v60 = vld [vmem:[%s4581_s1 + $0x1a0] sm:$0xff] }
  0x20   : >> { %509 = vmatpush.bf16.msra.mxu3 %v3679_v16  ;;  %v3712_v58 = vld [vmem:[%s4581_s1 + $0x1e8] sm:$0xff]  ;;  %v3695_v61 = vld [vmem:[%s4581_s1 + $0x160] sm:$0xff]  ;;  %v4086_v63 = vld [vmem:[%s3985_s8 + $0x38] sm:$0x7] }
  0x21   : >> { %270 = vmatpush.bf16.msra.mxu0 %v3662_v17  ;;  %v366_v49 = vor.u32 %v365_v40, %v361_v39  ;;  %v456_v52 = vor.u32 %v455_v46, %v451_v45  ;;  %v3711_v62 = vld [vmem:[%s4581_s1 + $0x1e0] sm:$0xff]  ;;  %v3686_v1 = vld [vmem:[%s4581_s1 + $0x118] sm:$0xff]  ;;  %v789_v5 = vunpack.c.l.b16 %v4086_v63  ;;  %v3685_v6 = vld [vmem:[%s4581_s1 + $0x110] sm:$0xff] }
  0x22   : >> { %420 = vmatpush.bf16.msra.mxu2 %v3670_v18  ;;  %v3702_v2 = vld [vmem:[%s4581_s1 + $0x198] sm:$0xff]  ;;  %v3701_v7 = vld [vmem:[%s4581_s1 + $0x190] sm:$0xff]  ;;  %v520_v8 = vld [vmem:[%s3985_s8] sm:$0xe] }
  0x23   : >> { %331 = vmatpush.bf16.msra.mxu1 %v3654_v19  ;;  %v3694_v3 = vld [vmem:[%s4581_s1 + $0x158] sm:$0xff]  ;;  %v3693_v9 = vld [vmem:[%s4581_s1 + $0x150] sm:$0xff]  ;;  %v790_v11 = vpack.c.b16 %v789_v5, %v789_v5  ;;  %v3684_v12 = vld [vmem:[%s4581_s1 + $0x108] sm:$0xff]  ;;  %v539_v14 = vunpack.c.l.b16 %v520_v8 }
  0x24   : >> { %510 = vmatpush.bf16.msra.mxu3 %v3678_v20  ;;  %v3710_v4 = vld [vmem:[%s4581_s1 + $0x1d8] sm:$0xff]  ;;  %v3709_v10 = vld [vmem:[%s4581_s1 + $0x1d0] sm:$0xff]  ;;  %v3700_v13 = vld [vmem:[%s4581_s1 + $0x188] sm:$0xff] }
  0x25   : >> { %271 = vmatpush.bf16.msra.mxu0 %v3661_v24  ;;  %v3692_v15 = vld [vmem:[%s4581_s1 + $0x148] sm:$0xff]  ;;  %v794_v17 = vshll.u32 %v790_v11, 16  ;;  %v3683_v18 = vld [vmem:[%s4581_s1 + $0x100] sm:$0xff]  ;;  %v540_v20 = vpack.c.b16 %v539_v14, %v539_v14  ;;  %v3738_v22 = vld [vmem:[%s4581_s1 + $0x2b8] sm:$0xff] }
  0x26   : >> { %421 = vmatpush.bf16.msra.mxu2 %v3669_v25  ;;  %v3708_v16 = vld [vmem:[%s4581_s1 + $0x1c8] sm:$0xff]  ;;  %v3699_v19 = vld [vmem:[%s4581_s1 + $0x180] sm:$0xff]  ;;  %v792_v25 = vshrl.u32 %v790_v11, 16  ;;  %v2719_v30 = vld [vmem:[%s3985_s8 + $0x54] sm:$0x7] }
  0x27   : >> { %332 = vmatpush.bf16.msra.mxu1 %v3653_v27  ;;  %v3707_v24 = vld [vmem:[%s4581_s1 + $0x1c0] sm:$0xff]  ;;  %v796_v26 = vrot.slane %v794_v17, 1  ;;  %v3730_v27 = vld [vmem:[%s4581_s1 + $0x278] sm:$0xff]  ;;  %v541_v29 = vrot.slane %v540_v20, 1  ;;  %v3720_v36 = vld [vmem:[%s4581_s1 + $0x228] sm:$0xff] }
  0x28   : >> { %511 = vmatpush.bf16.msra.mxu3 %v3677_v28  ;;  %v3746_v28 = vld [vmem:[%s4581_s1 + $0x2f8] sm:$0xff]  ;;  %v3744_v39 = vld [vmem:[%s4581_s1 + $0x2e8] sm:$0xff]  ;;  %v3719_v40 = vld [vmem:[%s4581_s1 + $0x220] sm:$0xff] }
  0x29   : >> { %272 = vmatpush.bf16.msra.mxu0 %v3660_v31  ;;  %v3721_v31 = vld [vmem:[%s4581_s1 + $0x230] sm:$0xff]  ;;  %v797_v33 = vor.u32 %v796_v26, %v792_v25  ;;  %v3718_v45 = vld [vmem:[%s4581_s1 + $0x218] sm:$0xff]  ;;  %v3723_v5 = vld [vmem:[%s4581_s1 + $0x240] sm:$0xff] }
  0x2a   : >> { %422 = vmatpush.bf16.msra.mxu2 %v3668_v32  ;;  %v3737_v32 = vld [vmem:[%s4581_s1 + $0x2b0] sm:$0xff]  ;;  %v3734_v46 = vld [vmem:[%s4581_s1 + $0x298] sm:$0xff]  ;;  %v2914_v8 = vld [vmem:[%s3985_s8 + $0x4] sm:$0x7] }
  0x2b   : >> { %333 = vmatpush.bf16.msra.mxu1 %v3652_v34  ;;  %v3729_v34 = vld [vmem:[%s4581_s1 + $0x270] sm:$0xff]  ;;  %v3752_v17 = vld [vmem:[%s4581_s1 + $0x328] sm:$0xff]  ;;  %v1220_v25 = vunpack.c.l.b16 %v2914_v8  ;;  %v3750_v26 = vld [vmem:[%s4581_s1 + $0x318] sm:$0xff] }
  0x2c   : >> { %512 = vmatpush.bf16.msra.mxu3 %v3676_v35  ;;  %v3745_v35 = vld [vmem:[%s4581_s1 + $0x2f0] sm:$0xff]  ;;  %v3776_v20 = vld [vmem:[%s4581_s1 + $0x3e8] sm:$0xff] }
  0x2d   : >> { %273 = vmatpush.bf16.msra.mxu0 %v3659_v37  ;;  %v3736_v37 = vld [vmem:[%s4581_s1 + $0x2a8] sm:$0xff]  ;;  %v3769_v14 = vld [vmem:[%s4581_s1 + $0x3b0] sm:$0xff] }
  0x2e   : >> { %423 = vmatpush.bf16.msra.mxu2 %v3667_v38  ;;  %v3728_v38 = vld [vmem:[%s4581_s1 + $0x268] sm:$0xff] }
  0x2f   : >> { %334 = vmatpush.bf16.msra.mxu1 %v3651_v43  ;;  %v3743_v43 = vld [vmem:[%s4581_s1 + $0x2e0] sm:$0xff] }
  0x30   : >> { %513 = vmatpush.bf16.msra.mxu3 %v3675_v44  ;;  %274 = vmatmul.bf16.vlgmr.msra.gmra.mxu0 %v2443_v23  ;;  %v3691_v23 = vld [vmem:[%s4581_s1 + $0x140] sm:$0xff]  ;;  %v879_v44 = vunpack.c.l.b16 %v2719_v30 }
  0x31   : >> { %591 = vmatpush.bf16.msrb.mxu0 %v3690_v41  ;;  %424 = vmatmul.bf16.vlgmr.msra.gmra.mxu2 %v366_v49  ;;  %v3735_v41 = vld [vmem:[%s4581_s1 + $0x2a0] sm:$0xff] }
  0x32   : >> { %757 = vmatpush.bf16.msrb.mxu2 %v3706_v42  ;;  %335 = vmatmul.bf16.vlgmr.msra.gmra.mxu1 %v180_v21  ;;  %v3722_v21 = vld [vmem:[%s4581_s1 + $0x238] sm:$0xff]  ;;  %v3727_v42 = vld [vmem:[%s4581_s1 + $0x260] sm:$0xff]  ;;  %v880_v49 = vpack.c.b16 %v879_v44, %v879_v44  ;;  %v3772_v44 = vld [vmem:[%s4581_s1 + $0x3c8] sm:$0xff] }
  0x33   : >> { %674 = vmatpush.bf16.msrb.mxu1 %v3698_v47  ;;  %514 = vmatmul.bf16.vlgmr.msra.gmra.mxu3 %v456_v52  ;;  %v3726_v47 = vld [vmem:[%s4581_s1 + $0x258] sm:$0xff]  ;;  %v3725_v52 = vld [vmem:[%s4581_s1 + $0x250] sm:$0xff] }
  0x34   : >> { %847 = vmatpush.bf16.msrb.mxu3 %v3714_v48  ;;  %v3742_v48 = vld [vmem:[%s4581_s1 + $0x2d8] sm:$0xff] }
  0x35   : >> { %592 = vmatpush.bf16.msrb.mxu0 %v3689_v50  ;;  %v3717_v50 = vld [vmem:[%s4581_s1 + $0x210] sm:$0xff] }
  0x36   : >> { %758 = vmatpush.bf16.msrb.mxu2 %v3705_v51  ;;  %v3733_v51 = vld [vmem:[%s4581_s1 + $0x290] sm:$0xff] }
  0x37   : >> { %675 = vmatpush.bf16.msrb.mxu1 %v3697_v53  ;;  %v3741_v53 = vld [vmem:[%s4581_s1 + $0x2d0] sm:$0xff] }
  0x38   : >> { %848 = vmatpush.bf16.msrb.mxu3 %v3713_v54  ;;  %v2864_v54 = vld [vmem:[%s3985_s8 + $0x38] sm:$0xe] }
  0x39   : >> { %593 = vmatpush.bf16.msrb.mxu0 %v3688_v55  ;;  %v884_v55 = vshll.u32 %v880_v49, 16 }
  0x3a   : >> { %759 = vmatpush.bf16.msrb.mxu2 %v3704_v56  ;;  %v3716_v56 = vld [vmem:[%s4581_s1 + $0x208] sm:$0xff] }
  0x3b   : >> { %676 = vmatpush.bf16.msrb.mxu1 %v3696_v57  ;;  %v3732_v57 = vld [vmem:[%s4581_s1 + $0x288] sm:$0xff] }
  0x3c   : >> { %849 = vmatpush.bf16.msrb.mxu3 %v3712_v58  ;;  %v970_v58 = vunpack.c.l.b16 %v2864_v54  ;;  %v3755_v54 = vld [vmem:[%s4581_s1 + $0x340] sm:$0xff] }
  0x3d   : >> { %594 = vmatpush.bf16.msrb.mxu0 %v3687_v59  ;;  %v3724_v59 = vld [vmem:[%s4581_s1 + $0x248] sm:$0xff] }
  0x3e   : >> { %760 = vmatpush.bf16.msrb.mxu2 %v3703_v60  ;;  %v3740_v60 = vld [vmem:[%s4581_s1 + $0x2c8] sm:$0xff] }
  0x3f   : >> { %677 = vmatpush.bf16.msrb.mxu1 %v3695_v61  ;;  %v882_v61 = vshrl.u32 %v880_v49, 16  ;;  %v3763_v49 = vld [vmem:[%s4581_s1 + $0x380] sm:$0xff] }
  0x40   : >> { %850 = vmatpush.bf16.msrb.mxu3 %v3711_v62  ;;  %v886_v62 = vrot.slane %v884_v55, 1  ;;  %v3771_v55 = vld [vmem:[%s4581_s1 + $0x3c0] sm:$0xff] }
  0x41   : >> { %595 = vmatpush.bf16.msrb.mxu0 %v3686_v1  ;;  %v3731_v1 = vld [vmem:[%s4581_s1 + $0x280] sm:$0xff] }
  0x42   : >> { %761 = vmatpush.bf16.msrb.mxu2 %v3702_v2  ;;  %v3754_v2 = vld [vmem:[%s4581_s1 + $0x338] sm:$0xff] }
  0x43   : >> { %678 = vmatpush.bf16.msrb.mxu1 %v3694_v3  ;;  %v3770_v3 = vld [vmem:[%s4581_s1 + $0x3b8] sm:$0xff] }
  0x44   : >> { %851 = vmatpush.bf16.msrb.mxu3 %v3710_v4  ;;  %v971_v4 = vpack.c.b16 %v970_v58, %v970_v58  ;;  %v3794_v58 = vld [vmem:[%s4581_s1 + $0x478] sm:$0xff] }
  0x45   : >> { %596 = vmatpush.bf16.msrb.mxu0 %v3685_v6  ;;  %v3739_v6 = vld [vmem:[%s4581_s1 + $0x2c0] sm:$0xff] }
  0x46   : >> { %762 = vmatpush.bf16.msrb.mxu2 %v3701_v7  ;;  %v887_v7 = vor.u32 %v886_v62, %v882_v61  ;;  %v972_v11 = vrot.slane %v971_v4, 1  ;;  %v3159_v61 = vld [vmem:[%s3985_s8 + $0x3c] sm:$0x7]  ;;  %v3785_v62 = vld [vmem:[%s4581_s1 + $0x430] sm:$0xff]  ;;  %v3800_v4 = vld [vmem:[%s4581_s1 + $0x4a8] sm:$0xff] }
  0x47   : >> { %679 = vmatpush.bf16.msrb.mxu1 %v3693_v9  ;;  %v3762_v9 = vld [vmem:[%s4581_s1 + $0x378] sm:$0xff] }
  0x48   : >> { %852 = vmatpush.bf16.msrb.mxu3 %v3709_v10  ;;  %v3778_v10 = vld [vmem:[%s4581_s1 + $0x3f8] sm:$0xff] }
  0x49   : >> { %597 = vmatpush.bf16.msrb.mxu0 %v3684_v12  ;;  %v2964_v12 = vld [vmem:[%s3985_s8 + $0x20] sm:$0x7] }
  0x4a   : >> { %763 = vmatpush.bf16.msrb.mxu2 %v3700_v13  ;;  %v3753_v13 = vld [vmem:[%s4581_s1 + $0x330] sm:$0xff] }
  0x4b   : >> { %680 = vmatpush.bf16.msrb.mxu1 %v3692_v15  ;;  %v3761_v15 = vld [vmem:[%s4581_s1 + $0x370] sm:$0xff] }
  0x4c   : >> { %853 = vmatpush.bf16.msrb.mxu3 %v3708_v16  ;;  %v3777_v16 = vld [vmem:[%s4581_s1 + $0x3f0] sm:$0xff] }
  0x4d   : >> { %598 = vmatpush.bf16.msrb.mxu0 %v3683_v18  ;;  %v3768_v18 = vld [vmem:[%s4581_s1 + $0x3a8] sm:$0xff] }
  0x4e   : >> { %764 = vmatpush.bf16.msrb.mxu2 %v3699_v19  ;;  %v3760_v19 = vld [vmem:[%s4581_s1 + $0x368] sm:$0xff] }
  0x4f   : >> { %681 = vmatpush.bf16.msrb.mxu1 %v3691_v23  ;;  %v3759_v23 = vld [vmem:[%s4581_s1 + $0x360] sm:$0xff] }
  0x50   : >> { %854 = vmatpush.bf16.msrb.mxu3 %v3707_v24  ;;  %599 = vmatmul.bf16.vlgmr.msrb.gmra.mxu0 %v541_v29  ;;  %v3775_v24 = vld [vmem:[%s4581_s1 + $0x3e0] sm:$0xff]  ;;  %v3758_v29 = vld [vmem:[%s4581_s1 + $0x358] sm:$0xff] }
  0x51   : >> { %937 = vmatpush.bf16.msra.mxu0 %v3722_v21  ;;  %765 = vmatmul.bf16.vlgmr.msrb.gmra.mxu2 %v2719_v30  ;;  %v3751_v21 = vld [vmem:[%s4581_s1 + $0x320] sm:$0xff]  ;;  %v3774_v30 = vld [vmem:[%s4581_s1 + $0x3d8] sm:$0xff] }
  0x52   : >> { %1105 = vmatpush.bf16.msra.mxu2 %v3738_v22  ;;  %682 = vmatmul.bf16.vlgmr.msrb.gmra.mxu1 %v4086_v63  ;;  %v3715_v63 = vld [vmem:[%s4581_s1 + $0x200] sm:$0xff] }
  0x53   : >> { %1022 = vmatpush.bf16.msra.mxu1 %v3730_v27  ;;  %855 = vmatmul.bf16.vlgmr.msrb.gmra.mxu3 %v797_v33  ;;  %v3767_v22 = vld [vmem:[%s4581_s1 + $0x3a0] sm:$0xff]  ;;  %v3766_v27 = vld [vmem:[%s4581_s1 + $0x398] sm:$0xff]  ;;  %v3765_v33 = vld [vmem:[%s4581_s1 + $0x390] sm:$0xff] }
  0x54   : >> { %1188 = vmatpush.bf16.msra.mxu3 %v3746_v28  ;;  %v1310_v28 = vunpack.c.l.b16 %v2964_v12 }
  0x55   : >> { %938 = vmatpush.bf16.msra.mxu0 %v3721_v31  ;;  %v1221_v31 = vpack.c.b16 %v1220_v25, %v1220_v25 }
  0x56   : >> { %1106 = vmatpush.bf16.msra.mxu2 %v3737_v32  ;;  %v3749_v32 = vld [vmem:[%s4581_s1 + $0x310] sm:$0xff] }
  0x57   : >> { %1023 = vmatpush.bf16.msra.mxu1 %v3729_v34  ;;  %v3109_v34 = vld [vmem:[%s3985_s8 + $0x4] sm:$0xe] }
  0x58   : >> { %1189 = vmatpush.bf16.msra.mxu3 %v3745_v35  ;;  %v1311_v35 = vpack.c.b16 %v1310_v28, %v1310_v28 }
  0x59   : >> { %939 = vmatpush.bf16.msra.mxu0 %v3720_v36  ;;  %v3757_v36 = vld [vmem:[%s4581_s1 + $0x350] sm:$0xff] }
  0x5a   : >> { %1107 = vmatpush.bf16.msra.mxu2 %v3736_v37  ;;  %v3773_v37 = vld [vmem:[%s4581_s1 + $0x3d0] sm:$0xff] }
  0x5b   : >> { %1024 = vmatpush.bf16.msra.mxu1 %v3728_v38  ;;  %v1225_v38 = vshll.u32 %v1221_v31, 16 }
  0x5c   : >> { %1190 = vmatpush.bf16.msra.mxu3 %v3744_v39  ;;  %v1401_v39 = vunpack.c.l.b16 %v3109_v34  ;;  %v3779_v34 = vld [vmem:[%s4581_s1 + $0x400] sm:$0xff] }
  0x5d   : >> { %940 = vmatpush.bf16.msra.mxu0 %v3719_v40  ;;  %v3748_v40 = vld [vmem:[%s4581_s1 + $0x308] sm:$0xff] }
  0x5e   : >> { %1108 = vmatpush.bf16.msra.mxu2 %v3735_v41  ;;  %v3764_v41 = vld [vmem:[%s4581_s1 + $0x388] sm:$0xff] }
  0x5f   : >> { %1025 = vmatpush.bf16.msra.mxu1 %v3727_v42  ;;  %v1315_v42 = vshll.u32 %v1311_v35, 16 }
  0x60   : >> { %1191 = vmatpush.bf16.msra.mxu3 %v3743_v43  ;;  %v3756_v43 = vld [vmem:[%s4581_s1 + $0x348] sm:$0xff] }
  0x61   : >> { %941 = vmatpush.bf16.msra.mxu0 %v3718_v45  ;;  %v1223_v45 = vshrl.u32 %v1221_v31, 16  ;;  %v3804_v31 = vld [vmem:[%s4581_s1 + $0x4c8] sm:$0xff] }
  0x62   : >> { %1109 = vmatpush.bf16.msra.mxu2 %v3734_v46  ;;  %v1227_v46 = vrot.slane %v1225_v38, 1  ;;  %v3818_v38 = vld [vmem:[%s4581_s1 + $0x538] sm:$0xff] }
  0x63   : >> { %1026 = vmatpush.bf16.msra.mxu1 %v3726_v47  ;;  %v1402_v47 = vpack.c.b16 %v1401_v39, %v1401_v39  ;;  %v3834_v39 = vld [vmem:[%s4581_s1 + $0x5b8] sm:$0xff] }
  0x64   : >> { %1192 = vmatpush.bf16.msra.mxu3 %v3742_v48  ;;  %v3747_v48 = vld [vmem:[%s4581_s1 + $0x300] sm:$0xff] }
  0x65   : >> { %942 = vmatpush.bf16.msra.mxu0 %v3717_v50  ;;  %v1313_v50 = vshrl.u32 %v1311_v35, 16  ;;  %v3795_v35 = vld [vmem:[%s4581_s1 + $0x480] sm:$0xff] }
  0x66   : >> { %1110 = vmatpush.bf16.msra.mxu2 %v3733_v51  ;;  %v1317_v51 = vrot.slane %v1315_v42, 1  ;;  %v3803_v42 = vld [vmem:[%s4581_s1 + $0x4c0] sm:$0xff] }
  0x67   : >> { %1027 = vmatpush.bf16.msra.mxu1 %v3725_v52  ;;  %v3786_v52 = vld [vmem:[%s4581_s1 + $0x438] sm:$0xff] }
  0x68   : >> { %1193 = vmatpush.bf16.msra.mxu3 %v3741_v53  ;;  %v3802_v53 = vld [vmem:[%s4581_s1 + $0x4b8] sm:$0xff] }
  0x69   : >> { %943 = vmatpush.bf16.msra.mxu0 %v3716_v56  ;;  %v1228_v56 = vor.u32 %v1227_v46, %v1223_v45  ;;  %v3842_v45 = vld [vmem:[%s4581_s1 + $0x5f8] sm:$0xff] }
  0x6a   : >> { %1111 = vmatpush.bf16.msra.mxu2 %v3732_v57  ;;  %v1403_v57 = vrot.slane %v1402_v47, 1 }
  0x6b   : >> { %1028 = vmatpush.bf16.msra.mxu1 %v3724_v59  ;;  %v3810_v59 = vld [vmem:[%s4581_s1 + $0x4f8] sm:$0xff] }
  0x6c   : >> { %1194 = vmatpush.bf16.msra.mxu3 %v3740_v60  ;;  %v1318_v60 = vor.u32 %v1317_v51, %v1313_v50  ;;  %v3825_v50 = vld [vmem:[%s4581_s1 + $0x570] sm:$0xff] }
  0x6d   : >> { %944 = vmatpush.bf16.msra.mxu0 %v3715_v63  ;;  %v3801_v63 = vld [vmem:[%s4581_s1 + $0x4b0] sm:$0xff] }
  0x6e   : >> { %1112 = vmatpush.bf16.msra.mxu2 %v3731_v1  ;;  %v3793_v1 = vld [vmem:[%s4581_s1 + $0x470] sm:$0xff] }
  0x6f   : >> { %1029 = vmatpush.bf16.msra.mxu1 %v3723_v5  ;;  %v3792_v5 = vld [vmem:[%s4581_s1 + $0x468] sm:$0xff]  ;;  %v3841_v51 = vld [vmem:[%s4581_s1 + $0x5f0] sm:$0xff] }
  0x70   : >> { %1195 = vmatpush.bf16.msra.mxu3 %v3739_v6  ;;  %945 = vmatmul.bf16.vlgmr.msra.gmra.mxu0 %v887_v7  ;;  %v3808_v6 = vld [vmem:[%s4581_s1 + $0x4e8] sm:$0xff]  ;;  %v3783_v7 = vld [vmem:[%s4581_s1 + $0x420] sm:$0xff] }
  0x71   : >> { %1278 = vmatpush.bf16.msrb.mxu0 %v3754_v2  ;;  %1113 = vmatmul.bf16.vlgmr.msra.gmra.mxu2 %v2914_v8  ;;  %v3809_v2 = vld [vmem:[%s4581_s1 + $0x4f0] sm:$0xff]  ;;  %v3799_v8 = vld [vmem:[%s4581_s1 + $0x4a0] sm:$0xff] }
  0x72   : >> { %1453 = vmatpush.bf16.msrb.mxu2 %v3770_v3  ;;  %1030 = vmatmul.bf16.vlgmr.msra.gmra.mxu1 %v972_v11  ;;  %v3784_v3 = vld [vmem:[%s4581_s1 + $0x428] sm:$0xff]  ;;  %v3807_v11 = vld [vmem:[%s4581_s1 + $0x4e0] sm:$0xff] }
  0x73   : >> { %1368 = vmatpush.bf16.msrb.mxu1 %v3762_v9  ;;  %1196 = vmatmul.bf16.vlgmr.msra.gmra.mxu3 %v2964_v12  ;;  %v4380_v9 = vld [vmem:[%s3985_s8 + $0x58] sm:$0x7] }
  0x74   : >> { %1536 = vmatpush.bf16.msrb.mxu3 %v3778_v10  ;;  %v3791_v10 = vld [vmem:[%s4581_s1 + $0x460] sm:$0xff]  ;;  %v1741_v12 = vunpack.c.l.b16 %v4380_v9 }
  0x75   : >> { %1279 = vmatpush.bf16.msrb.mxu0 %v3753_v13  ;;  %v3782_v13 = vld [vmem:[%s4581_s1 + $0x418] sm:$0xff] }
  0x76   : >> { %1454 = vmatpush.bf16.msrb.mxu2 %v3769_v14  ;;  %v3798_v14 = vld [vmem:[%s4581_s1 + $0x498] sm:$0xff] }
  0x77   : >> { %1369 = vmatpush.bf16.msrb.mxu1 %v3761_v15  ;;  %v1651_v15 = vunpack.c.l.b16 %v3159_v61 }
  0x78   : >> { %1537 = vmatpush.bf16.msrb.mxu3 %v3777_v16  ;;  %v3790_v16 = vld [vmem:[%s4581_s1 + $0x458] sm:$0xff] }
  0x79   : >> { %1280 = vmatpush.bf16.msrb.mxu0 %v3752_v17  ;;  %v3806_v17 = vld [vmem:[%s4581_s1 + $0x4d8] sm:$0xff] }
  0x7a   : >> { %1455 = vmatpush.bf16.msrb.mxu2 %v3768_v18  ;;  %v1742_v18 = vpack.c.b16 %v1741_v12, %v1741_v12 }
  0x7b   : >> { %1370 = vmatpush.bf16.msrb.mxu1 %v3760_v19  ;;  %v3781_v19 = vld [vmem:[%s4581_s1 + $0x410] sm:$0xff] }
  0x7c   : >> { %1538 = vmatpush.bf16.msrb.mxu3 %v3776_v20  ;;  %v3797_v20 = vld [vmem:[%s4581_s1 + $0x490] sm:$0xff]  ;;  %v1746_v25 = vshll.u32 %v1742_v18, 16 }
  0x7d   : >> { %1281 = vmatpush.bf16.msrb.mxu0 %v3751_v21  ;;  %v1652_v21 = vpack.c.b16 %v1651_v15, %v1651_v15 }
  0x7e   : >> { %1456 = vmatpush.bf16.msrb.mxu2 %v3767_v22  ;;  %v3789_v22 = vld [vmem:[%s4581_s1 + $0x450] sm:$0xff] }
  0x7f   : >> { %1371 = vmatpush.bf16.msrb.mxu1 %v3759_v23  ;;  %v3805_v23 = vld [vmem:[%s4581_s1 + $0x4d0] sm:$0xff]  ;;  %v1656_v28 = vshll.u32 %v1652_v21, 16 }
  0x80   : >> { %1539 = vmatpush.bf16.msrb.mxu3 %v3775_v24  ;;  %v3354_v24 = vld [vmem:[%s3985_s8 + $0x3c] sm:$0xe] }
  0x81   : >> { %1282 = vmatpush.bf16.msrb.mxu0 %v3750_v26  ;;  %v3780_v26 = vld [vmem:[%s4581_s1 + $0x408] sm:$0xff] }
  0x82   : >> { %1457 = vmatpush.bf16.msrb.mxu2 %v3766_v27  ;;  %v3796_v27 = vld [vmem:[%s4581_s1 + $0x488] sm:$0xff] }
  0x83   : >> { %1372 = vmatpush.bf16.msrb.mxu1 %v3758_v29  ;;  %v1832_v29 = vunpack.c.l.b16 %v3354_v24  ;;  %v3820_v24 = vld [vmem:[%s4581_s1 + $0x548] sm:$0xff] }
  0x84   : >> { %1540 = vmatpush.bf16.msrb.mxu3 %v3774_v30  ;;  %v3788_v30 = vld [vmem:[%s4581_s1 + $0x448] sm:$0xff] }
  0x85   : >> { %1283 = vmatpush.bf16.msrb.mxu0 %v3749_v32  ;;  %v1744_v32 = vshrl.u32 %v1742_v18, 16 }
  0x86   : >> { %1458 = vmatpush.bf16.msrb.mxu2 %v3765_v33  ;;  %v1748_v33 = vrot.slane %v1746_v25, 1  ;;  %v3836_v25 = vld [vmem:[%s4581_s1 + $0x5c8] sm:$0xff] }
  0x87   : >> { %1373 = vmatpush.bf16.msrb.mxu1 %v3757_v36  ;;  %v1654_v36 = vshrl.u32 %v1652_v21, 16  ;;  %v3812_v21 = vld [vmem:[%s4581_s1 + $0x508] sm:$0xff] }
  0x88   : >> { %1541 = vmatpush.bf16.msrb.mxu3 %v3773_v37  ;;  %v1658_v37 = vrot.slane %v1656_v28, 1 }
  0x89   : >> { %1284 = vmatpush.bf16.msrb.mxu0 %v3748_v40  ;;  %v1833_v40 = vpack.c.b16 %v1832_v29, %v1832_v29  ;;  %v3811_v29 = vld [vmem:[%s4581_s1 + $0x500] sm:$0xff] }
  0x8a   : >> { %1459 = vmatpush.bf16.msrb.mxu2 %v3764_v41  ;;  %v3787_v41 = vld [vmem:[%s4581_s1 + $0x440] sm:$0xff]  ;;  %v1659_v46 = vor.u32 %v1658_v37, %v1654_v36 }
  0x8b   : >> { %1374 = vmatpush.bf16.msrb.mxu1 %v3756_v43  ;;  %v1749_v43 = vor.u32 %v1748_v33, %v1744_v32  ;;  %v1834_v47 = vrot.slane %v1833_v40, 1  ;;  %v3835_v36 = vld [vmem:[%s4581_s1 + $0x5c0] sm:$0xff]  ;;  %v3848_v40 = vld [vmem:[%s4581_s1 + $0x628] sm:$0xff] }
  0x8c   : >> { %1542 = vmatpush.bf16.msrb.mxu3 %v3772_v44  ;;  %v3826_v44 = vld [vmem:[%s4581_s1 + $0x578] sm:$0xff] }
  0x8d   : >> { %1285 = vmatpush.bf16.msrb.mxu0 %v3747_v48  ;;  %v3817_v48 = vld [vmem:[%s4581_s1 + $0x530] sm:$0xff] }
  0x8e   : >> { %1460 = vmatpush.bf16.msrb.mxu2 %v3763_v49  ;;  %v3833_v49 = vld [vmem:[%s4581_s1 + $0x5b0] sm:$0xff] }
  0x8f   : >> { %1375 = vmatpush.bf16.msrb.mxu1 %v3755_v54  ;;  %v3824_v54 = vld [vmem:[%s4581_s1 + $0x568] sm:$0xff] }
  0x90   : >> { %1543 = vmatpush.bf16.msrb.mxu3 %v3771_v55  ;;  %1286 = vmatmul.bf16.vlgmr.msrb.gmra.mxu0 %v1228_v56  ;;  %v3840_v55 = vld [vmem:[%s4581_s1 + $0x5e8] sm:$0xff]  ;;  %v3815_v56 = vld [vmem:[%s4581_s1 + $0x520] sm:$0xff] }
  0x91   : >> { %1619 = vmatpush.bf16.msra.mxu0 %v3786_v52  ;;  %1461 = vmatmul.bf16.vlgmr.msrb.gmra.mxu2 %v1403_v57  ;;  %v3816_v52 = vld [vmem:[%s4581_s1 + $0x528] sm:$0xff]  ;;  %v3831_v57 = vld [vmem:[%s4581_s1 + $0x5a0] sm:$0xff] }
  0x92   : >> { %1799 = vmatpush.bf16.msra.mxu2 %v3802_v53  ;;  %1376 = vmatmul.bf16.vlgmr.msrb.gmra.mxu1 %v1318_v60  ;;  %v3832_v53 = vld [vmem:[%s4581_s1 + $0x5a8] sm:$0xff]  ;;  %v3823_v60 = vld [vmem:[%s4581_s1 + $0x560] sm:$0xff] }
  0x93   : >> { %1709 = vmatpush.bf16.msra.mxu1 %v3794_v58  ;;  %1544 = vmatmul.bf16.vlgmr.msrb.gmra.mxu3 %v3159_v61  ;;  %v4482_v58 = vld [vmem:[%s3985_s8 + $0x8] sm:$0x7]  ;;  %v3839_v61 = vld [vmem:[%s4581_s1 + $0x5e0] sm:$0xff] }
  0x94   : >> { %1884 = vmatpush.bf16.msra.mxu3 %v3810_v59 }
  0x95   : >> { %1620 = vmatpush.bf16.msra.mxu0 %v3785_v62  ;;  %v4491_v62 = vld [vmem:[%s3985_s8 + $0x24] sm:$0x7] }
  0x96   : >> { %1800 = vmatpush.bf16.msra.mxu2 %v3801_v63 }
  0x97   : >> { %1710 = vmatpush.bf16.msra.mxu1 %v3793_v1  ;;  %v2082_v1 = vunpack.c.l.b16 %v4482_v58 }
  0x98   : >> { %1885 = vmatpush.bf16.msra.mxu3 %v3809_v2  ;;  %v3814_v2 = vld [vmem:[%s4581_s1 + $0x518] sm:$0xff] }
  0x99   : >> { %1621 = vmatpush.bf16.msra.mxu0 %v3784_v3  ;;  %v3830_v3 = vld [vmem:[%s4581_s1 + $0x598] sm:$0xff] }
  0x9a   : >> { %1801 = vmatpush.bf16.msra.mxu2 %v3800_v4 }
  0x9b   : >> { %1711 = vmatpush.bf16.msra.mxu1 %v3792_v5  ;;  %v2172_v5 = vunpack.c.l.b16 %v4491_v62 }
  0x9c   : >> { %1886 = vmatpush.bf16.msra.mxu3 %v3808_v6  ;;  %v3822_v6 = vld [vmem:[%s4581_s1 + $0x558] sm:$0xff] }
  0x9d   : >> { %1622 = vmatpush.bf16.msra.mxu0 %v3783_v7  ;;  %v3838_v7 = vld [vmem:[%s4581_s1 + $0x5d8] sm:$0xff] }
  0x9e   : >> { %1802 = vmatpush.bf16.msra.mxu2 %v3799_v8  ;;  %v2083_v8 = vpack.c.b16 %v2082_v1, %v2082_v1 }
  0x9f   : >> { %1712 = vmatpush.bf16.msra.mxu1 %v3791_v10  ;;  %v3813_v10 = vld [vmem:[%s4581_s1 + $0x510] sm:$0xff] }
  0xa0   : >> { %1887 = vmatpush.bf16.msra.mxu3 %v3807_v11  ;;  %v3829_v11 = vld [vmem:[%s4581_s1 + $0x590] sm:$0xff] }
  0xa1   : >> { %1623 = vmatpush.bf16.msra.mxu0 %v3782_v13  ;;  %v2173_v13 = vpack.c.b16 %v2172_v5, %v2172_v5 }
  0xa2   : >> { %1803 = vmatpush.bf16.msra.mxu2 %v3798_v14 }
  0xa3   : >> { %1713 = vmatpush.bf16.msra.mxu1 %v3790_v16  ;;  %v3821_v16 = vld [vmem:[%s4581_s1 + $0x550] sm:$0xff]  ;;  %v2175_v32 = vshrl.u32 %v2173_v13, 16 }
  0xa4   : >> { %1888 = vmatpush.bf16.msra.mxu3 %v3806_v17  ;;  %v3837_v17 = vld [vmem:[%s4581_s1 + $0x5d0] sm:$0xff] }
  0xa5   : >> { %1624 = vmatpush.bf16.msra.mxu0 %v3781_v19  ;;  %v2087_v19 = vshll.u32 %v2083_v8, 16 }
  0xa6   : >> { %1804 = vmatpush.bf16.msra.mxu2 %v3797_v20 }
  0xa7   : >> { %1714 = vmatpush.bf16.msra.mxu1 %v3789_v22  ;;  %v3828_v22 = vld [vmem:[%s4581_s1 + $0x588] sm:$0xff] }
  0xa8   : >> { %1889 = vmatpush.bf16.msra.mxu3 %v3805_v23  ;;  %v2177_v23 = vshll.u32 %v2173_v13, 16 }
  0xa9   : >> { %1625 = vmatpush.bf16.msra.mxu0 %v3780_v26  ;;  %v2085_v26 = vshrl.u32 %v2083_v8, 16 }
  0xaa   : >> { %1805 = vmatpush.bf16.msra.mxu2 %v3796_v27  ;;  %v2089_v27 = vrot.slane %v2087_v19, 1  ;;  %v2179_v33 = vrot.slane %v2177_v23, 1 }
  0xab   : >> { %1715 = vmatpush.bf16.msra.mxu1 %v3788_v30  ;;  %v3827_v30 = vld [vmem:[%s4581_s1 + $0x580] sm:$0xff] }
  0xac   : >> { %1890 = vmatpush.bf16.msra.mxu3 %v3804_v31  ;;  %v3850_v31 = vld [vmem:[%s4581_s1 + $0x638] sm:$0xff]  ;;  %v2090_v37 = vor.u32 %v2089_v27, %v2085_v26 }
  0xad   : >> { %1626 = vmatpush.bf16.msra.mxu0 %v3779_v34  ;;  %v275_v59 = vpop.f32.mrf.mxu0 }
  0xae   : >> { %1806 = vmatpush.bf16.msra.mxu2 %v3795_v35  ;;  %v3819_v35 = vld [vmem:[%s4581_s1 + $0x540] sm:$0xff] }
  0xaf   : >> { %1716 = vmatpush.bf16.msra.mxu1 %v3787_v41  ;;  %v336_v63 = vpop.f32.mrf.mxu1  ;;  %v3847_v41 = vld [vmem:[%s4581_s1 + $0x620] sm:$0xff] }
  0xb0   : >> { %1891 = vmatpush.bf16.msra.mxu3 %v3803_v42  ;;  %1627 = vmatmul.bf16.vlgmr.msra.gmra.mxu0 %v4380_v9  ;;  %v337_v4 = vadd.f32 %v336_v63, %v275_v59  ;;  %v3843_v59 = vld [vmem:[%s4581_s1 + $0x600] sm:$0xff] }
  0xb1   : >> { %1967 = vmatpush.bf16.msrb.mxu0 %v3818_v38  ;;  %1807 = vmatmul.bf16.vlgmr.msra.gmra.mxu2 %v1749_v43  ;;  %v2180_v38 = vor.u32 %v2179_v33, %v2175_v32 }
  0xb2   : >> { %2140 = vmatpush.bf16.msrb.mxu2 %v3834_v39  ;;  %1717 = vmatmul.bf16.vlgmr.msra.gmra.mxu1 %v1659_v46  ;;  %v3849_v39 = vld [vmem:[%s4581_s1 + $0x630] sm:$0xff]  ;;  %v3846_v46 = vld [vmem:[%s4581_s1 + $0x618] sm:$0xff] }
  0xb3   : >> { %2050 = vmatpush.bf16.msrb.mxu1 %v3826_v44  ;;  %1892 = vmatmul.bf16.vlgmr.msra.gmra.mxu3 %v1834_v47 }
  0xb4   : >> { %2230 = vmatpush.bf16.msrb.mxu3 %v3842_v45  ;;  %v425_v9 = vpop.f32.mrf.mxu2 }
  0xb5   : >> { %1968 = vmatpush.bf16.msrb.mxu0 %v3817_v48  ;;  %v429_v12 = vadd.f32 %v425_v9, %v337_v4  ;;  %v277_v15 = vpop.f32.mrf.mxu0 }
  0xb6   : >> { %2141 = vmatpush.bf16.msrb.mxu2 %v3833_v49  ;;  %v515_v14 = vpop.f32.mrf.mxu3  ;;  %v3845_v49 = vld [vmem:[%s4581_s1 + $0x610] sm:$0xff] }
  0xb7   : >> { %2051 = vmatpush.bf16.msrb.mxu1 %v3825_v50  ;;  %v519_v18 = vadd.f32 %v515_v14, %v429_v12  ;;  %v338_v20 = vpop.f32.mrf.mxu1 }
  0xb8   : >> { %2231 = vmatpush.bf16.msrb.mxu3 %v3841_v51  ;;  %v3599_v51 = vld [vmem:[%s3985_s8 + $0x8] sm:$0xe]  ;;  %s2336_s8 = scalar_lea.vmem %s3926_s23, %s2441_s30 }
  0xb9   : >> { %1969 = vmatpush.bf16.msrb.mxu0 %v3816_v52 }
  0xba   : >> { %2142 = vmatpush.bf16.msrb.mxu2 %v3832_v53 }
  0xbb   : >> { %2052 = vmatpush.bf16.msrb.mxu1 %v3824_v54 }
  0xbc   : >> { %2232 = vmatpush.bf16.msrb.mxu3 %v3840_v55  ;;  %v427_v28 = vpop.f32.mrf.mxu2  ;;  %v2263_v55 = vunpack.c.l.b16 %v3599_v51 }
  0xbd   : >> { %1970 = vmatpush.bf16.msrb.mxu0 %v3815_v56  ;;  %v3844_v56 = vld [vmem:[%s4581_s1 + $0x608] sm:$0xff] }
  0xbe   : >> { %2143 = vmatpush.bf16.msrb.mxu2 %v3831_v57  ;;  %v517_v34 = vpop.f32.mrf.mxu3 }
  0xbf   : >> { %2053 = vmatpush.bf16.msrb.mxu1 %v3823_v60 }
  0xc0   : >> { %2233 = vmatpush.bf16.msrb.mxu3 %v3839_v61 }
  0xc1   : >> { %1971 = vmatpush.bf16.msrb.mxu0 %v3814_v2 }
  0xc2   : >> { %2144 = vmatpush.bf16.msrb.mxu2 %v3830_v3 }
  0xc3   : >> { %2054 = vmatpush.bf16.msrb.mxu1 %v3822_v6 }
  0xc4   : >> { %2234 = vmatpush.bf16.msrb.mxu3 %v3838_v7 }
  0xc5   : >> { %1972 = vmatpush.bf16.msrb.mxu0 %v3813_v10 }
  0xc6   : >> { %2145 = vmatpush.bf16.msrb.mxu2 %v3829_v11 }
  0xc7   : >> { %2055 = vmatpush.bf16.msrb.mxu1 %v3821_v16 }
  0xc8   : >> { %2235 = vmatpush.bf16.msrb.mxu3 %v3837_v17 }
  0xc9   : >> { %1973 = vmatpush.bf16.msrb.mxu0 %v3812_v21 }
  0xca   : >> { %2146 = vmatpush.bf16.msrb.mxu2 %v3828_v22 }
  0xcb   : >> { %2056 = vmatpush.bf16.msrb.mxu1 %v3820_v24 }
  0xcc   : >> { %2236 = vmatpush.bf16.msrb.mxu3 %v3836_v25 }
  0xcd   : >> { %1974 = vmatpush.bf16.msrb.mxu0 %v3811_v29  ;;  %v600_v42 = vpop.f32.mrf.mxu0 }
  0xce   : >> { %2147 = vmatpush.bf16.msrb.mxu2 %v3827_v30  ;;  %v604_v43 = vadd.f32 %v600_v42, %v519_v18 }
  0xcf   : >> { %2057 = vmatpush.bf16.msrb.mxu1 %v3819_v35  ;;  %v683_v44 = vpop.f32.mrf.mxu1 }
  0xd0   : >> { %2237 = vmatpush.bf16.msrb.mxu3 %v3835_v36  ;;  %1975 = vmatmul.bf16.vlgmr.msrb.gmra.mxu0 %v4482_v58  ;;  %v687_v45 = vadd.f32 %v683_v44, %v604_v43  ;;  %v2264_v58 = vpack.c.b16 %v2263_v55, %v2263_v55 }
  0xd1   : >> { %2315 = vmatpush.bf16.msra.mxu0 %v3850_v31  ;;  %2148 = vmatmul.bf16.vlgmr.msrb.gmra.mxu2 %v2090_v37 }
  0xd2   : >> { %2058 = vmatmul.bf16.vlgmr.msrb.gmra.mxu1 %v4491_v62  ;;  %v2265_v61 = vrot.slane %v2264_v58, 1 }
  0xd3   : >> { %2238 = vmatmul.bf16.vlgmr.msrb.gmra.mxu3 %v2180_v38 }
  0xd4   : >> { %v766_v47 = vpop.f32.mrf.mxu2 }
  0xd5   : >> { %2316 = vmatpush.bf16.msra.mxu0 %v3849_v39  ;;  %v770_v48 = vadd.f32 %v766_v47, %v687_v45  ;;  %v602_v52 = vpop.f32.mrf.mxu0  ;;  %v2330_v47 = vperm.slane %v3916_v0, 0 }
  0xd6   : >> { %v856_v50 = vpop.f32.mrf.mxu3  ;;  %v2340_v52 = vld [vmem:[%s2336_s8] sm:$0x7] }
  0xd7   : >> { %v860_v53 = vadd.f32 %v856_v50, %v770_v48  ;;  %v685_v54 = vpop.f32.mrf.mxu1 }
  0xd9   : >> { %2317 = vmatpush.bf16.msra.mxu0 %v3848_v40 }
  0xdc   : >> { %v768_v57 = vpop.f32.mrf.mxu2 }
  0xdd   : >> { %2318 = vmatpush.bf16.msra.mxu0 %v3847_v41 }
  0xde   : >> { %v858_v60 = vpop.f32.mrf.mxu3 }
  0xe1   : >> { %2319 = vmatpush.bf16.msra.mxu0 %v3846_v46 }
  0xe5   : >> { %2320 = vmatpush.bf16.msra.mxu0 %v3845_v49 }
  0xe9   : >> { %2321 = vmatpush.bf16.msra.mxu0 %v3844_v56 }
  0xed   : >> { %2322 = vmatpush.bf16.msra.mxu0 %v3843_v59  ;;  %v946_v62 = vpop.f32.mrf.mxu0 }
  0xee   : >> { %v950_v63 = vadd.f32 %v946_v62, %v860_v53 }
  0xef   : >> { %v1031_v1 = vpop.f32.mrf.mxu1 }
  0xf0   : >> { %2323 = vmatmul.bf16.vlgmr.msra.gmra.mxu0 %v2265_v61  ;;  %v1035_v2 = vadd.f32 %v1031_v1, %v950_v63 }
  0xf4   : >> { %v1114_v3 = vpop.f32.mrf.mxu2 }
  0xf5   : >> { %v1118_v4 = vadd.f32 %v1114_v3, %v1035_v2  ;;  %v948_v6 = vpop.f32.mrf.mxu0 }
  0xf6   : >> { %v1197_v5 = vpop.f32.mrf.mxu3 }
  0xf7   : >> { %v1201_v7 = vadd.f32 %v1197_v5, %v1118_v4  ;;  %v1033_v8 = vpop.f32.mrf.mxu1 }
  0xfc   : >> { %v1116_v9 = vpop.f32.mrf.mxu2 }
  0xfe   : >> { %v1199_v10 = vpop.f32.mrf.mxu3 }
 0x10d   : >> { %v1287_v11 = vpop.f32.mrf.mxu0 }
 0x10e   : >> { %v1291_v12 = vadd.f32 %v1287_v11, %v1201_v7 }
 0x10f   : >> { %v1377_v13 = vpop.f32.mrf.mxu1 }
 0x110   : >> { %v1381_v14 = vadd.f32 %v1377_v13, %v1291_v12 }
 0x114   : >> { %v1462_v15 = vpop.f32.mrf.mxu2 }
 0x115   : >> { %v1466_v16 = vadd.f32 %v1462_v15, %v1381_v14  ;;  %v1289_v18 = vpop.f32.mrf.mxu0 }
 0x116   : >> { %v1545_v17 = vpop.f32.mrf.mxu3 }
 0x117   : >> { %v1549_v19 = vadd.f32 %v1545_v17, %v1466_v16  ;;  %v1379_v20 = vpop.f32.mrf.mxu1 }
 0x11c   : >> { %v1464_v21 = vpop.f32.mrf.mxu2 }
 0x11e   : >> { %v1547_v22 = vpop.f32.mrf.mxu3 }
 0x12d   : >> { %v1628_v23 = vpop.f32.mrf.mxu0 }
 0x12e   : >> { %v1632_v34 = vadd.f32 %v1628_v23, %v1549_v19 }
 0x12f   : >> { %v1718_v24 = vpop.f32.mrf.mxu1 }
 0x130   : >> { %v1722_v38 = vadd.f32 %v1718_v24, %v1632_v34 }
 0x134   : >> { %v1808_v25 = vpop.f32.mrf.mxu2 }
 0x135   : >> { %v1630_v27 = vpop.f32.mrf.mxu0  ;;  %v1812_v39 = vadd.f32 %v1808_v25, %v1722_v38 }
 0x136   : >> { %v1893_v26 = vpop.f32.mrf.mxu3 }
 0x137   : >> { %v1720_v28 = vpop.f32.mrf.mxu1  ;;  %v1897_v42 = vadd.f32 %v1893_v26, %v1812_v39 }
 0x13c   : >> { %v1810_v29 = vpop.f32.mrf.mxu2 }
 0x13e   : >> { %v1895_v30 = vpop.f32.mrf.mxu3 }
 0x14d   : >> { %v1976_v31 = vpop.f32.mrf.mxu0 }
 0x14e   : >> { %v1980_v43 = vadd.f32 %v1976_v31, %v1897_v42 }
 0x14f   : >> { %v2059_v32 = vpop.f32.mrf.mxu1 }
 0x150   : >> { %v2063_v44 = vadd.f32 %v2059_v32, %v1980_v43 }
 0x154   : >> { %v2149_v33 = vpop.f32.mrf.mxu2 }
 0x155   : >> { %v1978_v36 = vpop.f32.mrf.mxu0  ;;  %v2153_v45 = vadd.f32 %v2149_v33, %v2063_v44 }
 0x156   : >> { %v2239_v35 = vpop.f32.mrf.mxu3 }
 0x157   : >> { %v2061_v37 = vpop.f32.mrf.mxu1  ;;  %v2243_v46 = vadd.f32 %v2239_v35, %v2153_v45 }
 0x15c   : >> { %v2151_v40 = vpop.f32.mrf.mxu2 }
 0x15e   : >> { %v2241_v41 = vpop.f32.mrf.mxu3 }
 0x16d   : >> { %v2324_v48 = vpop.f32.mrf.mxu0 }
 0x16e   : >> { %v2328_v49 = vadd.f32 %v2324_v48, %v2243_v46 }
 0x170   : >> { %v2332_v50 = vadd.f32 %v2330_v47, %v2328_v49 }
 0x172   : >> { %v2333_v51 = vmax.f32 %v2332_v50, 0.0 }
 0x173   : > { %176 = sbr.rel (!%p174_p4) target bundleno = 16 (0x10), region = 104 }
 0x174   : >> { %v2334_v53 = vpack.c.bf16 %v2333_v51, %v2333_v51 }
 0x175   : >> { %v2326_v54 = vpop.f32.mrf.mxu0 }
 0x176   : >> { %v2341_v55 = vsel %vm2339_vm2, %v2334_v53, %v2340_v52 }
 0x177   : >> { %2342 = vst [vmem:[%s2336_s8] sm:$0x7] %v2341_v55 }
 0x178 PF: > { %s13_s12 = sadd.s32 1, %s3879_s12  }
 0x179   : > { %p10_p5 = scmp.ge.s32.totalorder %s13_s12, 4  }
 0x17b   :  { %12 = sbr.rel (!%p10_p5) target bundleno = 1 (0x1), region = 115 }

// kernel: pilotnet_forward.11
= control target key start
LH: loop header
LB: loop body
LE: loop exit
PB: predicated region body
PF: predicated region fallthrough
CT: control target
= control target key end

     0   :  { %s8936_s1 = inlined_call_operand.vmem [shape: bf16[256,1024], index: 1, kind: input, shape index: {}]   ;;  %s8937_s0 = inlined_call_operand.vmem [shape: bf16[8,256], index: 0, kind: input, shape index: {}]   ;;  %s8938_s3 = inlined_call_operand.vmem [shape: bf16[1024,512], index: 3, kind: input, shape index: {}]   ;;  %s8939_s2 = inlined_call_operand.vmem [shape: f32[1,1024], index: 2, kind: input, shape index: {}]   ;;  %s8940_s4 = inlined_call_operand.vmem [shape: f32[1,512], index: 4, kind: input, shape index: {}]   ;;  %s8941_s5 = inlined_call_operand.vmem [shape: bf16[512,256], index: 5, kind: input, shape index: {}]   ;;  %s8942_s6 = inlined_call_operand.vmem [shape: f32[1,256], index: 6, kind: input, shape index: {}]   ;;  %s8943_s8 = inlined_call_operand.vmem [shape: f32[1,128], index: 8, kind: input, shape index: {}]   ;;  %s8944_s7 = inlined_call_operand.vmem [shape: bf16[256,128], index: 7, kind: input, shape index: {}]   ;;  %s8945_s9 = inlined_call_operand.vmem [shape: f32[8,128], index: 9, kind: output, shape index: {}]  }
   0x1   :  { %v3907_v0 = vld [vmem:[%s8936_s1 + $0x1c0] sm:$0xf]  ;;  %v5593_v5 = vld [vmem:[%s8936_s1 + $0x1c4] sm:$0xf] }
   0x2   :  { %v5597_v1 = vld [vmem:[%s8936_s1 + $0x1dc] sm:$0xf0]  ;;  %v3909_v6 = vld [vmem:[%s8936_s1 + $0x1e0] sm:$0xf0] }
   0x3   :  { %v4163_v2 = vld [vmem:[%s8936_s1 + $0x3c0] sm:$0xf]  ;;  %v3908_v3 = vor.u32 %v5597_v1, %v3907_v0  ;;  %v3912_v8 = vor.u32 %v5593_v5, %v3909_v6  ;;  %v5657_v9 = vld [vmem:[%s8936_s1 + $0x3c4] sm:$0xf] }
   0x4   :  { %v5661_v4 = vld [vmem:[%s8936_s1 + $0x3dc] sm:$0xf0]  ;;  %v4165_v10 = vld [vmem:[%s8936_s1 + $0x3e0] sm:$0xf0] }
   0x5   :  { %v4164_v7 = vor.u32 %v5661_v4, %v4163_v2  ;;  %v3875_v11 = vld [vmem:[%s8936_s1 + $0x180] sm:$0xf]  ;;  %826 = vmatpush.bf16.msra.mxu0 %v3908_v3  ;;  %v4168_v12 = vor.u32 %v5657_v9, %v4165_v10  ;;  %852 = vmatpush.bf16.msra.mxu2 %v3912_v8  ;;  %v5585_v18 = vld [vmem:[%s8936_s1 + $0x184] sm:$0xf] }
   0x6   :  { %v5589_v13 = vld [vmem:[%s8936_s1 + $0x19c] sm:$0xf0]  ;;  %v3877_v19 = vld [vmem:[%s8936_s1 + $0x1a0] sm:$0xf0] }
   0x7   :  { %v4131_v14 = vld [vmem:[%s8936_s1 + $0x380] sm:$0xf]  ;;  %839 = vmatpush.bf16.msra.mxu1 %v4164_v7  ;;  %v3876_v16 = vor.u32 %v5589_v13, %v3875_v11  ;;  %v5649_v20 = vld [vmem:[%s8936_s1 + $0x384] sm:$0xf]  ;;  %865 = vmatpush.bf16.msra.mxu3 %v4168_v12  ;;  %v3880_v21 = vor.u32 %v5585_v18, %v3877_v19 }
   0x8   :  { %v5653_v15 = vld [vmem:[%s8936_s1 + $0x39c] sm:$0xf0]  ;;  %v4133_v22 = vld [vmem:[%s8936_s1 + $0x3a0] sm:$0xf0] }
   0x9   :  { %v4132_v17 = vor.u32 %v5653_v15, %v4131_v14  ;;  %v3843_v23 = vld [vmem:[%s8936_s1 + $0x140] sm:$0xf]  ;;  %v4136_v25 = vor.u32 %v5649_v20, %v4133_v22  ;;  %v5577_v28 = vld [vmem:[%s8936_s1 + $0x144] sm:$0xf]  ;;  %827 = vmatpush.bf16.msra.mxu0 %v3876_v16  ;;  %853 = vmatpush.bf16.msra.mxu2 %v3880_v21 }
   0xa   :  { %v5581_v24 = vld [vmem:[%s8936_s1 + $0x15c] sm:$0xf0]  ;;  %v3845_v30 = vld [vmem:[%s8936_s1 + $0x160] sm:$0xf0] }
   0xb   :  { %v4099_v26 = vld [vmem:[%s8936_s1 + $0x340] sm:$0xf]  ;;  %v3844_v29 = vor.u32 %v5581_v24, %v3843_v23  ;;  %v5641_v31 = vld [vmem:[%s8936_s1 + $0x344] sm:$0xf]  ;;  %840 = vmatpush.bf16.msra.mxu1 %v4132_v17  ;;  %v3848_v34 = vor.u32 %v5577_v28, %v3845_v30  ;;  %866 = vmatpush.bf16.msra.mxu3 %v4136_v25  ;;  %v3915_v28 = vld [vmem:[%s8936_s1 + $0x1c8] sm:$0xf] }
   0xc   :  { %v5645_v27 = vld [vmem:[%s8936_s1 + $0x35c] sm:$0xf0]  ;;  %v4101_v32 = vld [vmem:[%s8936_s1 + $0x360] sm:$0xf0]  ;;  %v4171_v30 = vld [vmem:[%s8936_s1 + $0x3c8] sm:$0xf] }
   0xd   :  { %v4100_v33 = vor.u32 %v5645_v27, %v4099_v26  ;;  %v3811_v35 = vld [vmem:[%s8936_s1 + $0x100] sm:$0xf]  ;;  %v4104_v38 = vor.u32 %v5641_v31, %v4101_v32  ;;  %v5569_v40 = vld [vmem:[%s8936_s1 + $0x104] sm:$0xf]  ;;  %828 = vmatpush.bf16.msra.mxu0 %v3844_v29  ;;  %854 = vmatpush.bf16.msra.mxu2 %v3848_v34  ;;  %v5598_v29 = vld [vmem:[%s8936_s1 + $0x1e4] sm:$0xf0] }
   0xe   :  { %v5573_v36 = vld [vmem:[%s8936_s1 + $0x11c] sm:$0xf0]  ;;  %v3813_v41 = vld [vmem:[%s8936_s1 + $0x120] sm:$0xf0]  ;;  %v5662_v32 = vld [vmem:[%s8936_s1 + $0x3e4] sm:$0xf0] }
   0xf   :  { %v4067_v37 = vld [vmem:[%s8936_s1 + $0x300] sm:$0xf]  ;;  %v5633_v42 = vld [vmem:[%s8936_s1 + $0x304] sm:$0xf]  ;;  %v3812_v44 = vor.u32 %v5573_v36, %v3811_v35  ;;  %841 = vmatpush.bf16.msra.mxu1 %v4100_v33  ;;  %v3816_v46 = vor.u32 %v5569_v40, %v3813_v41  ;;  %867 = vmatpush.bf16.msra.mxu3 %v4104_v38  ;;  %v5594_v33 = vld [vmem:[%s8936_s1 + $0x1cc] sm:$0xf]  ;;  %v3916_v40 = vor.u32 %v5598_v29, %v3915_v28 }
  0x10   :  { %v5637_v39 = vld [vmem:[%s8936_s1 + $0x31c] sm:$0xf0]  ;;  %v4069_v43 = vld [vmem:[%s8936_s1 + $0x320] sm:$0xf0]  ;;  %v3917_v34 = vld [vmem:[%s8936_s1 + $0x1e8] sm:$0xf0]  ;;  %v4172_v41 = vor.u32 %v5662_v32, %v4171_v30 }
  0x11   :  { %v4068_v45 = vor.u32 %v5637_v39, %v4067_v37  ;;  %v3779_v47 = vld [vmem:[%s8936_s1 + $0xc0] sm:$0xf]  ;;  %v4072_v50 = vor.u32 %v5633_v42, %v4069_v43  ;;  %v5561_v52 = vld [vmem:[%s8936_s1 + $0xc4] sm:$0xf]  ;;  %829 = vmatpush.bf16.msra.mxu0 %v3812_v44  ;;  %855 = vmatpush.bf16.msra.mxu2 %v3816_v46  ;;  %v5658_v37 = vld [vmem:[%s8936_s1 + $0x3cc] sm:$0xf]  ;;  %v3920_v42 = vor.u32 %v5594_v33, %v3917_v34 }
  0x12   :  { %v5565_v48 = vld [vmem:[%s8936_s1 + $0xdc] sm:$0xf0]  ;;  %v3781_v53 = vld [vmem:[%s8936_s1 + $0xe0] sm:$0xf0]  ;;  %v4173_v38 = vld [vmem:[%s8936_s1 + $0x3e8] sm:$0xf0] }
  0x13   :  { %v4035_v49 = vld [vmem:[%s8936_s1 + $0x2c0] sm:$0xf]  ;;  %v5625_v54 = vld [vmem:[%s8936_s1 + $0x2c4] sm:$0xf]  ;;  %v3780_v56 = vor.u32 %v5565_v48, %v3779_v47  ;;  %842 = vmatpush.bf16.msra.mxu1 %v4068_v45  ;;  %v3784_v58 = vor.u32 %v5561_v52, %v3781_v53  ;;  %868 = vmatpush.bf16.msra.mxu3 %v4072_v50  ;;  %v3883_v43 = vld [vmem:[%s8936_s1 + $0x188] sm:$0xf]  ;;  %v4176_v46 = vor.u32 %v5658_v37, %v4173_v38 }
  0x14   :  { %v5629_v51 = vld [vmem:[%s8936_s1 + $0x2dc] sm:$0xf0]  ;;  %v4037_v55 = vld [vmem:[%s8936_s1 + $0x2e0] sm:$0xf0]  ;;  %v5590_v44 = vld [vmem:[%s8936_s1 + $0x1a4] sm:$0xf0] }
  0x15   :  { %v4036_v57 = vor.u32 %v5629_v51, %v4035_v49  ;;  %v3747_v59 = vld [vmem:[%s8936_s1 + $0x80] sm:$0xf]  ;;  %v4040_v62 = vor.u32 %v5625_v54, %v4037_v55  ;;  %v5553_v0 = vld [vmem:[%s8936_s1 + $0x84] sm:$0xf]  ;;  %830 = vmatpush.bf16.msra.mxu0 %v3780_v56  ;;  %856 = vmatpush.bf16.msra.mxu2 %v3784_v58  ;;  %v4139_v45 = vld [vmem:[%s8936_s1 + $0x388] sm:$0xf]  ;;  %v3884_v53 = vor.u32 %v5590_v44, %v3883_v43 }
  0x16   :  { %v5557_v60 = vld [vmem:[%s8936_s1 + $0x9c] sm:$0xf0]  ;;  %v3749_v1 = vld [vmem:[%s8936_s1 + $0xa0] sm:$0xf0]  ;;  %v5654_v47 = vld [vmem:[%s8936_s1 + $0x3a4] sm:$0xf0] }
  0x17   :  { %v4003_v61 = vld [vmem:[%s8936_s1 + $0x280] sm:$0xf]  ;;  %v5617_v2 = vld [vmem:[%s8936_s1 + $0x284] sm:$0xf]  ;;  %v3748_v4 = vor.u32 %v5557_v60, %v3747_v59  ;;  %843 = vmatpush.bf16.msra.mxu1 %v4036_v57  ;;  %v3752_v6 = vor.u32 %v5553_v0, %v3749_v1  ;;  %869 = vmatpush.bf16.msra.mxu3 %v4040_v62  ;;  %v5586_v48 = vld [vmem:[%s8936_s1 + $0x18c] sm:$0xf]  ;;  %v4140_v56 = vor.u32 %v5654_v47, %v4139_v45 }
  0x18   :  { %v5621_v63 = vld [vmem:[%s8936_s1 + $0x29c] sm:$0xf0]  ;;  %v4005_v3 = vld [vmem:[%s8936_s1 + $0x2a0] sm:$0xf0]  ;;  %v3885_v49 = vld [vmem:[%s8936_s1 + $0x1a8] sm:$0xf0] }
  0x19   :  { %v4004_v5 = vor.u32 %v5621_v63, %v4003_v61  ;;  %v3715_v7 = vld [vmem:[%s8936_s1 + $0x40] sm:$0xf]  ;;  %v4008_v10 = vor.u32 %v5617_v2, %v4005_v3  ;;  %v5545_v12 = vld [vmem:[%s8936_s1 + $0x44] sm:$0xf]  ;;  %831 = vmatpush.bf16.msra.mxu0 %v3748_v4  ;;  %857 = vmatpush.bf16.msra.mxu2 %v3752_v6  ;;  %v5650_v50 = vld [vmem:[%s8936_s1 + $0x38c] sm:$0xf]  ;;  %v3888_v57 = vor.u32 %v5586_v48, %v3885_v49 }
  0x1a   :  { %v5549_v8 = vld [vmem:[%s8936_s1 + $0x5c] sm:$0xf0]  ;;  %v3717_v13 = vld [vmem:[%s8936_s1 + $0x60] sm:$0xf0]  ;;  %v4141_v51 = vld [vmem:[%s8936_s1 + $0x3a8] sm:$0xf0] }
  0x1b   :  { %v3971_v9 = vld [vmem:[%s8936_s1 + $0x240] sm:$0xf]  ;;  %v5609_v14 = vld [vmem:[%s8936_s1 + $0x244] sm:$0xf]  ;;  %v3716_v16 = vor.u32 %v5549_v8, %v3715_v7  ;;  %844 = vmatpush.bf16.msra.mxu1 %v4004_v5  ;;  %v3720_v20 = vor.u32 %v5545_v12, %v3717_v13  ;;  %870 = vmatpush.bf16.msra.mxu3 %v4008_v10  ;;  %v3851_v58 = vld [vmem:[%s8936_s1 + $0x148] sm:$0xf]  ;;  %v4144_v61 = vor.u32 %v5650_v50, %v4141_v51 }
  0x1c   :  { %v5613_v11 = vld [vmem:[%s8936_s1 + $0x25c] sm:$0xf0]  ;;  %v3973_v15 = vld [vmem:[%s8936_s1 + $0x260] sm:$0xf0]  ;;  %v5582_v59 = vld [vmem:[%s8936_s1 + $0x164] sm:$0xf0] }
  0x1d   :  { %v3683_v17 = vld [vmem:[%s8936_s1] sm:$0xf]  ;;  %v3972_v19 = vor.u32 %v5613_v11, %v3971_v9  ;;  %v5537_v23 = vld [vmem:[%s8936_s1 + $0x4] sm:$0xf]  ;;  %v3976_v24 = vor.u32 %v5609_v14, %v3973_v15  ;;  %832 = vmatpush.bf16.msra.mxu0 %v3716_v16  ;;  %858 = vmatpush.bf16.msra.mxu2 %v3720_v20  ;;  %v4107_v60 = vld [vmem:[%s8936_s1 + $0x348] sm:$0xf]  ;;  %v3852_v5 = vor.u32 %v5582_v59, %v3851_v58 }
  0x1e   :  { %v5541_v18 = vld [vmem:[%s8936_s1 + $0x1c] sm:$0xf0]  ;;  %v3685_v25 = vld [vmem:[%s8936_s1 + $0x20] sm:$0xf0]  ;;  %v5646_v62 = vld [vmem:[%s8936_s1 + $0x364] sm:$0xf0] }
  0x1f   :  { %v3939_v21 = vld [vmem:[%s8936_s1 + $0x200] sm:$0xf]  ;;  %v5601_v26 = vld [vmem:[%s8936_s1 + $0x204] sm:$0xf]  ;;  %v3684_v31 = vor.u32 %v5541_v18, %v3683_v17  ;;  %845 = vmatpush.bf16.msra.mxu1 %v3972_v19  ;;  %v3688_v36 = vor.u32 %v5537_v23, %v3685_v25  ;;  %871 = vmatpush.bf16.msra.mxu3 %v3976_v24  ;;  %v5578_v63 = vld [vmem:[%s8936_s1 + $0x14c] sm:$0xf]  ;;  %v4108_v6 = vor.u32 %v5646_v62, %v4107_v60 }
  0x20   :  { %v5605_v22 = vld [vmem:[%s8936_s1 + $0x21c] sm:$0xf0]  ;;  %v3941_v27 = vld [vmem:[%s8936_s1 + $0x220] sm:$0xf0]  ;;  %v3853_v0 = vld [vmem:[%s8936_s1 + $0x168] sm:$0xf0] }
  0x21   :  { %v3940_v35 = vor.u32 %v5605_v22, %v3939_v21  ;;  %v3944_v39 = vor.u32 %v5601_v26, %v3941_v27  ;;  %833 = vmatpush.bf16.msra.mxu0 %v3684_v31  ;;  %859 = vmatpush.bf16.msra.mxu2 %v3688_v36  ;;  %v32_v52 = vld [vmem:[%s8937_s0] sm:$0xff]  ;;  %v5642_v2 = vld [vmem:[%s8936_s1 + $0x34c] sm:$0xf]  ;;  %v3856_v7 = vor.u32 %v5578_v63, %v3853_v0  ;;  %v3819_v8 = vld [vmem:[%s8936_s1 + $0x108] sm:$0xf] }
  0x22   :  { %v180_v54 = vunpack.c.l.b16 %v32_v52  ;;  %v181_v55 = vunpack.c.h.b16 %v32_v52  ;;  %v4109_v3 = vld [vmem:[%s8936_s1 + $0x368] sm:$0xf0]  ;;  %v5574_v9 = vld [vmem:[%s8936_s1 + $0x124] sm:$0xf0] }
  0x23   :  { %846 = vmatpush.bf16.msra.mxu1 %v3940_v35  ;;  %872 = vmatpush.bf16.msra.mxu3 %v3944_v39  ;;  %v4075_v10 = vld [vmem:[%s8936_s1 + $0x308] sm:$0xf]  ;;  %v4112_v11 = vor.u32 %v5642_v2, %v4109_v3  ;;  %v5570_v13 = vld [vmem:[%s8936_s1 + $0x10c] sm:$0xf]  ;;  %v3820_v17 = vor.u32 %v5574_v9, %v3819_v8  ;;  %v3923_v2 = vld [vmem:[%s8936_s1 + $0x1d0] sm:$0xf] }
  0x24   :  { %v6314_v1 = vpack.c.b16 %v180_v54, %v180_v54  ;;  %v6322_v4 = vpack.c.b16 %v181_v55, %v181_v55  ;;  %v5638_v12 = vld [vmem:[%s8936_s1 + $0x324] sm:$0xf0]  ;;  %v3821_v14 = vld [vmem:[%s8936_s1 + $0x128] sm:$0xf0]  ;;  %v5599_v3 = vld [vmem:[%s8936_s1 + $0x1ec] sm:$0xf0] }
  0x25   :  { %878 = vmatpush.bf16.msrb.mxu0 %v3916_v40  ;;  %904 = vmatpush.bf16.msrb.mxu2 %v3920_v42  ;;  %v5634_v15 = vld [vmem:[%s8936_s1 + $0x30c] sm:$0xf]  ;;  %v4076_v18 = vor.u32 %v5638_v12, %v4075_v10  ;;  %v3824_v19 = vor.u32 %v5570_v13, %v3821_v14  ;;  %v3787_v20 = vld [vmem:[%s8936_s1 + $0xc8] sm:$0xf]  ;;  %v5595_v8 = vld [vmem:[%s8936_s1 + $0x1d4] sm:$0xf] }
  0x26   :  { %860 = vmatmul.bf16.vlgmr.msra.gmra.mxu2 %v6314_v1  ;;  %834 = vmatmul.bf16.vlgmr.msra.gmra.mxu0 %v6314_v1  ;;  %v4077_v16 = vld [vmem:[%s8936_s1 + $0x328] sm:$0xf0]  ;;  %v5566_v21 = vld [vmem:[%s8936_s1 + $0xe4] sm:$0xf0]  ;;  %v3925_v9 = vld [vmem:[%s8936_s1 + $0x1f0] sm:$0xf0] }
  0x27   :  { %891 = vmatpush.bf16.msrb.mxu1 %v4172_v41  ;;  %917 = vmatpush.bf16.msrb.mxu3 %v4176_v46  ;;  %v4043_v22 = vld [vmem:[%s8936_s1 + $0x2c8] sm:$0xf]  ;;  %v4080_v23 = vor.u32 %v5634_v15, %v4077_v16  ;;  %v5562_v25 = vld [vmem:[%s8936_s1 + $0xcc] sm:$0xf]  ;;  %v3788_v29 = vor.u32 %v5566_v21, %v3787_v20  ;;  %v5659_v12 = vld [vmem:[%s8936_s1 + $0x3d4] sm:$0xf]  ;;  %v3924_v15 = vor.u32 %v5599_v3, %v3923_v2 }
  0x28   :  { %847 = vmatmul.bf16.vlgmr.msra.gmra.mxu1 %v6322_v4  ;;  %873 = vmatmul.bf16.vlgmr.msra.gmra.mxu3 %v6322_v4  ;;  %v5630_v24 = vld [vmem:[%s8936_s1 + $0x2e4] sm:$0xf0]  ;;  %v3789_v26 = vld [vmem:[%s8936_s1 + $0xe8] sm:$0xf0]  ;;  %v4181_v13 = vld [vmem:[%s8936_s1 + $0x3f0] sm:$0xf0] }
  0x29   :  { %879 = vmatpush.bf16.msrb.mxu0 %v3884_v53  ;;  %905 = vmatpush.bf16.msrb.mxu2 %v3888_v57  ;;  %v5626_v27 = vld [vmem:[%s8936_s1 + $0x2cc] sm:$0xf]  ;;  %v4044_v30 = vor.u32 %v5630_v24, %v4043_v22  ;;  %v3792_v31 = vor.u32 %v5562_v25, %v3789_v26  ;;  %v3755_v32 = vld [vmem:[%s8936_s1 + $0x88] sm:$0xf]  ;;  %v4147_v20 = vld [vmem:[%s8936_s1 + $0x390] sm:$0xf]  ;;  %v4184_v21 = vor.u32 %v5659_v12, %v4181_v13 }
  0x2a   :  { %v4045_v28 = vld [vmem:[%s8936_s1 + $0x2e8] sm:$0xf0]  ;;  %v5558_v33 = vld [vmem:[%s8936_s1 + $0xa4] sm:$0xf0]  ;;  %v5655_v22 = vld [vmem:[%s8936_s1 + $0x3ac] sm:$0xf0] }
  0x2b   :  { %892 = vmatpush.bf16.msrb.mxu1 %v4140_v56  ;;  %918 = vmatpush.bf16.msrb.mxu3 %v4144_v61  ;;  %v4011_v34 = vld [vmem:[%s8936_s1 + $0x288] sm:$0xf]  ;;  %v4048_v35 = vor.u32 %v5626_v27, %v4045_v28  ;;  %v5554_v37 = vld [vmem:[%s8936_s1 + $0x8c] sm:$0xf]  ;;  %v3756_v41 = vor.u32 %v5558_v33, %v3755_v32  ;;  %v3893_v24 = vld [vmem:[%s8936_s1 + $0x1b0] sm:$0xf0]  ;;  %v4148_v28 = vor.u32 %v5655_v22, %v4147_v20 }
  0x2c   :  { %v5622_v36 = vld [vmem:[%s8936_s1 + $0x2a4] sm:$0xf0]  ;;  %v3757_v38 = vld [vmem:[%s8936_s1 + $0xa8] sm:$0xf0]  ;;  %v5651_v25 = vld [vmem:[%s8936_s1 + $0x394] sm:$0xf] }
  0x2d   :  { %880 = vmatpush.bf16.msrb.mxu0 %v3852_v5  ;;  %906 = vmatpush.bf16.msrb.mxu2 %v3856_v7  ;;  %v5618_v39 = vld [vmem:[%s8936_s1 + $0x28c] sm:$0xf]  ;;  %v4012_v42 = vor.u32 %v5622_v36, %v4011_v34  ;;  %v3760_v43 = vor.u32 %v5554_v37, %v3757_v38  ;;  %v3723_v44 = vld [vmem:[%s8936_s1 + $0x48] sm:$0xf]  ;;  %v4179_v5 = vld [vmem:[%s8936_s1 + $0x3d0] sm:$0xf] }
  0x2e   :  { %v4013_v40 = vld [vmem:[%s8936_s1 + $0x2a8] sm:$0xf0]  ;;  %v5550_v45 = vld [vmem:[%s8936_s1 + $0x64] sm:$0xf0]  ;;  %v5663_v7 = vld [vmem:[%s8936_s1 + $0x3ec] sm:$0xf0] }
  0x2f   :  { %893 = vmatpush.bf16.msrb.mxu1 %v4108_v6  ;;  %919 = vmatpush.bf16.msrb.mxu3 %v4112_v11  ;;  %v3979_v46 = vld [vmem:[%s8936_s1 + $0x248] sm:$0xf]  ;;  %v4016_v47 = vor.u32 %v5618_v39, %v4013_v40  ;;  %v5546_v49 = vld [vmem:[%s8936_s1 + $0x4c] sm:$0xf]  ;;  %v3724_v53 = vor.u32 %v5550_v45, %v3723_v44  ;;  %v4180_v16 = vor.u32 %v5663_v7, %v4179_v5  ;;  %v4149_v26 = vld [vmem:[%s8936_s1 + $0x3b0] sm:$0xf0] }
  0x30   :  { %v5614_v48 = vld [vmem:[%s8936_s1 + $0x264] sm:$0xf0]  ;;  %v3725_v50 = vld [vmem:[%s8936_s1 + $0x68] sm:$0xf0]  ;;  %v4115_v32 = vld [vmem:[%s8936_s1 + $0x350] sm:$0xf]  ;;  %v4152_v33 = vor.u32 %v5651_v25, %v4149_v26 }
  0x31   :  { %881 = vmatpush.bf16.msrb.mxu0 %v3820_v17  ;;  %907 = vmatpush.bf16.msrb.mxu2 %v3824_v19  ;;  %v5610_v51 = vld [vmem:[%s8936_s1 + $0x24c] sm:$0xf]  ;;  %v3691_v54 = vld [vmem:[%s8936_s1 + $0x8] sm:$0xf]  ;;  %v3980_v56 = vor.u32 %v5614_v48, %v3979_v46  ;;  %v3728_v57 = vor.u32 %v5546_v49, %v3725_v50  ;;  %v3928_v17 = vor.u32 %v5595_v8, %v3925_v9  ;;  %v5591_v19 = vld [vmem:[%s8936_s1 + $0x1ac] sm:$0xf0] }
  0x32   :  { %v3981_v52 = vld [vmem:[%s8936_s1 + $0x268] sm:$0xf0]  ;;  %v5542_v55 = vld [vmem:[%s8936_s1 + $0x24] sm:$0xf0]  ;;  %v5647_v34 = vld [vmem:[%s8936_s1 + $0x36c] sm:$0xf0] }
  0x33   :  { %894 = vmatpush.bf16.msrb.mxu1 %v4076_v18  ;;  %920 = vmatpush.bf16.msrb.mxu3 %v4080_v23  ;;  %v3947_v58 = vld [vmem:[%s8936_s1 + $0x208] sm:$0xf]  ;;  %v5538_v60 = vld [vmem:[%s8936_s1 + $0xc] sm:$0xf]  ;;  %v3984_v61 = vor.u32 %v5610_v51, %v3981_v52  ;;  %v3692_v6 = vor.u32 %v5542_v55, %v3691_v54  ;;  %v3891_v18 = vld [vmem:[%s8936_s1 + $0x190] sm:$0xf]  ;;  %v4116_v40 = vor.u32 %v5647_v34, %v4115_v32 }
  0x34   :  { %v5606_v59 = vld [vmem:[%s8936_s1 + $0x224] sm:$0xf0]  ;;  %v3693_v62 = vld [vmem:[%s8936_s1 + $0x28] sm:$0xf0]  ;;  %v5587_v23 = vld [vmem:[%s8936_s1 + $0x194] sm:$0xf]  ;;  %v3892_v27 = vor.u32 %v5591_v19, %v3891_v18 }
  0x35   :  { %882 = vmatpush.bf16.msrb.mxu0 %v3788_v29  ;;  %908 = vmatpush.bf16.msrb.mxu2 %v3792_v31  ;;  %v5602_v63 = vld [vmem:[%s8936_s1 + $0x20c] sm:$0xf]  ;;  %v3948_v10 = vor.u32 %v5606_v59, %v3947_v58  ;;  %v3696_v11 = vor.u32 %v5538_v60, %v3693_v62  ;;  %v3896_v29 = vor.u32 %v5587_v23, %v3893_v24  ;;  %v5583_v31 = vld [vmem:[%s8936_s1 + $0x16c] sm:$0xf0]  ;;  %v3861_v36 = vld [vmem:[%s8936_s1 + $0x170] sm:$0xf0] }
  0x36   :  { %v3949_v0 = vld [vmem:[%s8936_s1 + $0x228] sm:$0xf0]  ;;  %v5643_v37 = vld [vmem:[%s8936_s1 + $0x354] sm:$0xf]  ;;  %v4083_v44 = vld [vmem:[%s8936_s1 + $0x310] sm:$0xf] }
  0x37   :  { %895 = vmatpush.bf16.msrb.mxu1 %v4044_v30  ;;  %921 = vmatpush.bf16.msrb.mxu3 %v4048_v35  ;;  %v3952_v14 = vor.u32 %v5602_v63, %v3949_v0  ;;  %v3859_v30 = vld [vmem:[%s8936_s1 + $0x150] sm:$0xf]  ;;  %v5579_v35 = vld [vmem:[%s8936_s1 + $0x154] sm:$0xf] }
  0x38   :  { %v4117_v38 = vld [vmem:[%s8936_s1 + $0x370] sm:$0xf0]  ;;  %v3860_v39 = vor.u32 %v5583_v31, %v3859_v30  ;;  %v5639_v46 = vld [vmem:[%s8936_s1 + $0x32c] sm:$0xf0] }
  0x39   :  { %883 = vmatpush.bf16.msrb.mxu0 %v3756_v41  ;;  %909 = vmatpush.bf16.msrb.mxu2 %v3760_v43  ;;  %v3864_v41 = vor.u32 %v5579_v35, %v3861_v36  ;;  %v5575_v43 = vld [vmem:[%s8936_s1 + $0x12c] sm:$0xf0]  ;;  %v4120_v45 = vor.u32 %v5643_v37, %v4117_v38  ;;  %v3829_v48 = vld [vmem:[%s8936_s1 + $0x130] sm:$0xf0]  ;;  %v4084_v52 = vor.u32 %v5639_v46, %v4083_v44  ;;  %v3931_v37 = vld [vmem:[%s8936_s1 + $0x1d8] sm:$0xf] }
  0x3a   :  { %v5635_v49 = vld [vmem:[%s8936_s1 + $0x314] sm:$0xf]  ;;  %v3795_v54 = vld [vmem:[%s8936_s1 + $0xd0] sm:$0xf]  ;;  %v5600_v38 = vld [vmem:[%s8936_s1 + $0x1f4] sm:$0xf0] }
  0x3b   :  { %896 = vmatpush.bf16.msrb.mxu1 %v4012_v42  ;;  %922 = vmatpush.bf16.msrb.mxu3 %v4016_v47  ;;  %v3827_v42 = vld [vmem:[%s8936_s1 + $0x110] sm:$0xf]  ;;  %v5571_v47 = vld [vmem:[%s8936_s1 + $0x114] sm:$0xf]  ;;  %v5660_v46 = vld [vmem:[%s8936_s1 + $0x3dc] sm:$0xf] }
  0x3c   :  { %v4085_v50 = vld [vmem:[%s8936_s1 + $0x330] sm:$0xf0]  ;;  %v3828_v51 = vor.u32 %v5575_v43, %v3827_v42  ;;  %v5567_v55 = vld [vmem:[%s8936_s1 + $0xec] sm:$0xf0]  ;;  %v5596_v42 = vld [vmem:[%s8936_s1 + $0x1dc] sm:$0xf] }
  0x3d   :  { %884 = vmatpush.bf16.msrb.mxu0 %v3724_v53  ;;  %910 = vmatpush.bf16.msrb.mxu2 %v3728_v57  ;;  %v3832_v53 = vor.u32 %v5571_v47, %v3829_v48  ;;  %v4088_v57 = vor.u32 %v5635_v49, %v4085_v50  ;;  %v5631_v58 = vld [vmem:[%s8936_s1 + $0x2ec] sm:$0xf0]  ;;  %v5563_v59 = vld [vmem:[%s8936_s1 + $0xd4] sm:$0xf]  ;;  %v3796_v63 = vor.u32 %v5567_v55, %v3795_v54  ;;  %v3933_v43 = vld [vmem:[%s8936_s1 + $0x1f8] sm:$0xf0] }
  0x3e   :  { %v3797_v60 = vld [vmem:[%s8936_s1 + $0xf0] sm:$0xf0]  ;;  %v3763_v3 = vld [vmem:[%s8936_s1 + $0x90] sm:$0xf]  ;;  %v4189_v47 = vld [vmem:[%s8936_s1 + $0x3f8] sm:$0xf0]  ;;  %v3932_v49 = vor.u32 %v5600_v38, %v3931_v37 }
  0x3f   :  { %897 = vmatpush.bf16.msrb.mxu1 %v3980_v56  ;;  %923 = vmatpush.bf16.msrb.mxu3 %v3984_v61  ;;  %v4051_v56 = vld [vmem:[%s8936_s1 + $0x2d0] sm:$0xf]  ;;  %v5627_v61 = vld [vmem:[%s8936_s1 + $0x2d4] sm:$0xf]  ;;  %v3800_v2 = vor.u32 %v5563_v59, %v3797_v60  ;;  %v4155_v54 = vld [vmem:[%s8936_s1 + $0x398] sm:$0xf]  ;;  %v4192_v55 = vor.u32 %v5660_v46, %v4189_v47 }
  0x40   :  { %v4053_v62 = vld [vmem:[%s8936_s1 + $0x2f0] sm:$0xf0]  ;;  %v4052_v0 = vor.u32 %v5631_v58, %v4051_v56  ;;  %v5559_v5 = vld [vmem:[%s8936_s1 + $0xac] sm:$0xf0]  ;;  %v5656_v56 = vld [vmem:[%s8936_s1 + $0x3b4] sm:$0xf0] }
  0x41   :  { %885 = vmatpush.bf16.msrb.mxu0 %v3692_v6  ;;  %911 = vmatpush.bf16.msrb.mxu2 %v3696_v11  ;;  %v4019_v6 = vld [vmem:[%s8936_s1 + $0x290] sm:$0xf]  ;;  %v4056_v7 = vor.u32 %v5627_v61, %v4053_v62  ;;  %v5555_v9 = vld [vmem:[%s8936_s1 + $0x94] sm:$0xf]  ;;  %v3764_v13 = vor.u32 %v5559_v5, %v3763_v3  ;;  %v3901_v58 = vld [vmem:[%s8936_s1 + $0x1b8] sm:$0xf0]  ;;  %v4156_v62 = vor.u32 %v5656_v56, %v4155_v54 }
  0x42   :  { %v5623_v8 = vld [vmem:[%s8936_s1 + $0x2ac] sm:$0xf0]  ;;  %v5619_v11 = vld [vmem:[%s8936_s1 + $0x294] sm:$0xf]  ;;  %v5652_v59 = vld [vmem:[%s8936_s1 + $0x39c] sm:$0xf] }
  0x43   :  { %898 = vmatpush.bf16.msrb.mxu1 %v3948_v10  ;;  %924 = vmatpush.bf16.msrb.mxu3 %v3952_v14  ;;  %v3765_v10 = vld [vmem:[%s8936_s1 + $0xb0] sm:$0xf0]  ;;  %v4020_v14 = vor.u32 %v5623_v8, %v4019_v6  ;;  %v3987_v18 = vld [vmem:[%s8936_s1 + $0x250] sm:$0xf]  ;;  %v4157_v60 = vld [vmem:[%s8936_s1 + $0x3b8] sm:$0xf0] }
  0x44   :  { %886 = vmatmul.bf16.vlgmr.msrb.gmra.mxu0 %v6314_v1  ;;  %912 = vmatmul.bf16.vlgmr.msrb.gmra.mxu2 %v6314_v1  ;;  %v4021_v12 = vld [vmem:[%s8936_s1 + $0x2b0] sm:$0xf0]  ;;  %v5615_v20 = vld [vmem:[%s8936_s1 + $0x26c] sm:$0xf0]  ;;  %v4123_v3 = vld [vmem:[%s8936_s1 + $0x358] sm:$0xf]  ;;  %v4160_v5 = vor.u32 %v5652_v59, %v4157_v60 }
  0x45   :  { %930 = vmatpush.bf16.msra.mxu0 %v3924_v15  ;;  %956 = vmatpush.bf16.msra.mxu2 %v3928_v17  ;;  %v3768_v15 = vor.u32 %v5555_v9, %v3765_v10  ;;  %v5551_v17 = vld [vmem:[%s8936_s1 + $0x6c] sm:$0xf0]  ;;  %v4024_v19 = vor.u32 %v5619_v11, %v4021_v12  ;;  %v3733_v22 = vld [vmem:[%s8936_s1 + $0x70] sm:$0xf0]  ;;  %v5648_v6 = vld [vmem:[%s8936_s1 + $0x374] sm:$0xf0] }
  0x46   :  { %899 = vmatmul.bf16.vlgmr.msrb.gmra.mxu1 %v6322_v4  ;;  %925 = vmatmul.bf16.vlgmr.msrb.gmra.mxu3 %v6322_v4  ;;  %v5611_v23 = vld [vmem:[%s8936_s1 + $0x254] sm:$0xf]  ;;  %v3699_v26 = vld [vmem:[%s8936_s1 + $0x10] sm:$0xf]  ;;  %v3869_v8 = vld [vmem:[%s8936_s1 + $0x178] sm:$0xf0]  ;;  %v4124_v12 = vor.u32 %v5648_v6, %v4123_v3 }
  0x47   :  { %943 = vmatpush.bf16.msra.mxu1 %v4180_v16  ;;  %969 = vmatpush.bf16.msra.mxu3 %v4184_v21  ;;  %v3731_v16 = vld [vmem:[%s8936_s1 + $0x50] sm:$0xf]  ;;  %v5547_v21 = vld [vmem:[%s8936_s1 + $0x54] sm:$0xf]  ;;  %v5644_v9 = vld [vmem:[%s8936_s1 + $0x35c] sm:$0xf] }
  0x48   :  { %v3989_v24 = vld [vmem:[%s8936_s1 + $0x270] sm:$0xf0]  ;;  %v3732_v25 = vor.u32 %v5551_v17, %v3731_v16  ;;  %v3955_v30 = vld [vmem:[%s8936_s1 + $0x210] sm:$0xf]  ;;  %v4125_v10 = vld [vmem:[%s8936_s1 + $0x378] sm:$0xf0] }
  0x49   :  { %931 = vmatpush.bf16.msra.mxu0 %v3892_v27  ;;  %957 = vmatpush.bf16.msra.mxu2 %v3896_v29  ;;  %v5543_v27 = vld [vmem:[%s8936_s1 + $0x2c] sm:$0xf0]  ;;  %v3736_v29 = vor.u32 %v5547_v21, %v3733_v22  ;;  %v5539_v32 = vld [vmem:[%s8936_s1 + $0x14] sm:$0xf]  ;;  %v4091_v16 = vld [vmem:[%s8936_s1 + $0x318] sm:$0xf]  ;;  %v4128_v17 = vor.u32 %v5644_v9, %v4125_v10 }
  0x4a   :  { %v5607_v31 = vld [vmem:[%s8936_s1 + $0x22c] sm:$0xf0]  ;;  %v3701_v34 = vld [vmem:[%s8936_s1 + $0x30] sm:$0xf0]  ;;  %v5636_v21 = vld [vmem:[%s8936_s1 + $0x31c] sm:$0xf] }
  0x4b   :  { %944 = vmatpush.bf16.msra.mxu1 %v4148_v28  ;;  %970 = vmatpush.bf16.msra.mxu3 %v4152_v33  ;;  %v3988_v28 = vor.u32 %v5615_v20, %v3987_v18  ;;  %v3992_v33 = vor.u32 %v5611_v23, %v3989_v24  ;;  %v5603_v35 = vld [vmem:[%s8936_s1 + $0x214] sm:$0xf]  ;;  %v3956_v44 = vor.u32 %v5607_v31, %v3955_v30  ;;  %v5640_v18 = vld [vmem:[%s8936_s1 + $0x334] sm:$0xf0]  ;;  %v3837_v20 = vld [vmem:[%s8936_s1 + $0x138] sm:$0xf0] }
  0x4c   :  { %v3957_v36 = vld [vmem:[%s8936_s1 + $0x230] sm:$0xf0]  ;;  %v4093_v22 = vld [vmem:[%s8936_s1 + $0x338] sm:$0xf0]  ;;  %v4092_v24 = vor.u32 %v5640_v18, %v4091_v16  ;;  %v5632_v30 = vld [vmem:[%s8936_s1 + $0x2f4] sm:$0xf0] }
  0x4d   :  { %932 = vmatpush.bf16.msra.mxu0 %v3860_v39  ;;  %958 = vmatpush.bf16.msra.mxu2 %v3864_v41  ;;  %v4187_v39 = vld [vmem:[%s8936_s1 + $0x3d8] sm:$0xf]  ;;  %v3960_v48 = vor.u32 %v5603_v35, %v3957_v36  ;;  %v5564_v31 = vld [vmem:[%s8936_s1 + $0xdc] sm:$0xf]  ;;  %v4307_v9 = vld [vmem:[%s8938_s3 + $0xe0] sm:$0xf] }
  0x4e   :  { %v5664_v41 = vld [vmem:[%s8936_s1 + $0x3f4] sm:$0xf0]  ;;  %v4029_v46 = vld [vmem:[%s8936_s1 + $0x2b8] sm:$0xf0]  ;;  %v5695_v10 = vld [vmem:[%s8938_s3 + $0xec] sm:$0xf0] }
  0x4f   :  { %945 = vmatpush.bf16.msra.mxu1 %v4116_v40  ;;  %971 = vmatpush.bf16.msra.mxu3 %v4120_v45  ;;  %v3700_v40 = vor.u32 %v5543_v27, %v3699_v26  ;;  %v3704_v45 = vor.u32 %v5539_v32, %v3701_v34  ;;  %v4188_v50 = vor.u32 %v5664_v41, %v4187_v39  ;;  %v3803_v26 = vld [vmem:[%s8936_s1 + $0xd8] sm:$0xf]  ;;  %v3805_v32 = vld [vmem:[%s8936_s1 + $0xf8] sm:$0xf0]  ;;  %v4563_v18 = vld [vmem:[%s8938_s3 + $0x2e0] sm:$0xf] }
  0x50   :  { %v5568_v27 = vld [vmem:[%s8936_s1 + $0xf4] sm:$0xf0]  ;;  %v4061_v34 = vld [vmem:[%s8936_s1 + $0x2f8] sm:$0xf0]  ;;  %v3808_v37 = vor.u32 %v5564_v31, %v3805_v32  ;;  %v4403_v32 = vld [vmem:[%s8938_s3 + $0x1a0] sm:$0xf] }
  0x51   :  { %933 = vmatpush.bf16.msra.mxu0 %v3828_v51  ;;  %959 = vmatpush.bf16.msra.mxu2 %v3832_v53  ;;  %v3936_v51 = vor.u32 %v5596_v42, %v3933_v43  ;;  %v5592_v53 = vld [vmem:[%s8936_s1 + $0x1b4] sm:$0xf0]  ;;  %v3804_v35 = vor.u32 %v5568_v27, %v3803_v26  ;;  %v5556_v43 = vld [vmem:[%s8936_s1 + $0x9c] sm:$0xf]  ;;  %v4547_v27 = vld [vmem:[%s8938_s3 + $0x2c0] sm:$0xf] }
  0x52   :  { %v3771_v38 = vld [vmem:[%s8936_s1 + $0x98] sm:$0xf]  ;;  %v3741_v56 = vld [vmem:[%s8936_s1 + $0x78] sm:$0xf0] }
  0x53   :  { %946 = vmatpush.bf16.msra.mxu1 %v4084_v52  ;;  %972 = vmatpush.bf16.msra.mxu3 %v4088_v57  ;;  %v3899_v52 = vld [vmem:[%s8936_s1 + $0x198] sm:$0xf]  ;;  %v5588_v57 = vld [vmem:[%s8936_s1 + $0x19c] sm:$0xf] }
  0x54   :  { %v3900_v61 = vor.u32 %v5592_v53, %v3899_v52  ;;  %v5560_v39 = vld [vmem:[%s8936_s1 + $0xb4] sm:$0xf0]  ;;  %v3709_v6 = vld [vmem:[%s8936_s1 + $0x38] sm:$0xf0] }
  0x55   :  { %934 = vmatpush.bf16.msra.mxu0 %v3796_v63  ;;  %960 = vmatpush.bf16.msra.mxu2 %v3800_v2  ;;  %v3904_v63 = vor.u32 %v5588_v57, %v3901_v58  ;;  %v5584_v2 = vld [vmem:[%s8936_s1 + $0x174] sm:$0xf0]  ;;  %v3772_v47 = vor.u32 %v5560_v39, %v3771_v38  ;;  %v5612_v57 = vld [vmem:[%s8936_s1 + $0x25c] sm:$0xf]  ;;  %v4387_v38 = vld [vmem:[%s8938_s3 + $0x180] sm:$0xf] }
  0x56   :  { %v5624_v42 = vld [vmem:[%s8936_s1 + $0x2b4] sm:$0xf0]  ;;  %v3997_v58 = vld [vmem:[%s8936_s1 + $0x278] sm:$0xf0] }
  0x57   :  { %947 = vmatpush.bf16.msra.mxu1 %v4052_v0  ;;  %973 = vmatpush.bf16.msra.mxu3 %v4056_v7  ;;  %v3867_v0 = vld [vmem:[%s8936_s1 + $0x158] sm:$0xf]  ;;  %v5580_v7 = vld [vmem:[%s8936_s1 + $0x15c] sm:$0xf]  ;;  %v4000_v3 = vor.u32 %v5612_v57, %v3997_v58  ;;  %v5751_v57 = vld [vmem:[%s8938_s3 + $0x2ac] sm:$0xf0] }
  0x58   :  { %v3868_v11 = vor.u32 %v5584_v2, %v3867_v0  ;;  %v3995_v52 = vld [vmem:[%s8936_s1 + $0x258] sm:$0xf]  ;;  %v5671_v58 = vld [vmem:[%s8938_s3 + $0x2c] sm:$0xf0] }
  0x59   :  { %935 = vmatpush.bf16.msra.mxu0 %v3764_v13  ;;  %961 = vmatpush.bf16.msra.mxu2 %v3768_v15  ;;  %v3872_v13 = vor.u32 %v5580_v7, %v3869_v8  ;;  %v5576_v15 = vld [vmem:[%s8936_s1 + $0x134] sm:$0xf0]  ;;  %v5604_v7 = vld [vmem:[%s8936_s1 + $0x21c] sm:$0xf] }
  0x5a   :  { %v5616_v54 = vld [vmem:[%s8936_s1 + $0x274] sm:$0xf0]  ;;  %v3965_v8 = vld [vmem:[%s8936_s1 + $0x238] sm:$0xf0] }
  0x5b   :  { %948 = vmatpush.bf16.msra.mxu1 %v4020_v14  ;;  %974 = vmatpush.bf16.msra.mxu3 %v4024_v19  ;;  %v3835_v14 = vld [vmem:[%s8936_s1 + $0x118] sm:$0xf]  ;;  %v5572_v19 = vld [vmem:[%s8936_s1 + $0x11c] sm:$0xf]  ;;  %v3968_v16 = vor.u32 %v5604_v7, %v3965_v8  ;;  %v5667_v8 = vld [vmem:[%s8938_s3 + $0xc] sm:$0xf0] }
  0x5c   :  { %v3836_v23 = vor.u32 %v5576_v15, %v3835_v14  ;;  %v3707_v60 = vld [vmem:[%s8936_s1 + $0x18] sm:$0xf] }
  0x5d   :  { %936 = vmatpush.bf16.msra.mxu0 %v3732_v25  ;;  %962 = vmatpush.bf16.msra.mxu2 %v3736_v29  ;;  %v3840_v25 = vor.u32 %v5572_v19, %v3837_v20  ;;  %v4096_v29 = vor.u32 %v5636_v21, %v4093_v22  ;;  %v3963_v0 = vld [vmem:[%s8936_s1 + $0x218] sm:$0xf]  ;;  %v5759_v19 = vld [vmem:[%s8938_s3 + $0x2ec] sm:$0xf0]  ;;  %v4291_v20 = vld [vmem:[%s8938_s3 + $0xc0] sm:$0xf] }
  0x5e   :  { %v5608_v2 = vld [vmem:[%s8936_s1 + $0x234] sm:$0xf0]  ;;  %v5691_v21 = vld [vmem:[%s8938_s3 + $0xcc] sm:$0xf0] }
  0x5f   :  { %949 = vmatpush.bf16.msra.mxu1 %v3988_v28  ;;  %975 = vmatpush.bf16.msra.mxu3 %v3992_v33  ;;  %v4059_v28 = vld [vmem:[%s8936_s1 + $0x2d8] sm:$0xf]  ;;  %v5628_v33 = vld [vmem:[%s8936_s1 + $0x2dc] sm:$0xf]  ;;  %v3964_v14 = vor.u32 %v5608_v2, %v3963_v0  ;;  %v4292_v26 = vor.u32 %v5691_v21, %v4291_v20  ;;  %v5703_v0 = vld [vmem:[%s8938_s3 + $0x12c] sm:$0xf0] }
  0x60   :  { %v4060_v36 = vor.u32 %v5632_v30, %v4059_v28  ;;  %v4064_v41 = vor.u32 %v5628_v33, %v4061_v34  ;;  %v5755_v28 = vld [vmem:[%s8938_s3 + $0x2cc] sm:$0xf0]  ;;  %v4947_v20 = vld [vmem:[%s8938_s3 + $0x5e0] sm:$0xf] }
  0x61   :  { %937 = vmatpush.bf16.msra.mxu0 %v3700_v40  ;;  %963 = vmatpush.bf16.msra.mxu2 %v3704_v45  ;;  %v4027_v40 = vld [vmem:[%s8936_s1 + $0x298] sm:$0xf]  ;;  %v5620_v45 = vld [vmem:[%s8936_s1 + $0x29c] sm:$0xf]  ;;  %v5687_v30 = vld [vmem:[%s8938_s3 + $0xac] sm:$0xf0]  ;;  %v4548_v34 = vor.u32 %v5755_v28, %v4547_v27 }
  0x62   :  { %v4032_v53 = vor.u32 %v5620_v45, %v4029_v46  ;;  %v5719_v33 = vld [vmem:[%s8938_s3 + $0x1ac] sm:$0xf0]  ;;  %v4691_v45 = vld [vmem:[%s8938_s3 + $0x3e0] sm:$0xf] }
  0x63   :  { %950 = vmatpush.bf16.msra.mxu1 %v3956_v44  ;;  %976 = vmatpush.bf16.msra.mxu3 %v3960_v48  ;;  %v3773_v44 = vld [vmem:[%s8936_s1 + $0xb8] sm:$0xf0]  ;;  %v4028_v48 = vor.u32 %v5624_v42, %v4027_v40  ;;  %v4243_v40 = vld [vmem:[%s8938_s3 + $0x60] sm:$0xf]  ;;  %v5791_v46 = vld [vmem:[%s8938_s3 + $0x3ec] sm:$0xf0] }
  0x64   :  { %938 = vmatmul.bf16.vlgmr.msra.gmra.mxu0 %v6314_v1  ;;  %964 = vmatmul.bf16.vlgmr.msra.gmra.mxu2 %v6314_v1  ;;  %v5855_v21 = vld [vmem:[%s8938_s3 + $0x5ec] sm:$0xf0] }
  0x65   :  { %982 = vmatpush.bf16.msrb.mxu0 %v3932_v49  ;;  %1008 = vmatpush.bf16.msrb.mxu2 %v3936_v51  ;;  %v3776_v49 = vor.u32 %v5556_v43, %v3773_v44  ;;  %v5552_v51 = vld [vmem:[%s8936_s1 + $0x74] sm:$0xf0]  ;;  %v4371_v43 = vld [vmem:[%s8938_s3 + $0x160] sm:$0xf]  ;;  %v5711_v44 = vld [vmem:[%s8938_s3 + $0x16c] sm:$0xf0] }
  0x66   :  { %951 = vmatmul.bf16.vlgmr.msra.gmra.mxu1 %v6322_v4  ;;  %977 = vmatmul.bf16.vlgmr.msra.gmra.mxu3 %v6322_v4 }
  0x67   :  { %995 = vmatpush.bf16.msrb.mxu1 %v4188_v50  ;;  %1021 = vmatpush.bf16.msrb.mxu3 %v4192_v55  ;;  %v3739_v50 = vld [vmem:[%s8936_s1 + $0x58] sm:$0xf]  ;;  %v5548_v55 = vld [vmem:[%s8936_s1 + $0x5c] sm:$0xf] }
  0x68   :  { %v3740_v59 = vor.u32 %v5552_v51, %v3739_v50  ;;  %v5675_v50 = vld [vmem:[%s8938_s3 + $0x4c] sm:$0xf0]  ;;  %v4372_v51 = vor.u32 %v5711_v44, %v4371_v43  ;;  %v4771_v43 = vld [vmem:[%s8938_s3 + $0x480] sm:$0xf] }
  0x69   :  { %983 = vmatpush.bf16.msrb.mxu0 %v3900_v61  ;;  %1009 = vmatpush.bf16.msrb.mxu2 %v3904_v63  ;;  %v3996_v61 = vor.u32 %v5616_v54, %v3995_v52  ;;  %v5544_v63 = vld [vmem:[%s8936_s1 + $0x34] sm:$0xf0]  ;;  %v4355_v52 = vld [vmem:[%s8938_s3 + $0x140] sm:$0xf]  ;;  %v5811_v44 = vld [vmem:[%s8938_s3 + $0x48c] sm:$0xf0] }
  0x6b   :  { %996 = vmatpush.bf16.msrb.mxu1 %v4156_v62  ;;  %1022 = vmatpush.bf16.msrb.mxu3 %v4160_v5  ;;  %v3744_v62 = vor.u32 %v5548_v55, %v3741_v56  ;;  %v5540_v5 = vld [vmem:[%s8936_s1 + $0x1c] sm:$0xf]  ;;  %v4211_v55 = vld [vmem:[%s8938_s3 + $0x20] sm:$0xf] }
  0x6c   :  { %v3712_v15 = vor.u32 %v5540_v5, %v3709_v6  ;;  %v4531_v56 = vld [vmem:[%s8938_s3 + $0x2a0] sm:$0xf]  ;;  %v5747_v6 = vld [vmem:[%s8938_s3 + $0x28c] sm:$0xf0]  ;;  %v4212_v7 = vor.u32 %v5671_v58, %v4211_v55 }
  0x6d   :  { %984 = vmatpush.bf16.msrb.mxu0 %v3868_v11  ;;  %1010 = vmatpush.bf16.msrb.mxu2 %v3872_v13  ;;  %v3708_v11 = vor.u32 %v5544_v63, %v3707_v60  ;;  %v5727_v13 = vld [vmem:[%s8938_s3 + $0x1ec] sm:$0xf0]  ;;  %v4532_v60 = vor.u32 %v5751_v57, %v4531_v56  ;;  %v4339_v63 = vld [vmem:[%s8938_s3 + $0x120] sm:$0xf] }
  0x6e   :  { %v4515_v5 = vld [vmem:[%s8938_s3 + $0x280] sm:$0xf]  ;;  %v5807_v56 = vld [vmem:[%s8938_s3 + $0x46c] sm:$0xf0] }
  0x6f   :  { %997 = vmatpush.bf16.msrb.mxu1 %v4124_v12  ;;  %1023 = vmatpush.bf16.msrb.mxu3 %v4128_v17  ;;  %v4435_v12 = vld [vmem:[%s8938_s3 + $0x1e0] sm:$0xf]  ;;  %v4308_v17 = vor.u32 %v5695_v10, %v4307_v9  ;;  %v5823_v10 = vld [vmem:[%s8938_s3 + $0x4ec] sm:$0xf0] }
  0x70   :  { %v4436_v22 = vor.u32 %v5727_v13, %v4435_v12  ;;  %v4819_v9 = vld [vmem:[%s8938_s3 + $0x4e0] sm:$0xf]  ;;  %v4340_v12 = vor.u32 %v5703_v0, %v4339_v63 }
  0x71   :  { %985 = vmatpush.bf16.msrb.mxu0 %v3836_v23  ;;  %1011 = vmatpush.bf16.msrb.mxu2 %v3840_v25  ;;  %v4419_v23 = vld [vmem:[%s8938_s3 + $0x1c0] sm:$0xf]  ;;  %v4564_v25 = vor.u32 %v5759_v19, %v4563_v18  ;;  %v5743_v19 = vld [vmem:[%s8938_s3 + $0x26c] sm:$0xf0] }
  0x72   :  { %v4323_v13 = vld [vmem:[%s8938_s3 + $0x100] sm:$0xf] }
  0x73   :  { %998 = vmatpush.bf16.msrb.mxu1 %v4092_v24  ;;  %1024 = vmatpush.bf16.msrb.mxu3 %v4096_v29  ;;  %v5723_v24 = vld [vmem:[%s8938_s3 + $0x1cc] sm:$0xf0]  ;;  %v4275_v29 = vld [vmem:[%s8938_s3 + $0xa0] sm:$0xf] }
  0x74   :  { %v4420_v31 = vor.u32 %v5723_v24, %v4419_v23  ;;  %v4499_v18 = vld [vmem:[%s8938_s3 + $0x260] sm:$0xf] }
  0x75   :  { %986 = vmatpush.bf16.msrb.mxu0 %v3804_v35  ;;  %1012 = vmatpush.bf16.msrb.mxu2 %v3808_v37  ;;  %v4276_v35 = vor.u32 %v5687_v30, %v4275_v29  ;;  %v4404_v37 = vor.u32 %v5719_v33, %v4403_v32  ;;  %v4643_v23 = vld [vmem:[%s8938_s3 + $0x380] sm:$0xf]  ;;  %v5739_v30 = vld [vmem:[%s8938_s3 + $0x24c] sm:$0xf0]  ;;  %v4948_v33 = vor.u32 %v5855_v21, %v4947_v20 }
  0x76   :  { %v4483_v29 = vld [vmem:[%s8938_s3 + $0x240] sm:$0xf]  ;;  %v5819_v32 = vld [vmem:[%s8938_s3 + $0x4cc] sm:$0xf0] }
  0x77   :  { %999 = vmatpush.bf16.msrb.mxu1 %v4060_v36  ;;  %1025 = vmatpush.bf16.msrb.mxu3 %v4064_v41  ;;  %v4259_v36 = vld [vmem:[%s8938_s3 + $0x80] sm:$0xf]  ;;  %v5679_v41 = vld [vmem:[%s8938_s3 + $0x6c] sm:$0xf0] }
  0x78   :  { %v4755_v55 = vld [vmem:[%s8938_s3 + $0x460] sm:$0xf]  ;;  %v5887_v20 = vld [vmem:[%s8938_s3 + $0x6ec] sm:$0xf0] }
  0x79   :  { %987 = vmatpush.bf16.msrb.mxu0 %v3772_v47  ;;  %1013 = vmatpush.bf16.msrb.mxu2 %v3776_v49  ;;  %v4692_v47 = vor.u32 %v5791_v46, %v4691_v45  ;;  %v4227_v49 = vld [vmem:[%s8938_s3 + $0x40] sm:$0xf] }
  0x7a   :  { %v4228_v54 = vor.u32 %v5675_v50, %v4227_v49  ;;  %v4899_v46 = vld [vmem:[%s8938_s3 + $0x580] sm:$0xf]  ;;  %v5775_v49 = vld [vmem:[%s8938_s3 + $0x36c] sm:$0xf0] }
  0x7b   :  { %1000 = vmatpush.bf16.msrb.mxu1 %v4028_v48  ;;  %1026 = vmatpush.bf16.msrb.mxu3 %v4032_v53  ;;  %v4244_v48 = vor.u32 %v5679_v41, %v4243_v40  ;;  %v5707_v53 = vld [vmem:[%s8938_s3 + $0x14c] sm:$0xf0]  ;;  %v7039_v41 = vld [vmem:[%s8939_s2] sm:$0xff] }
  0x7c   :  { %v5847_v40 = vld [vmem:[%s8938_s3 + $0x5ac] sm:$0xf0] }
  0x7d   :  { %988 = vmatpush.bf16.msrb.mxu0 %v3740_v59  ;;  %1014 = vmatpush.bf16.msrb.mxu2 %v3744_v62  ;;  %v4356_v59 = vor.u32 %v5707_v53, %v4355_v52  ;;  %v5787_v62 = vld [vmem:[%s8938_s3 + $0x3cc] sm:$0xf0]  ;;  %v4772_v52 = vor.u32 %v5811_v44, %v4771_v43  ;;  %v4467_v53 = vld [vmem:[%s8938_s3 + $0x220] sm:$0xf]  ;;  %v4309_v43 = vld [vmem:[%s8938_s3 + $0xf0] sm:$0xf0] }
  0x7f   :  { %1001 = vmatpush.bf16.msrb.mxu1 %v3996_v61  ;;  %1027 = vmatpush.bf16.msrb.mxu3 %v4000_v3  ;;  %v4675_v61 = vld [vmem:[%s8938_s3 + $0x3c0] sm:$0xf] }
  0x80   :  { %v4676_v2 = vor.u32 %v5787_v62, %v4675_v61  ;;  %v4195_v3 = vld [vmem:[%s8938_s3] sm:$0xf]  ;;  %v5771_v62 = vld [vmem:[%s8938_s3 + $0x34c] sm:$0xf0] }
  0x81   :  { %989 = vmatpush.bf16.msrb.mxu0 %v3708_v11  ;;  %1015 = vmatpush.bf16.msrb.mxu2 %v3712_v15  ;;  %v4516_v11 = vor.u32 %v5747_v6, %v4515_v5  ;;  %v5783_v15 = vld [vmem:[%s8938_s3 + $0x3ac] sm:$0xf0]  ;;  %v4196_v24 = vor.u32 %v5667_v8, %v4195_v3  ;;  %v4611_v61 = vld [vmem:[%s8938_s3 + $0x340] sm:$0xf]  ;;  %v4756_v3 = vor.u32 %v5807_v56, %v4755_v55  ;;  %v4437_v55 = vld [vmem:[%s8938_s3 + $0x1f0] sm:$0xf0] }
  0x82   :  { %v4612_v63 = vor.u32 %v5771_v62, %v4611_v61  ;;  %v4451_v5 = vld [vmem:[%s8938_s3 + $0x200] sm:$0xf]  ;;  %v5731_v6 = vld [vmem:[%s8938_s3 + $0x20c] sm:$0xf0] }
  0x83   :  { %1002 = vmatpush.bf16.msrb.mxu1 %v3964_v14  ;;  %1028 = vmatpush.bf16.msrb.mxu3 %v3968_v16  ;;  %v4659_v14 = vld [vmem:[%s8938_s3 + $0x3a0] sm:$0xf]  ;;  %v5699_v16 = vld [vmem:[%s8938_s3 + $0x10c] sm:$0xf0] }
  0x84   :  { %990 = vmatmul.bf16.vlgmr.msrb.gmra.mxu0 %v6314_v1  ;;  %1016 = vmatmul.bf16.vlgmr.msrb.gmra.mxu2 %v6314_v1  ;;  %v5683_v1 = vld [vmem:[%s8938_s3 + $0x8c] sm:$0xf0]  ;;  %v4324_v27 = vor.u32 %v5699_v16, %v4323_v13  ;;  %v4867_v13 = vld [vmem:[%s8938_s3 + $0x540] sm:$0xf] }
  0x85   :  { %2596 = vmatpush.bf16.msra.mxu0 %v4308_v17  ;;  %2622 = vmatpush.bf16.msra.mxu2 %v4564_v25  ;;  %v4260_v39 = vor.u32 %v5683_v1, %v4259_v36  ;;  %v4660_v17 = vor.u32 %v5783_v15, %v4659_v14  ;;  %v5779_v25 = vld [vmem:[%s8938_s3 + $0x38c] sm:$0xf0]  ;;  %v4484_v36 = vor.u32 %v5739_v30, %v4483_v29  ;;  %v4595_v15 = vld [vmem:[%s8938_s3 + $0x320] sm:$0xf] }
  0x86   :  { %1003 = vmatmul.bf16.vlgmr.msrb.gmra.mxu1 %v6322_v4  ;;  %1029 = vmatmul.bf16.vlgmr.msrb.gmra.mxu3 %v6322_v4  ;;  %v5715_v4 = vld [vmem:[%s8938_s3 + $0x18c] sm:$0xf0]  ;;  %v4644_v28 = vor.u32 %v5779_v25, %v4643_v23  ;;  %v4723_v23 = vld [vmem:[%s8938_s3 + $0x420] sm:$0xf] }
  0x87   :  { %2609 = vmatpush.bf16.msra.mxu1 %v4436_v22  ;;  %v4388_v42 = vor.u32 %v5715_v4, %v4387_v38  ;;  %2635 = vmatpush.bf16.msra.mxu3 %v4692_v47  ;;  %v4500_v22 = vor.u32 %v5743_v19, %v4499_v18  ;;  %v5815_v38 = vld [vmem:[%s8938_s3 + $0x4ac] sm:$0xf0]  ;;  %v5075_v19 = vld [vmem:[%s8938_s3 + $0x6e0] sm:$0xf] }
  0x88   :  { %v5843_v47 = vld [vmem:[%s8938_s3 + $0x58c] sm:$0xf0]  ;;  %v4851_v29 = vld [vmem:[%s8938_s3 + $0x520] sm:$0xf] }
  0x89   :  { %2597 = vmatpush.bf16.msra.mxu0 %v4292_v26  ;;  %2623 = vmatpush.bf16.msra.mxu2 %v4548_v34  ;;  %v4820_v26 = vor.u32 %v5823_v10, %v4819_v9  ;;  %v4931_v34 = vld [vmem:[%s8938_s3 + $0x5c0] sm:$0xf]  ;;  %v4900_v57 = vor.u32 %v5843_v47, %v4899_v46  ;;  %v5803_v10 = vld [vmem:[%s8938_s3 + $0x44c] sm:$0xf0] }
  0x8a   :  { %v4739_v9 = vld [vmem:[%s8938_s3 + $0x440] sm:$0xf]  ;;  %v5835_v14 = vld [vmem:[%s8938_s3 + $0x54c] sm:$0xf0] }
  0x8b   :  { %2610 = vmatpush.bf16.msra.mxu1 %v4420_v31  ;;  %2636 = vmatpush.bf16.msra.mxu3 %v4676_v2  ;;  %v4803_v31 = vld [vmem:[%s8938_s3 + $0x4c0] sm:$0xf]  ;;  %v164_v2 = vperm.slane %v7039_v41, 1  ;;  %v5767_v16 = vld [vmem:[%s8938_s3 + $0x32c] sm:$0xf0] }
  0x8c   :  { %v4804_v1 = vor.u32 %v5819_v32, %v4803_v31  ;;  %v4596_v18 = vor.u32 %v5767_v16, %v4595_v15  ;;  %v5831_v30 = vld [vmem:[%s8938_s3 + $0x52c] sm:$0xf0]  ;;  %v4579_v31 = vld [vmem:[%s8938_s3 + $0x300] sm:$0xf] }
  0x8d   :  { %2598 = vmatpush.bf16.msra.mxu0 %v4276_v35  ;;  %2624 = vmatpush.bf16.msra.mxu2 %v4532_v60  ;;  %v5851_v35 = vld [vmem:[%s8938_s3 + $0x5cc] sm:$0xf0]  ;;  %v4852_v46 = vor.u32 %v5831_v30, %v4851_v29  ;;  %v4835_v47 = vld [vmem:[%s8938_s3 + $0x500] sm:$0xf]  ;;  %v5681_v30 = vld [vmem:[%s8938_s3 + $0x84] sm:$0xf] }
  0x8e   :  { %v4932_v4 = vor.u32 %v5851_v35, %v4931_v34  ;;  %v5839_v60 = vld [vmem:[%s8938_s3 + $0x56c] sm:$0xf0]  ;;  %v4707_v35 = vld [vmem:[%s8938_s3 + $0x400] sm:$0xf] }
  0x8f   :  { %2611 = vmatpush.bf16.msra.mxu1 %v4404_v37  ;;  %2637 = vmatpush.bf16.msra.mxu3 %v4660_v17  ;;  %v4787_v37 = vld [vmem:[%s8938_s3 + $0x4a0] sm:$0xf]  ;;  %v5763_v32 = vld [vmem:[%s8938_s3 + $0x30c] sm:$0xf0] }
  0x90   :  { %v5879_v56 = vld [vmem:[%s8938_s3 + $0x6ac] sm:$0xf0]  ;;  %v5187_v61 = vld [vmem:[%s8938_s3 + $0x7c0] sm:$0xf] }
  0x91   :  { %2599 = vmatpush.bf16.msra.mxu0 %v4260_v39  ;;  %2625 = vmatpush.bf16.msra.mxu2 %v4516_v11  ;;  %v4915_v39 = vld [vmem:[%s8938_s3 + $0x5a0] sm:$0xf]  ;;  %v5915_v62 = vld [vmem:[%s8938_s3 + $0x7cc] sm:$0xf0] }
  0x92   :  { %v4916_v45 = vor.u32 %v5847_v40, %v4915_v39  ;;  %v5795_v40 = vld [vmem:[%s8938_s3 + $0x40c] sm:$0xf0]  ;;  %v5011_v16 = vld [vmem:[%s8938_s3 + $0x660] sm:$0xf] }
  0x93   :  { %2612 = vmatpush.bf16.msra.mxu1 %v4388_v42  ;;  %2638 = vmatpush.bf16.msra.mxu3 %v4644_v28  ;;  %v4788_v42 = vor.u32 %v5815_v38, %v4787_v37  ;;  %v4868_v28 = vor.u32 %v5835_v14, %v4867_v13  ;;  %v5883_v37 = vld [vmem:[%s8938_s3 + $0x6cc] sm:$0xf0]  ;;  %v4421_v13 = vld [vmem:[%s8938_s3 + $0x1d0] sm:$0xf0] }
  0x94   :  { %v5911_v14 = vld [vmem:[%s8938_s3 + $0x7ac] sm:$0xf0] }
  0x95   :  { %2600 = vmatpush.bf16.msra.mxu0 %v4244_v48  ;;  %2626 = vmatpush.bf16.msra.mxu2 %v4500_v22  ;;  %v4627_v48 = vld [vmem:[%s8938_s3 + $0x360] sm:$0xf]  ;;  %v4740_v22 = vor.u32 %v5803_v10, %v4739_v9 }
  0x96   :  { %v4628_v50 = vor.u32 %v5775_v49, %v4627_v48  ;;  %v5203_v48 = vld [vmem:[%s8938_s3 + $0x7e0] sm:$0xf]  ;;  %v5919_v49 = vld [vmem:[%s8938_s3 + $0x7ec] sm:$0xf0] }
  0x97   :  { %2613 = vmatpush.bf16.msra.mxu1 %v4372_v51  ;;  %v163_v51 = vperm.slane %v7039_v41, 0  ;;  %v5171_v10 = vld [vmem:[%s8938_s3 + $0x7a0] sm:$0xf] }
  0x98   :  { %2639 = vmatpush.bf16.msra.mxu3 %v4628_v50  ;;  %v5172_v15 = vor.u32 %v5911_v14, %v5171_v10 }
  0x99   :  { %2601 = vmatpush.bf16.msra.mxu0 %v4228_v54  ;;  %2627 = vmatpush.bf16.msra.mxu2 %v4484_v36  ;;  %v5735_v54 = vld [vmem:[%s8938_s3 + $0x22c] sm:$0xf0]  ;;  %v4580_v36 = vor.u32 %v5763_v32, %v4579_v31  ;;  %v4261_v31 = vld [vmem:[%s8938_s3 + $0x90] sm:$0xf0] }
  0x9a   :  { %v4468_v58 = vor.u32 %v5735_v54, %v4467_v53  ;;  %v5043_v53 = vld [vmem:[%s8938_s3 + $0x6a0] sm:$0xf]  ;;  %v5725_v54 = vld [vmem:[%s8938_s3 + $0x1e4] sm:$0xf] }
  0x9b   :  { %2614 = vmatpush.bf16.msra.mxu1 %v4356_v59  ;;  %v4883_v59 = vld [vmem:[%s8938_s3 + $0x560] sm:$0xf] }
  0x9c   :  { %v4884_v11 = vor.u32 %v5839_v60, %v4883_v59  ;;  %2640 = vmatpush.bf16.msra.mxu3 %v4612_v63  ;;  %v4708_v59 = vor.u32 %v5795_v40, %v4707_v35  ;;  %v5044_v60 = vor.u32 %v5879_v56, %v5043_v53  ;;  %v4389_v35 = vld [vmem:[%s8938_s3 + $0x190] sm:$0xf0]  ;;  %v5673_v56 = vld [vmem:[%s8938_s3 + $0x44] sm:$0xf] }
  0x9d   :  { %2602 = vmatpush.bf16.msra.mxu0 %v4212_v7  ;;  %2628 = vmatpush.bf16.msra.mxu2 %v4468_v58 }
  0x9f   :  { %2615 = vmatpush.bf16.msra.mxu1 %v4340_v12  ;;  %v4452_v12 = vor.u32 %v5731_v6, %v4451_v5  ;;  %v5875_v5 = vld [vmem:[%s8938_s3 + $0x68c] sm:$0xf0]  ;;  %v5689_v6 = vld [vmem:[%s8938_s3 + $0xc4] sm:$0xf] }
  0xa0   :  { %2641 = vmatpush.bf16.msra.mxu3 %v4596_v18 }
  0xa1   :  { %2603 = vmatpush.bf16.msra.mxu0 %v4196_v24  ;;  %2629 = vmatpush.bf16.msra.mxu2 %v4452_v12  ;;  %v5076_v24 = vor.u32 %v5887_v20, %v5075_v19  ;;  %v5721_v12 = vld [vmem:[%s8938_s3 + $0x1c4] sm:$0xf]  ;;  %v5155_v19 = vld [vmem:[%s8938_s3 + $0x780] sm:$0xf]  ;;  %v5907_v20 = vld [vmem:[%s8938_s3 + $0x78c] sm:$0xf0] }
  0xa3   :  { %2616 = vmatpush.bf16.msra.mxu1 %v4324_v27  ;;  %v835_v0 = vpop.f32.mrf.mxu0  ;;  %v5799_v27 = vld [vmem:[%s8938_s3 + $0x42c] sm:$0xf0] }
  0xa4   :  { %v836_v7 = vadd.f32 %v835_v0, %v163_v51  ;;  %v4724_v39 = vor.u32 %v5799_v27, %v4723_v23  ;;  %2642 = vmatpush.bf16.msra.mxu3 %v4580_v36  ;;  %v5827_v51 = vld [vmem:[%s8938_s3 + $0x50c] sm:$0xf0]  ;;  %v4424_v23 = vor.u32 %v5721_v12, %v4421_v13  ;;  %v5156_v27 = vor.u32 %v5907_v20, %v5155_v19  ;;  %v4995_v36 = vld [vmem:[%s8938_s3 + $0x640] sm:$0xf]  ;;  %v4565_v12 = vld [vmem:[%s8938_s3 + $0x2f0] sm:$0xf0] }
  0xa5   :  { %2648 = vmatpush.bf16.msrb.mxu0 %v4820_v26  ;;  %v848_v8 = vpop.f32.mrf.mxu1  ;;  %2674 = vmatpush.bf16.msrb.mxu2 %v5076_v24  ;;  %v4836_v0 = vor.u32 %v5827_v51, %v4835_v47  ;;  %v5863_v51 = vld [vmem:[%s8938_s3 + $0x62c] sm:$0xf0]  ;;  %v5107_v19 = vld [vmem:[%s8938_s3 + $0x720] sm:$0xf] }
  0xa6   :  { %v849_v17 = vadd.f32 %v848_v8, %v836_v7  ;;  %v4293_v7 = vld [vmem:[%s8938_s3 + $0xd0] sm:$0xf0]  ;;  %v4440_v8 = vor.u32 %v5725_v54, %v4437_v55  ;;  %v5895_v20 = vld [vmem:[%s8938_s3 + $0x72c] sm:$0xf0] }
  0xa7   :  { %2661 = vmatpush.bf16.msrb.mxu1 %v4948_v33  ;;  %v4296_v18 = vor.u32 %v5689_v6, %v4293_v7  ;;  %v5757_v7 = vld [vmem:[%s8938_s3 + $0x2e4] sm:$0xf] }
  0xa8   :  { %v1034_v25 = vmax.f32 %v849_v17, 0.0  ;;  %v5871_v17 = vld [vmem:[%s8938_s3 + $0x66c] sm:$0xf0] }
  0xa9   :  { %2649 = vmatpush.bf16.msrb.mxu0 %v4804_v1  ;;  %v861_v21 = vpop.f32.mrf.mxu2  ;;  %v5059_v1 = vld [vmem:[%s8938_s3 + $0x6c0] sm:$0xf]  ;;  %v5012_v24 = vor.u32 %v5871_v17, %v5011_v16  ;;  %v4213_v16 = vld [vmem:[%s8938_s3 + $0x30] sm:$0xf0] }
  0xaa   :  { %v862_v26 = vadd.f32 %v861_v21, %v164_v2  ;;  %v7133_v33 = vpack.c.bf16 %v1034_v25, %v1034_v25  ;;  %v5060_v44 = vor.u32 %v5883_v37, %v5059_v1  ;;  %v5188_v2 = vor.u32 %v5915_v62, %v5187_v61  ;;  %v5685_v21 = vld [vmem:[%s8938_s3 + $0xa4] sm:$0xf]  ;;  %v5867_v1 = vld [vmem:[%s8938_s3 + $0x64c] sm:$0xf0] }
  0xab   :  { %2662 = vmatpush.bf16.msrb.mxu1 %v4932_v4  ;;  %v874_v34 = vpop.f32.mrf.mxu3  ;;  %v837_v38 = vpop.f32.mrf.mxu0  ;;  %v5717_v25 = vld [vmem:[%s8938_s3 + $0x1a4] sm:$0xf]  ;;  %v4996_v37 = vor.u32 %v5867_v1, %v4995_v36 }
  0xac   :  { %v875_v4 = vadd.f32 %v874_v34, %v862_v26  ;;  %2604 = vmatmul.bf16.vlgmr.msra.gmra.mxu0 %v7133_v33  ;;  %2675 = vmatpush.bf16.msrb.mxu2 %v5060_v44  ;;  %v4405_v26 = vld [vmem:[%s8938_s3 + $0x1b0] sm:$0xf0]  ;;  %v5713_v34 = vld [vmem:[%s8938_s3 + $0x184] sm:$0xf]  ;;  %v4264_v38 = vor.u32 %v5681_v30, %v4261_v31  ;;  %v5091_v31 = vld [vmem:[%s8938_s3 + $0x700] sm:$0xf] }
  0xad   :  { %2650 = vmatpush.bf16.msrb.mxu0 %v4788_v42  ;;  %v5693_v42 = vld [vmem:[%s8938_s3 + $0xe4] sm:$0xf]  ;;  %v4408_v32 = vor.u32 %v5717_v25, %v4405_v26  ;;  %v4392_v44 = vor.u32 %v5713_v34, %v4389_v35  ;;  %v4197_v35 = vld [vmem:[%s8938_s3 + $0x10] sm:$0xf0] }
  0xae   :  { %v1035_v50 = vmax.f32 %v875_v4, 0.0  ;;  %v4312_v63 = vor.u32 %v5693_v42, %v4309_v43  ;;  %v5139_v4 = vld [vmem:[%s8938_s3 + $0x760] sm:$0xf]  ;;  %v5677_v42 = vld [vmem:[%s8938_s3 + $0x64] sm:$0xf] }
  0xaf   :  { %2663 = vmatpush.bf16.msrb.mxu1 %v4916_v45  ;;  %v850_v45 = vpop.f32.mrf.mxu1  ;;  %v4245_v43 = vld [vmem:[%s8938_s3 + $0x70] sm:$0xf0]  ;;  %v5753_v26 = vld [vmem:[%s8938_s3 + $0x2c4] sm:$0xf] }
  0xb0   :  { %2676 = vmatpush.bf16.msrb.mxu2 %v5044_v60  ;;  %v4248_v55 = vor.u32 %v5677_v42, %v4245_v43  ;;  %v4229_v60 = vld [vmem:[%s8938_s3 + $0x50] sm:$0xf0]  ;;  %v5749_v43 = vld [vmem:[%s8938_s3 + $0x2a4] sm:$0xf] }
  0xb1   :  { %2651 = vmatpush.bf16.msrb.mxu0 %v4772_v52  ;;  %v5204_v52 = vor.u32 %v5919_v49, %v5203_v48  ;;  %v863_v58 = vpop.f32.mrf.mxu2  ;;  %v4373_v49 = vld [vmem:[%s8938_s3 + $0x170] sm:$0xf0]  ;;  %v4232_v10 = vor.u32 %v5673_v56, %v4229_v60  ;;  %v5781_v56 = vld [vmem:[%s8938_s3 + $0x3a4] sm:$0xf] }
  0xb2   :  { %v5123_v58 = vld [vmem:[%s8938_s3 + $0x740] sm:$0xf]  ;;  %v5741_v60 = vld [vmem:[%s8938_s3 + $0x264] sm:$0xf] }
  0xb3   :  { %2664 = vmatpush.bf16.msrb.mxu1 %v4900_v57  ;;  %v7178_v57 = vpack.c.bf16 %v1035_v50, %v1035_v50  ;;  %2687 = vmatpush.bf16.msrb.mxu3 %v5204_v52  ;;  %v4979_v50 = vld [vmem:[%s8938_s3 + $0x620] sm:$0xf]  ;;  %v166_v52 = vperm.slane %v7039_v41, 3 }
  0xb4   :  { %v4980_v53 = vor.u32 %v5863_v51, %v4979_v50  ;;  %v5785_v50 = vld [vmem:[%s8938_s3 + $0x3c4] sm:$0xf]  ;;  %v4677_v51 = vld [vmem:[%s8938_s3 + $0x3d0] sm:$0xf0] }
  0xb5   :  { %2652 = vmatpush.bf16.msrb.mxu0 %v4756_v3  ;;  %v5027_v3 = vld [vmem:[%s8938_s3 + $0x680] sm:$0xf]  ;;  %2617 = vmatmul.bf16.vlgmr.msra.gmra.mxu1 %v7178_v57 }
  0xb6   :  { %v5028_v9 = vor.u32 %v5875_v5, %v5027_v3  ;;  %v4963_v3 = vld [vmem:[%s8938_s3 + $0x600] sm:$0xf]  ;;  %v5859_v5 = vld [vmem:[%s8938_s3 + $0x60c] sm:$0xf0] }
  0xb7   :  { %2665 = vmatpush.bf16.msrb.mxu1 %v4884_v11  ;;  %v876_v11 = vpop.f32.mrf.mxu3  ;;  %2688 = vmatpush.bf16.msrb.mxu3 %v5188_v2  ;;  %v4964_v6 = vor.u32 %v5859_v5, %v4963_v3  ;;  %v5737_v3 = vld [vmem:[%s8938_s3 + $0x244] sm:$0xf]  ;;  %v4485_v5 = vld [vmem:[%s8938_s3 + $0x250] sm:$0xf0] }
  0xb8   :  { %2677 = vmatpush.bf16.msrb.mxu2 %v5028_v9  ;;  %v5669_v11 = vld [vmem:[%s8938_s3 + $0x24] sm:$0xf] }
  0xb9   :  { %2653 = vmatpush.bf16.msrb.mxu0 %v4740_v22  ;;  %v4277_v22 = vld [vmem:[%s8938_s3 + $0xb0] sm:$0xf0] }
  0xba   :  { %v4280_v29 = vor.u32 %v5685_v21, %v4277_v22  ;;  %v5108_v22 = vor.u32 %v5895_v20, %v5107_v19  ;;  %v4613_v19 = vld [vmem:[%s8938_s3 + $0x350] sm:$0xf0] }
  0xbb   :  { %2666 = vmatpush.bf16.msrb.mxu1 %v4868_v28  ;;  %2689 = vmatpush.bf16.msrb.mxu3 %v5172_v15  ;;  %v165_v28 = vperm.slane %v7039_v41, 2 }
  0xbc   :  { %2678 = vmatpush.bf16.msrb.mxu2 %v5012_v24  ;;  %v4341_v24 = vld [vmem:[%s8938_s3 + $0x130] sm:$0xf0] }
  0xbd   :  { %2654 = vmatpush.bf16.msrb.mxu0 %v4724_v39  ;;  %v5903_v39 = vld [vmem:[%s8938_s3 + $0x76c] sm:$0xf0] }
  0xbe   :  { %v5140_v45 = vor.u32 %v5903_v39, %v5139_v4  ;;  %v5789_v4 = vld [vmem:[%s8938_s3 + $0x3e4] sm:$0xf]  ;;  %v4693_v39 = vld [vmem:[%s8938_s3 + $0x3f0] sm:$0xf0] }
  0xbf   :  { %2667 = vmatpush.bf16.msrb.mxu1 %v4852_v46  ;;  %2690 = vmatpush.bf16.msrb.mxu3 %v5156_v27  ;;  %v5709_v46 = vld [vmem:[%s8938_s3 + $0x164] sm:$0xf]  ;;  %v4549_v27 = vld [vmem:[%s8938_s3 + $0x2d0] sm:$0xf0]  ;;  %v4696_v42 = vor.u32 %v5789_v4, %v4693_v39 }
  0xc0   :  { %2679 = vmatpush.bf16.msrb.mxu2 %v4996_v37  ;;  %v4376_v61 = vor.u32 %v5709_v46, %v4373_v49  ;;  %v4552_v30 = vor.u32 %v5753_v26, %v4549_v27  ;;  %v5697_v37 = vld [vmem:[%s8938_s3 + $0x104] sm:$0xf]  ;;  %v4453_v26 = vld [vmem:[%s8938_s3 + $0x210] sm:$0xf0] }
  0xc1   :  { %2655 = vmatpush.bf16.msrb.mxu0 %v4708_v59  ;;  %v887_v40 = vpop.f32.mrf.mxu0  ;;  %v5899_v59 = vld [vmem:[%s8938_s3 + $0x74c] sm:$0xf0]  ;;  %v5853_v39 = vld [vmem:[%s8938_s3 + $0x5e4] sm:$0xf] }
  0xc2   :  { %v888_v47 = vadd.f32 %v887_v40, %v165_v28  ;;  %v5124_v62 = vor.u32 %v5899_v59, %v5123_v58  ;;  %v4216_v28 = vor.u32 %v5669_v11, %v4213_v16  ;;  %v4661_v58 = vld [vmem:[%s8938_s3 + $0x3b0] sm:$0xf0] }
  0xc3   :  { %2668 = vmatpush.bf16.msrb.mxu1 %v4836_v0  ;;  %v900_v48 = vpop.f32.mrf.mxu1  ;;  %2691 = vmatpush.bf16.msrb.mxu3 %v5140_v45  ;;  %v4357_v0 = vld [vmem:[%s8938_s3 + $0x150] sm:$0xf0]  ;;  %v4664_v59 = vor.u32 %v5781_v56, %v4661_v58 }
  0xc4   :  { %v901_v54 = vadd.f32 %v900_v48, %v888_v47  ;;  %2680 = vmatpush.bf16.msrb.mxu2 %v4980_v53  ;;  %v5745_v53 = vld [vmem:[%s8938_s3 + $0x284] sm:$0xf]  ;;  %v4933_v56 = vld [vmem:[%s8938_s3 + $0x5d0] sm:$0xf0] }
  0xc5   :  { %2700 = vmatpush.bf16.msra.mxu0 %v4312_v63  ;;  %v5705_v63 = vld [vmem:[%s8938_s3 + $0x144] sm:$0xf] }
  0xc6   :  { %v1036_v2 = vmax.f32 %v901_v54, 0.0  ;;  %v4360_v17 = vor.u32 %v5705_v63, %v4357_v0  ;;  %v4517_v54 = vld [vmem:[%s8938_s3 + $0x290] sm:$0xf0]  ;;  %v5777_v63 = vld [vmem:[%s8938_s3 + $0x384] sm:$0xf] }
  0xc7   :  { %2713 = vmatpush.bf16.msra.mxu1 %v4440_v8  ;;  %2692 = vmatpush.bf16.msrb.mxu3 %v5124_v62  ;;  %v913_v9 = vpop.f32.mrf.mxu2  ;;  %v4645_v0 = vld [vmem:[%s8938_s3 + $0x390] sm:$0xf0] }
  0xc8   :  { %v7306_v8 = vpack.c.bf16 %v1036_v2, %v1036_v2  ;;  %v914_v13 = vadd.f32 %v913_v9, %v166_v52  ;;  %2681 = vmatpush.bf16.msrb.mxu2 %v4964_v6  ;;  %v4680_v52 = vor.u32 %v5785_v50, %v4677_v51  ;;  %v4648_v2 = vor.u32 %v5777_v63, %v4645_v0  ;;  %v5773_v9 = vld [vmem:[%s8938_s3 + $0x364] sm:$0xf] }
  0xc9   :  { %2701 = vmatpush.bf16.msra.mxu0 %v4296_v18  ;;  %v926_v14 = vpop.f32.mrf.mxu3  ;;  %v889_v15 = vpop.f32.mrf.mxu0  ;;  %v4568_v18 = vor.u32 %v5757_v7, %v4565_v12  ;;  %v167_v6 = vperm.slane %v7039_v41, 4  ;;  %v4488_v7 = vor.u32 %v5737_v3, %v4485_v5  ;;  %v5845_v0 = vld [vmem:[%s8938_s3 + $0x5a4] sm:$0xf]  ;;  %v4757_v5 = vld [vmem:[%s8938_s3 + $0x470] sm:$0xf0] }
  0xca   :  { %2630 = vmatmul.bf16.vlgmr.msra.gmra.mxu2 %v7306_v8  ;;  %v927_v25 = vadd.f32 %v926_v14, %v914_v13  ;;  %v5733_v13 = vld [vmem:[%s8938_s3 + $0x224] sm:$0xf]  ;;  %v4469_v14 = vld [vmem:[%s8938_s3 + $0x230] sm:$0xf0] }
  0xcb   :  { %2714 = vmatpush.bf16.msra.mxu1 %v4424_v23  ;;  %v902_v21 = vpop.f32.mrf.mxu1  ;;  %v5701_v23 = vld [vmem:[%s8938_s3 + $0x124] sm:$0xf]  ;;  %2693 = vmatpush.bf16.msrb.mxu3 %v5108_v22  ;;  %v4821_v22 = vld [vmem:[%s8938_s3 + $0x4f0] sm:$0xf0] }
  0xcc   :  { %2726 = vmatpush.bf16.msra.mxu2 %v4568_v18  ;;  %v1037_v34 = vmax.f32 %v927_v25, 0.0  ;;  %v4344_v36 = vor.u32 %v5701_v23, %v4341_v24  ;;  %v5769_v18 = vld [vmem:[%s8938_s3 + $0x344] sm:$0xf]  ;;  %v168_v24 = vperm.slane %v7039_v41, 5 }
  0xcd   :  { %2702 = vmatpush.bf16.msra.mxu0 %v4280_v29  ;;  %v5665_v29 = vld [vmem:[%s8938_s3 + $0x4] sm:$0xf]  ;;  %v4616_v23 = vor.u32 %v5769_v18, %v4613_v19  ;;  %v4725_v19 = vld [vmem:[%s8938_s3 + $0x430] sm:$0xf0] }
  0xce   :  { %v7360_v40 = vpack.c.bf16 %v1037_v34, %v1037_v34  ;;  %v4200_v46 = vor.u32 %v5665_v29, %v4197_v35  ;;  %v5821_v21 = vld [vmem:[%s8938_s3 + $0x4e4] sm:$0xf]  ;;  %v4805_v34 = vld [vmem:[%s8938_s3 + $0x4d0] sm:$0xf0] }
  0xcf   :  { %2715 = vmatpush.bf16.msra.mxu1 %v4408_v32  ;;  %v5891_v32 = vld [vmem:[%s8938_s3 + $0x70c] sm:$0xf0]  ;;  %v915_v45 = vpop.f32.mrf.mxu2  ;;  %v5729_v25 = vld [vmem:[%s8938_s3 + $0x204] sm:$0xf]  ;;  %v4824_v29 = vor.u32 %v5821_v21, %v4821_v22 }
  0xd0   :  { %v5092_v1 = vor.u32 %v5891_v32, %v5091_v31  ;;  %2727 = vmatpush.bf16.msra.mxu2 %v4552_v30  ;;  %2643 = vmatmul.bf16.vlgmr.msra.gmra.mxu3 %v7360_v40  ;;  %v5817_v30 = vld [vmem:[%s8938_s3 + $0x4c4] sm:$0xf]  ;;  %v4949_v45 = vld [vmem:[%s8938_s3 + $0x5f0] sm:$0xf0] }
  0xd1   :  { %2703 = vmatpush.bf16.msra.mxu0 %v4264_v38  ;;  %v4325_v38 = vld [vmem:[%s8938_s3 + $0x110] sm:$0xf0]  ;;  %v928_v48 = vpop.f32.mrf.mxu3  ;;  %v5765_v35 = vld [vmem:[%s8938_s3 + $0x324] sm:$0xf] }
  0xd2   :  { %2694 = vmatpush.bf16.msrb.mxu3 %v5092_v1  ;;  %v4328_v49 = vor.u32 %v5697_v37, %v4325_v38  ;;  %v5813_v48 = vld [vmem:[%s8938_s3 + $0x4a4] sm:$0xf] }
  0xd3   :  { %2716 = vmatpush.bf16.msra.mxu1 %v4392_v44  ;;  %v4533_v44 = vld [vmem:[%s8938_s3 + $0x2b0] sm:$0xf0]  ;;  %v5805_v3 = vld [vmem:[%s8938_s3 + $0x464] sm:$0xf] }
  0xd4   :  { %v4536_v47 = vor.u32 %v5749_v43, %v4533_v44  ;;  %v4808_v44 = vor.u32 %v5817_v30, %v4805_v34  ;;  %v5797_v18 = vld [vmem:[%s8938_s3 + $0x424] sm:$0xf]  ;;  %v4315_v34 = vld [vmem:[%s8938_s3 + $0xe8] sm:$0xf] }
  0xd5   :  { %2704 = vmatpush.bf16.msra.mxu0 %v4248_v55  ;;  %v4520_v55 = vor.u32 %v5745_v53, %v4517_v54 }
  0xd6   :  { %2739 = vmatpush.bf16.msra.mxu3 %v4696_v42  ;;  %2728 = vmatpush.bf16.msra.mxu2 %v4536_v47  ;;  %v4581_v47 = vld [vmem:[%s8938_s3 + $0x310] sm:$0xf0] }
  0xd7   :  { %2717 = vmatpush.bf16.msra.mxu1 %v4376_v61  ;;  %v4501_v61 = vld [vmem:[%s8938_s3 + $0x270] sm:$0xf0] }
  0xd8   :  { %v4504_v62 = vor.u32 %v5741_v60, %v4501_v61  ;;  %v4773_v60 = vld [vmem:[%s8938_s3 + $0x490] sm:$0xf0] }
  0xd9   :  { %2705 = vmatpush.bf16.msra.mxu0 %v4232_v10  ;;  %v4629_v10 = vld [vmem:[%s8938_s3 + $0x370] sm:$0xf0] }
  0xda   :  { %2740 = vmatpush.bf16.msra.mxu3 %v4680_v52  ;;  %2729 = vmatpush.bf16.msra.mxu2 %v4520_v55  ;;  %v4632_v11 = vor.u32 %v5773_v9, %v4629_v10  ;;  %v4952_v52 = vor.u32 %v5853_v39, %v4949_v45  ;;  %v5849_v55 = vld [vmem:[%s8938_s3 + $0x5c4] sm:$0xf]  ;;  %v4901_v10 = vld [vmem:[%s8938_s3 + $0x590] sm:$0xf0] }
  0xdb   :  { %2718 = vmatpush.bf16.msra.mxu1 %v4360_v17  ;;  %v4472_v17 = vor.u32 %v5733_v13, %v4469_v14  ;;  %v5841_v9 = vld [vmem:[%s8938_s3 + $0x584] sm:$0xf]  ;;  %v169_v14 = vperm.slane %v7039_v41, 6  ;;  %v4853_v39 = vld [vmem:[%s8938_s3 + $0x530] sm:$0xf0] }
  0xdc   :  { %v4904_v13 = vor.u32 %v5841_v9, %v4901_v10 }
  0xdd   :  { %2706 = vmatpush.bf16.msra.mxu0 %v4216_v28  ;;  %v4456_v28 = vor.u32 %v5729_v25, %v4453_v26  ;;  %v5833_v25 = vld [vmem:[%s8938_s3 + $0x544] sm:$0xf]  ;;  %v4869_v26 = vld [vmem:[%s8938_s3 + $0x550] sm:$0xf0] }
  0xde   :  { %2741 = vmatpush.bf16.msra.mxu3 %v4664_v59  ;;  %2730 = vmatpush.bf16.msra.mxu2 %v4504_v62  ;;  %v5809_v59 = vld [vmem:[%s8938_s3 + $0x484] sm:$0xf]  ;;  %v4936_v62 = vor.u32 %v5849_v55, %v4933_v56  ;;  %v4837_v56 = vld [vmem:[%s8938_s3 + $0x510] sm:$0xf0] }
  0xdf   :  { %2719 = vmatpush.bf16.msra.mxu1 %v4344_v36  ;;  %v4597_v36 = vld [vmem:[%s8938_s3 + $0x330] sm:$0xf0]  ;;  %v4776_v63 = vor.u32 %v5809_v59, %v4773_v60 }
  0xe0   :  { %v4600_v4 = vor.u32 %v5765_v35, %v4597_v36  ;;  %v5696_v35 = vld [vmem:[%s8938_s3 + $0xf4] sm:$0xf0]  ;;  %v170_v36 = vperm.slane %v7039_v41, 7  ;;  %v5205_v59 = vld [vmem:[%s8938_s3 + $0x7f0] sm:$0xf0] }
  0xe1   :  { %2707 = vmatpush.bf16.msra.mxu0 %v4200_v46  ;;  %v939_v12 = vpop.f32.mrf.mxu0  ;;  %v5761_v46 = vld [vmem:[%s8938_s3 + $0x304] sm:$0xf] }
  0xe2   :  { %2742 = vmatpush.bf16.msra.mxu3 %v4648_v2  ;;  %2731 = vmatpush.bf16.msra.mxu2 %v4488_v7  ;;  %v940_v15 = vadd.f32 %v939_v12, %v167_v6  ;;  %v4584_v50 = vor.u32 %v5761_v46, %v4581_v47  ;;  %v4917_v2 = vld [vmem:[%s8938_s3 + $0x5b0] sm:$0xf0]  ;;  %v4760_v7 = vor.u32 %v5805_v3, %v4757_v5  ;;  %v4299_v47 = vld [vmem:[%s8938_s3 + $0xc8] sm:$0xf] }
  0xe3   :  { %2720 = vmatpush.bf16.msra.mxu1 %v4328_v49  ;;  %v952_v16 = vpop.f32.mrf.mxu1  ;;  %v4789_v49 = vld [vmem:[%s8938_s3 + $0x4b0] sm:$0xf0]  ;;  %v4920_v6 = vor.u32 %v5845_v0, %v4917_v2  ;;  %v5728_v0 = vld [vmem:[%s8938_s3 + $0x1f4] sm:$0xf0]  ;;  %v5877_v2 = vld [vmem:[%s8938_s3 + $0x6a4] sm:$0xf] }
  0xe4   :  { %v953_v20 = vadd.f32 %v952_v16, %v940_v15  ;;  %v4792_v54 = vor.u32 %v5813_v48, %v4789_v49  ;;  %v4741_v12 = vld [vmem:[%s8938_s3 + $0x450] sm:$0xf0]  ;;  %v5837_v16 = vld [vmem:[%s8938_s3 + $0x564] sm:$0xf]  ;;  %v5692_v48 = vld [vmem:[%s8938_s3 + $0xd4] sm:$0xf0] }
  0xe5   :  { %v5061_v46 = vld [vmem:[%s8938_s3 + $0x6d0] sm:$0xf0]  ;;  %v4283_v5 = vld [vmem:[%s8938_s3 + $0xa8] sm:$0xf] }
  0xe6   :  { %2743 = vmatpush.bf16.msra.mxu3 %v4632_v11  ;;  %2732 = vmatpush.bf16.msra.mxu2 %v4472_v17  ;;  %v1038_v27 = vmax.f32 %v953_v20, 0.0  ;;  %v5801_v11 = vld [vmem:[%s8938_s3 + $0x444] sm:$0xf]  ;;  %v4885_v17 = vld [vmem:[%s8938_s3 + $0x570] sm:$0xf0] }
  0xe7   :  { %v965_v32 = vpop.f32.mrf.mxu2  ;;  %v4744_v15 = vor.u32 %v5801_v11, %v4741_v12  ;;  %v4888_v21 = vor.u32 %v5837_v16, %v4885_v17  ;;  %v5045_v3 = vld [vmem:[%s8938_s3 + $0x6b0] sm:$0xf0]  ;;  %v5913_v12 = vld [vmem:[%s8938_s3 + $0x7c4] sm:$0xf]  ;;  %v4427_v17 = vld [vmem:[%s8938_s3 + $0x1c8] sm:$0xf] }
  0xe8   :  { %v7440_v31 = vpack.c.bf16 %v1038_v27, %v1038_v27  ;;  %v966_v1 = vadd.f32 %v965_v32, %v168_v24  ;;  %v4728_v24 = vor.u32 %v5797_v18, %v4725_v19  ;;  %v5793_v27 = vld [vmem:[%s8938_s3 + $0x404] sm:$0xf]  ;;  %v5077_v32 = vld [vmem:[%s8938_s3 + $0x6f0] sm:$0xf0]  ;;  %v5724_v18 = vld [vmem:[%s8938_s3 + $0x1d4] sm:$0xf0] }
  0xe9   :  { %v978_v37 = vpop.f32.mrf.mxu3  ;;  %v941_v38 = vpop.f32.mrf.mxu0  ;;  %v5873_v19 = vld [vmem:[%s8938_s3 + $0x684] sm:$0xf] }
  0xea   :  { %2744 = vmatpush.bf16.msra.mxu3 %v4616_v23  ;;  %2733 = vmatpush.bf16.msra.mxu2 %v4456_v28  ;;  %v979_v43 = vadd.f32 %v978_v37, %v966_v1  ;;  %v4709_v28 = vld [vmem:[%s8938_s3 + $0x410] sm:$0xf0]  ;;  %v4872_v1 = vor.u32 %v5833_v25, %v4869_v26  ;;  %v4428_v26 = vor.u32 %v5724_v18, %v4427_v17  ;;  %v4827_v17 = vld [vmem:[%s8938_s3 + $0x4e8] sm:$0xf]  ;;  %v5824_v18 = vld [vmem:[%s8938_s3 + $0x4f4] sm:$0xf0] }
  0xeb   :  { %2656 = vmatmul.bf16.vlgmr.msrb.gmra.mxu0 %v7440_v31  ;;  %v954_v42 = vpop.f32.mrf.mxu1  ;;  %v4712_v38 = vor.u32 %v5793_v27, %v4709_v28  ;;  %v5909_v27 = vld [vmem:[%s8938_s3 + $0x7a4] sm:$0xf] }
  0xec   :  { %2752 = vmatpush.bf16.msrb.mxu0 %v4824_v29  ;;  %v1039_v51 = vmax.f32 %v979_v43, 0.0  ;;  %v5885_v29 = vld [vmem:[%s8938_s3 + $0x6e4] sm:$0xf]  ;;  %v4316_v43 = vor.u32 %v5696_v35, %v4315_v34  ;;  %v5720_v34 = vld [vmem:[%s8938_s3 + $0x1b4] sm:$0xf0] }
  0xed   :  { %v5080_v42 = vor.u32 %v5885_v29, %v5077_v32  ;;  %v4411_v32 = vld [vmem:[%s8938_s3 + $0x1a8] sm:$0xf] }
  0xee   :  { %2745 = vmatpush.bf16.msra.mxu3 %v4600_v4  ;;  %v7470_v53 = vpack.c.bf16 %v1039_v51, %v1039_v51  ;;  %v5829_v4 = vld [vmem:[%s8938_s3 + $0x524] sm:$0xf]  ;;  %v4251_v35 = vld [vmem:[%s8938_s3 + $0x68] sm:$0xf] }
  0xef   :  { %v967_v58 = vpop.f32.mrf.mxu2 }
  0xf0   :  { %2753 = vmatpush.bf16.msrb.mxu0 %v4808_v44  ;;  %2669 = vmatmul.bf16.vlgmr.msrb.gmra.mxu1 %v7470_v53  ;;  %v5881_v44 = vld [vmem:[%s8938_s3 + $0x6c4] sm:$0xf] }
  0xf1   :  { %v980_v61 = vpop.f32.mrf.mxu3  ;;  %2765 = vmatpush.bf16.msrb.mxu1 %v4952_v52  ;;  %v4856_v52 = vor.u32 %v5829_v4, %v4853_v39  ;;  %v5917_v58 = vld [vmem:[%s8938_s3 + $0x7e4] sm:$0xf]  ;;  %v4412_v4 = vor.u32 %v5720_v34, %v4411_v32  ;;  %v4555_v32 = vld [vmem:[%s8938_s3 + $0x2c8] sm:$0xf] }
  0xf2   :  { %2746 = vmatpush.bf16.msra.mxu3 %v4584_v50  ;;  %v5064_v61 = vor.u32 %v5881_v44, %v5061_v46  ;;  %v5208_v10 = vor.u32 %v5917_v58, %v5205_v59  ;;  %v5905_v39 = vld [vmem:[%s8938_s3 + $0x784] sm:$0xf]  ;;  %v4395_v44 = vld [vmem:[%s8938_s3 + $0x188] sm:$0xf]  ;;  %v5712_v59 = vld [vmem:[%s8938_s3 + $0x174] sm:$0xf0] }
  0xf3   :  { %v4379_v58 = vld [vmem:[%s8938_s3 + $0x168] sm:$0xf] }
  0xf4   :  { %2754 = vmatpush.bf16.msrb.mxu0 %v4792_v54  ;;  %v5825_v54 = vld [vmem:[%s8938_s3 + $0x504] sm:$0xf]  ;;  %v4811_v34 = vld [vmem:[%s8938_s3 + $0x4c8] sm:$0xf] }
  0xf5   :  { %2766 = vmatpush.bf16.msrb.mxu1 %v4936_v62  ;;  %v4300_v62 = vor.u32 %v5692_v48, %v4299_v47  ;;  %v4840_v9 = vor.u32 %v5825_v54, %v4837_v56  ;;  %v4235_v47 = vld [vmem:[%s8938_s3 + $0x48] sm:$0xf]  ;;  %v5676_v48 = vld [vmem:[%s8938_s3 + $0x54] sm:$0xf0]  ;;  %v5901_v54 = vld [vmem:[%s8938_s3 + $0x764] sm:$0xf] }
  0xf6   :  { %v5141_v56 = vld [vmem:[%s8938_s3 + $0x770] sm:$0xf0] }
  0xf8   :  { %2755 = vmatpush.bf16.msrb.mxu0 %v4776_v63  ;;  %v4443_v63 = vld [vmem:[%s8938_s3 + $0x1e8] sm:$0xf] }
  0xf9   :  { %2767 = vmatpush.bf16.msrb.mxu1 %v4920_v6  ;;  %v5688_v6 = vld [vmem:[%s8938_s3 + $0xb4] sm:$0xf0]  ;;  %v4444_v11 = vor.u32 %v5728_v0, %v4443_v63  ;;  %v5861_v63 = vld [vmem:[%s8938_s3 + $0x624] sm:$0xf]  ;;  %v4981_v0 = vld [vmem:[%s8938_s3 + $0x630] sm:$0xf0] }
  0xfa   :  { %v4284_v16 = vor.u32 %v5688_v6, %v4283_v5  ;;  %v5897_v5 = vld [vmem:[%s8938_s3 + $0x744] sm:$0xf] }
  0xfb   :  { %2708 = vmatmul.bf16.vlgmr.msra.gmra.mxu0 %v7133_v33 }
  0xfc   :  { %2756 = vmatpush.bf16.msrb.mxu0 %v4760_v7 }
  0xfd   :  { %2768 = vmatpush.bf16.msrb.mxu1 %v4904_v13  ;;  %v5189_v13 = vld [vmem:[%s8938_s3 + $0x7d0] sm:$0xf0] }
  0xfe   :  { %v5192_v25 = vor.u32 %v5913_v12, %v5189_v13  ;;  %v5857_v12 = vld [vmem:[%s8938_s3 + $0x604] sm:$0xf]  ;;  %v4203_v13 = vld [vmem:[%s8938_s3 + $0x8] sm:$0xf] }
 0x100   :  { %2757 = vmatpush.bf16.msrb.mxu0 %v4744_v15  ;;  %2721 = vmatmul.bf16.vlgmr.msra.gmra.mxu1 %v7178_v57  ;;  %v5048_v15 = vor.u32 %v5877_v2, %v5045_v3  ;;  %v5144_v2 = vor.u32 %v5901_v54, %v5141_v56  ;;  %v4380_v3 = vor.u32 %v5712_v59, %v4379_v58  ;;  %v4539_v54 = vld [vmem:[%s8938_s3 + $0x2a8] sm:$0xf] }
 0x101   :  { %v991_v20 = vpop.f32.mrf.mxu0  ;;  %2769 = vmatpush.bf16.msrb.mxu1 %v4888_v21  ;;  %v5029_v21 = vld [vmem:[%s8938_s3 + $0x690] sm:$0xf0]  ;;  %v4683_v59 = vld [vmem:[%s8938_s3 + $0x3c8] sm:$0xf] }
 0x102   :  { %v992_v22 = vadd.f32 %v991_v20, %v169_v14  ;;  %v5032_v28 = vor.u32 %v5873_v19, %v5029_v21  ;;  %v4571_v21 = vld [vmem:[%s8938_s3 + $0x2e8] sm:$0xf] }
 0x103   :  { %v1004_v23 = vpop.f32.mrf.mxu1 }
 0x104   :  { %v1005_v30 = vadd.f32 %v1004_v23, %v992_v22  ;;  %2758 = vmatpush.bf16.msrb.mxu0 %v4728_v24  ;;  %v4267_v22 = vld [vmem:[%s8938_s3 + $0x88] sm:$0xf]  ;;  %v5684_v23 = vld [vmem:[%s8938_s3 + $0x94] sm:$0xf0] }
 0x105   :  { %2770 = vmatpush.bf16.msrb.mxu1 %v4872_v1  ;;  %v4268_v29 = vor.u32 %v5684_v23, %v4267_v22  ;;  %v5869_v1 = vld [vmem:[%s8938_s3 + $0x664] sm:$0xf]  ;;  %v5760_v22 = vld [vmem:[%s8938_s3 + $0x2f4] sm:$0xf0] }
 0x106   :  { %v1040_v37 = vmax.f32 %v1005_v30, 0.0  ;;  %v5173_v30 = vld [vmem:[%s8938_s3 + $0x7b0] sm:$0xf0]  ;;  %v5893_v23 = vld [vmem:[%s8938_s3 + $0x724] sm:$0xf] }
 0x107   :  { %v1017_v41 = vpop.f32.mrf.mxu2 }
 0x108   :  { %v7558_v45 = vpack.c.bf16 %v1040_v37, %v1040_v37  ;;  %v1018_v49 = vadd.f32 %v1017_v41, %v170_v36  ;;  %2759 = vmatpush.bf16.msrb.mxu0 %v4712_v38  ;;  %v5680_v36 = vld [vmem:[%s8938_s3 + $0x74] sm:$0xf0]  ;;  %v5013_v37 = vld [vmem:[%s8938_s3 + $0x670] sm:$0xf0]  ;;  %v5176_v38 = vor.u32 %v5909_v27, %v5173_v30  ;;  %v4572_v30 = vor.u32 %v5760_v22, %v4571_v21  ;;  %v4507_v21 = vld [vmem:[%s8938_s3 + $0x268] sm:$0xf] }
 0x109   :  { %v1030_v50 = vpop.f32.mrf.mxu3  ;;  %v993_v51 = vpop.f32.mrf.mxu0  ;;  %2771 = vmatpush.bf16.msrb.mxu1 %v4856_v52  ;;  %v5716_v41 = vld [vmem:[%s8938_s3 + $0x194] sm:$0xf0]  ;;  %v5016_v46 = vor.u32 %v5869_v1, %v5013_v37 }
 0x10a   :  { %2682 = vmatmul.bf16.vlgmr.msrb.gmra.mxu2 %v7558_v45  ;;  %v1031_v60 = vadd.f32 %v1030_v50, %v1018_v49  ;;  %v5865_v49 = vld [vmem:[%s8938_s3 + $0x644] sm:$0xf]  ;;  %v4997_v50 = vld [vmem:[%s8938_s3 + $0x650] sm:$0xf0]  ;;  %v4396_v52 = vor.u32 %v5716_v41, %v4395_v44  ;;  %v5704_v27 = vld [vmem:[%s8938_s3 + $0x134] sm:$0xf0] }
 0x10b   :  { %v1006_v55 = vpop.f32.mrf.mxu1  ;;  %2778 = vmatpush.bf16.msrb.mxu2 %v5080_v42  ;;  %2760 = vmatmul.bf16.vlgmr.msrb.gmra.mxu0 %v7440_v31  ;;  %v4252_v42 = vor.u32 %v5680_v36, %v4251_v35  ;;  %v5820_v35 = vld [vmem:[%s8938_s3 + $0x4d4] sm:$0xf0] }
 0x10c   :  { %2804 = vmatpush.bf16.msra.mxu0 %v4316_v43  ;;  %v1041_v7 = vmax.f32 %v1031_v60, 0.0  ;;  %v5157_v43 = vld [vmem:[%s8938_s3 + $0x790] sm:$0xf0]  ;;  %v4236_v55 = vor.u32 %v5676_v48, %v4235_v47  ;;  %v5000_v60 = vor.u32 %v5865_v49, %v4997_v50  ;;  %v5756_v37 = vld [vmem:[%s8938_s3 + $0x2d4] sm:$0xf0]  ;;  %v4812_v44 = vor.u32 %v5820_v35, %v4811_v34 }
 0x10d   :  { %2772 = vmatpush.bf16.msrb.mxu1 %v4840_v9  ;;  %v5160_v51 = vor.u32 %v5905_v39, %v5157_v43  ;;  %v4363_v9 = vld [vmem:[%s8938_s3 + $0x148] sm:$0xf]  ;;  %v5792_v41 = vld [vmem:[%s8938_s3 + $0x3f4] sm:$0xf0]  ;;  %v4556_v48 = vor.u32 %v5756_v37, %v4555_v32 }
 0x10e   :  { %v7607_v14 = vpack.c.bf16 %v1041_v7, %v1041_v7  ;;  %v5125_v7 = vld [vmem:[%s8938_s3 + $0x750] sm:$0xf0]  ;;  %v4331_v39 = vld [vmem:[%s8938_s3 + $0x108] sm:$0xf]  ;;  %v5856_v47 = vld [vmem:[%s8938_s3 + $0x5f4] sm:$0xf0] }
 0x10f   :  { %2779 = vmatpush.bf16.msrb.mxu2 %v5064_v61  ;;  %v1019_v20 = vpop.f32.mrf.mxu2  ;;  %v4219_v61 = vld [vmem:[%s8938_s3 + $0x28] sm:$0xf]  ;;  %v5128_v19 = vor.u32 %v5897_v5, %v5125_v7  ;;  %v5816_v50 = vld [vmem:[%s8938_s3 + $0x4b4] sm:$0xf0]  ;;  %v1306_v5 = vld [vmem:[%s8940_s4] sm:$0xf] }
 0x110   :  { %2805 = vmatpush.bf16.msra.mxu0 %v4300_v62  ;;  %2695 = vmatmul.bf16.vlgmr.msrb.gmra.mxu3 %v7607_v14  ;;  %v5672_v62 = vld [vmem:[%s8938_s3 + $0x34] sm:$0xf0]  ;;  %v4699_v43 = vld [vmem:[%s8938_s3 + $0x3e8] sm:$0xf] }
 0x111   :  { %v1032_v24 = vpop.f32.mrf.mxu3  ;;  %2791 = vmatpush.bf16.msrb.mxu3 %v5208_v10  ;;  %2817 = vmatpush.bf16.msra.mxu1 %v4444_v11  ;;  %v4220_v6 = vor.u32 %v5672_v62, %v4219_v61  ;;  %v5708_v10 = vld [vmem:[%s8938_s3 + $0x154] sm:$0xf0]  ;;  %v4984_v11 = vor.u32 %v5861_v63, %v4981_v0  ;;  %v4795_v49 = vld [vmem:[%s8938_s3 + $0x4a8] sm:$0xf]  ;;  %v4700_v56 = vor.u32 %v5792_v41, %v4699_v43 }
 0x112   :  { %2773 = vmatmul.bf16.vlgmr.msrb.gmra.mxu1 %v7470_v53  ;;  %v4364_v20 = vor.u32 %v5708_v10, %v4363_v9  ;;  %v5788_v61 = vld [vmem:[%s8938_s3 + $0x3d4] sm:$0xf0]  ;;  %v4939_v62 = vld [vmem:[%s8938_s3 + $0x5c8] sm:$0xf] }
 0x113   :  { %2780 = vmatpush.bf16.msrb.mxu2 %v5048_v15  ;;  %v5668_v15 = vld [vmem:[%s8938_s3 + $0x14] sm:$0xf0]  ;;  %v4684_v9 = vor.u32 %v5788_v61, %v4683_v59  ;;  %v4747_v35 = vld [vmem:[%s8938_s3 + $0x448] sm:$0xf] }
 0x114   :  { %2806 = vmatpush.bf16.msra.mxu0 %v4284_v16  ;;  %v4965_v16 = vld [vmem:[%s8938_s3 + $0x610] sm:$0xf0]  ;;  %v4204_v24 = vor.u32 %v5668_v15, %v4203_v13  ;;  %v5852_v63 = vld [vmem:[%s8938_s3 + $0x5d4] sm:$0xf0]  ;;  %v4923_v15 = vld [vmem:[%s8938_s3 + $0x5a8] sm:$0xf] }
 0x115   :  { %2792 = vmatpush.bf16.msrb.mxu3 %v5192_v25  ;;  %2818 = vmatpush.bf16.msra.mxu1 %v4428_v26  ;;  %v5109_v25 = vld [vmem:[%s8938_s3 + $0x730] sm:$0xf0]  ;;  %v4347_v26 = vld [vmem:[%s8938_s3 + $0x128] sm:$0xf]  ;;  %v5748_v7 = vld [vmem:[%s8938_s3 + $0x294] sm:$0xf0]  ;;  %v4940_v10 = vor.u32 %v5852_v63, %v4939_v62 }
 0x116   :  { %v5112_v36 = vor.u32 %v5893_v23, %v5109_v25  ;;  %v4348_v1 = vor.u32 %v5704_v27, %v4347_v26  ;;  %v5744_v22 = vld [vmem:[%s8938_s3 + $0x274] sm:$0xf0]  ;;  %v4651_v26 = vld [vmem:[%s8938_s3 + $0x388] sm:$0xf] }
 0x117   :  { %2781 = vmatpush.bf16.msrb.mxu2 %v5032_v28  ;;  %v4968_v28 = vor.u32 %v5857_v12, %v4965_v16  ;;  %v5784_v12 = vld [vmem:[%s8938_s3 + $0x3b4] sm:$0xf0]  ;;  %v4508_v34 = vor.u32 %v5744_v22, %v4507_v21  ;;  %v4891_v41 = vld [vmem:[%s8938_s3 + $0x568] sm:$0xf] }
 0x118   :  { %2807 = vmatpush.bf16.msra.mxu0 %v4268_v29  ;;  %v4828_v29 = vor.u32 %v5824_v18, %v4827_v17  ;;  %v5848_v16 = vld [vmem:[%s8938_s3 + $0x5b4] sm:$0xf0]  ;;  %v1308_v17 = vperm.slane %v1306_v5, 0  ;;  %v4875_v61 = vld [vmem:[%s8938_s3 + $0x548] sm:$0xf] }
 0x119   :  { %2793 = vmatpush.bf16.msrb.mxu3 %v5176_v38  ;;  %2819 = vmatpush.bf16.msra.mxu1 %v4412_v4  ;;  %v5889_v38 = vld [vmem:[%s8938_s3 + $0x704] sm:$0xf]  ;;  %v5093_v4 = vld [vmem:[%s8938_s3 + $0x710] sm:$0xf0]  ;;  %v4924_v25 = vor.u32 %v5848_v16, %v4923_v15  ;;  %v5740_v37 = vld [vmem:[%s8938_s3 + $0x254] sm:$0xf0] }
 0x11a   :  { %2734 = vmatmul.bf16.vlgmr.msra.gmra.mxu2 %v7306_v8  ;;  %v5836_v62 = vld [vmem:[%s8938_s3 + $0x554] sm:$0xf0] }
 0x11b   :  { %2782 = vmatpush.bf16.msrb.mxu2 %v5016_v46  ;;  %v4955_v46 = vld [vmem:[%s8938_s3 + $0x5e8] sm:$0xf]  ;;  %v5732_v5 = vld [vmem:[%s8938_s3 + $0x214] sm:$0xf0] }
 0x11c   :  { %2808 = vmatpush.bf16.msra.mxu0 %v4252_v42  ;;  %v5700_v42 = vld [vmem:[%s8938_s3 + $0x114] sm:$0xf0]  ;;  %v4956_v58 = vor.u32 %v5856_v47, %v4955_v46 }
 0x11d   :  { %2794 = vmatpush.bf16.msrb.mxu3 %v5160_v51  ;;  %2820 = vmatpush.bf16.msra.mxu1 %v4396_v52  ;;  %v5096_v51 = vor.u32 %v5889_v38, %v5093_v4  ;;  %v4332_v52 = vor.u32 %v5700_v42, %v4331_v39  ;;  %v4635_v39 = vld [vmem:[%s8938_s3 + $0x368] sm:$0xf]  ;;  %v5840_v46 = vld [vmem:[%s8938_s3 + $0x574] sm:$0xf0] }
 0x11f   :  { %2783 = vmatpush.bf16.msrb.mxu2 %v5000_v60  ;;  %v4796_v60 = vor.u32 %v5816_v50, %v4795_v49  ;;  %v4731_v49 = vld [vmem:[%s8938_s3 + $0x428] sm:$0xf]  ;;  %v5800_v50 = vld [vmem:[%s8938_s3 + $0x434] sm:$0xf0] }
 0x120   :  { %2809 = vmatpush.bf16.msra.mxu0 %v4236_v55  ;;  %2747 = vmatmul.bf16.vlgmr.msra.gmra.mxu3 %v7360_v40  ;;  %v5752_v55 = vld [vmem:[%s8938_s3 + $0x2b4] sm:$0xf0]  ;;  %v4732_v59 = vor.u32 %v5800_v50, %v4731_v49  ;;  %v5195_v50 = vld [vmem:[%s8938_s3 + $0x7c8] sm:$0xf] }
 0x121   :  { %2795 = vmatpush.bf16.msrb.mxu3 %v5144_v2  ;;  %2821 = vmatpush.bf16.msra.mxu1 %v4380_v3  ;;  %v4540_v0 = vor.u32 %v5752_v55, %v4539_v54  ;;  %v4779_v2 = vld [vmem:[%s8938_s3 + $0x488] sm:$0xf]  ;;  %v5812_v3 = vld [vmem:[%s8938_s3 + $0x494] sm:$0xf0] }
 0x122   :  { %v4780_v13 = vor.u32 %v5812_v3, %v4779_v2  ;;  %v4715_v2 = vld [vmem:[%s8938_s3 + $0x408] sm:$0xf]  ;;  %v5796_v3 = vld [vmem:[%s8938_s3 + $0x414] sm:$0xf0] }
 0x123   :  { %2784 = vmatpush.bf16.msrb.mxu2 %v4984_v11  ;;  %v4667_v11 = vld [vmem:[%s8938_s3 + $0x3a8] sm:$0xf]  ;;  %v4716_v16 = vor.u32 %v5796_v3, %v4715_v2  ;;  %v5880_v49 = vld [vmem:[%s8938_s3 + $0x6b4] sm:$0xf0] }
 0x124   :  { %2810 = vmatpush.bf16.msra.mxu0 %v4220_v6  ;;  %v4523_v6 = vld [vmem:[%s8938_s3 + $0x288] sm:$0xf]  ;;  %v5912_v3 = vld [vmem:[%s8938_s3 + $0x7b4] sm:$0xf0] }
 0x125   :  { %2796 = vmatpush.bf16.msrb.mxu3 %v5128_v19  ;;  %2822 = vmatpush.bf16.msra.mxu1 %v4364_v20  ;;  %v4524_v18 = vor.u32 %v5748_v7, %v4523_v6  ;;  %v4763_v19 = vld [vmem:[%s8938_s3 + $0x468] sm:$0xf]  ;;  %v5808_v20 = vld [vmem:[%s8938_s3 + $0x474] sm:$0xf0]  ;;  %v5694_v6 = vld [vmem:[%s8938_s3 + $0xec] sm:$0xf] }
 0x126   :  { %v4764_v27 = vor.u32 %v5808_v20, %v4763_v19  ;;  %v4317_v7 = vld [vmem:[%s8938_s3 + $0xf8] sm:$0xf0]  ;;  %v5832_v19 = vld [vmem:[%s8938_s3 + $0x534] sm:$0xf0] }
 0x127   :  { %2785 = vmatpush.bf16.msrb.mxu2 %v4968_v28  ;;  %v5780_v28 = vld [vmem:[%s8938_s3 + $0x394] sm:$0xf0]  ;;  %v4320_v21 = vor.u32 %v5694_v6, %v4317_v7  ;;  %v4413_v6 = vld [vmem:[%s8938_s3 + $0x1b8] sm:$0xf0]  ;;  %v5678_v7 = vld [vmem:[%s8938_s3 + $0x6c] sm:$0xf] }
 0x128   :  { %2811 = vmatpush.bf16.msra.mxu0 %v4204_v24  ;;  %v4668_v24 = vor.u32 %v5784_v12, %v4667_v11  ;;  %v4652_v38 = vor.u32 %v5780_v28, %v4651_v26  ;;  %v5083_v11 = vld [vmem:[%s8938_s3 + $0x6e8] sm:$0xf]  ;;  %v5888_v12 = vld [vmem:[%s8938_s3 + $0x6f4] sm:$0xf0] }
 0x129   :  { %2797 = vmatpush.bf16.msrb.mxu3 %v5112_v36  ;;  %2823 = vmatpush.bf16.msra.mxu1 %v4348_v1  ;;  %v2605_v23 = vpop.f32.mrf.mxu0  ;;  %v5804_v36 = vld [vmem:[%s8938_s3 + $0x454] sm:$0xf0]  ;;  %v4491_v1 = vld [vmem:[%s8938_s3 + $0x248] sm:$0xf]  ;;  %v5084_v22 = vor.u32 %v5888_v12, %v5083_v11 }
 0x12a   :  { %2786 = vmatmul.bf16.vlgmr.msrb.gmra.mxu2 %v7558_v45  ;;  %v2606_v32 = vadd.f32 %v2605_v23, %v1308_v17  ;;  %v4748_v43 = vor.u32 %v5804_v36, %v4747_v35  ;;  %v5768_v17 = vld [vmem:[%s8938_s3 + $0x334] sm:$0xf0]  ;;  %v5067_v23 = vld [vmem:[%s8938_s3 + $0x6c8] sm:$0xf] }
 0x12b   :  { %2830 = vmatpush.bf16.msra.mxu2 %v4572_v30  ;;  %2812 = vmatmul.bf16.vlgmr.msra.gmra.mxu0 %v7133_v33  ;;  %v5844_v30 = vld [vmem:[%s8938_s3 + $0x594] sm:$0xf0]  ;;  %v5211_v35 = vld [vmem:[%s8938_s3 + $0x7e8] sm:$0xf] }
 0x12c   :  { %2856 = vmatpush.bf16.msrb.mxu0 %v4828_v29  ;;  %v4907_v29 = vld [vmem:[%s8938_s3 + $0x588] sm:$0xf]  ;;  %v5884_v28 = vld [vmem:[%s8938_s3 + $0x6d4] sm:$0xf0] }
 0x12d   :  { %2798 = vmatpush.bf16.msrb.mxu3 %v5096_v51  ;;  %2824 = vmatpush.bf16.msra.mxu1 %v4332_v52  ;;  %v4908_v4 = vor.u32 %v5844_v30, %v4907_v29  ;;  %v4475_v51 = vld [vmem:[%s8938_s3 + $0x228] sm:$0xf]  ;;  %v5736_v52 = vld [vmem:[%s8938_s3 + $0x234] sm:$0xf0] }
 0x12e   :  { %v4476_v63 = vor.u32 %v5736_v52, %v4475_v51  ;;  %v4587_v29 = vld [vmem:[%s8938_s3 + $0x308] sm:$0xf]  ;;  %v5764_v30 = vld [vmem:[%s8938_s3 + $0x314] sm:$0xf0] }
 0x12f   :  { %2831 = vmatpush.bf16.msra.mxu2 %v4556_v48  ;;  %v4492_v48 = vor.u32 %v5740_v37, %v4491_v1  ;;  %v5920_v1 = vld [vmem:[%s8938_s3 + $0x7f4] sm:$0xf0]  ;;  %v5726_v37 = vld [vmem:[%s8938_s3 + $0x1ec] sm:$0xf] }
 0x130   :  { %2857 = vmatpush.bf16.msrb.mxu0 %v4812_v44  ;;  %2825 = vmatmul.bf16.vlgmr.msra.gmra.mxu1 %v7178_v57  ;;  %v5776_v44 = vld [vmem:[%s8938_s3 + $0x374] sm:$0xf0] }
 0x131   :  { %2843 = vmatpush.bf16.msra.mxu3 %v4700_v56  ;;  %2869 = vmatpush.bf16.msrb.mxu1 %v4956_v58  ;;  %v2607_v54 = vpop.f32.mrf.mxu0  ;;  %v4636_v55 = vor.u32 %v5776_v44, %v4635_v39  ;;  %v4892_v56 = vor.u32 %v5840_v46, %v4891_v41  ;;  %v4619_v58 = vld [vmem:[%s8938_s3 + $0x348] sm:$0xf]  ;;  %v5686_v39 = vld [vmem:[%s8938_s3 + $0xac] sm:$0xf]  ;;  %v5212_v41 = vor.u32 %v5920_v1, %v5211_v35  ;;  %v5916_v52 = vld [vmem:[%s8938_s3 + $0x7d4] sm:$0xf0] }
 0x132   :  { %2799 = vmatmul.bf16.vlgmr.msrb.gmra.mxu3 %v7607_v14  ;;  %v2618_v42 = vpop.f32.mrf.mxu1  ;;  %v5722_v54 = vld [vmem:[%s8938_s3 + $0x1cc] sm:$0xf]  ;;  %v4381_v35 = vld [vmem:[%s8938_s3 + $0x178] sm:$0xf0] }
 0x133   :  { %2832 = vmatpush.bf16.msra.mxu2 %v4540_v0  ;;  %v7890_v47 = vadd.f32 %v2618_v42, %v2606_v32  ;;  %v4459_v0 = vld [vmem:[%s8938_s3 + $0x208] sm:$0xf]  ;;  %v4285_v42 = vld [vmem:[%s8938_s3 + $0xb8] sm:$0xf0] }
 0x134   :  { %2858 = vmatpush.bf16.msrb.mxu0 %v4796_v60  ;;  %v5772_v60 = vld [vmem:[%s8938_s3 + $0x354] sm:$0xf0]  ;;  %v4460_v20 = vor.u32 %v5732_v5, %v4459_v0  ;;  %v4843_v32 = vld [vmem:[%s8938_s3 + $0x508] sm:$0xf]  ;;  %v4288_v51 = vor.u32 %v5686_v39, %v4285_v42  ;;  %v5718_v5 = vld [vmem:[%s8938_s3 + $0x1ac] sm:$0xf] }
 0x135   :  { %2844 = vmatpush.bf16.msra.mxu3 %v4684_v9  ;;  %2870 = vmatpush.bf16.msrb.mxu1 %v4940_v10  ;;  %v4620_v9 = vor.u32 %v5772_v60, %v4619_v58  ;;  %v4876_v10 = vor.u32 %v5836_v62, %v4875_v61  ;;  %v4269_v58 = vld [vmem:[%s8938_s3 + $0x98] sm:$0xf0]  ;;  %v5196_v60 = vor.u32 %v5916_v52, %v5195_v50  ;;  %v5035_v62 = vld [vmem:[%s8938_s3 + $0x688] sm:$0xf]  ;;  %v5864_v42 = vld [vmem:[%s8938_s3 + $0x634] sm:$0xf0] }
 0x136   :  { %v5179_v0 = vld [vmem:[%s8938_s3 + $0x7a8] sm:$0xf]  ;;  %v4416_v12 = vor.u32 %v5718_v5, %v4413_v6  ;;  %v4221_v1 = vld [vmem:[%s8938_s3 + $0x38] sm:$0xf0]  ;;  %v5666_v50 = vld [vmem:[%s8938_s3 + $0xc] sm:$0xf] }
 0x137   :  { %2833 = vmatpush.bf16.msra.mxu2 %v4524_v18  ;;  %v4859_v18 = vld [vmem:[%s8938_s3 + $0x528] sm:$0xf]  ;;  %v5180_v11 = vor.u32 %v5912_v3, %v5179_v0  ;;  %v4573_v0 = vld [vmem:[%s8938_s3 + $0x2f8] sm:$0xf0]  ;;  %v5896_v3 = vld [vmem:[%s8938_s3 + $0x734] sm:$0xf0] }
 0x138   :  { %2859 = vmatpush.bf16.msrb.mxu0 %v4780_v13  ;;  %v4603_v13 = vld [vmem:[%s8938_s3 + $0x328] sm:$0xf]  ;;  %v5702_v6 = vld [vmem:[%s8938_s3 + $0x12c] sm:$0xf] }
 0x139   :  { %2845 = vmatpush.bf16.msra.mxu3 %v4668_v24  ;;  %2871 = vmatpush.bf16.msrb.mxu1 %v4924_v25  ;;  %v5690_v24 = vld [vmem:[%s8938_s3 + $0xcc] sm:$0xf]  ;;  %v4301_v25 = vld [vmem:[%s8938_s3 + $0xd8] sm:$0xf0]  ;;  %v4604_v26 = vor.u32 %v5768_v17, %v4603_v13  ;;  %v5019_v13 = vld [vmem:[%s8938_s3 + $0x668] sm:$0xf] }
 0x13a   :  { %v2620_v15 = vpop.f32.mrf.mxu1  ;;  %v4304_v36 = vor.u32 %v5690_v24, %v4301_v25  ;;  %v4987_v39 = vld [vmem:[%s8938_s3 + $0x628] sm:$0xf] }
 0x13b   :  { %2834 = vmatpush.bf16.msra.mxu2 %v4508_v34  ;;  %v5828_v34 = vld [vmem:[%s8938_s3 + $0x514] sm:$0xf0] }
 0x13c   :  { %2860 = vmatpush.bf16.msrb.mxu0 %v4764_v27  ;;  %v4860_v27 = vor.u32 %v5832_v19, %v4859_v18  ;;  %v4844_v44 = vor.u32 %v5828_v34, %v4843_v32  ;;  %v5872_v15 = vld [vmem:[%s8938_s3 + $0x674] sm:$0xf0]  ;;  %v5714_v19 = vld [vmem:[%s8938_s3 + $0x18c] sm:$0xf] }
 0x13d   :  { %2846 = vmatpush.bf16.msra.mxu3 %v4652_v38  ;;  %2872 = vmatpush.bf16.msrb.mxu1 %v4908_v4  ;;  %v4445_v38 = vld [vmem:[%s8938_s3 + $0x1f8] sm:$0xf0]  ;;  %v5068_v4 = vor.u32 %v5884_v28, %v5067_v23  ;;  %v5908_v18 = vld [vmem:[%s8938_s3 + $0x794] sm:$0xf0]  ;;  %v5020_v24 = vor.u32 %v5872_v15, %v5019_v13  ;;  %v5710_v34 = vld [vmem:[%s8938_s3 + $0x16c] sm:$0xf] }
 0x13e   :  { %v4448_v46 = vor.u32 %v5726_v37, %v4445_v38  ;;  %v4237_v23 = vld [vmem:[%s8938_s3 + $0x58] sm:$0xf0]  ;;  %v5868_v28 = vld [vmem:[%s8938_s3 + $0x654] sm:$0xf0]  ;;  %v5754_v15 = vld [vmem:[%s8938_s3 + $0x2cc] sm:$0xf] }
 0x13f   :  { %2835 = vmatpush.bf16.msra.mxu2 %v4492_v48  ;;  %v5051_v48 = vld [vmem:[%s8938_s3 + $0x6a8] sm:$0xf]  ;;  %v5904_v32 = vld [vmem:[%s8938_s3 + $0x774] sm:$0xf0] }
 0x140   :  { %2861 = vmatpush.bf16.msrb.mxu0 %v4748_v43  ;;  %v4588_v43 = vor.u32 %v5764_v30, %v4587_v29  ;;  %v5147_v29 = vld [vmem:[%s8938_s3 + $0x768] sm:$0xf] }
 0x141   :  { %2847 = vmatpush.bf16.msra.mxu3 %v4636_v55  ;;  %2873 = vmatpush.bf16.msrb.mxu1 %v4892_v56  ;;  %v4429_v55 = vld [vmem:[%s8938_s3 + $0x1d8] sm:$0xf0]  ;;  %v5682_v56 = vld [vmem:[%s8938_s3 + $0x8c] sm:$0xf]  ;;  %v5148_v38 = vor.u32 %v5904_v32, %v5147_v29 }
 0x142   :  { %v4432_v61 = vor.u32 %v5722_v54, %v4429_v55  ;;  %v4272_v2 = vor.u32 %v5682_v56, %v4269_v58  ;;  %v4988_v54 = vor.u32 %v5864_v42, %v4987_v39  ;;  %v5822_v55 = vld [vmem:[%s8938_s3 + $0x4ec] sm:$0xf]  ;;  %v4829_v56 = vld [vmem:[%s8938_s3 + $0x4f8] sm:$0xf0] }
 0x143   :  { %2836 = vmatpush.bf16.msra.mxu2 %v4476_v63  ;;  %v5876_v63 = vld [vmem:[%s8938_s3 + $0x694] sm:$0xf0]  ;;  %v4832_v5 = vor.u32 %v5822_v55, %v4829_v56  ;;  %v5814_v29 = vld [vmem:[%s8938_s3 + $0x4ac] sm:$0xf] }
 0x144   :  { %2862 = vmatpush.bf16.msrb.mxu0 %v4732_v59  ;;  %v5052_v59 = vor.u32 %v5880_v49, %v5051_v48  ;;  %v5706_v48 = vld [vmem:[%s8938_s3 + $0x14c] sm:$0xf]  ;;  %v4365_v49 = vld [vmem:[%s8938_s3 + $0x158] sm:$0xf0] }
 0x145   :  { %2848 = vmatpush.bf16.msra.mxu3 %v4620_v9  ;;  %2874 = vmatpush.bf16.msrb.mxu1 %v4876_v10  ;;  %v4253_v9 = vld [vmem:[%s8938_s3 + $0x78] sm:$0xf0]  ;;  %v5036_v10 = vor.u32 %v5876_v63, %v5035_v62  ;;  %v5758_v62 = vld [vmem:[%s8938_s3 + $0x2ec] sm:$0xf] }
 0x146   :  { %v4256_v17 = vor.u32 %v5678_v7, %v4253_v9  ;;  %v4349_v7 = vld [vmem:[%s8938_s3 + $0x138] sm:$0xf0]  ;;  %v5786_v39 = vld [vmem:[%s8938_s3 + $0x3cc] sm:$0xf] }
 0x147   :  { %2837 = vmatpush.bf16.msra.mxu2 %v4460_v20  ;;  %v4397_v20 = vld [vmem:[%s8938_s3 + $0x198] sm:$0xf0]  ;;  %v5850_v42 = vld [vmem:[%s8938_s3 + $0x5cc] sm:$0xf] }
 0x148   :  { %2863 = vmatpush.bf16.msrb.mxu0 %v4716_v16  ;;  %v5163_v16 = vld [vmem:[%s8938_s3 + $0x788] sm:$0xf]  ;;  %v5782_v56 = vld [vmem:[%s8938_s3 + $0x3ac] sm:$0xf] }
 0x149   :  { %2849 = vmatpush.bf16.msra.mxu3 %v4604_v26  ;;  %2875 = vmatpush.bf16.msrb.mxu1 %v4860_v27  ;;  %v5164_v25 = vor.u32 %v5908_v18, %v5163_v16  ;;  %v4400_v26 = vor.u32 %v5714_v19, %v4397_v20  ;;  %v5003_v27 = vld [vmem:[%s8938_s3 + $0x648] sm:$0xf]  ;;  %v4557_v16 = vld [vmem:[%s8938_s3 + $0x2d8] sm:$0xf0]  ;;  %v4352_v18 = vor.u32 %v5702_v6, %v4349_v7  ;;  %v5892_v19 = vld [vmem:[%s8938_s3 + $0x714] sm:$0xf0] }
 0x14a   :  { %2838 = vmatmul.bf16.vlgmr.msra.gmra.mxu2 %v7306_v8  ;;  %v5004_v37 = vor.u32 %v5868_v28, %v5003_v27  ;;  %v5698_v20 = vld [vmem:[%s8938_s3 + $0x10c] sm:$0xf]  ;;  %v4957_v28 = vld [vmem:[%s8938_s3 + $0x5f8] sm:$0xf0]  ;;  %v4560_v32 = vor.u32 %v5754_v15, %v4557_v16 }
 0x14b   :  { %2882 = vmatpush.bf16.msrb.mxu2 %v5084_v22  ;;  %2864 = vmatmul.bf16.vlgmr.msrb.gmra.mxu0 %v7440_v31  ;;  %v5674_v22 = vld [vmem:[%s8938_s3 + $0x4c] sm:$0xf]  ;;  %v4653_v7 = vld [vmem:[%s8938_s3 + $0x398] sm:$0xf0] }
 0x14c   :  { %2908 = vmatpush.bf16.msra.mxu0 %v4320_v21  ;;  %v4240_v30 = vor.u32 %v5674_v22, %v4237_v23  ;;  %v4333_v22 = vld [vmem:[%s8938_s3 + $0x118] sm:$0xf0]  ;;  %v5854_v27 = vld [vmem:[%s8938_s3 + $0x5ec] sm:$0xf] }
 0x14d   :  { %2850 = vmatpush.bf16.msra.mxu3 %v4588_v43  ;;  %2876 = vmatpush.bf16.msrb.mxu1 %v4844_v44  ;;  %v8064_v21 = vpop.f32.mrf.mxu2  ;;  %v5131_v43 = vld [vmem:[%s8938_s3 + $0x748] sm:$0xf] }
 0x14f   :  { %2883 = vmatpush.bf16.msrb.mxu2 %v5068_v4  ;;  %v4384_v4 = vor.u32 %v5710_v34, %v4381_v35  ;;  %v4336_v35 = vor.u32 %v5698_v20, %v4333_v22 }
 0x150   :  { %2909 = vmatpush.bf16.msra.mxu0 %v4304_v36  ;;  %2851 = vmatmul.bf16.vlgmr.msra.gmra.mxu3 %v7360_v40  ;;  %v5670_v36 = vld [vmem:[%s8938_s3 + $0x2c] sm:$0xf] }
 0x151   :  { %2895 = vmatpush.bf16.msrb.mxu3 %v5212_v41  ;;  %2921 = vmatpush.bf16.msra.mxu1 %v4448_v46  ;;  %v4224_v41 = vor.u32 %v5670_v36, %v4221_v1  ;;  %v5900_v46 = vld [vmem:[%s8938_s3 + $0x754] sm:$0xf0]  ;;  %v5750_v1 = vld [vmem:[%s8938_s3 + $0x2ac] sm:$0xf] }
 0x152   :  { %2877 = vmatmul.bf16.vlgmr.msrb.gmra.mxu1 %v7470_v53  ;;  %v5132_v58 = vor.u32 %v5900_v46, %v5131_v43  ;;  %v4941_v43 = vld [vmem:[%s8938_s3 + $0x5d8] sm:$0xf0] }
 0x153   :  { %2884 = vmatpush.bf16.msrb.mxu2 %v5052_v59  ;;  %v8105_v44 = vpop.f32.mrf.mxu3  ;;  %v4368_v59 = vor.u32 %v5706_v48, %v4365_v49  ;;  %v4781_v46 = vld [vmem:[%s8938_s3 + $0x498] sm:$0xf0] }
 0x154   :  { %2910 = vmatpush.bf16.msra.mxu0 %v4288_v51  ;;  %v4205_v51 = vld [vmem:[%s8938_s3 + $0x18] sm:$0xf0] }
 0x155   :  { %2896 = vmatpush.bf16.msrb.mxu3 %v5196_v60  ;;  %2922 = vmatpush.bf16.msra.mxu1 %v4432_v61  ;;  %v2633_v52 = vpop.f32.mrf.mxu2  ;;  %v4971_v60 = vld [vmem:[%s8938_s3 + $0x608] sm:$0xf]  ;;  %v5860_v61 = vld [vmem:[%s8938_s3 + $0x614] sm:$0xf0]  ;;  %v4208_v63 = vor.u32 %v5666_v50, %v4205_v51  ;;  %v5746_v50 = vld [vmem:[%s8938_s3 + $0x28c] sm:$0xf] }
 0x156   :  { %v4972_v9 = vor.u32 %v5860_v61, %v4971_v60  ;;  %v4525_v51 = vld [vmem:[%s8938_s3 + $0x298] sm:$0xf0]  ;;  %v5806_v61 = vld [vmem:[%s8938_s3 + $0x46c] sm:$0xf] }
 0x157   :  { %2885 = vmatpush.bf16.msrb.mxu2 %v5036_v10  ;;  %v5818_v10 = vld [vmem:[%s8938_s3 + $0x4cc] sm:$0xf]  ;;  %v4925_v60 = vld [vmem:[%s8938_s3 + $0x5b8] sm:$0xf0] }
 0x158   :  { %2911 = vmatpush.bf16.msra.mxu0 %v4272_v2  ;;  %v5115_v2 = vld [vmem:[%s8938_s3 + $0x728] sm:$0xf] }
 0x159   :  { %2897 = vmatpush.bf16.msrb.mxu3 %v5180_v11  ;;  %2923 = vmatpush.bf16.msra.mxu1 %v4416_v12  ;;  %v4813_v11 = vld [vmem:[%s8938_s3 + $0x4d8] sm:$0xf0]  ;;  %v4576_v12 = vor.u32 %v5758_v62, %v4573_v0  ;;  %v5116_v13 = vor.u32 %v5896_v3, %v5115_v2  ;;  %v5742_v2 = vld [vmem:[%s8938_s3 + $0x26c] sm:$0xf] }
 0x15a   :  { %v4765_v62 = vld [vmem:[%s8938_s3 + $0x478] sm:$0xf0] }
 0x15b   :  { %2886 = vmatpush.bf16.msrb.mxu2 %v5020_v24  ;;  %v2646_v23 = vpop.f32.mrf.mxu3  ;;  %v4816_v24 = vor.u32 %v5818_v10, %v4813_v11  ;;  %v4509_v3 = vld [vmem:[%s8938_s3 + $0x278] sm:$0xf0]  ;;  %v4768_v6 = vor.u32 %v5806_v61, %v4765_v62  ;;  %v5802_v11 = vld [vmem:[%s8938_s3 + $0x44c] sm:$0xf] }
 0x15c   :  { %2912 = vmatpush.bf16.msra.mxu0 %v4256_v17  ;;  %v5099_v17 = vld [vmem:[%s8938_s3 + $0x708] sm:$0xf]  ;;  %v4909_v10 = vld [vmem:[%s8938_s3 + $0x598] sm:$0xf0]  ;;  %v5774_v23 = vld [vmem:[%s8938_s3 + $0x36c] sm:$0xf] }
 0x15d   :  { %2898 = vmatpush.bf16.msrb.mxu3 %v5164_v25  ;;  %2924 = vmatpush.bf16.msra.mxu1 %v4400_v26  ;;  %v5790_v25 = vld [vmem:[%s8938_s3 + $0x3ec] sm:$0xf]  ;;  %v4701_v26 = vld [vmem:[%s8938_s3 + $0x3f8] sm:$0xf0]  ;;  %v5100_v34 = vor.u32 %v5892_v19, %v5099_v17 }
 0x15e   :  { %v4704_v36 = vor.u32 %v5790_v25, %v4701_v26  ;;  %v5738_v17 = vld [vmem:[%s8938_s3 + $0x24c] sm:$0xf]  ;;  %v4893_v26 = vld [vmem:[%s8938_s3 + $0x578] sm:$0xf0] }
 0x15f   :  { %2887 = vmatpush.bf16.msrb.mxu2 %v5004_v37  ;;  %v4541_v37 = vld [vmem:[%s8938_s3 + $0x2b8] sm:$0xf0]  ;;  %v5838_v25 = vld [vmem:[%s8938_s3 + $0x56c] sm:$0xf] }
 0x160   :  { %2913 = vmatpush.bf16.msra.mxu0 %v4240_v30  ;;  %v4797_v30 = vld [vmem:[%s8938_s3 + $0x4b8] sm:$0xf0]  ;;  %v4544_v48 = vor.u32 %v5750_v1, %v4541_v37  ;;  %v5770_v1 = vld [vmem:[%s8938_s3 + $0x34c] sm:$0xf] }
 0x161   :  { %2899 = vmatpush.bf16.msrb.mxu3 %v5148_v38  ;;  %2925 = vmatpush.bf16.msra.mxu1 %v4384_v4  ;;  %v4960_v38 = vor.u32 %v5854_v27, %v4957_v28  ;;  %v4800_v4 = vor.u32 %v5814_v29, %v4797_v30  ;;  %v5798_v27 = vld [vmem:[%s8938_s3 + $0x42c] sm:$0xf]  ;;  %v4733_v28 = vld [vmem:[%s8938_s3 + $0x438] sm:$0xf0] }
 0x162   :  { %v4621_v37 = vld [vmem:[%s8938_s3 + $0x358] sm:$0xf0]  ;;  %v5830_v62 = vld [vmem:[%s8938_s3 + $0x52c] sm:$0xf] }
 0x163   :  { %2888 = vmatpush.bf16.msrb.mxu2 %v4988_v54  ;;  %v4944_v54 = vor.u32 %v5850_v42, %v4941_v43  ;;  %v5275_v43 = vld [vmem:[%s8941_s5 + $0x70] sm:$0xf] }
 0x164   :  { %2914 = vmatpush.bf16.msra.mxu0 %v4224_v41  ;;  %v5810_v41 = vld [vmem:[%s8938_s3 + $0x48c] sm:$0xf] }
 0x165   :  { %2900 = vmatpush.bf16.msrb.mxu3 %v5132_v58  ;;  %2926 = vmatpush.bf16.msra.mxu1 %v4368_v59  ;;  %v4784_v55 = vor.u32 %v5810_v41, %v4781_v46  ;;  %v4669_v58 = vld [vmem:[%s8938_s3 + $0x3b8] sm:$0xf0]  ;;  %v5846_v59 = vld [vmem:[%s8938_s3 + $0x5ac] sm:$0xf]  ;;  %v5936_v41 = vld [vmem:[%s8941_s5 + $0x74] sm:$0xf0] }
 0x166   :  { %v4672_v0 = vor.u32 %v5782_v56, %v4669_v58  ;;  %v5085_v58 = vld [vmem:[%s8938_s3 + $0x6f8] sm:$0xf0]  ;;  %v5276_v61 = vor.u32 %v5936_v41, %v5275_v43  ;;  %v5910_v41 = vld [vmem:[%s8938_s3 + $0x7ac] sm:$0xf] }
 0x167   :  { %2889 = vmatpush.bf16.msrb.mxu2 %v4972_v9  ;;  %v5842_v9 = vld [vmem:[%s8938_s3 + $0x58c] sm:$0xf] }
 0x168   :  { %2915 = vmatpush.bf16.msra.mxu0 %v4208_v63  ;;  %v8226_v52 = vpop.f32.mrf.mxu0  ;;  %v4528_v63 = vor.u32 %v5746_v50, %v4525_v51  ;;  %v4912_v20 = vor.u32 %v5842_v9, %v4909_v10  ;;  %v4461_v50 = vld [vmem:[%s8938_s3 + $0x218] sm:$0xf0]  ;;  %v5886_v51 = vld [vmem:[%s8938_s3 + $0x6ec] sm:$0xf] }
 0x169   :  { %2901 = vmatpush.bf16.msrb.mxu3 %v5116_v13  ;;  %2927 = vmatpush.bf16.msra.mxu1 %v4352_v18  ;;  %v4512_v13 = vor.u32 %v5742_v2, %v4509_v3  ;;  %v4493_v18 = vld [vmem:[%s8938_s3 + $0x258] sm:$0xf0]  ;;  %v5267_v2 = vld [vmem:[%s8941_s5 + $0x60] sm:$0xf]  ;;  %v5934_v3 = vld [vmem:[%s8941_s5 + $0x64] sm:$0xf0] }
 0x16a   :  { %2890 = vmatmul.bf16.vlgmr.msrb.gmra.mxu2 %v7558_v45  ;;  %v4496_v29 = vor.u32 %v5738_v17, %v4493_v18  ;;  %v5762_v9 = vld [vmem:[%s8938_s3 + $0x30c] sm:$0xf]  ;;  %v5213_v18 = vld [vmem:[%s8938_s3 + $0x7f8] sm:$0xf0] }
 0x16b   :  { %2934 = vmatpush.bf16.msra.mxu2 %v4576_v12  ;;  %2916 = vmatmul.bf16.vlgmr.msra.gmra.mxu0 %v7133_v33  ;;  %v4685_v33 = vld [vmem:[%s8938_s3 + $0x3d8] sm:$0xf0]  ;;  %v5918_v17 = vld [vmem:[%s8938_s3 + $0x7ec] sm:$0xf] }
 0x16c   :  { %2960 = vmatpush.bf16.msrb.mxu0 %v4832_v5  ;;  %v4688_v49 = vor.u32 %v5786_v39, %v4685_v33  ;;  %v4928_v5 = vor.u32 %v5846_v59, %v4925_v60  ;;  %v4749_v12 = vld [vmem:[%s8938_s3 + $0x458] sm:$0xf0]  ;;  %v5794_v39 = vld [vmem:[%s8938_s3 + $0x40c] sm:$0xf] }
 0x16d   :  { %2902 = vmatpush.bf16.msrb.mxu3 %v5100_v34  ;;  %2928 = vmatpush.bf16.msra.mxu1 %v4336_v35  ;;  %v8272_v15 = vpop.f32.mrf.mxu1  ;;  %v4752_v22 = vor.u32 %v5802_v11, %v4749_v12  ;;  %v4477_v34 = vld [vmem:[%s8938_s3 + $0x238] sm:$0xf0]  ;;  %v4896_v35 = vor.u32 %v5838_v25, %v4893_v26  ;;  %v5766_v59 = vld [vmem:[%s8938_s3 + $0x32c] sm:$0xf] }
 0x16e   :  { %v4717_v33 = vld [vmem:[%s8938_s3 + $0x418] sm:$0xf0]  ;;  %v5826_v12 = vld [vmem:[%s8938_s3 + $0x50c] sm:$0xf] }
 0x16f   :  { %2935 = vmatpush.bf16.msra.mxu2 %v4560_v32  ;;  %v5734_v32 = vld [vmem:[%s8938_s3 + $0x22c] sm:$0xf]  ;;  %v4720_v56 = vor.u32 %v5794_v39, %v4717_v33  ;;  %v4605_v60 = vld [vmem:[%s8938_s3 + $0x338] sm:$0xf0] }
 0x170   :  { %2961 = vmatpush.bf16.msrb.mxu0 %v4816_v24  ;;  %2903 = vmatmul.bf16.vlgmr.msrb.gmra.mxu3 %v7607_v14  ;;  %v2659_v19 = vpop.f32.mrf.mxu0  ;;  %v4637_v24 = vld [vmem:[%s8938_s3 + $0x378] sm:$0xf0]  ;;  %v4480_v42 = vor.u32 %v5734_v32, %v4477_v34  ;;  %v5874_v33 = vld [vmem:[%s8938_s3 + $0x68c] sm:$0xf] }
 0x171   :  { %2947 = vmatpush.bf16.msra.mxu3 %v4704_v36  ;;  %2973 = vmatpush.bf16.msrb.mxu1 %v4960_v38  ;;  %v4640_v30 = vor.u32 %v5774_v23, %v4637_v24  ;;  %v4736_v36 = vor.u32 %v5798_v27, %v4733_v28  ;;  %v5834_v38 = vld [vmem:[%s8938_s3 + $0x54c] sm:$0xf]  ;;  %v4589_v11 = vld [vmem:[%s8938_s3 + $0x318] sm:$0xf0]  ;;  %v5259_v19 = vld [vmem:[%s8941_s5 + $0x50] sm:$0xf] }
 0x172   :  { %2929 = vmatmul.bf16.vlgmr.msra.gmra.mxu1 %v7178_v57  ;;  %v5778_v57 = vld [vmem:[%s8938_s3 + $0x38c] sm:$0xf]  ;;  %v5952_v23 = vld [vmem:[%s8941_s5 + $0xf4] sm:$0xf0]  ;;  %v4592_v26 = vor.u32 %v5762_v9, %v4589_v11  ;;  %v5053_v32 = vld [vmem:[%s8938_s3 + $0x6b8] sm:$0xf0] }
 0x173   :  { %2936 = vmatpush.bf16.msra.mxu2 %v4544_v48  ;;  %v4656_v16 = vor.u32 %v5778_v57, %v4653_v7  ;;  %v4624_v48 = vor.u32 %v5770_v1, %v4621_v37  ;;  %v5882_v57 = vld [vmem:[%s8938_s3 + $0x6cc] sm:$0xf]  ;;  %v5069_v7 = vld [vmem:[%s8938_s3 + $0x6d8] sm:$0xf0]  ;;  %v5930_v37 = vld [vmem:[%s8941_s5 + $0x44] sm:$0xf0] }
 0x174   :  { %2962 = vmatpush.bf16.msrb.mxu0 %v4800_v4  ;;  %v4877_v4 = vld [vmem:[%s8938_s3 + $0x558] sm:$0xf0]  ;;  %v5072_v25 = vor.u32 %v5882_v57, %v5069_v7 }
 0x175   :  { %2948 = vmatpush.bf16.msra.mxu3 %v4688_v49  ;;  %2974 = vmatpush.bf16.msrb.mxu1 %v4944_v54  ;;  %v2672_v46 = vpop.f32.mrf.mxu1  ;;  %v5730_v49 = vld [vmem:[%s8938_s3 + $0x20c] sm:$0xf]  ;;  %v5005_v11 = vld [vmem:[%s8938_s3 + $0x658] sm:$0xf0] }
 0x176   :  { %v5181_v46 = vld [vmem:[%s8938_s3 + $0x7b8] sm:$0xf0] }
 0x177   :  { %2937 = vmatpush.bf16.msra.mxu2 %v4528_v63  ;;  %v4861_v63 = vld [vmem:[%s8938_s3 + $0x538] sm:$0xf0] }
 0x178   :  { %2963 = vmatpush.bf16.msrb.mxu0 %v4784_v55  ;;  %v8337_v54 = vpop.f32.mrf.mxu0  ;;  %v4880_v55 = vor.u32 %v5834_v38, %v4877_v4  ;;  %v4864_v10 = vor.u32 %v5830_v62, %v4861_v63  ;;  %v5950_v38 = vld [vmem:[%s8941_s5 + $0xe4] sm:$0xf0]  ;;  %v2632_v62 = vadd.f32 %v8064_v21, %v7890_v47  ;;  %v5906_v63 = vld [vmem:[%s8938_s3 + $0x78c] sm:$0xf]  ;;  %v5315_v21 = vld [vmem:[%s8941_s5 + $0xc0] sm:$0xf] }
 0x179   :  { %2949 = vmatpush.bf16.msra.mxu3 %v4672_v0  ;;  %2975 = vmatpush.bf16.msrb.mxu1 %v4928_v5  ;;  %v4464_v0 = vor.u32 %v5730_v49, %v4461_v50  ;;  %v5088_v5 = vor.u32 %v5886_v51, %v5085_v58  ;;  %v5928_v50 = vld [vmem:[%s8941_s5 + $0x34] sm:$0xf0]  ;;  %v5323_v51 = vld [vmem:[%s8941_s5 + $0xd0] sm:$0xf]  ;;  %v5926_v47 = vld [vmem:[%s8941_s5 + $0x24] sm:$0xf0] }
 0x17b   :  { %2938 = vmatpush.bf16.msra.mxu2 %v4512_v13  ;;  %v4845_v13 = vld [vmem:[%s8938_s3 + $0x518] sm:$0xf0] }
 0x17c   :  { %2964 = vmatpush.bf16.msrb.mxu0 %v4768_v6  ;;  %v4608_v6 = vor.u32 %v5766_v59, %v4605_v60  ;;  %v4848_v28 = vor.u32 %v5826_v12, %v4845_v13  ;;  %v5870_v60 = vld [vmem:[%s8938_s3 + $0x66c] sm:$0xf] }
 0x17d   :  { %2950 = vmatpush.bf16.msra.mxu3 %v4656_v16  ;;  %2976 = vmatpush.bf16.msrb.mxu1 %v4912_v20  ;;  %v5268_v16 = vor.u32 %v5934_v3, %v5267_v2  ;;  %v5932_v20 = vld [vmem:[%s8941_s5 + $0x54] sm:$0xf0]  ;;  %v8396_v24 = vpop.f32.mrf.mxu1  ;;  %v5235_v2 = vld [vmem:[%s8941_s5 + $0x20] sm:$0xf] }
 0x17e   :  { %v5260_v34 = vor.u32 %v5932_v20, %v5259_v19  ;;  %v5236_v13 = vor.u32 %v5926_v47, %v5235_v2  ;;  %v5307_v19 = vld [vmem:[%s8941_s5 + $0xb0] sm:$0xf]  ;;  %v5944_v20 = vld [vmem:[%s8941_s5 + $0xb4] sm:$0xf0]  ;;  %v5101_v2 = vld [vmem:[%s8938_s3 + $0x718] sm:$0xf0] }
 0x17f   :  { %2939 = vmatpush.bf16.msra.mxu2 %v4496_v29  ;;  %v5216_v29 = vor.u32 %v5918_v17, %v5213_v18  ;;  %v5227_v17 = vld [vmem:[%s8941_s5 + $0x10] sm:$0xf] }
 0x180   :  { %2965 = vmatpush.bf16.msrb.mxu0 %v4752_v22  ;;  %v5339_v22 = vld [vmem:[%s8941_s5 + $0xf0] sm:$0xf]  ;;  %v2711_v27 = vpop.f32.mrf.mxu0 }
 0x181   :  { %2951 = vmatpush.bf16.msra.mxu3 %v4640_v30  ;;  %2977 = vmatpush.bf16.msrb.mxu1 %v4896_v35  ;;  %v5878_v30 = vld [vmem:[%s8938_s3 + $0x6ac] sm:$0xf]  ;;  %v5340_v1 = vor.u32 %v5952_v23, %v5339_v22 }
 0x182   :  { %v5914_v35 = vld [vmem:[%s8938_s3 + $0x7cc] sm:$0xf]  ;;  %v5056_v4 = vor.u32 %v5878_v30, %v5053_v32 }
 0x183   :  { %2940 = vmatpush.bf16.msra.mxu2 %v4480_v42  ;;  %v5037_v42 = vld [vmem:[%s8938_s3 + $0x698] sm:$0xf0] }
 0x184   :  { %2966 = vmatpush.bf16.msrb.mxu0 %v4736_v36  ;;  %v5251_v36 = vld [vmem:[%s8941_s5 + $0x40] sm:$0xf]  ;;  %v5040_v58 = vor.u32 %v5874_v33, %v5037_v42  ;;  %v5935_v33 = vld [vmem:[%s8941_s5 + $0x74] sm:$0xf]  ;;  %v5277_v42 = vld [vmem:[%s8941_s5 + $0x78] sm:$0xf0] }
 0x185   :  { %2952 = vmatpush.bf16.msra.mxu3 %v4624_v48  ;;  %2978 = vmatpush.bf16.msrb.mxu1 %v4880_v55  ;;  %v5252_v43 = vor.u32 %v5930_v37, %v5251_v36  ;;  %v5243_v48 = vld [vmem:[%s8941_s5 + $0x30] sm:$0xf]  ;;  %v5948_v55 = vld [vmem:[%s8941_s5 + $0xd4] sm:$0xf0]  ;;  %v5299_v37 = vld [vmem:[%s8941_s5 + $0xa0] sm:$0xf] }
 0x186   :  { %v5324_v3 = vor.u32 %v5948_v55, %v5323_v51 }
 0x187   :  { %2941 = vmatpush.bf16.msra.mxu2 %v4464_v0  ;;  %v5165_v0 = vld [vmem:[%s8938_s3 + $0x798] sm:$0xf0] }
 0x188   :  { %2967 = vmatpush.bf16.msrb.mxu0 %v4720_v56  ;;  %v2724_v56 = vpop.f32.mrf.mxu1  ;;  %v8450_v59 = vpop.f32.mrf.mxu0  ;;  %v5168_v9 = vor.u32 %v5906_v63, %v5165_v0  ;;  %v5890_v0 = vld [vmem:[%s8938_s3 + $0x70c] sm:$0xf] }
 0x189   :  { %2953 = vmatpush.bf16.msra.mxu3 %v4608_v6  ;;  %2979 = vmatpush.bf16.msrb.mxu1 %v4864_v10  ;;  %v2645_v6 = vadd.f32 %v8105_v44, %v2632_v62  ;;  %v5866_v10 = vld [vmem:[%s8938_s3 + $0x64c] sm:$0xf]  ;;  %v5280_v56 = vor.u32 %v5935_v33, %v5277_v42  ;;  %v5933_v62 = vld [vmem:[%s8941_s5 + $0x64] sm:$0xf]  ;;  %v5395_v42 = vld [vmem:[%s8941_s5 + $0x160] sm:$0xf] }
 0x18a   :  { %2942 = vmatmul.bf16.vlgmr.msra.gmra.mxu2 %v7306_v8  ;;  %v5331_v8 = vld [vmem:[%s8941_s5 + $0xe0] sm:$0xf]  ;;  %v5902_v44 = vld [vmem:[%s8938_s3 + $0x76c] sm:$0xf] }
 0x18b   :  { %2986 = vmatpush.bf16.msrb.mxu2 %v5088_v5  ;;  %2968 = vmatmul.bf16.vlgmr.msrb.gmra.mxu0 %v7440_v31  ;;  %v5197_v31 = vld [vmem:[%s8938_s3 + $0x7d8] sm:$0xf0]  ;;  %v5332_v49 = vor.u32 %v5950_v38, %v5331_v8  ;;  %v5946_v5 = vld [vmem:[%s8941_s5 + $0xc4] sm:$0xf0]  ;;  %v2658_v12 = vadd.f32 %v8226_v52, %v2645_v6  ;;  %v5924_v52 = vld [vmem:[%s8941_s5 + $0x14] sm:$0xf0] }
 0x18c   :  { %3410 = vmatpush.bf16.msra.mxu0 %v5276_v61  ;;  %v5200_v39 = vor.u32 %v5914_v35, %v5197_v31  ;;  %v5021_v61 = vld [vmem:[%s8938_s3 + $0x678] sm:$0xf0]  ;;  %v5316_v18 = vor.u32 %v5946_v5, %v5315_v21  ;;  %v5228_v32 = vor.u32 %v5924_v52, %v5227_v17  ;;  %v5219_v35 = vld [vmem:[%s8941_s5] sm:$0xf]  ;;  %v5308_v31 = vor.u32 %v5944_v20, %v5307_v19  ;;  %v5942_v8 = vld [vmem:[%s8941_s5 + $0xa4] sm:$0xf0] }
 0x18d   :  { %2954 = vmatpush.bf16.msra.mxu3 %v4592_v26  ;;  %2980 = vmatpush.bf16.msrb.mxu1 %v4848_v28  ;;  %v2683_v57 = vpop.f32.mrf.mxu2  ;;  %v5024_v7 = vor.u32 %v5870_v60, %v5021_v61  ;;  %v2671_v22 = vadd.f32 %v8272_v15, %v2658_v12  ;;  %v5862_v28 = vld [vmem:[%s8938_s3 + $0x62c] sm:$0xf]  ;;  %v5300_v51 = vor.u32 %v5942_v8, %v5299_v37  ;;  %v5931_v6 = vld [vmem:[%s8941_s5 + $0x54] sm:$0xf]  ;;  %v5929_v52 = vld [vmem:[%s8941_s5 + $0x44] sm:$0xf] }
 0x18e   :  { %v5898_v15 = vld [vmem:[%s8938_s3 + $0x74c] sm:$0xf]  ;;  %v5925_v8 = vld [vmem:[%s8941_s5 + $0x24] sm:$0xf] }
 0x18f   :  { %2987 = vmatpush.bf16.msrb.mxu2 %v5072_v25  ;;  %v5008_v25 = vor.u32 %v5866_v10, %v5005_v11  ;;  %v2684_v30 = vadd.f32 %v2683_v57, %v2671_v22  ;;  %v5283_v57 = vld [vmem:[%s8941_s5 + $0x80] sm:$0xf]  ;;  %v5951_v10 = vld [vmem:[%s8941_s5 + $0xf4] sm:$0xf]  ;;  %v5341_v11 = vld [vmem:[%s8941_s5 + $0xf8] sm:$0xf0] }
 0x190   :  { %3411 = vmatpush.bf16.msra.mxu0 %v5268_v16  ;;  %2955 = vmatmul.bf16.vlgmr.msra.gmra.mxu3 %v7360_v40  ;;  %v5184_v40 = vor.u32 %v5910_v41, %v5181_v46  ;;  %v5149_v16 = vld [vmem:[%s8938_s3 + $0x778] sm:$0xf0]  ;;  %v8505_v23 = vpop.f32.mrf.mxu1  ;;  %v2763_v26 = vpop.f32.mrf.mxu0  ;;  %v5858_v41 = vld [vmem:[%s8938_s3 + $0x60c] sm:$0xf]  ;;  %v5344_v19 = vor.u32 %v5951_v10, %v5341_v11  ;;  %v5949_v22 = vld [vmem:[%s8941_s5 + $0xe4] sm:$0xf] }
 0x191   :  { %2999 = vmatpush.bf16.msrb.mxu3 %v5216_v29  ;;  %3423 = vmatpush.bf16.msra.mxu1 %v5340_v1  ;;  %v5152_v27 = vor.u32 %v5902_v44, %v5149_v16  ;;  %v4989_v29 = vld [vmem:[%s8938_s3 + $0x638] sm:$0xf0]  ;;  %v5922_v1 = vld [vmem:[%s8941_s5 + $0x4] sm:$0xf0]  ;;  %v8591_v16 = vld [vmem:[%s8940_s4] sm:$0xf] }
 0x192   :  { %2981 = vmatmul.bf16.vlgmr.msrb.gmra.mxu1 %v7470_v53  ;;  %v5244_v53 = vor.u32 %v5928_v50, %v5243_v48  ;;  %v4973_v46 = vld [vmem:[%s8938_s3 + $0x618] sm:$0xf0]  ;;  %v5220_v48 = vor.u32 %v5922_v1, %v5219_v35  ;;  %v1309_v17 = vperm.slane %v8591_v16, 1  ;;  %v5253_v20 = vld [vmem:[%s8941_s5 + $0x48] sm:$0xf0] }
 0x193   :  { %2988 = vmatpush.bf16.msrb.mxu2 %v5056_v4  ;;  %v2696_v36 = vpop.f32.mrf.mxu3  ;;  %v5117_v50 = vld [vmem:[%s8938_s3 + $0x738] sm:$0xf0]  ;;  %v4976_v61 = vor.u32 %v5858_v41, %v4973_v46 }
 0x194   :  { %3412 = vmatpush.bf16.msra.mxu0 %v5260_v34  ;;  %v5133_v34 = vld [vmem:[%s8938_s3 + $0x758] sm:$0xf0]  ;;  %v2697_v38 = vadd.f32 %v2696_v36, %v2684_v30 }
 0x195   :  { %3000 = vmatpush.bf16.msrb.mxu3 %v5200_v39  ;;  %3424 = vmatpush.bf16.msra.mxu1 %v5332_v49  ;;  %v2685_v4 = vpop.f32.mrf.mxu2  ;;  %v4992_v39 = vor.u32 %v5862_v28, %v4989_v29  ;;  %v5894_v49 = vld [vmem:[%s8938_s3 + $0x72c] sm:$0xf]  ;;  %v5927_v28 = vld [vmem:[%s8941_s5 + $0x34] sm:$0xf]  ;;  %v5245_v29 = vld [vmem:[%s8941_s5 + $0x38] sm:$0xf0] }
 0x196   :  { %v3012_v55 = vmax.f32 %v2697_v38, 0.0  ;;  %v5120_v63 = vor.u32 %v5894_v49, %v5117_v50  ;;  %v5237_v4 = vld [vmem:[%s8941_s5 + $0x28] sm:$0xf0] }
 0x197   :  { %2989 = vmatpush.bf16.msrb.mxu2 %v5040_v58  ;;  %v5291_v58 = vld [vmem:[%s8941_s5 + $0x90] sm:$0xf]  ;;  %v5240_v46 = vor.u32 %v5925_v8, %v5237_v4  ;;  %v5405_v8 = vld [vmem:[%s8941_s5 + $0x178] sm:$0xf0] }
 0x198   :  { %3413 = vmatpush.bf16.msra.mxu0 %v5252_v43  ;;  %v5136_v43 = vor.u32 %v5898_v15, %v5133_v34  ;;  %v2776_v60 = vpop.f32.mrf.mxu1  ;;  %v8567_v47 = vpack.c.bf16 %v3012_v55, %v3012_v55  ;;  %v5403_v15 = vld [vmem:[%s8941_s5 + $0x170] sm:$0xf]  ;;  %v5968_v34 = vld [vmem:[%s8941_s5 + $0x174] sm:$0xf0]  ;;  %v5943_v55 = vld [vmem:[%s8941_s5 + $0xb4] sm:$0xf] }
 0x199   :  { %3001 = vmatpush.bf16.msrb.mxu3 %v5184_v40  ;;  %3425 = vmatpush.bf16.msra.mxu1 %v5324_v3  ;;  %v5940_v40 = vld [vmem:[%s8941_s5 + $0x94] sm:$0xf0]  ;;  %v5404_v36 = vor.u32 %v5968_v34, %v5403_v15 }
 0x19a   :  { %v5292_v3 = vor.u32 %v5940_v40, %v5291_v58  ;;  %v5956_v15 = vld [vmem:[%s8941_s5 + $0x114] sm:$0xf0] }
 0x19b   :  { %2990 = vmatpush.bf16.msrb.mxu2 %v5024_v7  ;;  %v2698_v21 = vpop.f32.mrf.mxu3  ;;  %v5938_v7 = vld [vmem:[%s8941_s5 + $0x84] sm:$0xf0] }
 0x19c   :  { %3414 = vmatpush.bf16.msra.mxu0 %v5244_v53  ;;  %v5269_v53 = vld [vmem:[%s8941_s5 + $0x68] sm:$0xf0]  ;;  %v5284_v44 = vor.u32 %v5938_v7, %v5283_v57  ;;  %v5941_v21 = vld [vmem:[%s8941_s5 + $0xa4] sm:$0xf]  ;;  %v5379_v7 = vld [vmem:[%s8941_s5 + $0x140] sm:$0xf] }
 0x19d   :  { %3002 = vmatpush.bf16.msrb.mxu3 %v5168_v9  ;;  %3426 = vmatpush.bf16.msra.mxu1 %v5316_v18  ;;  %v5272_v5 = vor.u32 %v5933_v62, %v5269_v53  ;;  %v5261_v9 = vld [vmem:[%s8941_s5 + $0x58] sm:$0xf0]  ;;  %v2735_v12 = vpop.f32.mrf.mxu2  ;;  %v5964_v62 = vld [vmem:[%s8941_s5 + $0x154] sm:$0xf0] }
 0x19e   :  { %v5264_v18 = vor.u32 %v5931_v6, %v5261_v9  ;;  %v5962_v9 = vld [vmem:[%s8941_s5 + $0x144] sm:$0xf0] }
 0x19f   :  { %2991 = vmatpush.bf16.msrb.mxu2 %v5008_v25  ;;  %v5333_v25 = vld [vmem:[%s8941_s5 + $0xe8] sm:$0xf0] }
 0x1a0   :  { %3415 = vmatpush.bf16.msra.mxu0 %v5236_v13  ;;  %v5104_v13 = vor.u32 %v5890_v0, %v5101_v2  ;;  %v5336_v30 = vor.u32 %v5949_v22, %v5333_v25  ;;  %v5921_v0 = vld [vmem:[%s8941_s5 + $0x4] sm:$0xf] }
 0x1a1   :  { %3003 = vmatpush.bf16.msrb.mxu3 %v5152_v27  ;;  %3427 = vmatpush.bf16.msra.mxu1 %v5308_v31  ;;  %v5256_v27 = vor.u32 %v5929_v52, %v5253_v20  ;;  %v5293_v52 = vld [vmem:[%s8941_s5 + $0x98] sm:$0xf0]  ;;  %v5960_v20 = vld [vmem:[%s8941_s5 + $0x134] sm:$0xf0] }
 0x1a3   :  { %2992 = vmatpush.bf16.msrb.mxu2 %v4992_v39  ;;  %v2748_v26 = vpop.f32.mrf.mxu3  ;;  %v5317_v39 = vld [vmem:[%s8941_s5 + $0xc8] sm:$0xf0] }
 0x1a4   :  { %3416 = vmatpush.bf16.msra.mxu0 %v5228_v32  ;;  %v5947_v32 = vld [vmem:[%s8941_s5 + $0xd4] sm:$0xf] }
 0x1a5   :  { %3004 = vmatpush.bf16.msrb.mxu3 %v5136_v43  ;;  %3428 = vmatpush.bf16.msra.mxu1 %v5300_v51  ;;  %v2737_v31 = vpop.f32.mrf.mxu2  ;;  %v5966_v43 = vld [vmem:[%s8941_s5 + $0x164] sm:$0xf0]  ;;  %v5229_v51 = vld [vmem:[%s8941_s5 + $0x18] sm:$0xf0] }
 0x1a6   :  { %v5396_v50 = vor.u32 %v5966_v43, %v5395_v42 }
 0x1a7   :  { %2993 = vmatpush.bf16.msrb.mxu2 %v4976_v61  ;;  %v5387_v61 = vld [vmem:[%s8941_s5 + $0x150] sm:$0xf] }
 0x1a8   :  { %3417 = vmatpush.bf16.msra.mxu0 %v5220_v48  ;;  %v8628_v37 = vpop.f32.mrf.mxu0  ;;  %v5923_v48 = vld [vmem:[%s8941_s5 + $0x14] sm:$0xf] }
 0x1a9   :  { %3005 = vmatpush.bf16.msrb.mxu3 %v5120_v63  ;;  %3429 = vmatpush.bf16.msra.mxu1 %v5292_v3  ;;  %v5232_v63 = vor.u32 %v5923_v48, %v5229_v51  ;;  %v5388_v3 = vor.u32 %v5964_v62, %v5387_v61  ;;  %v5381_v51 = vld [vmem:[%s8941_s5 + $0x148] sm:$0xf0]  ;;  %v5959_v61 = vld [vmem:[%s8941_s5 + $0x134] sm:$0xf]  ;;  %v5373_v62 = vld [vmem:[%s8941_s5 + $0x138] sm:$0xf0] }
 0x1aa   :  { %2994 = vmatmul.bf16.vlgmr.msrb.gmra.mxu2 %v7558_v45  ;;  %v2710_v45 = vadd.f32 %v8337_v54, %v1309_v17  ;;  %v5325_v54 = vld [vmem:[%s8941_s5 + $0xd8] sm:$0xf0] }
 0x1ab   :  { %3418 = vmatmul.bf16.vlgmr.msra.gmra.mxu0 %v8567_v47  ;;  %v5328_v38 = vor.u32 %v5947_v32, %v5325_v54  ;;  %3436 = vmatpush.bf16.msra.mxu2 %v5404_v36  ;;  %v2750_v41 = vpop.f32.mrf.mxu3  ;;  %v5355_v54 = vld [vmem:[%s8941_s5 + $0x110] sm:$0xf]  ;;  %v5954_v36 = vld [vmem:[%s8941_s5 + $0x104] sm:$0xf0] }
 0x1ac   :  { %3462 = vmatpush.bf16.msrb.mxu0 %v5280_v56  ;;  %v2723_v35 = vadd.f32 %v8396_v24, %v2710_v45  ;;  %v5945_v24 = vld [vmem:[%s8941_s5 + $0xc4] sm:$0xf]  ;;  %v5309_v56 = vld [vmem:[%s8941_s5 + $0xb8] sm:$0xf0]  ;;  %v5356_v31 = vor.u32 %v5956_v15, %v5355_v54  ;;  %v5963_v41 = vld [vmem:[%s8941_s5 + $0x154] sm:$0xf] }
 0x1ad   :  { %3006 = vmatpush.bf16.msrb.mxu3 %v5104_v13  ;;  %3430 = vmatpush.bf16.msra.mxu1 %v5284_v44  ;;  %v5320_v49 = vor.u32 %v5945_v24, %v5317_v39  ;;  %v8661_v40 = vpop.f32.mrf.mxu1  ;;  %v2787_v60 = vpop.f32.mrf.mxu2  ;;  %v5312_v2 = vor.u32 %v5943_v55, %v5309_v56  ;;  %v5965_v24 = vld [vmem:[%s8941_s5 + $0x164] sm:$0xf]  ;;  %v5397_v39 = vld [vmem:[%s8941_s5 + $0x168] sm:$0xf0] }
 0x1ae   :  { %v2736_v1 = vadd.f32 %v2735_v12, %v2723_v35  ;;  %v5380_v12 = vor.u32 %v5962_v9, %v5379_v7  ;;  %v5953_v9 = vld [vmem:[%s8941_s5 + $0x104] sm:$0xf] }
 0x1af   :  { %3437 = vmatpush.bf16.msra.mxu2 %v5396_v50  ;;  %v5961_v50 = vld [vmem:[%s8941_s5 + $0x144] sm:$0xf] }
 0x1b0   :  { %3463 = vmatpush.bf16.msrb.mxu0 %v5272_v5  ;;  %3007 = vmatmul.bf16.vlgmr.msrb.gmra.mxu3 %v7607_v14  ;;  %v5248_v14 = vor.u32 %v5927_v28, %v5245_v29  ;;  %v2749_v33 = vadd.f32 %v2748_v26, %v2736_v1  ;;  %v2815_v53 = vpop.f32.mrf.mxu0  ;;  %v5301_v5 = vld [vmem:[%s8941_s5 + $0xa8] sm:$0xf0]  ;;  %v5363_v26 = vld [vmem:[%s8941_s5 + $0x120] sm:$0xf]  ;;  %v5937_v29 = vld [vmem:[%s8941_s5 + $0x84] sm:$0xf]  ;;  %v5384_v56 = vor.u32 %v5961_v50, %v5381_v51 }
 0x1b1   :  { %3475 = vmatpush.bf16.msrb.mxu1 %v5344_v19  ;;  %v5304_v11 = vor.u32 %v5941_v21, %v5301_v5  ;;  %v5371_v19 = vld [vmem:[%s8941_s5 + $0x130] sm:$0xf]  ;;  %v5967_v1 = vld [vmem:[%s8941_s5 + $0x174] sm:$0xf]  ;;  %v5376_v53 = vor.u32 %v5959_v61, %v5373_v62  ;;  %v1310_v21 = vperm.slane %v8591_v16, 2 }
 0x1b2   :  { %v2762_v58 = vadd.f32 %v8450_v59, %v2749_v33  ;;  %v5221_v59 = vld [vmem:[%s8941_s5 + $0x8] sm:$0xf0]  ;;  %v5372_v25 = vor.u32 %v5960_v20, %v5371_v19  ;;  %v5408_v4 = vor.u32 %v5967_v1, %v5405_v8  ;;  %v5400_v33 = vor.u32 %v5965_v24, %v5397_v39  ;;  %v5976_v1 = vld [vmem:[%s8941_s5 + $0x1b4] sm:$0xf0]  ;;  %v5419_v39 = vld [vmem:[%s8941_s5 + $0x190] sm:$0xf] }
 0x1b3   :  { %3438 = vmatpush.bf16.msra.mxu2 %v5388_v3  ;;  %v5224_v57 = vor.u32 %v5921_v0, %v5221_v59  ;;  %v5365_v0 = vld [vmem:[%s8941_s5 + $0x128] sm:$0xf0]  ;;  %v5357_v3 = vld [vmem:[%s8941_s5 + $0x118] sm:$0xf0] }
 0x1b4   :  { %3464 = vmatpush.bf16.msrb.mxu0 %v5264_v18  ;;  %v2775_v6 = vadd.f32 %v8505_v23, %v2762_v58  ;;  %v5939_v23 = vld [vmem:[%s8941_s5 + $0x94] sm:$0xf]  ;;  %v5469_v50 = vld [vmem:[%s8941_s5 + $0x1f8] sm:$0xf0] }
 0x1b5   :  { %3476 = vmatpush.bf16.msrb.mxu1 %v5336_v30  ;;  %v2800_v13 = vpop.f32.mrf.mxu3  ;;  %v2828_v17 = vpop.f32.mrf.mxu1  ;;  %v5296_v45 = vor.u32 %v5939_v23, %v5293_v52  ;;  %v5285_v30 = vld [vmem:[%s8941_s5 + $0x88] sm:$0xf0]  ;;  %v5982_v23 = vld [vmem:[%s8941_s5 + $0x1e4] sm:$0xf0] }
 0x1b6   :  { %v2788_v10 = vadd.f32 %v2787_v60, %v2775_v6  ;;  %v2789_v18 = vpop.f32.mrf.mxu2  ;;  %v5288_v35 = vor.u32 %v5937_v29, %v5285_v30  ;;  %v5443_v30 = vld [vmem:[%s8941_s5 + $0x1c0] sm:$0xf] }
 0x1b7   :  { %3439 = vmatpush.bf16.msra.mxu2 %v5380_v12  ;;  %v5459_v18 = vld [vmem:[%s8941_s5 + $0x1e0] sm:$0xf] }
 0x1b8   :  { %3465 = vmatpush.bf16.msrb.mxu0 %v5256_v27  ;;  %v2801_v44 = vadd.f32 %v2800_v13, %v2788_v10  ;;  %v5958_v27 = vld [vmem:[%s8941_s5 + $0x124] sm:$0xf0]  ;;  %v5349_v10 = vld [vmem:[%s8941_s5 + $0x108] sm:$0xf0]  ;;  %v5460_v52 = vor.u32 %v5982_v23, %v5459_v18 }
 0x1b9   :  { %3477 = vmatpush.bf16.msrb.mxu1 %v5328_v38  ;;  %v5364_v32 = vor.u32 %v5958_v27, %v5363_v26  ;;  %v5352_v12 = vor.u32 %v5953_v9, %v5349_v10  ;;  %v5437_v9 = vld [vmem:[%s8941_s5 + $0x1b8] sm:$0xf0] }
 0x1ba   :  { %v3013_v22 = vmax.f32 %v2801_v44, 0.0 }
 0x1bb   :  { %3440 = vmatpush.bf16.msra.mxu2 %v5372_v25  ;;  %v5451_v25 = vld [vmem:[%s8941_s5 + $0x1d0] sm:$0xf] }
 0x1bc   :  { %3466 = vmatpush.bf16.msrb.mxu0 %v5248_v14  ;;  %v3017_v28 = vpack.c.bf16 %v3013_v22, %v3013_v22 }
 0x1bd   :  { %3478 = vmatpush.bf16.msrb.mxu1 %v5320_v49  ;;  %v2802_v34 = vpop.f32.mrf.mxu3 }
 0x1be   :  { %3431 = vmatmul.bf16.vlgmr.msra.gmra.mxu1 %v3017_v28 }
 0x1bf   :  { %3441 = vmatpush.bf16.msra.mxu2 %v5364_v32  ;;  %v5978_v32 = vld [vmem:[%s8941_s5 + $0x1c4] sm:$0xf0] }
 0x1c0   :  { %3467 = vmatpush.bf16.msrb.mxu0 %v5240_v46  ;;  %v5389_v46 = vld [vmem:[%s8941_s5 + $0x158] sm:$0xf0]  ;;  %v5444_v15 = vor.u32 %v5978_v32, %v5443_v30 }
 0x1c1   :  { %3479 = vmatpush.bf16.msrb.mxu1 %v5312_v2  ;;  %v5392_v49 = vor.u32 %v5963_v41, %v5389_v46  ;;  %v5955_v2 = vld [vmem:[%s8941_s5 + $0x114] sm:$0xf]  ;;  %v5411_v41 = vld [vmem:[%s8941_s5 + $0x180] sm:$0xf]  ;;  %v5970_v46 = vld [vmem:[%s8941_s5 + $0x184] sm:$0xf0] }
 0x1c2   :  { %v5360_v6 = vor.u32 %v5955_v2, %v5357_v3  ;;  %v5977_v2 = vld [vmem:[%s8941_s5 + $0x1c4] sm:$0xf]  ;;  %v5445_v3 = vld [vmem:[%s8941_s5 + $0x1c8] sm:$0xf0] }
 0x1c3   :  { %3442 = vmatpush.bf16.msra.mxu2 %v5356_v31 }
 0x1c4   :  { %3468 = vmatpush.bf16.msrb.mxu0 %v5232_v63  ;;  %v5957_v63 = vld [vmem:[%s8941_s5 + $0x124] sm:$0xf] }
 0x1c5   :  { %3480 = vmatpush.bf16.msrb.mxu1 %v5304_v11  ;;  %v5368_v59 = vor.u32 %v5957_v63, %v5365_v0  ;;  %v5467_v11 = vld [vmem:[%s8941_s5 + $0x1f0] sm:$0xf]  ;;  %v5453_v63 = vld [vmem:[%s8941_s5 + $0x1d8] sm:$0xf0] }
 0x1c8   :  { %3469 = vmatpush.bf16.msrb.mxu0 %v5224_v57  ;;  %v2865_v38 = vpop.f32.mrf.mxu0  ;;  %v2814_v57 = vadd.f32 %v8628_v37, %v1310_v21  ;;  %v5984_v37 = vld [vmem:[%s8941_s5 + $0x1f4] sm:$0xf0] }
 0x1c9   :  { %3481 = vmatpush.bf16.msrb.mxu1 %v5296_v45  ;;  %v5980_v45 = vld [vmem:[%s8941_s5 + $0x1d4] sm:$0xf0] }
 0x1ca   :  { %v2827_v7 = vadd.f32 %v8661_v40, %v2814_v57  ;;  %v5468_v40 = vor.u32 %v5984_v37, %v5467_v11  ;;  %v5452_v27 = vor.u32 %v5980_v45, %v5451_v25  ;;  %v5973_v11 = vld [vmem:[%s8941_s5 + $0x1a4] sm:$0xf]  ;;  %v5413_v25 = vld [vmem:[%s8941_s5 + $0x188] sm:$0xf0] }
 0x1cb   :  { %3470 = vmatmul.bf16.vlgmr.msrb.gmra.mxu0 %v8567_v47  ;;  %v5347_v47 = vld [vmem:[%s8941_s5 + $0x100] sm:$0xf] }
 0x1cc   :  { %v5348_v14 = vor.u32 %v5954_v36, %v5347_v47  ;;  %3449 = vmatpush.bf16.msra.mxu3 %v5468_v40  ;;  %v5435_v36 = vld [vmem:[%s8941_s5 + $0x1b0] sm:$0xf]  ;;  %v5421_v40 = vld [vmem:[%s8941_s5 + $0x198] sm:$0xf0] }
 0x1cd   :  { %3482 = vmatpush.bf16.msrb.mxu1 %v5288_v35  ;;  %v2839_v42 = vpop.f32.mrf.mxu2 }
 0x1ce   :  { %3443 = vmatpush.bf16.msra.mxu2 %v5348_v14  ;;  %v2840_v13 = vadd.f32 %v2839_v42, %v2827_v7  ;;  %v5436_v14 = vor.u32 %v5976_v1, %v5435_v36  ;;  %v5975_v7 = vld [vmem:[%s8941_s5 + $0x1b4] sm:$0xf] }
 0x1cf   :  { %v2878_v43 = vpop.f32.mrf.mxu1  ;;  %v5440_v10 = vor.u32 %v5975_v7, %v5437_v9 }
 0x1d0   :  { %3483 = vmatmul.bf16.vlgmr.msrb.gmra.mxu1 %v3017_v28  ;;  %v2867_v48 = vpop.f32.mrf.mxu0  ;;  %3450 = vmatpush.bf16.msra.mxu3 %v5460_v52 }
 0x1d1   :  { %v5983_v48 = vld [vmem:[%s8941_s5 + $0x1f4] sm:$0xf] }
 0x1d2   :  { %3488 = vmatpush.bf16.msrb.mxu2 %v5408_v4  ;;  %v5974_v4 = vld [vmem:[%s8941_s5 + $0x1a4] sm:$0xf0]  ;;  %v5472_v51 = vor.u32 %v5983_v48, %v5469_v50  ;;  %v6000_v48 = vld [vmem:[%s8944_s7 + $0x78] sm:$0xff]  ;;  %v5999_v50 = vld [vmem:[%s8944_s7 + $0x70] sm:$0xff] }
 0x1d3   :  { %v2852_v55 = vpop.f32.mrf.mxu3  ;;  %3663 = vmatpush.bf16.msra.mxu1 %v6000_v48 }
 0x1d4   :  { %v2853_v17 = vadd.f32 %v2852_v55, %v2840_v13  ;;  %3451 = vmatpush.bf16.msra.mxu3 %v5452_v27  ;;  %v5971_v13 = vld [vmem:[%s8941_s5 + $0x194] sm:$0xf] }
 0x1d5   :  { %v2841_v58 = vpop.f32.mrf.mxu2  ;;  %v5424_v23 = vor.u32 %v5971_v13, %v5421_v40 }
 0x1d6   :  { %3489 = vmatpush.bf16.msrb.mxu2 %v5400_v33  ;;  %v2866_v19 = vadd.f32 %v2865_v38, %v2853_v17  ;;  %v5427_v38 = vld [vmem:[%s8941_s5 + $0x1a0] sm:$0xf]  ;;  %v5972_v33 = vld [vmem:[%s8941_s5 + $0x194] sm:$0xf0]  ;;  %v5461_v58 = vld [vmem:[%s8941_s5 + $0x1e8] sm:$0xf0] }
 0x1d7   :  { %v2880_v60 = vpop.f32.mrf.mxu1  ;;  %v5428_v24 = vor.u32 %v5974_v4, %v5427_v38  ;;  %v1311_v17 = vperm.slane %v8591_v16, 3  ;;  %3664 = vmatpush.bf16.msra.mxu1 %v5999_v50 }
 0x1d8   :  { %v2879_v28 = vadd.f32 %v2878_v43, %v2866_v19  ;;  %3452 = vmatpush.bf16.msra.mxu3 %v5444_v15  ;;  %v5420_v43 = vor.u32 %v5972_v33, %v5419_v39 }
 0x1da   :  { %3490 = vmatpush.bf16.msrb.mxu2 %v5392_v49  ;;  %v5412_v49 = vor.u32 %v5970_v46, %v5411_v41  ;;  %v5992_v46 = vld [vmem:[%s8944_s7 + $0x38] sm:$0xff] }
 0x1db   :  { %v2854_v5 = vpop.f32.mrf.mxu3  ;;  %3650 = vmatpush.bf16.msra.mxu0 %v5992_v46 }
 0x1dc   :  { %3453 = vmatpush.bf16.msra.mxu3 %v5436_v14  ;;  %v5448_v5 = vor.u32 %v5977_v2, %v5445_v3  ;;  %v5997_v2 = vld [vmem:[%s8944_s7 + $0x60] sm:$0xff]  ;;  %v5996_v3 = vld [vmem:[%s8944_s7 + $0x58] sm:$0xff] }
 0x1de   :  { %3491 = vmatpush.bf16.msrb.mxu2 %v5384_v56  ;;  %v5981_v56 = vld [vmem:[%s8941_s5 + $0x1e4] sm:$0xf] }
 0x1df   :  { %v5464_v60 = vor.u32 %v5981_v56, %v5461_v58  ;;  %v5989_v56 = vld [vmem:[%s8944_s7 + $0x20] sm:$0xff]  ;;  %v5988_v58 = vld [vmem:[%s8944_s7 + $0x18] sm:$0xff] }
 0x1e0   :  { %3454 = vmatpush.bf16.msra.mxu3 %v5428_v24 }
 0x1e2   :  { %3492 = vmatpush.bf16.msrb.mxu2 %v5376_v53  ;;  %v5979_v53 = vld [vmem:[%s8941_s5 + $0x1d4] sm:$0xf] }
 0x1e4   :  { %3455 = vmatpush.bf16.msra.mxu3 %v5420_v43 }
 0x1e6   :  { %3493 = vmatpush.bf16.msrb.mxu2 %v5368_v59  ;;  %v5456_v59 = vor.u32 %v5979_v53, %v5453_v63  ;;  %v5986_v63 = vld [vmem:[%s8944_s7 + $0x8] sm:$0xff] }
 0x1e8   :  { %v8782_v44 = vpop.f32.mrf.mxu0  ;;  %3456 = vmatpush.bf16.msra.mxu3 %v5412_v49  ;;  %v5991_v49 = vld [vmem:[%s8944_s7 + $0x30] sm:$0xff] }
 0x1e9   :  { %v2918_v52 = vadd.f32 %v8782_v44, %v1311_v17  ;;  %3651 = vmatpush.bf16.msra.mxu0 %v5991_v49 }
 0x1ea   :  { %3494 = vmatpush.bf16.msrb.mxu2 %v5360_v6 }
 0x1ec   :  { %3501 = vmatpush.bf16.msrb.mxu3 %v5472_v51  ;;  %v5990_v51 = vld [vmem:[%s8944_s7 + $0x28] sm:$0xff] }
 0x1ed   :  { %v2891_v20 = vpop.f32.mrf.mxu2  ;;  %3652 = vmatpush.bf16.msra.mxu0 %v5990_v51 }
 0x1ee   :  { %3495 = vmatpush.bf16.msrb.mxu2 %v5352_v12  ;;  %v2892_v29 = vadd.f32 %v2891_v20, %v2879_v28  ;;  %v5429_v12 = vld [vmem:[%s8941_s5 + $0x1a8] sm:$0xf0]  ;;  %v5969_v20 = vld [vmem:[%s8941_s5 + $0x184] sm:$0xf] }
 0x1ef   :  { %v8790_v22 = vpop.f32.mrf.mxu1  ;;  %v5432_v37 = vor.u32 %v5973_v11, %v5429_v12  ;;  %v5416_v27 = vor.u32 %v5969_v20, %v5413_v25  ;;  %v6001_v20 = vld [vmem:[%s8943_s8] ss:$0 sm:$0xff] }
 0x1f0   :  { %v2919_v26 = vpop.f32.mrf.mxu0  ;;  %3502 = vmatpush.bf16.msrb.mxu3 %v5464_v60  ;;  %v2931_v19 = vadd.f32 %v8790_v22, %v2918_v52 }
 0x1f1   :  { %3653 = vmatpush.bf16.msra.mxu0 %v5989_v56 }
 0x1f3   :  { %v2904_v54 = vpop.f32.mrf.mxu3 }
 0x1f4   :  { %v2905_v34 = vadd.f32 %v2904_v54, %v2892_v29  ;;  %3503 = vmatpush.bf16.msrb.mxu3 %v5456_v59  ;;  %v5985_v59 = vld [vmem:[%s8944_s7] sm:$0xff] }
 0x1f5   :  { %v2893_v31 = vpop.f32.mrf.mxu2  ;;  %3654 = vmatpush.bf16.msra.mxu0 %v5988_v58 }
 0x1f6   :  { %v3014_v35 = vmax.f32 %v2905_v34, 0.0 }
 0x1f7   :  { %v2932_v47 = vpop.f32.mrf.mxu1 }
 0x1f8   :  { %v3018_v8 = vpack.c.bf16 %v3014_v35, %v3014_v35  ;;  %3504 = vmatpush.bf16.msrb.mxu3 %v5448_v5  ;;  %v3084_v47 = vld [vmem:[%s8942_s6] sm:$0x3]  ;;  %v5994_v5 = vld [vmem:[%s8944_s7 + $0x48] sm:$0xff] }
 0x1f9   :  { %v3086_v36 = vperm.slane %v3084_v47, 0  ;;  %v3087_v39 = vperm.slane %v3084_v47, 1 }
 0x1fa   :  { %3444 = vmatmul.bf16.vlgmr.msra.gmra.mxu2 %v3018_v8 }
 0x1fb   :  { %v2906_v42 = vpop.f32.mrf.mxu3 }
 0x1fc   :  { %3505 = vmatpush.bf16.msrb.mxu3 %v5440_v10 }
 0x200   :  { %3506 = vmatpush.bf16.msrb.mxu3 %v5432_v37 }
 0x204   :  { %3507 = vmatpush.bf16.msrb.mxu3 %v5424_v23 }
 0x208   :  { %v2969_v55 = vpop.f32.mrf.mxu0  ;;  %3508 = vmatpush.bf16.msrb.mxu3 %v5416_v27 }
 0x20a   :  { %3496 = vmatmul.bf16.vlgmr.msrb.gmra.mxu2 %v3018_v8 }
 0x20d   :  { %v2943_v61 = vpop.f32.mrf.mxu2 }
 0x20e   :  { %v2944_v45 = vadd.f32 %v2943_v61, %v2931_v19  ;;  %v5987_v61 = vld [vmem:[%s8944_s7 + $0x10] sm:$0xff] }
 0x20f   :  { %v2982_v62 = vpop.f32.mrf.mxu1  ;;  %3655 = vmatpush.bf16.msra.mxu0 %v5987_v61 }
 0x210   :  { %v2971_v0 = vpop.f32.mrf.mxu0 }
 0x211   :  { %v5998_v0 = vld [vmem:[%s8944_s7 + $0x68] sm:$0xff] }
 0x212   :  { %3665 = vmatpush.bf16.msra.mxu1 %v5998_v0 }
 0x213   :  { %v2956_v21 = vpop.f32.mrf.mxu3  ;;  %3656 = vmatpush.bf16.msra.mxu0 %v5986_v63 }
 0x214   :  { %v2957_v16 = vadd.f32 %v2956_v21, %v2944_v45  ;;  %v5995_v21 = vld [vmem:[%s8944_s7 + $0x50] sm:$0xff] }
 0x215   :  { %v2945_v6 = vpop.f32.mrf.mxu2 }
 0x216   :  { %v2970_v28 = vadd.f32 %v2969_v55, %v2957_v16  ;;  %3666 = vmatpush.bf16.msra.mxu1 %v5997_v2  ;;  %v5993_v6 = vld [vmem:[%s8944_s7 + $0x40] sm:$0xff] }
 0x217   :  { %v2984_v57 = vpop.f32.mrf.mxu1  ;;  %3657 = vmatpush.bf16.msra.mxu0 %v5985_v59 }
 0x218   :  { %v2983_v44 = vadd.f32 %v2982_v62, %v2970_v28 }
 0x21a   :  { %3667 = vmatpush.bf16.msra.mxu1 %v5996_v3 }
 0x21b   :  { %v2958_v18 = vpop.f32.mrf.mxu3 }
 0x21e   :  { %3668 = vmatpush.bf16.msra.mxu1 %v5995_v21 }
 0x222   :  { %3669 = vmatpush.bf16.msra.mxu1 %v5994_v5 }
 0x226   :  { %3670 = vmatpush.bf16.msra.mxu1 %v5993_v6 }
 0x228   :  { %v3419_v26 = vpop.f32.mrf.mxu0 }
 0x229   :  { %v3420_v1 = vadd.f32 %v3419_v26, %v3086_v36 }
 0x22d   :  { %v2995_v29 = vpop.f32.mrf.mxu2 }
 0x22e   :  { %v2996_v32 = vadd.f32 %v2995_v29, %v2983_v44 }
 0x230   :  { %v3421_v30 = vpop.f32.mrf.mxu0 }
 0x233   :  { %v3008_v22 = vpop.f32.mrf.mxu3 }
 0x234   :  { %v3009_v54 = vadd.f32 %v3008_v22, %v2996_v32 }
 0x235   :  { %v2997_v34 = vpop.f32.mrf.mxu2 }
 0x236   :  { %v3015_v15 = vmax.f32 %v3009_v54, 0.0 }
 0x238   :  { %v3019_v35 = vpack.c.bf16 %v3015_v15, %v3015_v15 }
 0x23a   :  { %3457 = vmatmul.bf16.vlgmr.msra.gmra.mxu3 %v3019_v35 }
 0x23b   :  { %v3010_v31 = vpop.f32.mrf.mxu3  ;;  %v3432_v8 = vpop.f32.mrf.mxu1 }
 0x23c   :  { %v3433_v38 = vadd.f32 %v3432_v8, %v3420_v1 }
 0x243   :  { %v3434_v24 = vpop.f32.mrf.mxu1 }
 0x248   :  { %v3471_v14 = vpop.f32.mrf.mxu0 }
 0x249   :  { %v3472_v33 = vadd.f32 %v3471_v14, %v3087_v39 }
 0x24a   :  { %3509 = vmatmul.bf16.vlgmr.msrb.gmra.mxu3 %v3019_v35 }
 0x24d   :  { %v3484_v42 = vpop.f32.mrf.mxu1 }
 0x24e   :  { %v3485_v43 = vadd.f32 %v3484_v42, %v3472_v33 }
 0x250   :  { %v3473_v4 = vpop.f32.mrf.mxu0 }
 0x255   :  { %v3486_v41 = vpop.f32.mrf.mxu1 }
 0x27d   :  { %v3445_v55 = vpop.f32.mrf.mxu2 }
 0x27e   :  { %v3446_v57 = vadd.f32 %v3445_v55, %v3433_v38 }
 0x285   :  { %v3447_v60 = vpop.f32.mrf.mxu2 }
 0x28d   :  { %v3497_v62 = vpop.f32.mrf.mxu2 }
 0x28e   :  { %v3498_v37 = vadd.f32 %v3497_v62, %v3485_v43 }
 0x295   :  { %v3499_v53 = vpop.f32.mrf.mxu2 }
 0x2bd   :  { %v3458_v7 = vpop.f32.mrf.mxu3 }
 0x2be   :  { %v3459_v9 = vadd.f32 %v3458_v7, %v3446_v57 }
 0x2c0   :  { %v3514_v10 = vmax.f32 %v3459_v9, 0.0 }
 0x2c2   :  { %v3516_v11 = vpack.c.bf16 %v3514_v10, %v3514_v10 }
 0x2c4   :  { %3658 = vmatmul.bf16.vlgmr.msra.gmra.mxu0 %v3516_v11 }
 0x2c5   :  { %v3460_v12 = vpop.f32.mrf.mxu3 }
 0x2cd   :  { %v3510_v13 = vpop.f32.mrf.mxu3 }
 0x2ce   :  { %v3511_v40 = vadd.f32 %v3510_v13, %v3498_v37 }
 0x2d0   :  { %v3515_v17 = vmax.f32 %v3511_v40, 0.0 }
 0x2d2   :  { %v3517_v18 = vpack.c.bf16 %v3515_v17, %v3515_v17 }
 0x2d4   :  { %3671 = vmatmul.bf16.vlgmr.msra.gmra.mxu1 %v3517_v18 }
 0x2d5   :  { %v3512_v23 = vpop.f32.mrf.mxu3 }
 0x341   :  { %v3659_v52 = vpop.f32.mrf.mxu0 }
 0x342   :  { %v3660_v25 = vadd.f32 %v6001_v20, %v3659_v52 }
 0x349   :  { %v3661_v19 = vpop.f32.mrf.mxu0 }
 0x351   :  { %v3672_v45 = vpop.f32.mrf.mxu1 }
 0x352   :  { %v3673_v26 = vadd.f32 %v3672_v45, %v3660_v25 }
 0x354   :  { %3676 = vst [vmem:[%s8945_s9] sm:$0xff] %v3673_v26 }
 0x359   :  { %v3674_v27 = vpop.f32.mrf.mxu1 }

</bundles_post_ra>
